<compile_context>
chip_gen: v7x
topology: tpu7x:2x2x1
jax: 0.10.0
libtpu: 0.0.40
codegen_flags: <defaults>
</compile_context>

<pallas_src>
import functools
import math

import jax
import jax.numpy as jnp
from jax.experimental import pallas as pl
from jax.experimental.pallas import tpu as pltpu

VMEM_SPEC = pl.BlockSpec(memory_space=pltpu.MemorySpace.VMEM)


# ----------------------------------------------------------------------------- kernels
def _gemm_kernel(x_ref, w_ref, b_ref, t_ref, o_ref, *, act):
    """Fused GEMM + bias + per-sample additive embedding + optional SiLU.

    Grid is over the batch dim (megacore-parallel on v7x).
    x_ref: (1, M, K)  bf16   (im2col patches or flattened activations, this sample)
    w_ref: (K, N)     bf16
    b_ref: (1, 1, N)  f32
    t_ref: (1, 1, N)  f32    (per-sample, per-channel time embedding; zeros if unused)
    o_ref: (1, M, N)  f32
    """
    x = x_ref[0]                                                   # (M, K)
    y = jnp.dot(x, w_ref[...], preferred_element_type=jnp.float32)  # f32 accumulate
    y = y + b_ref[0] + t_ref[0]                                    # (M,N)+(1,N)+(1,N)
    if act:
        y = y * jax.nn.sigmoid(y)                                  # SiLU in f32
    o_ref[0] = y.astype(o_ref.dtype)


def _linear_kernel(x_ref, w_ref, b_ref, o_ref, *, act):
    y = jnp.dot(x_ref[...], w_ref[...], preferred_element_type=jnp.float32)
    y = y + b_ref[...]
    if act:
        y = y * jax.nn.sigmoid(y)
    o_ref[...] = y.astype(o_ref.dtype)


def _time_mlp_kernel(t_ref, w1_ref, b1_ref, w2_ref, b2_ref, o_ref):
    """Fused 2-layer time-embedding MLP (linear + SiLU + linear) in one launch."""
    h = jnp.dot(t_ref[...], w1_ref[...], preferred_element_type=jnp.float32) + b1_ref[...]
    h = h * jax.nn.sigmoid(h)
    h = jnp.dot(h.astype(w2_ref.dtype), w2_ref[...],
                preferred_element_type=jnp.float32) + b2_ref[...]
    o_ref[...] = h.astype(o_ref.dtype)


def _attn_kernel(h_ref, c_ref, wq_ref, bq_ref, wk_ref, bk_ref,
                 wv_ref, bv_ref, wo_ref, bo_ref, o_ref, *, scale):
    """Fused mid-block cross-attention: q/k/v projections + softmax(QK^T)V + o-projection
    + residual add, all in one kernel (replaces 6 separate launches).  Grid over batch."""
    h = h_ref[0]                                                   # (N, C) f32
    ctx = c_ref[0]                                                 # (S, D) bf16
    hb = h.astype(jnp.bfloat16)
    q = jnp.dot(hb, wq_ref[...], preferred_element_type=jnp.float32) + bq_ref[0]
    k = jnp.dot(ctx, wk_ref[...], preferred_element_type=jnp.float32) + bk_ref[0]
    v = jnp.dot(ctx, wv_ref[...], preferred_element_type=jnp.float32) + bv_ref[0]
    s = jnp.einsum('nc,sc->ns', q, k, preferred_element_type=jnp.float32) * scale
    p = jax.nn.softmax(s, axis=-1)                                 # f32 softmax
    o = jnp.einsum('ns,sc->nc', p, v, preferred_element_type=jnp.float32)
    out = jnp.dot(o.astype(jnp.bfloat16), wo_ref[...],
                  preferred_element_type=jnp.float32) + bo_ref[0]
    o_ref[0] = (h + out).astype(o_ref.dtype)


def _sum_kernel(x_ref, o_ref):
    """Single full reduction over a lane-dense (rows, 128) buffer."""
    s = jnp.sum(x_ref[...].astype(jnp.float32))
    o_ref[...] = jnp.full((1, 1), s, dtype=o_ref.dtype)


# ----------------------------------------------------------------------------- wrappers
def fused_gemm(x, w, b, temb=None, act=False):
    """x: (B, M, K) bf16; w: (K, N) bf16; b: (N,) f32; temb: (B, N) f32 or None.
    Returns (B, M, N) f32.  Grid over B, sharded across TensorCores on v7x."""
    B, M, K = x.shape
    N = w.shape[-1]
    if temb is None:
        temb = jnp.zeros((B, N), jnp.float32)
    b3 = b.reshape(1, 1, N).astype(jnp.float32)
    t3 = temb.reshape(B, 1, N).astype(jnp.float32)
    kern = functools.partial(_gemm_kernel, act=act)
    return pl.pallas_call(
        kern,
        out_shape=jax.ShapeDtypeStruct((B, M, N), jnp.float32),
        grid=(B,),
        in_specs=[
            pl.BlockSpec((1, M, K), lambda i: (i, 0, 0)),
            pl.BlockSpec((K, N), lambda i: (0, 0)),
            pl.BlockSpec((1, 1, N), lambda i: (0, 0, 0)),
            pl.BlockSpec((1, 1, N), lambda i: (i, 0, 0)),
        ],
        out_specs=pl.BlockSpec((1, M, N), lambda i: (i, 0, 0)),
        compiler_params=pltpu.CompilerParams(dimension_semantics=("parallel",)),
    )(x, w, b3, t3)


def _im2col(x, stride=1):
    """x: (B,H,W,Cin) f32 -> (B, Ho*Wo, 9*Cin) bf16 patch matrix (pad=1, kernel 3x3).
    Strided sampling implements stride-2 convs directly (only needed outputs)."""
    B, H, W, C = x.shape
    xp = jnp.pad(x, ((0, 0), (1, 1), (1, 1), (0, 0)))
    Ho = (H - 1) // stride + 1
    Wo = (W - 1) // stride + 1
    cols = []
    for dy in range(3):
        for dx in range(3):
            cols.append(xp[:, dy:dy + (Ho - 1) * stride + 1:stride,
                            dx:dx + (Wo - 1) * stride + 1:stride, :])
    pm = jnp.concatenate(cols, axis=-1).reshape(B, Ho * Wo, 9 * C)
    return pm.astype(jnp.bfloat16), Ho, Wo


def conv3x3(x, wf, b, temb=None, act=False, stride=1):
    """3x3 conv (pad=1) as a single long-K GEMM.  x: (B,H,W,Cin) f32 NHWC;
    wf: (9*Cin, Cout) bf16 (pre-reshaped once); b: (Cout,) f32; temb: (B,Cout) f32."""
    B = x.shape[0]
    Cout = wf.shape[-1]
    patches, Ho, Wo = _im2col(x, stride)
    y = fused_gemm(patches, wf, b, temb=temb, act=act)     # (B, Ho*Wo, Cout)
    return y.reshape(B, Ho, Wo, Cout)


def linear(x, w, b, act=False):
    """Small grid-less linear: x (M,K) bf16, w (K,N) bf16, b (N,) f32 -> (M,N) f32."""
    M = x.shape[0]
    N = w.shape[-1]
    kern = functools.partial(_linear_kernel, act=act)
    return pl.pallas_call(
        kern,
        out_shape=jax.ShapeDtypeStruct((M, N), jnp.float32),
        in_specs=[VMEM_SPEC] * 3,
        out_specs=VMEM_SPEC,
    )(x, w, b.reshape(1, N).astype(jnp.float32))


def time_mlp(t_sin, w1, b1, w2, b2):
    B = t_sin.shape[0]
    N = w2.shape[-1]
    return pl.pallas_call(
        _time_mlp_kernel,
        out_shape=jax.ShapeDtypeStruct((B, N), jnp.float32),
        in_specs=[VMEM_SPEC] * 5,
        out_specs=VMEM_SPEC,
    )(t_sin, w1, b1.reshape(1, -1).astype(jnp.float32),
      w2, b2.reshape(1, -1).astype(jnp.float32))


def cross_attention_block(h, ctx_bf16, ap):
    """h: (B, N, C) f32; ctx: (B, S, D) bf16; returns h + attn(h, ctx) projected, (B,N,C) f32."""
    B, N, C = h.shape
    S, D = ctx_bf16.shape[1], ctx_bf16.shape[2]
    kern = functools.partial(_attn_kernel, scale=1.0 / math.sqrt(C))
    bias = lambda v: v.reshape(1, 1, -1).astype(jnp.float32)
    return pl.pallas_call(
        kern,
        out_shape=jax.ShapeDtypeStruct((B, N, C), jnp.float32),
        grid=(B,),
        in_specs=[
            pl.BlockSpec((1, N, C), lambda i: (i, 0, 0)),
            pl.BlockSpec((1, S, D), lambda i: (i, 0, 0)),
            pl.BlockSpec(ap['wq'].shape, lambda i: (0, 0)),
            pl.BlockSpec((1, 1, C), lambda i: (0, 0, 0)),
            pl.BlockSpec(ap['wk'].shape, lambda i: (0, 0)),
            pl.BlockSpec((1, 1, C), lambda i: (0, 0, 0)),
            pl.BlockSpec(ap['wv'].shape, lambda i: (0, 0)),
            pl.BlockSpec((1, 1, C), lambda i: (0, 0, 0)),
            pl.BlockSpec(ap['wo'].shape, lambda i: (0, 0)),
            pl.BlockSpec((1, 1, C), lambda i: (0, 0, 0)),
        ],
        out_specs=pl.BlockSpec((1, N, C), lambda i: (i, 0, 0)),
        compiler_params=pltpu.CompilerParams(dimension_semantics=("parallel",)),
    )(h, ctx_bf16, ap['wq'], bias(ap['bq']), ap['wk'], bias(ap['bk']),
      ap['wv'], bias(ap['bv']), ap['wo'], bias(ap['bo']))


def pallas_sum(flat):
    """Single lane-dense full reduction of a flat f32 vector (tracer trick)."""
    pad = (-flat.shape[0]) % 1024                       # rows multiple of 8, 128 lanes
    if pad:
        flat = jnp.pad(flat, (0, pad))
    x2 = flat.reshape(-1, 128)
    out = pl.pallas_call(
        _sum_kernel,
        out_shape=jax.ShapeDtypeStruct((1, 1), jnp.float32),
        in_specs=[VMEM_SPEC],
        out_specs=VMEM_SPEC,
    )(x2)
    return out[0, 0]


# ----------------------------------------------------------------------------- synthetic UNet
TIME_EMB_DIM = 32
CTX_DIM = 32
DOWN_CH = [8, 16, 32, 32]

# (h_in_channels, residual_channels, out_channels) per up-block resnet
UP_PLAN = [
    [(32, 32, 32), (32, 32, 32), (32, 32, 32)],
    [(32, 32, 32), (32, 32, 32), (32, 16, 32)],
    [(32, 16, 16), (16, 16, 16), (16, 8, 16)],
    [(16, 8, 8), (8, 8, 8), (8, 8, 8)],
]


def init_params(key):
    keys = iter(jax.random.split(key, 256))

    def w(shape, scale=0.1):
        return jax.random.normal(next(keys), shape, jnp.float32) * scale

    def conv_p(cin, cout):
        return {'w': w((3, 3, cin, cout)), 'b': jnp.zeros((cout,), jnp.float32)}

    def lin_p(cin, cout):
        return {'w': w((cin, cout)), 'b': jnp.zeros((cout,), jnp.float32)}

    def resnet_p(cin, cout):
        return {'conv': conv_p(cin, cout), 'temb': lin_p(TIME_EMB_DIM, cout)}

    params = {
        'time_mlp': [lin_p(16, TIME_EMB_DIM), lin_p(TIME_EMB_DIM, TIME_EMB_DIM)],
        'conv_in': conv_p(4, DOWN_CH[0]),
        'down': [],
        'mid': {
            'res1': resnet_p(DOWN_CH[-1], DOWN_CH[-1]),
            'attn': {'q': lin_p(DOWN_CH[-1], DOWN_CH[-1]),
                     'k': lin_p(CTX_DIM, DOWN_CH[-1]),
                     'v': lin_p(CTX_DIM, DOWN_CH[-1]),
                     'o': lin_p(DOWN_CH[-1], DOWN_CH[-1])},
            'res2': resnet_p(DOWN_CH[-1], DOWN_CH[-1]),
        },
        'up': [],
        'conv_out': conv_p(DOWN_CH[0], 4),
    }

    prev = DOWN_CH[0]
    for bi, ch in enumerate(DOWN_CH):
        blk = {'res': [resnet_p(prev, ch), resnet_p(ch, ch)]}
        blk['down'] = conv_p(ch, ch) if bi < len(DOWN_CH) - 1 else None
        params['down'].append(blk)
        prev = ch

    for block in UP_PLAN:
        entries = []
        for (hin, rc, out) in block:
            entries.append({
                'resnet': resnet_p(hin, out),
                'proj': lin_p(rc, hin) if rc != hin else None,
            })
        params['up'].append({'res': entries})
    return params


def prepare_params(params):
    """One-time weight preparation: reshape conv weights to (9*Cin, Cout), cast MXU
    operands to bf16, and concatenate every per-resnet temb projection into one
    (32, padded-to-128) weight so all 22 projections run as a single matmul."""
    bf16 = jnp.bfloat16

    def prep_conv(cp):
        k = cp['w'].shape[0] * cp['w'].shape[1] * cp['w'].shape[2]
        return {'w': cp['w'].reshape(k, cp['w'].shape[3]).astype(bf16), 'b': cp['b']}

    temb_ws, temb_bs = [], []
    off_counter = [0]

    def prep_resnet(rp):
        cout = rp['conv']['w'].shape[3]
        temb_ws.append(rp['temb']['w'])
        temb_bs.append(rp['temb']['b'])
        entry = {'conv': prep_conv(rp['conv']), 'toff': off_counter[0], 'tn': cout}
        off_counter[0] += cout
        return entry

    prepared = {
        'time_mlp': {
            'w1': params['time_mlp'][0]['w'].astype(bf16), 'b1': params['time_mlp'][0]['b'],
            'w2': params['time_mlp'][1]['w'].astype(bf16), 'b2': params['time_mlp'][1]['b'],
        },
        'conv_in': prep_conv(params['conv_in']),
        'conv_out': prep_conv(params['conv_out']),
        'down': [], 'mid': {}, 'up': [],
    }

    for blk in params['down']:
        prepared['down'].append({
            'res': [prep_resnet(r) for r in blk['res']],
            'down': prep_conv(blk['down']) if blk['down'] is not None else None,
        })

    ap = params['mid']['attn']
    prepared['mid'] = {
        'res1': prep_resnet(params['mid']['res1']),
        'attn': {'wq': ap['q']['w'].astype(bf16), 'bq': ap['q']['b'],
                 'wk': ap['k']['w'].astype(bf16), 'bk': ap['k']['b'],
                 'wv': ap['v']['w'].astype(bf16), 'bv': ap['v']['b'],
                 'wo': ap['o']['w'].astype(bf16), 'bo': ap['o']['b']},
        'res2': prep_resnet(params['mid']['res2']),
    }

    for ub in params['up']:
        entries = []
        for e in ub['res']:
            entries.append({
                'resnet': prep_resnet(e['resnet']),
                'proj': ({'w': e['proj']['w'].astype(bf16), 'b': e['proj']['b']}
                         if e['proj'] is not None else None),
            })
        prepared['up'].append({'res': entries})

    w_all = jnp.concatenate(temb_ws, axis=1)           # (32, sum Cout)
    b_all = jnp.concatenate(temb_bs, axis=0)
    pad = (-w_all.shape[1]) % 128                      # lane-dense batched output
    if pad:
        w_all = jnp.pad(w_all, ((0, 0), (0, pad)))
        b_all = jnp.pad(b_all, (0, pad))
    prepared['temb_all'] = {'w': w_all.astype(bf16), 'b': b_all}
    return prepared


def timestep_embedding(t, dim=16):
    half = dim // 2
    freqs = jnp.exp(-math.log(10000.0) * jnp.arange(half, dtype=jnp.float32) / half)
    args = t.astype(jnp.float32)[:, None] * freqs[None, :]
    return jnp.concatenate([jnp.cos(args), jnp.sin(args)], axis=-1)


def unet_forward(prep, sample, timestep, encoder_hidden_states,
                 down_block_additional_residuals=None,
                 mid_block_additional_residual=None):
    """Synthetic UNet2DConditionModel stand-in.  sample is NCHW; returns NCHW."""
    # TODO(synk): the real diffusers UNet2DConditionModel (GroupNorm, multi-head
    # attention, concat-based up blocks) is external to the wrapper; this is a
    # small synthetic UNet with matching residual plumbing and output shape.
    x = jnp.transpose(sample, (0, 2, 3, 1))            # NCHW -> NHWC
    B = x.shape[0]

    # fused 2-layer time-embedding MLP (1 launch)
    t_sin = timestep_embedding(timestep, 16).astype(jnp.bfloat16)
    tm = prep['time_mlp']
    temb = time_mlp(t_sin, tm['w1'], tm['b1'], tm['w2'], tm['b2'])          # (B, 32) f32

    # all per-resnet temb projections batched into one matmul (1 launch), sliced per resnet
    ta = prep['temb_all']
    temb_all = linear(temb.astype(jnp.bfloat16), ta['w'], ta['b'])          # (B, padded) f32

    def resnet(h, rp):
        t_c = temb_all[:, rp['toff']:rp['toff'] + rp['tn']]                 # (B, Cout)
        return conv3x3(h, rp['conv']['w'], rp['conv']['b'], temb=t_c, act=True)

    # ---- down path (produces 12 residuals, like SD's 12 down_block_res_samples)
    h = conv3x3(x, prep['conv_in']['w'], prep['conv_in']['b'])
    res_samples = [h]
    for blk in prep['down']:
        for rp in blk['res']:
            h = resnet(h, rp)
            res_samples.append(h)
        if blk['down'] is not None:
            # stride-2 conv computed directly (only even output rows/cols)
            h = conv3x3(h, blk['down']['w'], blk['down']['b'], stride=2)
            res_samples.append(h)
    assert len(res_samples) == 12

    # ControlNet semantics: additional residuals are added to the saved residuals
    if down_block_additional_residuals is not None:
        res_samples = [r + jnp.transpose(a, (0, 2, 3, 1))
                       for r, a in zip(res_samples, down_block_additional_residuals)]

    # ---- mid block (resnet + fused cross-attention + resnet)
    h = resnet(h, prep['mid']['res1'])
    Bh, Hh, Wh, Ch = h.shape
    h = cross_attention_block(h.reshape(Bh, Hh * Wh, Ch),
                              encoder_hidden_states.astype(jnp.bfloat16),
                              prep['mid']['attn']).reshape(Bh, Hh, Wh, Ch)
    h = resnet(h, prep['mid']['res2'])
    if mid_block_additional_residual is not None:
        h = h + jnp.transpose(mid_block_additional_residual, (0, 2, 3, 1))

    # ---- up path (consumes the 12 residuals, 3 per up block, in reverse)
    # NOTE: further per-stage fusion (one pallas_call per resolution stage) is possible
    # but would require in-kernel neighbor-patch construction; kept as separate GEMMs here.
    res_stack = list(res_samples)
    n_up = len(prep['up'])
    for ui, ub in enumerate(prep['up']):
        for pe in ub['res']:
            r = res_stack.pop()
            if pe['proj'] is not None:
                Br, Hr, Wr, Cr = r.shape
                rproj = fused_gemm(r.reshape(Br, Hr * Wr, Cr).astype(jnp.bfloat16),
                                   pe['proj']['w'], pe['proj']['b'])
                r = rproj.reshape(Br, Hr, Wr, -1)
            h = resnet(h + r, pe['resnet'])
        if ui < n_up - 1:
            h = jnp.repeat(jnp.repeat(h, 2, axis=1), 2, axis=2)   # nearest upsample

    h = conv3x3(h, prep['conv_out']['w'], prep['conv_out']['b'])
    return jnp.transpose(h, (0, 3, 1, 2))              # NHWC -> NCHW


# ----------------------------------------------------------------------------- wrapper
class UNet2DConditionOutput:
    def __init__(self, sample):
        self.sample = sample


class TraceableUNetWrapper:
    """JAX/Pallas mirror of mirror_ai.compile.models.TraceableUNetWrapper."""

    def __init__(self, unet_params, all_input_names):
        self.all_input_names = list(all_input_names)
        if len(self.all_input_names) != 16:
            raise ValueError(
                f'TraceableUNetWrapper expected 16 input names, got '
                f'{len(self.all_input_names)}: {self.all_input_names}')

        def sort_key(name):
            if name.startswith('down_res_'):
                try:
                    return int(name.split('_')[-1])
                except (ValueError, IndexError):
                    return float('inf')
            return float('inf')

        self.down_res_names = sorted(
            [n for n in self.all_input_names if n.startswith('down_res_')], key=sort_key)
        if len(self.down_res_names) != 12:
            raise ValueError(f"Wrapper expected 12 'down_res_' names, found "
                             f"{len(self.down_res_names)}: {self.down_res_names}")
        self.mid_res_name = 'mid_res_0'
        if self.mid_res_name not in self.all_input_names:
            raise ValueError(f"Expected mid residual name '{self.mid_res_name}' not found")
        self.sample_idx = self.all_input_names.index('sample')
        self.timestep_idx = self.all_input_names.index('timestep')
        self.encoder_hidden_states_idx = self.all_input_names.index('encoder_hidden_states')
        self.down_res_indices = [self.all_input_names.index(n) for n in self.down_res_names]
        self.mid_res_idx = self.all_input_names.index(self.mid_res_name)

        # one-time weight preparation (reshape/concat/cast), then jit the whole forward
        prep = prepare_params(unet_params)
        self._prep = prep

        def _fwd(sample, timestep, encoder_hidden_states, down_residuals, mid_residual):
            # tracer trick: one fused zero-sum over ALL residuals (single Pallas launch)
            flat = jnp.concatenate(
                [jnp.ravel(r).astype(jnp.float32) for r in list(down_residuals) + [mid_residual]])
            tracer = pallas_sum(flat) * jnp.float32(0.0)
            out = unet_forward(prep, sample, timestep, encoder_hidden_states,
                               down_block_additional_residuals=down_residuals,
                               mid_block_additional_residual=mid_residual)
            return out + tracer

        self._forward = jax.jit(_fwd)

    def __call__(self, *args):
        if len(args) != len(self.all_input_names):
            raise ValueError(f'Wrapper forward received {len(args)} arguments, '
                             f'expected {len(self.all_input_names)}')
        sample = args[self.sample_idx]
        timestep = args[self.timestep_idx]
        encoder_hidden_states = args[self.encoder_hidden_states_idx]
        down_residuals = tuple(args[i] for i in self.down_res_indices)
        mid_residual = args[self.mid_res_idx]
        out = self._forward(sample, timestep, encoder_hidden_states,
                            down_residuals, mid_residual)
        return UNet2DConditionOutput(sample=out)


# ----------------------------------------------------------------------------- main
ALL_INPUT_NAMES = (['sample', 'timestep', 'encoder_hidden_states']
                   + [f'down_res_{i}' for i in range(12)]
                   + ['mid_res_0'])

# NCHW shapes of the 12 down residuals produced/consumed by the synthetic UNet
DOWN_RES_SHAPES = [
    (2, 8, 16, 16), (2, 8, 16, 16), (2, 8, 16, 16), (2, 8, 8, 8),
    (2, 16, 8, 8), (2, 16, 8, 8), (2, 16, 4, 4),
    (2, 32, 4, 4), (2, 32, 4, 4), (2, 32, 2, 2),
    (2, 32, 2, 2), (2, 32, 2, 2),
]
MID_RES_SHAPE = (2, 32, 2, 2)


if __name__ == "__main__":
    key = jax.random.PRNGKey(0)
    pkey, dkey = jax.random.split(key)
    params = init_params(pkey)

    B, C, H, W = 2, 4, 16, 16
    dkeys = jax.random.split(dkey, 16)
    sample = jax.random.normal(dkeys[0], (B, C, H, W), jnp.float32)
    timestep = jnp.array([10.0, 500.0], jnp.float32)
    encoder_hidden_states = jax.random.normal(dkeys[1], (B, 8, CTX_DIM), jnp.float32)
    down_res = [jax.random.normal(dkeys[2 + i], s, jnp.float32) * 0.1
                for i, s in enumerate(DOWN_RES_SHAPES)]
    mid_res = jax.random.normal(dkeys[14], MID_RES_SHAPE, jnp.float32) * 0.1

    wrapper = TraceableUNetWrapper(params, ALL_INPUT_NAMES)

    # assemble the 16 positional args in the declared name order
    args = [None] * 16
    args[ALL_INPUT_NAMES.index('sample')] = sample
    args[ALL_INPUT_NAMES.index('timestep')] = timestep
    args[ALL_INPUT_NAMES.index('encoder_hidden_states')] = encoder_hidden_states
    for i in range(12):
        args[ALL_INPUT_NAMES.index(f'down_res_{i}')] = down_res[i]
    args[ALL_INPUT_NAMES.index('mid_res_0')] = mid_res

    out = wrapper(*args)
    jax.block_until_ready(out.sample)
    assert out.sample.shape == (B, C, H, W)
    assert out.sample.dtype == jnp.float32
    assert bool(jnp.all(jnp.isfinite(out.sample)))
    print("KERNEL_OK")
</pallas_src>

<mosaic_0001>
module attributes {stable_mosaic.version = 11 : i64} {
  func.func @_gemm_kernel(%arg0: i32, %arg1: memref<1x256x36xbf16, #tpu.memory_space<vmem>>, %arg2: memref<36x8xbf16, #tpu.memory_space<vmem>>, %arg3: memref<1x1x8xf32, #tpu.memory_space<vmem>>, %arg4: memref<1x1x8xf32, #tpu.memory_space<vmem>>, %arg5: memref<1x256x8xf32, #tpu.memory_space<vmem>>) attributes {dimension_semantics = [#tpu.dimension_semantics<parallel>], iteration_bounds = array<i64: 2>, scalar_prefetch = 0 : i64, scratch_operands = 0 : i64, tpu.core_type = #tpu.core_type<tc>, window_params = [{transform_indices = @transform_0, window_bounds = array<i64: 1, 256, 36>}, {pipeline_mode = #tpu.pipeline_mode<synchronous>, transform_indices = @transform_1, window_bounds = array<i64: 36, 8>}, {pipeline_mode = #tpu.pipeline_mode<synchronous>, transform_indices = @transform_2, window_bounds = array<i64: 1, 1, 8>}, {transform_indices = @transform_3, window_bounds = array<i64: 1, 1, 8>}, {transform_indices = @transform_4, window_bounds = array<i64: 1, 256, 8>}]} {
    %c0 = arith.constant 0 : index
    %c0_0 = arith.constant 0 : index
    %c0_1 = arith.constant 0 : index
    %0 = vector.load %arg1[%c0, %c0_0, %c0_1] : memref<1x256x36xbf16, #tpu.memory_space<vmem>>, vector<1x256x36xbf16>
    %1 = vector.shape_cast %0 : vector<1x256x36xbf16> to vector<256x36xbf16>
    %c0_2 = arith.constant 0 : index
    %c0_3 = arith.constant 0 : index
    %2 = vector.load %arg2[%c0_2, %c0_3] : memref<36x8xbf16, #tpu.memory_space<vmem>>, vector<36x8xbf16>
    %cst = arith.constant dense<0.000000e+00> : vector<256x8xf32>
    %3 = tpu.matmul %1, %2, %cst {dimension_numbers = #tpu.dot_dimension_numbers<[1], [0], [0], [1], [0, 0, 1, 1], [], []>} : vector<256x36xbf16>, vector<36x8xbf16>, vector<256x8xf32> -> vector<256x8xf32>
    %c0_4 = arith.constant 0 : index
    %c0_5 = arith.constant 0 : index
    %c0_6 = arith.constant 0 : index
    %4 = vector.load %arg3[%c0_4, %c0_5, %c0_6] : memref<1x1x8xf32, #tpu.memory_space<vmem>>, vector<1x1x8xf32>
    %5 = vector.shape_cast %4 : vector<1x1x8xf32> to vector<1x8xf32>
    %6 = vector.broadcast %5 : vector<1x8xf32> to vector<256x8xf32>
    %7 = arith.addf %3, %6 : vector<256x8xf32>
    %c0_7 = arith.constant 0 : index
    %c0_8 = arith.constant 0 : index
    %c0_9 = arith.constant 0 : index
    %8 = vector.load %arg4[%c0_7, %c0_8, %c0_9] : memref<1x1x8xf32, #tpu.memory_space<vmem>>, vector<1x1x8xf32>
    %9 = vector.shape_cast %8 : vector<1x1x8xf32> to vector<1x8xf32>
    %10 = vector.broadcast %9 : vector<1x8xf32> to vector<256x8xf32>
    %11 = arith.addf %7, %10 : vector<256x8xf32>
    %c0_10 = arith.constant 0 : index
    %c0_11 = arith.constant 0 : index
    %c0_12 = arith.constant 0 : index
    %12 = vector.load %arg5[%c0_10, %c0_11, %c0_12] : memref<1x256x8xf32, #tpu.memory_space<vmem>>, vector<1x256x8xf32>
    %13 = vector.shape_cast %12 : vector<1x256x8xf32> to vector<256x8xf32>
    %14 = vector.shape_cast %11 : vector<256x8xf32> to vector<1x256x8xf32>
    tpu.vector_store %arg5[%c0_10, %c0_11, %c0_12], %14 {strides = array<i32>} : memref<1x256x8xf32, #tpu.memory_space<vmem>>, vector<1x256x8xf32>,
    return
  }
  func.func @transform_0(%arg0: i32) -> (i32, i32, i32) {
    %c0_i32 = arith.constant 0 : i32
    %c0_i32_0 = arith.constant 0 : i32
    %c0_i32_1 = arith.constant 0 : i32
    return %arg0, %c0_i32, %c0_i32_0 : i32, i32, i32
  }
  func.func @transform_1(%arg0: i32) -> (i32, i32) {
    %c0_i32 = arith.constant 0 : i32
    %c0_i32_0 = arith.constant 0 : i32
    %c0_i32_1 = arith.constant 0 : i32
    return %c0_i32, %c0_i32_0 : i32, i32
  }
  func.func @transform_2(%arg0: i32) -> (i32, i32, i32) {
    %c0_i32 = arith.constant 0 : i32
    %c0_i32_0 = arith.constant 0 : i32
    %c0_i32_1 = arith.constant 0 : i32
    %c0_i32_2 = arith.constant 0 : i32
    return %c0_i32, %c0_i32_0, %c0_i32_1 : i32, i32, i32
  }
  func.func @transform_3(%arg0: i32) -> (i32, i32, i32) {
    %c0_i32 = arith.constant 0 : i32
    %c0_i32_0 = arith.constant 0 : i32
    %c0_i32_1 = arith.constant 0 : i32
    return %arg0, %c0_i32, %c0_i32_0 : i32, i32, i32
  }
  func.func @transform_4(%arg0: i32) -> (i32, i32, i32) {
    %c0_i32 = arith.constant 0 : i32
    %c0_i32_0 = arith.constant 0 : i32
    %c0_i32_1 = arith.constant 0 : i32
    return %arg0, %c0_i32, %c0_i32_0 : i32, i32, i32
  }
}

module attributes {stable_mosaic.version = 11 : i64} {
  func.func @_time_mlp_kernel(%arg0: memref<2x16xbf16, #tpu.memory_space<vmem>>, %arg1: memref<16x32xbf16, #tpu.memory_space<vmem>>, %arg2: memref<1x32xf32, #tpu.memory_space<vmem>>, %arg3: memref<32x32xbf16, #tpu.memory_space<vmem>>, %arg4: memref<1x32xf32, #tpu.memory_space<vmem>>, %arg5: memref<2x32xf32, #tpu.memory_space<vmem>>) attributes {dimension_semantics = [], scalar_prefetch = 0 : i64, scratch_operands = 0 : i64, tpu.core_type = #tpu.core_type<tc>} {
    %c0 = arith.constant 0 : index
    %c0_0 = arith.constant 0 : index
    %0 = vector.load %arg0[%c0, %c0_0] : memref<2x16xbf16, #tpu.memory_space<vmem>>, vector<2x16xbf16>
    %c0_1 = arith.constant 0 : index
    %c0_2 = arith.constant 0 : index
    %1 = vector.load %arg1[%c0_1, %c0_2] : memref<16x32xbf16, #tpu.memory_space<vmem>>, vector<16x32xbf16>
    %cst = arith.constant dense<0.000000e+00> : vector<2x32xf32>
    %2 = tpu.matmul %0, %1, %cst {dimension_numbers = #tpu.dot_dimension_numbers<[1], [0], [0], [1], [0, 0, 1, 1], [], []>} : vector<2x16xbf16>, vector<16x32xbf16>, vector<2x32xf32> -> vector<2x32xf32>
    %c0_3 = arith.constant 0 : index
    %c0_4 = arith.constant 0 : index
    %3 = vector.load %arg2[%c0_3, %c0_4] : memref<1x32xf32, #tpu.memory_space<vmem>>, vector<1x32xf32>
    %4 = vector.broadcast %3 : vector<1x32xf32> to vector<2x32xf32>
    %5 = arith.addf %2, %4 : vector<2x32xf32>
    %6 = arith.negf %5 : vector<2x32xf32>
    %7 = math.exp %6 : vector<2x32xf32>
    %cst_5 = arith.constant 1.000000e+00 : f32
    %8 = vector.broadcast %cst_5 : f32 to vector<2x32xf32>
    %9 = arith.addf %8, %7 : vector<2x32xf32>
    %10 = arith.divf %8, %9 : vector<2x32xf32>
    %11 = arith.mulf %5, %10 : vector<2x32xf32>
    %12 = arith.truncf %11 : vector<2x32xf32> to vector<2x32xbf16>
    %c0_6 = arith.constant 0 : index
    %c0_7 = arith.constant 0 : index
    %13 = vector.load %arg3[%c0_6, %c0_7] : memref<32x32xbf16, #tpu.memory_space<vmem>>, vector<32x32xbf16>
    %cst_8 = arith.constant dense<0.000000e+00> : vector<2x32xf32>
    %14 = tpu.matmul %12, %13, %cst_8 {dimension_numbers = #tpu.dot_dimension_numbers<[1], [0], [0], [1], [0, 0, 1, 1], [], []>} : vector<2x32xbf16>, vector<32x32xbf16>, vector<2x32xf32> -> vector<2x32xf32>
    %c0_9 = arith.constant 0 : index
    %c0_10 = arith.constant 0 : index
    %15 = vector.load %arg4[%c0_9, %c0_10] : memref<1x32xf32, #tpu.memory_space<vmem>>, vector<1x32xf32>
    %16 = vector.broadcast %15 : vector<1x32xf32> to vector<2x32xf32>
    %17 = arith.addf %14, %16 : vector<2x32xf32>
    %c0_11 = arith.constant 0 : index
    %c0_12 = arith.constant 0 : index
    %18 = vector.load %arg5[%c0_11, %c0_12] : memref<2x32xf32, #tpu.memory_space<vmem>>, vector<2x32xf32>
    tpu.vector_store %arg5[%c0_11, %c0_12], %17 {strides = array<i32>} : memref<2x32xf32, #tpu.memory_space<vmem>>, vector<2x32xf32>,
    return
  }
}

module attributes {stable_mosaic.version = 11 : i64} {
  func.func @_linear_kernel(%arg0: memref<2x32xbf16, #tpu.memory_space<vmem>>, %arg1: memref<32x512xbf16, #tpu.memory_space<vmem>>, %arg2: memref<1x512xf32, #tpu.memory_space<vmem>>, %arg3: memref<2x512xf32, #tpu.memory_space<vmem>>) attributes {dimension_semantics = [], scalar_prefetch = 0 : i64, scratch_operands = 0 : i64, tpu.core_type = #tpu.core_type<tc>} {
    %c0 = arith.constant 0 : index
    %c0_0 = arith.constant 0 : index
    %0 = vector.load %arg0[%c0, %c0_0] : memref<2x32xbf16, #tpu.memory_space<vmem>>, vector<2x32xbf16>
    %c0_1 = arith.constant 0 : index
    %c0_2 = arith.constant 0 : index
    %1 = vector.load %arg1[%c0_1, %c0_2] : memref<32x512xbf16, #tpu.memory_space<vmem>>, vector<32x512xbf16>
    %cst = arith.constant dense<0.000000e+00> : vector<2x512xf32>
    %2 = tpu.matmul %0, %1, %cst {dimension_numbers = #tpu.dot_dimension_numbers<[1], [0], [0], [1], [0, 0, 1, 1], [], []>} : vector<2x32xbf16>, vector<32x512xbf16>, vector<2x512xf32> -> vector<2x512xf32>
    %c0_3 = arith.constant 0 : index
    %c0_4 = arith.constant 0 : index
    %3 = vector.load %arg2[%c0_3, %c0_4] : memref<1x512xf32, #tpu.memory_space<vmem>>, vector<1x512xf32>
    %4 = vector.broadcast %3 : vector<1x512xf32> to vector<2x512xf32>
    %5 = arith.addf %2, %4 : vector<2x512xf32>
    %c0_5 = arith.constant 0 : index
    %c0_6 = arith.constant 0 : index
    %6 = vector.load %arg3[%c0_5, %c0_6] : memref<2x512xf32, #tpu.memory_space<vmem>>, vector<2x512xf32>
    tpu.vector_store %arg3[%c0_5, %c0_6], %5 {strides = array<i32>} : memref<2x512xf32, #tpu.memory_space<vmem>>, vector<2x512xf32>,
    return
  }
}

module attributes {stable_mosaic.version = 11 : i64} {
  func.func @_gemm_kernel(%arg0: i32, %arg1: memref<1x256x72xbf16, #tpu.memory_space<vmem>>, %arg2: memref<72x8xbf16, #tpu.memory_space<vmem>>, %arg3: memref<1x1x8xf32, #tpu.memory_space<vmem>>, %arg4: memref<1x1x8xf32, #tpu.memory_space<vmem>>, %arg5: memref<1x256x8xf32, #tpu.memory_space<vmem>>) attributes {dimension_semantics = [#tpu.dimension_semantics<parallel>], iteration_bounds = array<i64: 2>, scalar_prefetch = 0 : i64, scratch_operands = 0 : i64, tpu.core_type = #tpu.core_type<tc>, window_params = [{transform_indices = @transform_0, window_bounds = array<i64: 1, 256, 72>}, {pipeline_mode = #tpu.pipeline_mode<synchronous>, transform_indices = @transform_1, window_bounds = array<i64: 72, 8>}, {pipeline_mode = #tpu.pipeline_mode<synchronous>, transform_indices = @transform_2, window_bounds = array<i64: 1, 1, 8>}, {transform_indices = @transform_3, window_bounds = array<i64: 1, 1, 8>}, {transform_indices = @transform_4, window_bounds = array<i64: 1, 256, 8>}]} {
    %c0 = arith.constant 0 : index
    %c0_0 = arith.constant 0 : index
    %c0_1 = arith.constant 0 : index
    %0 = vector.load %arg1[%c0, %c0_0, %c0_1] : memref<1x256x72xbf16, #tpu.memory_space<vmem>>, vector<1x256x72xbf16>
    %1 = vector.shape_cast %0 : vector<1x256x72xbf16> to vector<256x72xbf16>
    %c0_2 = arith.constant 0 : index
    %c0_3 = arith.constant 0 : index
    %2 = vector.load %arg2[%c0_2, %c0_3] : memref<72x8xbf16, #tpu.memory_space<vmem>>, vector<72x8xbf16>
    %cst = arith.constant dense<0.000000e+00> : vector<256x8xf32>
    %3 = tpu.matmul %1, %2, %cst {dimension_numbers = #tpu.dot_dimension_numbers<[1], [0], [0], [1], [0, 0, 1, 1], [], []>} : vector<256x72xbf16>, vector<72x8xbf16>, vector<256x8xf32> -> vector<256x8xf32>
    %c0_4 = arith.constant 0 : index
    %c0_5 = arith.constant 0 : index
    %c0_6 = arith.constant 0 : index
    %4 = vector.load %arg3[%c0_4, %c0_5, %c0_6] : memref<1x1x8xf32, #tpu.memory_space<vmem>>, vector<1x1x8xf32>
    %5 = vector.shape_cast %4 : vector<1x1x8xf32> to vector<1x8xf32>
    %6 = vector.broadcast %5 : vector<1x8xf32> to vector<256x8xf32>
    %7 = arith.addf %3, %6 : vector<256x8xf32>
    %c0_7 = arith.constant 0 : index
    %c0_8 = arith.constant 0 : index
    %c0_9 = arith.constant 0 : index
    %8 = vector.load %arg4[%c0_7, %c0_8, %c0_9] : memref<1x1x8xf32, #tpu.memory_space<vmem>>, vector<1x1x8xf32>
    %9 = vector.shape_cast %8 : vector<1x1x8xf32> to vector<1x8xf32>
    %10 = vector.broadcast %9 : vector<1x8xf32> to vector<256x8xf32>
    %11 = arith.addf %7, %10 : vector<256x8xf32>
    %12 = arith.negf %11 : vector<256x8xf32>
    %13 = math.exp %12 : vector<256x8xf32>
    %cst_10 = arith.constant 1.000000e+00 : f32
    %14 = vector.broadcast %cst_10 : f32 to vector<256x8xf32>
    %15 = arith.addf %14, %13 : vector<256x8xf32>
    %16 = arith.divf %14, %15 : vector<256x8xf32>
    %17 = arith.mulf %11, %16 : vector<256x8xf32>
    %c0_11 = arith.constant 0 : index
    %c0_12 = arith.constant 0 : index
    %c0_13 = arith.constant 0 : index
    %18 = vector.load %arg5[%c0_11, %c0_12, %c0_13] : memref<1x256x8xf32, #tpu.memory_space<vmem>>, vector<1x256x8xf32>
    %19 = vector.shape_cast %18 : vector<1x256x8xf32> to vector<256x8xf32>
    %20 = vector.shape_cast %17 : vector<256x8xf32> to vector<1x256x8xf32>
    tpu.vector_store %arg5[%c0_11, %c0_12, %c0_13], %20 {strides = array<i32>} : memref<1x256x8xf32, #tpu.memory_space<vmem>>, vector<1x256x8xf32>,
    return
  }
  func.func @transform_0(%arg0: i32) -> (i32, i32, i32) {
    %c0_i32 = arith.constant 0 : i32
    %c0_i32_0 = arith.constant 0 : i32
    %c0_i32_1 = arith.constant 0 : i32
    return %arg0, %c0_i32, %c0_i32_0 : i32, i32, i32
  }
  func.func @transform_1(%arg0: i32) -> (i32, i32) {
    %c0_i32 = arith.constant 0 : i32
    %c0_i32_0 = arith.constant 0 : i32
    %c0_i32_1 = arith.constant 0 : i32
    return %c0_i32, %c0_i32_0 : i32, i32
  }
  func.func @transform_2(%arg0: i32) -> (i32, i32, i32) {
    %c0_i32 = arith.constant 0 : i32
    %c0_i32_0 = arith.constant 0 : i32
    %c0_i32_1 = arith.constant 0 : i32
    %c0_i32_2 = arith.constant 0 : i32
    return %c0_i32, %c0_i32_0, %c0_i32_1 : i32, i32, i32
  }
  func.func @transform_3(%arg0: i32) -> (i32, i32, i32) {
    %c0_i32 = arith.constant 0 : i32
    %c0_i32_0 = arith.constant 0 : i32
    %c0_i32_1 = arith.constant 0 : i32
    return %arg0, %c0_i32, %c0_i32_0 : i32, i32, i32
  }
  func.func @transform_4(%arg0: i32) -> (i32, i32, i32) {
    %c0_i32 = arith.constant 0 : i32
    %c0_i32_0 = arith.constant 0 : i32
    %c0_i32_1 = arith.constant 0 : i32
    return %arg0, %c0_i32, %c0_i32_0 : i32, i32, i32
  }
}

module attributes {stable_mosaic.version = 11 : i64} {
  func.func @_gemm_kernel(%arg0: i32, %arg1: memref<1x64x72xbf16, #tpu.memory_space<vmem>>, %arg2: memref<72x8xbf16, #tpu.memory_space<vmem>>, %arg3: memref<1x1x8xf32, #tpu.memory_space<vmem>>, %arg4: memref<1x1x8xf32, #tpu.memory_space<vmem>>, %arg5: memref<1x64x8xf32, #tpu.memory_space<vmem>>) attributes {dimension_semantics = [#tpu.dimension_semantics<parallel>], iteration_bounds = array<i64: 2>, scalar_prefetch = 0 : i64, scratch_operands = 0 : i64, tpu.core_type = #tpu.core_type<tc>, window_params = [{transform_indices = @transform_0, window_bounds = array<i64: 1, 64, 72>}, {pipeline_mode = #tpu.pipeline_mode<synchronous>, transform_indices = @transform_1, window_bounds = array<i64: 72, 8>}, {pipeline_mode = #tpu.pipeline_mode<synchronous>, transform_indices = @transform_2, window_bounds = array<i64: 1, 1, 8>}, {transform_indices = @transform_3, window_bounds = array<i64: 1, 1, 8>}, {transform_indices = @transform_4, window_bounds = array<i64: 1, 64, 8>}]} {
    %c0 = arith.constant 0 : index
    %c0_0 = arith.constant 0 : index
    %c0_1 = arith.constant 0 : index
    %0 = vector.load %arg1[%c0, %c0_0, %c0_1] : memref<1x64x72xbf16, #tpu.memory_space<vmem>>, vector<1x64x72xbf16>
    %1 = vector.shape_cast %0 : vector<1x64x72xbf16> to vector<64x72xbf16>
    %c0_2 = arith.constant 0 : index
    %c0_3 = arith.constant 0 : index
    %2 = vector.load %arg2[%c0_2, %c0_3] : memref<72x8xbf16, #tpu.memory_space<vmem>>, vector<72x8xbf16>
    %cst = arith.constant dense<0.000000e+00> : vector<64x8xf32>
    %3 = tpu.matmul %1, %2, %cst {dimension_numbers = #tpu.dot_dimension_numbers<[1], [0], [0], [1], [0, 0, 1, 1], [], []>} : vector<64x72xbf16>, vector<72x8xbf16>, vector<64x8xf32> -> vector<64x8xf32>
    %c0_4 = arith.constant 0 : index
    %c0_5 = arith.constant 0 : index
    %c0_6 = arith.constant 0 : index
    %4 = vector.load %arg3[%c0_4, %c0_5, %c0_6] : memref<1x1x8xf32, #tpu.memory_space<vmem>>, vector<1x1x8xf32>
    %5 = vector.shape_cast %4 : vector<1x1x8xf32> to vector<1x8xf32>
    %6 = vector.broadcast %5 : vector<1x8xf32> to vector<64x8xf32>
    %7 = arith.addf %3, %6 : vector<64x8xf32>
    %c0_7 = arith.constant 0 : index
    %c0_8 = arith.constant 0 : index
    %c0_9 = arith.constant 0 : index
    %8 = vector.load %arg4[%c0_7, %c0_8, %c0_9] : memref<1x1x8xf32, #tpu.memory_space<vmem>>, vector<1x1x8xf32>
    %9 = vector.shape_cast %8 : vector<1x1x8xf32> to vector<1x8xf32>
    %10 = vector.broadcast %9 : vector<1x8xf32> to vector<64x8xf32>
    %11 = arith.addf %7, %10 : vector<64x8xf32>
    %c0_10 = arith.constant 0 : index
    %c0_11 = arith.constant 0 : index
    %c0_12 = arith.constant 0 : index
    %12 = vector.load %arg5[%c0_10, %c0_11, %c0_12] : memref<1x64x8xf32, #tpu.memory_space<vmem>>, vector<1x64x8xf32>
    %13 = vector.shape_cast %12 : vector<1x64x8xf32> to vector<64x8xf32>
    %14 = vector.shape_cast %11 : vector<64x8xf32> to vector<1x64x8xf32>
    tpu.vector_store %arg5[%c0_10, %c0_11, %c0_12], %14 {strides = array<i32>} : memref<1x64x8xf32, #tpu.memory_space<vmem>>, vector<1x64x8xf32>,
    return
  }
  func.func @transform_0(%arg0: i32) -> (i32, i32, i32) {
    %c0_i32 = arith.constant 0 : i32
    %c0_i32_0 = arith.constant 0 : i32
    %c0_i32_1 = arith.constant 0 : i32
    return %arg0, %c0_i32, %c0_i32_0 : i32, i32, i32
  }
  func.func @transform_1(%arg0: i32) -> (i32, i32) {
    %c0_i32 = arith.constant 0 : i32
    %c0_i32_0 = arith.constant 0 : i32
    %c0_i32_1 = arith.constant 0 : i32
    return %c0_i32, %c0_i32_0 : i32, i32
  }
  func.func @transform_2(%arg0: i32) -> (i32, i32, i32) {
    %c0_i32 = arith.constant 0 : i32
    %c0_i32_0 = arith.constant 0 : i32
    %c0_i32_1 = arith.constant 0 : i32
    %c0_i32_2 = arith.constant 0 : i32
    return %c0_i32, %c0_i32_0, %c0_i32_1 : i32, i32, i32
  }
  func.func @transform_3(%arg0: i32) -> (i32, i32, i32) {
    %c0_i32 = arith.constant 0 : i32
    %c0_i32_0 = arith.constant 0 : i32
    %c0_i32_1 = arith.constant 0 : i32
    return %arg0, %c0_i32, %c0_i32_0 : i32, i32, i32
  }
  func.func @transform_4(%arg0: i32) -> (i32, i32, i32) {
    %c0_i32 = arith.constant 0 : i32
    %c0_i32_0 = arith.constant 0 : i32
    %c0_i32_1 = arith.constant 0 : i32
    return %arg0, %c0_i32, %c0_i32_0 : i32, i32, i32
  }
}

module attributes {stable_mosaic.version = 11 : i64} {
  func.func @_gemm_kernel(%arg0: i32, %arg1: memref<1x64x72xbf16, #tpu.memory_space<vmem>>, %arg2: memref<72x16xbf16, #tpu.memory_space<vmem>>, %arg3: memref<1x1x16xf32, #tpu.memory_space<vmem>>, %arg4: memref<1x1x16xf32, #tpu.memory_space<vmem>>, %arg5: memref<1x64x16xf32, #tpu.memory_space<vmem>>) attributes {dimension_semantics = [#tpu.dimension_semantics<parallel>], iteration_bounds = array<i64: 2>, scalar_prefetch = 0 : i64, scratch_operands = 0 : i64, tpu.core_type = #tpu.core_type<tc>, window_params = [{transform_indices = @transform_0, window_bounds = array<i64: 1, 64, 72>}, {pipeline_mode = #tpu.pipeline_mode<synchronous>, transform_indices = @transform_1, window_bounds = array<i64: 72, 16>}, {pipeline_mode = #tpu.pipeline_mode<synchronous>, transform_indices = @transform_2, window_bounds = array<i64: 1, 1, 16>}, {transform_indices = @transform_3, window_bounds = array<i64: 1, 1, 16>}, {transform_indices = @transform_4, window_bounds = array<i64: 1, 64, 16>}]} {
    %c0 = arith.constant 0 : index
    %c0_0 = arith.constant 0 : index
    %c0_1 = arith.constant 0 : index
    %0 = vector.load %arg1[%c0, %c0_0, %c0_1] : memref<1x64x72xbf16, #tpu.memory_space<vmem>>, vector<1x64x72xbf16>
    %1 = vector.shape_cast %0 : vector<1x64x72xbf16> to vector<64x72xbf16>
    %c0_2 = arith.constant 0 : index
    %c0_3 = arith.constant 0 : index
    %2 = vector.load %arg2[%c0_2, %c0_3] : memref<72x16xbf16, #tpu.memory_space<vmem>>, vector<72x16xbf16>
    %cst = arith.constant dense<0.000000e+00> : vector<64x16xf32>
    %3 = tpu.matmul %1, %2, %cst {dimension_numbers = #tpu.dot_dimension_numbers<[1], [0], [0], [1], [0, 0, 1, 1], [], []>} : vector<64x72xbf16>, vector<72x16xbf16>, vector<64x16xf32> -> vector<64x16xf32>
    %c0_4 = arith.constant 0 : index
    %c0_5 = arith.constant 0 : index
    %c0_6 = arith.constant 0 : index
    %4 = vector.load %arg3[%c0_4, %c0_5, %c0_6] : memref<1x1x16xf32, #tpu.memory_space<vmem>>, vector<1x1x16xf32>
    %5 = vector.shape_cast %4 : vector<1x1x16xf32> to vector<1x16xf32>
    %6 = vector.broadcast %5 : vector<1x16xf32> to vector<64x16xf32>
    %7 = arith.addf %3, %6 : vector<64x16xf32>
    %c0_7 = arith.constant 0 : index
    %c0_8 = arith.constant 0 : index
    %c0_9 = arith.constant 0 : index
    %8 = vector.load %arg4[%c0_7, %c0_8, %c0_9] : memref<1x1x16xf32, #tpu.memory_space<vmem>>, vector<1x1x16xf32>
    %9 = vector.shape_cast %8 : vector<1x1x16xf32> to vector<1x16xf32>
    %10 = vector.broadcast %9 : vector<1x16xf32> to vector<64x16xf32>
    %11 = arith.addf %7, %10 : vector<64x16xf32>
    %12 = arith.negf %11 : vector<64x16xf32>
    %13 = math.exp %12 : vector<64x16xf32>
    %cst_10 = arith.constant 1.000000e+00 : f32
    %14 = vector.broadcast %cst_10 : f32 to vector<64x16xf32>
    %15 = arith.addf %14, %13 : vector<64x16xf32>
    %16 = arith.divf %14, %15 : vector<64x16xf32>
    %17 = arith.mulf %11, %16 : vector<64x16xf32>
    %c0_11 = arith.constant 0 : index
    %c0_12 = arith.constant 0 : index
    %c0_13 = arith.constant 0 : index
    %18 = vector.load %arg5[%c0_11, %c0_12, %c0_13] : memref<1x64x16xf32, #tpu.memory_space<vmem>>, vector<1x64x16xf32>
    %19 = vector.shape_cast %18 : vector<1x64x16xf32> to vector<64x16xf32>
    %20 = vector.shape_cast %17 : vector<64x16xf32> to vector<1x64x16xf32>
    tpu.vector_store %arg5[%c0_11, %c0_12, %c0_13], %20 {strides = array<i32>} : memref<1x64x16xf32, #tpu.memory_space<vmem>>, vector<1x64x16xf32>,
    return
  }
  func.func @transform_0(%arg0: i32) -> (i32, i32, i32) {
    %c0_i32 = arith.constant 0 : i32
    %c0_i32_0 = arith.constant 0 : i32
    %c0_i32_1 = arith.constant 0 : i32
    return %arg0, %c0_i32, %c0_i32_0 : i32, i32, i32
  }
  func.func @transform_1(%arg0: i32) -> (i32, i32) {
    %c0_i32 = arith.constant 0 : i32
    %c0_i32_0 = arith.constant 0 : i32
    %c0_i32_1 = arith.constant 0 : i32
    return %c0_i32, %c0_i32_0 : i32, i32
  }
  func.func @transform_2(%arg0: i32) -> (i32, i32, i32) {
    %c0_i32 = arith.constant 0 : i32
    %c0_i32_0 = arith.constant 0 : i32
    %c0_i32_1 = arith.constant 0 : i32
    %c0_i32_2 = arith.constant 0 : i32
    return %c0_i32, %c0_i32_0, %c0_i32_1 : i32, i32, i32
  }
  func.func @transform_3(%arg0: i32) -> (i32, i32, i32) {
    %c0_i32 = arith.constant 0 : i32
    %c0_i32_0 = arith.constant 0 : i32
    %c0_i32_1 = arith.constant 0 : i32
    return %arg0, %c0_i32, %c0_i32_0 : i32, i32, i32
  }
  func.func @transform_4(%arg0: i32) -> (i32, i32, i32) {
    %c0_i32 = arith.constant 0 : i32
    %c0_i32_0 = arith.constant 0 : i32
    %c0_i32_1 = arith.constant 0 : i32
    return %arg0, %c0_i32, %c0_i32_0 : i32, i32, i32
  }
}

module attributes {stable_mosaic.version = 11 : i64} {
  func.func @_gemm_kernel(%arg0: i32, %arg1: memref<1x64x144xbf16, #tpu.memory_space<vmem>>, %arg2: memref<144x16xbf16, #tpu.memory_space<vmem>>, %arg3: memref<1x1x16xf32, #tpu.memory_space<vmem>>, %arg4: memref<1x1x16xf32, #tpu.memory_space<vmem>>, %arg5: memref<1x64x16xf32, #tpu.memory_space<vmem>>) attributes {dimension_semantics = [#tpu.dimension_semantics<parallel>], iteration_bounds = array<i64: 2>, scalar_prefetch = 0 : i64, scratch_operands = 0 : i64, tpu.core_type = #tpu.core_type<tc>, window_params = [{transform_indices = @transform_0, window_bounds = array<i64: 1, 64, 144>}, {pipeline_mode = #tpu.pipeline_mode<synchronous>, transform_indices = @transform_1, window_bounds = array<i64: 144, 16>}, {pipeline_mode = #tpu.pipeline_mode<synchronous>, transform_indices = @transform_2, window_bounds = array<i64: 1, 1, 16>}, {transform_indices = @transform_3, window_bounds = array<i64: 1, 1, 16>}, {transform_indices = @transform_4, window_bounds = array<i64: 1, 64, 16>}]} {
    %c0 = arith.constant 0 : index
    %c0_0 = arith.constant 0 : index
    %c0_1 = arith.constant 0 : index
    %0 = vector.load %arg1[%c0, %c0_0, %c0_1] : memref<1x64x144xbf16, #tpu.memory_space<vmem>>, vector<1x64x144xbf16>
    %1 = vector.shape_cast %0 : vector<1x64x144xbf16> to vector<64x144xbf16>
    %c0_2 = arith.constant 0 : index
    %c0_3 = arith.constant 0 : index
    %2 = vector.load %arg2[%c0_2, %c0_3] : memref<144x16xbf16, #tpu.memory_space<vmem>>, vector<144x16xbf16>
    %cst = arith.constant dense<0.000000e+00> : vector<64x16xf32>
    %3 = tpu.matmul %1, %2, %cst {dimension_numbers = #tpu.dot_dimension_numbers<[1], [0], [0], [1], [0, 0, 1, 1], [], []>} : vector<64x144xbf16>, vector<144x16xbf16>, vector<64x16xf32> -> vector<64x16xf32>
    %c0_4 = arith.constant 0 : index
    %c0_5 = arith.constant 0 : index
    %c0_6 = arith.constant 0 : index
    %4 = vector.load %arg3[%c0_4, %c0_5, %c0_6] : memref<1x1x16xf32, #tpu.memory_space<vmem>>, vector<1x1x16xf32>
    %5 = vector.shape_cast %4 : vector<1x1x16xf32> to vector<1x16xf32>
    %6 = vector.broadcast %5 : vector<1x16xf32> to vector<64x16xf32>
    %7 = arith.addf %3, %6 : vector<64x16xf32>
    %c0_7 = arith.constant 0 : index
    %c0_8 = arith.constant 0 : index
    %c0_9 = arith.constant 0 : index
    %8 = vector.load %arg4[%c0_7, %c0_8, %c0_9] : memref<1x1x16xf32, #tpu.memory_space<vmem>>, vector<1x1x16xf32>
    %9 = vector.shape_cast %8 : vector<1x1x16xf32> to vector<1x16xf32>
    %10 = vector.broadcast %9 : vector<1x16xf32> to vector<64x16xf32>
    %11 = arith.addf %7, %10 : vector<64x16xf32>
    %12 = arith.negf %11 : vector<64x16xf32>
    %13 = math.exp %12 : vector<64x16xf32>
    %cst_10 = arith.constant 1.000000e+00 : f32
    %14 = vector.broadcast %cst_10 : f32 to vector<64x16xf32>
    %15 = arith.addf %14, %13 : vector<64x16xf32>
    %16 = arith.divf %14, %15 : vector<64x16xf32>
    %17 = arith.mulf %11, %16 : vector<64x16xf32>
    %c0_11 = arith.constant 0 : index
    %c0_12 = arith.constant 0 : index
    %c0_13 = arith.constant 0 : index
    %18 = vector.load %arg5[%c0_11, %c0_12, %c0_13] : memref<1x64x16xf32, #tpu.memory_space<vmem>>, vector<1x64x16xf32>
    %19 = vector.shape_cast %18 : vector<1x64x16xf32> to vector<64x16xf32>
    %20 = vector.shape_cast %17 : vector<64x16xf32> to vector<1x64x16xf32>
    tpu.vector_store %arg5[%c0_11, %c0_12, %c0_13], %20 {strides = array<i32>} : memref<1x64x16xf32, #tpu.memory_space<vmem>>, vector<1x64x16xf32>,
    return
  }
  func.func @transform_0(%arg0: i32) -> (i32, i32, i32) {
    %c0_i32 = arith.constant 0 : i32
    %c0_i32_0 = arith.constant 0 : i32
    %c0_i32_1 = arith.constant 0 : i32
    return %arg0, %c0_i32, %c0_i32_0 : i32, i32, i32
  }
  func.func @transform_1(%arg0: i32) -> (i32, i32) {
    %c0_i32 = arith.constant 0 : i32
    %c0_i32_0 = arith.constant 0 : i32
    %c0_i32_1 = arith.constant 0 : i32
    return %c0_i32, %c0_i32_0 : i32, i32
  }
  func.func @transform_2(%arg0: i32) -> (i32, i32, i32) {
    %c0_i32 = arith.constant 0 : i32
    %c0_i32_0 = arith.constant 0 : i32
    %c0_i32_1 = arith.constant 0 : i32
    %c0_i32_2 = arith.constant 0 : i32
    return %c0_i32, %c0_i32_0, %c0_i32_1 : i32, i32, i32
  }
  func.func @transform_3(%arg0: i32) -> (i32, i32, i32) {
    %c0_i32 = arith.constant 0 : i32
    %c0_i32_0 = arith.constant 0 : i32
    %c0_i32_1 = arith.constant 0 : i32
    return %arg0, %c0_i32, %c0_i32_0 : i32, i32, i32
  }
  func.func @transform_4(%arg0: i32) -> (i32, i32, i32) {
    %c0_i32 = arith.constant 0 : i32
    %c0_i32_0 = arith.constant 0 : i32
    %c0_i32_1 = arith.constant 0 : i32
    return %arg0, %c0_i32, %c0_i32_0 : i32, i32, i32
  }
}

module attributes {stable_mosaic.version = 11 : i64} {
  func.func @_gemm_kernel(%arg0: i32, %arg1: memref<1x16x144xbf16, #tpu.memory_space<vmem>>, %arg2: memref<144x16xbf16, #tpu.memory_space<vmem>>, %arg3: memref<1x1x16xf32, #tpu.memory_space<vmem>>, %arg4: memref<1x1x16xf32, #tpu.memory_space<vmem>>, %arg5: memref<1x16x16xf32, #tpu.memory_space<vmem>>) attributes {dimension_semantics = [#tpu.dimension_semantics<parallel>], iteration_bounds = array<i64: 2>, scalar_prefetch = 0 : i64, scratch_operands = 0 : i64, tpu.core_type = #tpu.core_type<tc>, window_params = [{transform_indices = @transform_0, window_bounds = array<i64: 1, 16, 144>}, {pipeline_mode = #tpu.pipeline_mode<synchronous>, transform_indices = @transform_1, window_bounds = array<i64: 144, 16>}, {pipeline_mode = #tpu.pipeline_mode<synchronous>, transform_indices = @transform_2, window_bounds = array<i64: 1, 1, 16>}, {transform_indices = @transform_3, window_bounds = array<i64: 1, 1, 16>}, {transform_indices = @transform_4, window_bounds = array<i64: 1, 16, 16>}]} {
    %c0 = arith.constant 0 : index
    %c0_0 = arith.constant 0 : index
    %c0_1 = arith.constant 0 : index
    %0 = vector.load %arg1[%c0, %c0_0, %c0_1] : memref<1x16x144xbf16, #tpu.memory_space<vmem>>, vector<1x16x144xbf16>
    %1 = vector.shape_cast %0 : vector<1x16x144xbf16> to vector<16x144xbf16>
    %c0_2 = arith.constant 0 : index
    %c0_3 = arith.constant 0 : index
    %2 = vector.load %arg2[%c0_2, %c0_3] : memref<144x16xbf16, #tpu.memory_space<vmem>>, vector<144x16xbf16>
    %cst = arith.constant dense<0.000000e+00> : vector<16x16xf32>
    %3 = tpu.matmul %1, %2, %cst {dimension_numbers = #tpu.dot_dimension_numbers<[1], [0], [0], [1], [0, 0, 1, 1], [], []>} : vector<16x144xbf16>, vector<144x16xbf16>, vector<16x16xf32> -> vector<16x16xf32>
    %c0_4 = arith.constant 0 : index
    %c0_5 = arith.constant 0 : index
    %c0_6 = arith.constant 0 : index
    %4 = vector.load %arg3[%c0_4, %c0_5, %c0_6] : memref<1x1x16xf32, #tpu.memory_space<vmem>>, vector<1x1x16xf32>
    %5 = vector.shape_cast %4 : vector<1x1x16xf32> to vector<1x16xf32>
    %6 = vector.broadcast %5 : vector<1x16xf32> to vector<16x16xf32>
    %7 = arith.addf %3, %6 : vector<16x16xf32>
    %c0_7 = arith.constant 0 : index
    %c0_8 = arith.constant 0 : index
    %c0_9 = arith.constant 0 : index
    %8 = vector.load %arg4[%c0_7, %c0_8, %c0_9] : memref<1x1x16xf32, #tpu.memory_space<vmem>>, vector<1x1x16xf32>
    %9 = vector.shape_cast %8 : vector<1x1x16xf32> to vector<1x16xf32>
    %10 = vector.broadcast %9 : vector<1x16xf32> to vector<16x16xf32>
    %11 = arith.addf %7, %10 : vector<16x16xf32>
    %c0_10 = arith.constant 0 : index
    %c0_11 = arith.constant 0 : index
    %c0_12 = arith.constant 0 : index
    %12 = vector.load %arg5[%c0_10, %c0_11, %c0_12] : memref<1x16x16xf32, #tpu.memory_space<vmem>>, vector<1x16x16xf32>
    %13 = vector.shape_cast %12 : vector<1x16x16xf32> to vector<16x16xf32>
    %14 = vector.shape_cast %11 : vector<16x16xf32> to vector<1x16x16xf32>
    tpu.vector_store %arg5[%c0_10, %c0_11, %c0_12], %14 {strides = array<i32>} : memref<1x16x16xf32, #tpu.memory_space<vmem>>, vector<1x16x16xf32>,
    return
  }
  func.func @transform_0(%arg0: i32) -> (i32, i32, i32) {
    %c0_i32 = arith.constant 0 : i32
    %c0_i32_0 = arith.constant 0 : i32
    %c0_i32_1 = arith.constant 0 : i32
    return %arg0, %c0_i32, %c0_i32_0 : i32, i32, i32
  }
  func.func @transform_1(%arg0: i32) -> (i32, i32) {
    %c0_i32 = arith.constant 0 : i32
    %c0_i32_0 = arith.constant 0 : i32
    %c0_i32_1 = arith.constant 0 : i32
    return %c0_i32, %c0_i32_0 : i32, i32
  }
  func.func @transform_2(%arg0: i32) -> (i32, i32, i32) {
    %c0_i32 = arith.constant 0 : i32
    %c0_i32_0 = arith.constant 0 : i32
    %c0_i32_1 = arith.constant 0 : i32
    %c0_i32_2 = arith.constant 0 : i32
    return %c0_i32, %c0_i32_0, %c0_i32_1 : i32, i32, i32
  }
  func.func @transform_3(%arg0: i32) -> (i32, i32, i32) {
    %c0_i32 = arith.constant 0 : i32
    %c0_i32_0 = arith.constant 0 : i32
    %c0_i32_1 = arith.constant 0 : i32
    return %arg0, %c0_i32, %c0_i32_0 : i32, i32, i32
  }
  func.func @transform_4(%arg0: i32) -> (i32, i32, i32) {
    %c0_i32 = arith.constant 0 : i32
    %c0_i32_0 = arith.constant 0 : i32
    %c0_i32_1 = arith.constant 0 : i32
    return %arg0, %c0_i32, %c0_i32_0 : i32, i32, i32
  }
}

module attributes {stable_mosaic.version = 11 : i64} {
  func.func @_gemm_kernel(%arg0: i32, %arg1: memref<1x16x144xbf16, #tpu.memory_space<vmem>>, %arg2: memref<144x32xbf16, #tpu.memory_space<vmem>>, %arg3: memref<1x1x32xf32, #tpu.memory_space<vmem>>, %arg4: memref<1x1x32xf32, #tpu.memory_space<vmem>>, %arg5: memref<1x16x32xf32, #tpu.memory_space<vmem>>) attributes {dimension_semantics = [#tpu.dimension_semantics<parallel>], iteration_bounds = array<i64: 2>, scalar_prefetch = 0 : i64, scratch_operands = 0 : i64, tpu.core_type = #tpu.core_type<tc>, window_params = [{transform_indices = @transform_0, window_bounds = array<i64: 1, 16, 144>}, {pipeline_mode = #tpu.pipeline_mode<synchronous>, transform_indices = @transform_1, window_bounds = array<i64: 144, 32>}, {pipeline_mode = #tpu.pipeline_mode<synchronous>, transform_indices = @transform_2, window_bounds = array<i64: 1, 1, 32>}, {transform_indices = @transform_3, window_bounds = array<i64: 1, 1, 32>}, {transform_indices = @transform_4, window_bounds = array<i64: 1, 16, 32>}]} {
    %c0 = arith.constant 0 : index
    %c0_0 = arith.constant 0 : index
    %c0_1 = arith.constant 0 : index
    %0 = vector.load %arg1[%c0, %c0_0, %c0_1] : memref<1x16x144xbf16, #tpu.memory_space<vmem>>, vector<1x16x144xbf16>
    %1 = vector.shape_cast %0 : vector<1x16x144xbf16> to vector<16x144xbf16>
    %c0_2 = arith.constant 0 : index
    %c0_3 = arith.constant 0 : index
    %2 = vector.load %arg2[%c0_2, %c0_3] : memref<144x32xbf16, #tpu.memory_space<vmem>>, vector<144x32xbf16>
    %cst = arith.constant dense<0.000000e+00> : vector<16x32xf32>
    %3 = tpu.matmul %1, %2, %cst {dimension_numbers = #tpu.dot_dimension_numbers<[1], [0], [0], [1], [0, 0, 1, 1], [], []>} : vector<16x144xbf16>, vector<144x32xbf16>, vector<16x32xf32> -> vector<16x32xf32>
    %c0_4 = arith.constant 0 : index
    %c0_5 = arith.constant 0 : index
    %c0_6 = arith.constant 0 : index
    %4 = vector.load %arg3[%c0_4, %c0_5, %c0_6] : memref<1x1x32xf32, #tpu.memory_space<vmem>>, vector<1x1x32xf32>
    %5 = vector.shape_cast %4 : vector<1x1x32xf32> to vector<1x32xf32>
    %6 = vector.broadcast %5 : vector<1x32xf32> to vector<16x32xf32>
    %7 = arith.addf %3, %6 : vector<16x32xf32>
    %c0_7 = arith.constant 0 : index
    %c0_8 = arith.constant 0 : index
    %c0_9 = arith.constant 0 : index
    %8 = vector.load %arg4[%c0_7, %c0_8, %c0_9] : memref<1x1x32xf32, #tpu.memory_space<vmem>>, vector<1x1x32xf32>
    %9 = vector.shape_cast %8 : vector<1x1x32xf32> to vector<1x32xf32>
    %10 = vector.broadcast %9 : vector<1x32xf32> to vector<16x32xf32>
    %11 = arith.addf %7, %10 : vector<16x32xf32>
    %12 = arith.negf %11 : vector<16x32xf32>
    %13 = math.exp %12 : vector<16x32xf32>
    %cst_10 = arith.constant 1.000000e+00 : f32
    %14 = vector.broadcast %cst_10 : f32 to vector<16x32xf32>
    %15 = arith.addf %14, %13 : vector<16x32xf32>
    %16 = arith.divf %14, %15 : vector<16x32xf32>
    %17 = arith.mulf %11, %16 : vector<16x32xf32>
    %c0_11 = arith.constant 0 : index
    %c0_12 = arith.constant 0 : index
    %c0_13 = arith.constant 0 : index
    %18 = vector.load %arg5[%c0_11, %c0_12, %c0_13] : memref<1x16x32xf32, #tpu.memory_space<vmem>>, vector<1x16x32xf32>
    %19 = vector.shape_cast %18 : vector<1x16x32xf32> to vector<16x32xf32>
    %20 = vector.shape_cast %17 : vector<16x32xf32> to vector<1x16x32xf32>
    tpu.vector_store %arg5[%c0_11, %c0_12, %c0_13], %20 {strides = array<i32>} : memref<1x16x32xf32, #tpu.memory_space<vmem>>, vector<1x16x32xf32>,
    return
  }
  func.func @transform_0(%arg0: i32) -> (i32, i32, i32) {
    %c0_i32 = arith.constant 0 : i32
    %c0_i32_0 = arith.constant 0 : i32
    %c0_i32_1 = arith.constant 0 : i32
    return %arg0, %c0_i32, %c0_i32_0 : i32, i32, i32
  }
  func.func @transform_1(%arg0: i32) -> (i32, i32) {
    %c0_i32 = arith.constant 0 : i32
    %c0_i32_0 = arith.constant 0 : i32
    %c0_i32_1 = arith.constant 0 : i32
    return %c0_i32, %c0_i32_0 : i32, i32
  }
  func.func @transform_2(%arg0: i32) -> (i32, i32, i32) {
    %c0_i32 = arith.constant 0 : i32
    %c0_i32_0 = arith.constant 0 : i32
    %c0_i32_1 = arith.constant 0 : i32
    %c0_i32_2 = arith.constant 0 : i32
    return %c0_i32, %c0_i32_0, %c0_i32_1 : i32, i32, i32
  }
  func.func @transform_3(%arg0: i32) -> (i32, i32, i32) {
    %c0_i32 = arith.constant 0 : i32
    %c0_i32_0 = arith.constant 0 : i32
    %c0_i32_1 = arith.constant 0 : i32
    return %arg0, %c0_i32, %c0_i32_0 : i32, i32, i32
  }
  func.func @transform_4(%arg0: i32) -> (i32, i32, i32) {
    %c0_i32 = arith.constant 0 : i32
    %c0_i32_0 = arith.constant 0 : i32
    %c0_i32_1 = arith.constant 0 : i32
    return %arg0, %c0_i32, %c0_i32_0 : i32, i32, i32
  }
}

module attributes {stable_mosaic.version = 11 : i64} {
  func.func @_gemm_kernel(%arg0: i32, %arg1: memref<1x16x288xbf16, #tpu.memory_space<vmem>>, %arg2: memref<288x32xbf16, #tpu.memory_space<vmem>>, %arg3: memref<1x1x32xf32, #tpu.memory_space<vmem>>, %arg4: memref<1x1x32xf32, #tpu.memory_space<vmem>>, %arg5: memref<1x16x32xf32, #tpu.memory_space<vmem>>) attributes {dimension_semantics = [#tpu.dimension_semantics<parallel>], iteration_bounds = array<i64: 2>, scalar_prefetch = 0 : i64, scratch_operands = 0 : i64, tpu.core_type = #tpu.core_type<tc>, window_params = [{transform_indices = @transform_0, window_bounds = array<i64: 1, 16, 288>}, {pipeline_mode = #tpu.pipeline_mode<synchronous>, transform_indices = @transform_1, window_bounds = array<i64: 288, 32>}, {pipeline_mode = #tpu.pipeline_mode<synchronous>, transform_indices = @transform_2, window_bounds = array<i64: 1, 1, 32>}, {transform_indices = @transform_3, window_bounds = array<i64: 1, 1, 32>}, {transform_indices = @transform_4, window_bounds = array<i64: 1, 16, 32>}]} {
    %c0 = arith.constant 0 : index
    %c0_0 = arith.constant 0 : index
    %c0_1 = arith.constant 0 : index
    %0 = vector.load %arg1[%c0, %c0_0, %c0_1] : memref<1x16x288xbf16, #tpu.memory_space<vmem>>, vector<1x16x288xbf16>
    %1 = vector.shape_cast %0 : vector<1x16x288xbf16> to vector<16x288xbf16>
    %c0_2 = arith.constant 0 : index
    %c0_3 = arith.constant 0 : index
    %2 = vector.load %arg2[%c0_2, %c0_3] : memref<288x32xbf16, #tpu.memory_space<vmem>>, vector<288x32xbf16>
    %cst = arith.constant dense<0.000000e+00> : vector<16x32xf32>
    %3 = tpu.matmul %1, %2, %cst {dimension_numbers = #tpu.dot_dimension_numbers<[1], [0], [0], [1], [0, 0, 1, 1], [], []>} : vector<16x288xbf16>, vector<288x32xbf16>, vector<16x32xf32> -> vector<16x32xf32>
    %c0_4 = arith.constant 0 : index
    %c0_5 = arith.constant 0 : index
    %c0_6 = arith.constant 0 : index
    %4 = vector.load %arg3[%c0_4, %c0_5, %c0_6] : memref<1x1x32xf32, #tpu.memory_space<vmem>>, vector<1x1x32xf32>
    %5 = vector.shape_cast %4 : vector<1x1x32xf32> to vector<1x32xf32>
    %6 = vector.broadcast %5 : vector<1x32xf32> to vector<16x32xf32>
    %7 = arith.addf %3, %6 : vector<16x32xf32>
    %c0_7 = arith.constant 0 : index
    %c0_8 = arith.constant 0 : index
    %c0_9 = arith.constant 0 : index
    %8 = vector.load %arg4[%c0_7, %c0_8, %c0_9] : memref<1x1x32xf32, #tpu.memory_space<vmem>>, vector<1x1x32xf32>
    %9 = vector.shape_cast %8 : vector<1x1x32xf32> to vector<1x32xf32>
    %10 = vector.broadcast %9 : vector<1x32xf32> to vector<16x32xf32>
    %11 = arith.addf %7, %10 : vector<16x32xf32>
    %12 = arith.negf %11 : vector<16x32xf32>
    %13 = math.exp %12 : vector<16x32xf32>
    %cst_10 = arith.constant 1.000000e+00 : f32
    %14 = vector.broadcast %cst_10 : f32 to vector<16x32xf32>
    %15 = arith.addf %14, %13 : vector<16x32xf32>
    %16 = arith.divf %14, %15 : vector<16x32xf32>
    %17 = arith.mulf %11, %16 : vector<16x32xf32>
    %c0_11 = arith.constant 0 : index
    %c0_12 = arith.constant 0 : index
    %c0_13 = arith.constant 0 : index
    %18 = vector.load %arg5[%c0_11, %c0_12, %c0_13] : memref<1x16x32xf32, #tpu.memory_space<vmem>>, vector<1x16x32xf32>
    %19 = vector.shape_cast %18 : vector<1x16x32xf32> to vector<16x32xf32>
    %20 = vector.shape_cast %17 : vector<16x32xf32> to vector<1x16x32xf32>
    tpu.vector_store %arg5[%c0_11, %c0_12, %c0_13], %20 {strides = array<i32>} : memref<1x16x32xf32, #tpu.memory_space<vmem>>, vector<1x16x32xf32>,
    return
  }
  func.func @transform_0(%arg0: i32) -> (i32, i32, i32) {
    %c0_i32 = arith.constant 0 : i32
    %c0_i32_0 = arith.constant 0 : i32
    %c0_i32_1 = arith.constant 0 : i32
    return %arg0, %c0_i32, %c0_i32_0 : i32, i32, i32
  }
  func.func @transform_1(%arg0: i32) -> (i32, i32) {
    %c0_i32 = arith.constant 0 : i32
    %c0_i32_0 = arith.constant 0 : i32
    %c0_i32_1 = arith.constant 0 : i32
    return %c0_i32, %c0_i32_0 : i32, i32
  }
  func.func @transform_2(%arg0: i32) -> (i32, i32, i32) {
    %c0_i32 = arith.constant 0 : i32
    %c0_i32_0 = arith.constant 0 : i32
    %c0_i32_1 = arith.constant 0 : i32
    %c0_i32_2 = arith.constant 0 : i32
    return %c0_i32, %c0_i32_0, %c0_i32_1 : i32, i32, i32
  }
  func.func @transform_3(%arg0: i32) -> (i32, i32, i32) {
    %c0_i32 = arith.constant 0 : i32
    %c0_i32_0 = arith.constant 0 : i32
    %c0_i32_1 = arith.constant 0 : i32
    return %arg0, %c0_i32, %c0_i32_0 : i32, i32, i32
  }
  func.func @transform_4(%arg0: i32) -> (i32, i32, i32) {
    %c0_i32 = arith.constant 0 : i32
    %c0_i32_0 = arith.constant 0 : i32
    %c0_i32_1 = arith.constant 0 : i32
    return %arg0, %c0_i32, %c0_i32_0 : i32, i32, i32
  }
}

module attributes {stable_mosaic.version = 11 : i64} {
  func.func @_gemm_kernel(%arg0: i32, %arg1: memref<1x4x288xbf16, #tpu.memory_space<vmem>>, %arg2: memref<288x32xbf16, #tpu.memory_space<vmem>>, %arg3: memref<1x1x32xf32, #tpu.memory_space<vmem>>, %arg4: memref<1x1x32xf32, #tpu.memory_space<vmem>>, %arg5: memref<1x4x32xf32, #tpu.memory_space<vmem>>) attributes {dimension_semantics = [#tpu.dimension_semantics<parallel>], iteration_bounds = array<i64: 2>, scalar_prefetch = 0 : i64, scratch_operands = 0 : i64, tpu.core_type = #tpu.core_type<tc>, window_params = [{transform_indices = @transform_0, window_bounds = array<i64: 1, 4, 288>}, {pipeline_mode = #tpu.pipeline_mode<synchronous>, transform_indices = @transform_1, window_bounds = array<i64: 288, 32>}, {pipeline_mode = #tpu.pipeline_mode<synchronous>, transform_indices = @transform_2, window_bounds = array<i64: 1, 1, 32>}, {transform_indices = @transform_3, window_bounds = array<i64: 1, 1, 32>}, {transform_indices = @transform_4, window_bounds = array<i64: 1, 4, 32>}]} {
    %c0 = arith.constant 0 : index
    %c0_0 = arith.constant 0 : index
    %c0_1 = arith.constant 0 : index
    %0 = vector.load %arg1[%c0, %c0_0, %c0_1] : memref<1x4x288xbf16, #tpu.memory_space<vmem>>, vector<1x4x288xbf16>
    %1 = vector.shape_cast %0 : vector<1x4x288xbf16> to vector<4x288xbf16>
    %c0_2 = arith.constant 0 : index
    %c0_3 = arith.constant 0 : index
    %2 = vector.load %arg2[%c0_2, %c0_3] : memref<288x32xbf16, #tpu.memory_space<vmem>>, vector<288x32xbf16>
    %cst = arith.constant dense<0.000000e+00> : vector<4x32xf32>
    %3 = tpu.matmul %1, %2, %cst {dimension_numbers = #tpu.dot_dimension_numbers<[1], [0], [0], [1], [0, 0, 1, 1], [], []>} : vector<4x288xbf16>, vector<288x32xbf16>, vector<4x32xf32> -> vector<4x32xf32>
    %c0_4 = arith.constant 0 : index
    %c0_5 = arith.constant 0 : index
    %c0_6 = arith.constant 0 : index
    %4 = vector.load %arg3[%c0_4, %c0_5, %c0_6] : memref<1x1x32xf32, #tpu.memory_space<vmem>>, vector<1x1x32xf32>
    %5 = vector.shape_cast %4 : vector<1x1x32xf32> to vector<1x32xf32>
    %6 = vector.broadcast %5 : vector<1x32xf32> to vector<4x32xf32>
    %7 = arith.addf %3, %6 : vector<4x32xf32>
    %c0_7 = arith.constant 0 : index
    %c0_8 = arith.constant 0 : index
    %c0_9 = arith.constant 0 : index
    %8 = vector.load %arg4[%c0_7, %c0_8, %c0_9] : memref<1x1x32xf32, #tpu.memory_space<vmem>>, vector<1x1x32xf32>
    %9 = vector.shape_cast %8 : vector<1x1x32xf32> to vector<1x32xf32>
    %10 = vector.broadcast %9 : vector<1x32xf32> to vector<4x32xf32>
    %11 = arith.addf %7, %10 : vector<4x32xf32>
    %c0_10 = arith.constant 0 : index
    %c0_11 = arith.constant 0 : index
    %c0_12 = arith.constant 0 : index
    %12 = vector.load %arg5[%c0_10, %c0_11, %c0_12] : memref<1x4x32xf32, #tpu.memory_space<vmem>>, vector<1x4x32xf32>
    %13 = vector.shape_cast %12 : vector<1x4x32xf32> to vector<4x32xf32>
    %14 = vector.shape_cast %11 : vector<4x32xf32> to vector<1x4x32xf32>
    tpu.vector_store %arg5[%c0_10, %c0_11, %c0_12], %14 {strides = array<i32>} : memref<1x4x32xf32, #tpu.memory_space<vmem>>, vector<1x4x32xf32>,
    return
  }
  func.func @transform_0(%arg0: i32) -> (i32, i32, i32) {
    %c0_i32 = arith.constant 0 : i32
    %c0_i32_0 = arith.constant 0 : i32
    %c0_i32_1 = arith.constant 0 : i32
    return %arg0, %c0_i32, %c0_i32_0 : i32, i32, i32
  }
  func.func @transform_1(%arg0: i32) -> (i32, i32) {
    %c0_i32 = arith.constant 0 : i32
    %c0_i32_0 = arith.constant 0 : i32
    %c0_i32_1 = arith.constant 0 : i32
    return %c0_i32, %c0_i32_0 : i32, i32
  }
  func.func @transform_2(%arg0: i32) -> (i32, i32, i32) {
    %c0_i32 = arith.constant 0 : i32
    %c0_i32_0 = arith.constant 0 : i32
    %c0_i32_1 = arith.constant 0 : i32
    %c0_i32_2 = arith.constant 0 : i32
    return %c0_i32, %c0_i32_0, %c0_i32_1 : i32, i32, i32
  }
  func.func @transform_3(%arg0: i32) -> (i32, i32, i32) {
    %c0_i32 = arith.constant 0 : i32
    %c0_i32_0 = arith.constant 0 : i32
    %c0_i32_1 = arith.constant 0 : i32
    return %arg0, %c0_i32, %c0_i32_0 : i32, i32, i32
  }
  func.func @transform_4(%arg0: i32) -> (i32, i32, i32) {
    %c0_i32 = arith.constant 0 : i32
    %c0_i32_0 = arith.constant 0 : i32
    %c0_i32_1 = arith.constant 0 : i32
    return %arg0, %c0_i32, %c0_i32_0 : i32, i32, i32
  }
}

module attributes {stable_mosaic.version = 11 : i64} {
  func.func @_attn_kernel(%arg0: i32, %arg1: memref<1x4x32xf32, #tpu.memory_space<vmem>>, %arg2: memref<1x8x32xbf16, #tpu.memory_space<vmem>>, %arg3: memref<32x32xbf16, #tpu.memory_space<vmem>>, %arg4: memref<1x1x32xf32, #tpu.memory_space<vmem>>, %arg5: memref<32x32xbf16, #tpu.memory_space<vmem>>, %arg6: memref<1x1x32xf32, #tpu.memory_space<vmem>>, %arg7: memref<32x32xbf16, #tpu.memory_space<vmem>>, %arg8: memref<1x1x32xf32, #tpu.memory_space<vmem>>, %arg9: memref<32x32xbf16, #tpu.memory_space<vmem>>, %arg10: memref<1x1x32xf32, #tpu.memory_space<vmem>>, %arg11: memref<1x4x32xf32, #tpu.memory_space<vmem>>) attributes {dimension_semantics = [#tpu.dimension_semantics<parallel>], iteration_bounds = array<i64: 2>, scalar_prefetch = 0 : i64, scratch_operands = 0 : i64, tpu.core_type = #tpu.core_type<tc>, window_params = [{transform_indices = @transform_0, window_bounds = array<i64: 1, 4, 32>}, {transform_indices = @transform_1, window_bounds = array<i64: 1, 8, 32>}, {pipeline_mode = #tpu.pipeline_mode<synchronous>, transform_indices = @transform_2, window_bounds = array<i64: 32, 32>}, {pipeline_mode = #tpu.pipeline_mode<synchronous>, transform_indices = @transform_3, window_bounds = array<i64: 1, 1, 32>}, {pipeline_mode = #tpu.pipeline_mode<synchronous>, transform_indices = @transform_4, window_bounds = array<i64: 32, 32>}, {pipeline_mode = #tpu.pipeline_mode<synchronous>, transform_indices = @transform_5, window_bounds = array<i64: 1, 1, 32>}, {pipeline_mode = #tpu.pipeline_mode<synchronous>, transform_indices = @transform_6, window_bounds = array<i64: 32, 32>}, {pipeline_mode = #tpu.pipeline_mode<synchronous>, transform_indices = @transform_7, window_bounds = array<i64: 1, 1, 32>}, {pipeline_mode = #tpu.pipeline_mode<synchronous>, transform_indices = @transform_8, window_bounds = array<i64: 32, 32>}, {pipeline_mode = #tpu.pipeline_mode<synchronous>, transform_indices = @transform_9, window_bounds = array<i64: 1, 1, 32>}, {transform_indices = @transform_10, window_bounds = array<i64: 1, 4, 32>}]} {
    %c0 = arith.constant 0 : index
    %c0_0 = arith.constant 0 : index
    %c0_1 = arith.constant 0 : index
    %0 = vector.load %arg1[%c0, %c0_0, %c0_1] : memref<1x4x32xf32, #tpu.memory_space<vmem>>, vector<1x4x32xf32>
    %1 = vector.shape_cast %0 : vector<1x4x32xf32> to vector<4x32xf32>
    %c0_2 = arith.constant 0 : index
    %c0_3 = arith.constant 0 : index
    %c0_4 = arith.constant 0 : index
    %2 = vector.load %arg2[%c0_2, %c0_3, %c0_4] : memref<1x8x32xbf16, #tpu.memory_space<vmem>>, vector<1x8x32xbf16>
    %3 = vector.shape_cast %2 : vector<1x8x32xbf16> to vector<8x32xbf16>
    %4 = arith.truncf %1 : vector<4x32xf32> to vector<4x32xbf16>
    %c0_5 = arith.constant 0 : index
    %c0_6 = arith.constant 0 : index
    %5 = vector.load %arg3[%c0_5, %c0_6] : memref<32x32xbf16, #tpu.memory_space<vmem>>, vector<32x32xbf16>
    %cst = arith.constant dense<0.000000e+00> : vector<4x32xf32>
    %6 = tpu.matmul %4, %5, %cst {dimension_numbers = #tpu.dot_dimension_numbers<[1], [0], [0], [1], [0, 0, 1, 1], [], []>} : vector<4x32xbf16>, vector<32x32xbf16>, vector<4x32xf32> -> vector<4x32xf32>
    %c0_7 = arith.constant 0 : index
    %c0_8 = arith.constant 0 : index
    %c0_9 = arith.constant 0 : index
    %7 = vector.load %arg4[%c0_7, %c0_8, %c0_9] : memref<1x1x32xf32, #tpu.memory_space<vmem>>, vector<1x1x32xf32>
    %8 = vector.shape_cast %7 : vector<1x1x32xf32> to vector<1x32xf32>
    %9 = vector.broadcast %8 : vector<1x32xf32> to vector<4x32xf32>
    %10 = arith.addf %6, %9 : vector<4x32xf32>
    %c0_10 = arith.constant 0 : index
    %c0_11 = arith.constant 0 : index
    %11 = vector.load %arg5[%c0_10, %c0_11] : memref<32x32xbf16, #tpu.memory_space<vmem>>, vector<32x32xbf16>
    %cst_12 = arith.constant dense<0.000000e+00> : vector<8x32xf32>
    %12 = tpu.matmul %3, %11, %cst_12 {dimension_numbers = #tpu.dot_dimension_numbers<[1], [0], [0], [1], [0, 0, 1, 1], [], []>} : vector<8x32xbf16>, vector<32x32xbf16>, vector<8x32xf32> -> vector<8x32xf32>
    %c0_13 = arith.constant 0 : index
    %c0_14 = arith.constant 0 : index
    %c0_15 = arith.constant 0 : index
    %13 = vector.load %arg6[%c0_13, %c0_14, %c0_15] : memref<1x1x32xf32, #tpu.memory_space<vmem>>, vector<1x1x32xf32>
    %14 = vector.shape_cast %13 : vector<1x1x32xf32> to vector<1x32xf32>
    %15 = vector.broadcast %14 : vector<1x32xf32> to vector<8x32xf32>
    %16 = arith.addf %12, %15 : vector<8x32xf32>
    %c0_16 = arith.constant 0 : index
    %c0_17 = arith.constant 0 : index
    %17 = vector.load %arg7[%c0_16, %c0_17] : memref<32x32xbf16, #tpu.memory_space<vmem>>, vector<32x32xbf16>
    %cst_18 = arith.constant dense<0.000000e+00> : vector<8x32xf32>
    %18 = tpu.matmul %3, %17, %cst_18 {dimension_numbers = #tpu.dot_dimension_numbers<[1], [0], [0], [1], [0, 0, 1, 1], [], []>} : vector<8x32xbf16>, vector<32x32xbf16>, vector<8x32xf32> -> vector<8x32xf32>
    %c0_19 = arith.constant 0 : index
    %c0_20 = arith.constant 0 : index
    %c0_21 = arith.constant 0 : index
    %19 = vector.load %arg8[%c0_19, %c0_20, %c0_21] : memref<1x1x32xf32, #tpu.memory_space<vmem>>, vector<1x1x32xf32>
    %20 = vector.shape_cast %19 : vector<1x1x32xf32> to vector<1x32xf32>
    %21 = vector.broadcast %20 : vector<1x32xf32> to vector<8x32xf32>
    %22 = arith.addf %18, %21 : vector<8x32xf32>
    "tpu.trace_start"() <{level = 10 : i32, message = "nc,sc->ns"}> : () -> ()
    %cst_22 = arith.constant dense<0.000000e+00> : vector<4x8xf32>
    %23 = tpu.matmul %10, %16, %cst_22 {dimension_numbers = #tpu.dot_dimension_numbers<[1], [1], [0], [0], [0, 0, 1, 0], [], []>} : vector<4x32xf32>, vector<8x32xf32>, vector<4x8xf32> -> vector<4x8xf32>
    "tpu.trace_stop"() : () -> ()
    %cst_23 = arith.constant 0.176776692 : f32
    %24 = vector.broadcast %cst_23 : f32 to vector<4x8xf32>
    %25 = arith.mulf %23, %24 : vector<4x8xf32>
    %cst_24 = arith.constant dense<0xFF800000> : vector<4xf32>
    %26 = vector.multi_reduction <maximumf>, %25, %cst_24 [1] : vector<4x8xf32> to vector<4xf32>
    %cst_25 = arith.constant 0xFF800000 : f32
    %27 = vector.broadcast %cst_25 : f32 to vector<4xf32>
    %28 = arith.maximumf %27, %26 : vector<4xf32>
    %29 = vector.shape_cast %28 : vector<4xf32> to vector<4x1xf32>
    %30 = vector.broadcast %29 : vector<4x1xf32> to vector<4x8xf32>
    %31 = arith.subf %25, %30 : vector<4x8xf32>
    %32 = math.exp %31 : vector<4x8xf32>
    %cst_26 = arith.constant dense<0.000000e+00> : vector<4xf32>
    %33 = vector.multi_reduction <add>, %32, %cst_26 [1] : vector<4x8xf32> to vector<4xf32>
    %34 = vector.shape_cast %33 : vector<4xf32> to vector<4x1xf32>
    %35 = vector.broadcast %34 : vector<4x1xf32> to vector<4x8xf32>
    %36 = arith.divf %32, %35 : vector<4x8xf32>
    "tpu.trace_start"() <{level = 10 : i32, message = "ns,sc->nc"}> : () -> ()
    %cst_27 = arith.constant dense<0.000000e+00> : vector<4x32xf32>
    %37 = tpu.matmul %36, %22, %cst_27 {dimension_numbers = #tpu.dot_dimension_numbers<[1], [0], [0], [1], [0, 0, 1, 1], [], []>} : vector<4x8xf32>, vector<8x32xf32>, vector<4x32xf32> -> vector<4x32xf32>
    "tpu.trace_stop"() : () -> ()
    %38 = arith.truncf %37 : vector<4x32xf32> to vector<4x32xbf16>
    %c0_28 = arith.constant 0 : index
    %c0_29 = arith.constant 0 : index
    %39 = vector.load %arg9[%c0_28, %c0_29] : memref<32x32xbf16, #tpu.memory_space<vmem>>, vector<32x32xbf16>
    %cst_30 = arith.constant dense<0.000000e+00> : vector<4x32xf32>
    %40 = tpu.matmul %38, %39, %cst_30 {dimension_numbers = #tpu.dot_dimension_numbers<[1], [0], [0], [1], [0, 0, 1, 1], [], []>} : vector<4x32xbf16>, vector<32x32xbf16>, vector<4x32xf32> -> vector<4x32xf32>
    %c0_31 = arith.constant 0 : index
    %c0_32 = arith.constant 0 : index
    %c0_33 = arith.constant 0 : index
    %41 = vector.load %arg10[%c0_31, %c0_32, %c0_33] : memref<1x1x32xf32, #tpu.memory_space<vmem>>, vector<1x1x32xf32>
    %42 = vector.shape_cast %41 : vector<1x1x32xf32> to vector<1x32xf32>
    %43 = vector.broadcast %42 : vector<1x32xf32> to vector<4x32xf32>
    %44 = arith.addf %40, %43 : vector<4x32xf32>
    %45 = arith.addf %1, %44 : vector<4x32xf32>
    %c0_34 = arith.constant 0 : index
    %c0_35 = arith.constant 0 : index
    %c0_36 = arith.constant 0 : index
    %46 = vector.load %arg11[%c0_34, %c0_35, %c0_36] : memref<1x4x32xf32, #tpu.memory_space<vmem>>, vector<1x4x32xf32>
    %47 = vector.shape_cast %46 : vector<1x4x32xf32> to vector<4x32xf32>
    %48 = vector.shape_cast %45 : vector<4x32xf32> to vector<1x4x32xf32>
    tpu.vector_store %arg11[%c0_34, %c0_35, %c0_36], %48 {strides = array<i32>} : memref<1x4x32xf32, #tpu.memory_space<vmem>>, vector<1x4x32xf32>,
    return
  }
  func.func @transform_0(%arg0: i32) -> (i32, i32, i32) {
    %c0_i32 = arith.constant 0 : i32
    %c0_i32_0 = arith.constant 0 : i32
    %c0_i32_1 = arith.constant 0 : i32
    return %arg0, %c0_i32, %c0_i32_0 : i32, i32, i32
  }
  func.func @transform_1(%arg0: i32) -> (i32, i32, i32) {
    %c0_i32 = arith.constant 0 : i32
    %c0_i32_0 = arith.constant 0 : i32
    %c0_i32_1 = arith.constant 0 : i32
    return %arg0, %c0_i32, %c0_i32_0 : i32, i32, i32
  }
  func.func @transform_2(%arg0: i32) -> (i32, i32) {
    %c0_i32 = arith.constant 0 : i32
    %c0_i32_0 = arith.constant 0 : i32
    %c0_i32_1 = arith.constant 0 : i32
    return %c0_i32, %c0_i32_0 : i32, i32
  }
  func.func @transform_3(%arg0: i32) -> (i32, i32, i32) {
    %c0_i32 = arith.constant 0 : i32
    %c0_i32_0 = arith.constant 0 : i32
    %c0_i32_1 = arith.constant 0 : i32
    %c0_i32_2 = arith.constant 0 : i32
    return %c0_i32, %c0_i32_0, %c0_i32_1 : i32, i32, i32
  }
  func.func @transform_4(%arg0: i32) -> (i32, i32) {
    %c0_i32 = arith.constant 0 : i32
    %c0_i32_0 = arith.constant 0 : i32
    %c0_i32_1 = arith.constant 0 : i32
    return %c0_i32, %c0_i32_0 : i32, i32
  }
  func.func @transform_5(%arg0: i32) -> (i32, i32, i32) {
    %c0_i32 = arith.constant 0 : i32
    %c0_i32_0 = arith.constant 0 : i32
    %c0_i32_1 = arith.constant 0 : i32
    %c0_i32_2 = arith.constant 0 : i32
    return %c0_i32, %c0_i32_0, %c0_i32_1 : i32, i32, i32
  }
  func.func @transform_6(%arg0: i32) -> (i32, i32) {
    %c0_i32 = arith.constant 0 : i32
    %c0_i32_0 = arith.constant 0 : i32
    %c0_i32_1 = arith.constant 0 : i32
    return %c0_i32, %c0_i32_0 : i32, i32
  }
  func.func @transform_7(%arg0: i32) -> (i32, i32, i32) {
    %c0_i32 = arith.constant 0 : i32
    %c0_i32_0 = arith.constant 0 : i32
    %c0_i32_1 = arith.constant 0 : i32
    %c0_i32_2 = arith.constant 0 : i32
    return %c0_i32, %c0_i32_0, %c0_i32_1 : i32, i32, i32
  }
  func.func @transform_8(%arg0: i32) -> (i32, i32) {
    %c0_i32 = arith.constant 0 : i32
    %c0_i32_0 = arith.constant 0 : i32
    %c0_i32_1 = arith.constant 0 : i32
    return %c0_i32, %c0_i32_0 : i32, i32
  }
  func.func @transform_9(%arg0: i32) -> (i32, i32, i32) {
    %c0_i32 = arith.constant 0 : i32
    %c0_i32_0 = arith.constant 0 : i32
    %c0_i32_1 = arith.constant 0 : i32
    %c0_i32_2 = arith.constant 0 : i32
    return %c0_i32, %c0_i32_0, %c0_i32_1 : i32, i32, i32
  }
  func.func @transform_10(%arg0: i32) -> (i32, i32, i32) {
    %c0_i32 = arith.constant 0 : i32
    %c0_i32_0 = arith.constant 0 : i32
    %c0_i32_1 = arith.constant 0 : i32
    return %arg0, %c0_i32, %c0_i32_0 : i32, i32, i32
  }
}

module attributes {stable_mosaic.version = 11 : i64} {
  func.func @_gemm_kernel(%arg0: i32, %arg1: memref<1x4x288xbf16, #tpu.memory_space<vmem>>, %arg2: memref<288x32xbf16, #tpu.memory_space<vmem>>, %arg3: memref<1x1x32xf32, #tpu.memory_space<vmem>>, %arg4: memref<1x1x32xf32, #tpu.memory_space<vmem>>, %arg5: memref<1x4x32xf32, #tpu.memory_space<vmem>>) attributes {dimension_semantics = [#tpu.dimension_semantics<parallel>], iteration_bounds = array<i64: 2>, scalar_prefetch = 0 : i64, scratch_operands = 0 : i64, tpu.core_type = #tpu.core_type<tc>, window_params = [{transform_indices = @transform_0, window_bounds = array<i64: 1, 4, 288>}, {pipeline_mode = #tpu.pipeline_mode<synchronous>, transform_indices = @transform_1, window_bounds = array<i64: 288, 32>}, {pipeline_mode = #tpu.pipeline_mode<synchronous>, transform_indices = @transform_2, window_bounds = array<i64: 1, 1, 32>}, {transform_indices = @transform_3, window_bounds = array<i64: 1, 1, 32>}, {transform_indices = @transform_4, window_bounds = array<i64: 1, 4, 32>}]} {
    %c0 = arith.constant 0 : index
    %c0_0 = arith.constant 0 : index
    %c0_1 = arith.constant 0 : index
    %0 = vector.load %arg1[%c0, %c0_0, %c0_1] : memref<1x4x288xbf16, #tpu.memory_space<vmem>>, vector<1x4x288xbf16>
    %1 = vector.shape_cast %0 : vector<1x4x288xbf16> to vector<4x288xbf16>
    %c0_2 = arith.constant 0 : index
    %c0_3 = arith.constant 0 : index
    %2 = vector.load %arg2[%c0_2, %c0_3] : memref<288x32xbf16, #tpu.memory_space<vmem>>, vector<288x32xbf16>
    %cst = arith.constant dense<0.000000e+00> : vector<4x32xf32>
    %3 = tpu.matmul %1, %2, %cst {dimension_numbers = #tpu.dot_dimension_numbers<[1], [0], [0], [1], [0, 0, 1, 1], [], []>} : vector<4x288xbf16>, vector<288x32xbf16>, vector<4x32xf32> -> vector<4x32xf32>
    %c0_4 = arith.constant 0 : index
    %c0_5 = arith.constant 0 : index
    %c0_6 = arith.constant 0 : index
    %4 = vector.load %arg3[%c0_4, %c0_5, %c0_6] : memref<1x1x32xf32, #tpu.memory_space<vmem>>, vector<1x1x32xf32>
    %5 = vector.shape_cast %4 : vector<1x1x32xf32> to vector<1x32xf32>
    %6 = vector.broadcast %5 : vector<1x32xf32> to vector<4x32xf32>
    %7 = arith.addf %3, %6 : vector<4x32xf32>
    %c0_7 = arith.constant 0 : index
    %c0_8 = arith.constant 0 : index
    %c0_9 = arith.constant 0 : index
    %8 = vector.load %arg4[%c0_7, %c0_8, %c0_9] : memref<1x1x32xf32, #tpu.memory_space<vmem>>, vector<1x1x32xf32>
    %9 = vector.shape_cast %8 : vector<1x1x32xf32> to vector<1x32xf32>
    %10 = vector.broadcast %9 : vector<1x32xf32> to vector<4x32xf32>
    %11 = arith.addf %7, %10 : vector<4x32xf32>
    %12 = arith.negf %11 : vector<4x32xf32>
    %13 = math.exp %12 : vector<4x32xf32>
    %cst_10 = arith.constant 1.000000e+00 : f32
    %14 = vector.broadcast %cst_10 : f32 to vector<4x32xf32>
    %15 = arith.addf %14, %13 : vector<4x32xf32>
    %16 = arith.divf %14, %15 : vector<4x32xf32>
    %17 = arith.mulf %11, %16 : vector<4x32xf32>
    %c0_11 = arith.constant 0 : index
    %c0_12 = arith.constant 0 : index
    %c0_13 = arith.constant 0 : index
    %18 = vector.load %arg5[%c0_11, %c0_12, %c0_13] : memref<1x4x32xf32, #tpu.memory_space<vmem>>, vector<1x4x32xf32>
    %19 = vector.shape_cast %18 : vector<1x4x32xf32> to vector<4x32xf32>
    %20 = vector.shape_cast %17 : vector<4x32xf32> to vector<1x4x32xf32>
    tpu.vector_store %arg5[%c0_11, %c0_12, %c0_13], %20 {strides = array<i32>} : memref<1x4x32xf32, #tpu.memory_space<vmem>>, vector<1x4x32xf32>,
    return
  }
  func.func @transform_0(%arg0: i32) -> (i32, i32, i32) {
    %c0_i32 = arith.constant 0 : i32
    %c0_i32_0 = arith.constant 0 : i32
    %c0_i32_1 = arith.constant 0 : i32
    return %arg0, %c0_i32, %c0_i32_0 : i32, i32, i32
  }
  func.func @transform_1(%arg0: i32) -> (i32, i32) {
    %c0_i32 = arith.constant 0 : i32
    %c0_i32_0 = arith.constant 0 : i32
    %c0_i32_1 = arith.constant 0 : i32
    return %c0_i32, %c0_i32_0 : i32, i32
  }
  func.func @transform_2(%arg0: i32) -> (i32, i32, i32) {
    %c0_i32 = arith.constant 0 : i32
    %c0_i32_0 = arith.constant 0 : i32
    %c0_i32_1 = arith.constant 0 : i32
    %c0_i32_2 = arith.constant 0 : i32
    return %c0_i32, %c0_i32_0, %c0_i32_1 : i32, i32, i32
  }
  func.func @transform_3(%arg0: i32) -> (i32, i32, i32) {
    %c0_i32 = arith.constant 0 : i32
    %c0_i32_0 = arith.constant 0 : i32
    %c0_i32_1 = arith.constant 0 : i32
    return %arg0, %c0_i32, %c0_i32_0 : i32, i32, i32
  }
  func.func @transform_4(%arg0: i32) -> (i32, i32, i32) {
    %c0_i32 = arith.constant 0 : i32
    %c0_i32_0 = arith.constant 0 : i32
    %c0_i32_1 = arith.constant 0 : i32
    return %arg0, %c0_i32, %c0_i32_0 : i32, i32, i32
  }
}

module attributes {stable_mosaic.version = 11 : i64} {
  func.func @_gemm_kernel(%arg0: i32, %arg1: memref<1x16x16xbf16, #tpu.memory_space<vmem>>, %arg2: memref<16x32xbf16, #tpu.memory_space<vmem>>, %arg3: memref<1x1x32xf32, #tpu.memory_space<vmem>>, %arg4: memref<1x1x32xf32, #tpu.memory_space<vmem>>, %arg5: memref<1x16x32xf32, #tpu.memory_space<vmem>>) attributes {dimension_semantics = [#tpu.dimension_semantics<parallel>], iteration_bounds = array<i64: 2>, scalar_prefetch = 0 : i64, scratch_operands = 0 : i64, tpu.core_type = #tpu.core_type<tc>, window_params = [{transform_indices = @transform_0, window_bounds = array<i64: 1, 16, 16>}, {pipeline_mode = #tpu.pipeline_mode<synchronous>, transform_indices = @transform_1, window_bounds = array<i64: 16, 32>}, {pipeline_mode = #tpu.pipeline_mode<synchronous>, transform_indices = @transform_2, window_bounds = array<i64: 1, 1, 32>}, {transform_indices = @transform_3, window_bounds = array<i64: 1, 1, 32>}, {transform_indices = @transform_4, window_bounds = array<i64: 1, 16, 32>}]} {
    %c0 = arith.constant 0 : index
    %c0_0 = arith.constant 0 : index
    %c0_1 = arith.constant 0 : index
    %0 = vector.load %arg1[%c0, %c0_0, %c0_1] : memref<1x16x16xbf16, #tpu.memory_space<vmem>>, vector<1x16x16xbf16>
    %1 = vector.shape_cast %0 : vector<1x16x16xbf16> to vector<16x16xbf16>
    %c0_2 = arith.constant 0 : index
    %c0_3 = arith.constant 0 : index
    %2 = vector.load %arg2[%c0_2, %c0_3] : memref<16x32xbf16, #tpu.memory_space<vmem>>, vector<16x32xbf16>
    %cst = arith.constant dense<0.000000e+00> : vector<16x32xf32>
    %3 = tpu.matmul %1, %2, %cst {dimension_numbers = #tpu.dot_dimension_numbers<[1], [0], [0], [1], [0, 0, 1, 1], [], []>} : vector<16x16xbf16>, vector<16x32xbf16>, vector<16x32xf32> -> vector<16x32xf32>
    %c0_4 = arith.constant 0 : index
    %c0_5 = arith.constant 0 : index
    %c0_6 = arith.constant 0 : index
    %4 = vector.load %arg3[%c0_4, %c0_5, %c0_6] : memref<1x1x32xf32, #tpu.memory_space<vmem>>, vector<1x1x32xf32>
    %5 = vector.shape_cast %4 : vector<1x1x32xf32> to vector<1x32xf32>
    %6 = vector.broadcast %5 : vector<1x32xf32> to vector<16x32xf32>
    %7 = arith.addf %3, %6 : vector<16x32xf32>
    %c0_7 = arith.constant 0 : index
    %c0_8 = arith.constant 0 : index
    %c0_9 = arith.constant 0 : index
    %8 = vector.load %arg4[%c0_7, %c0_8, %c0_9] : memref<1x1x32xf32, #tpu.memory_space<vmem>>, vector<1x1x32xf32>
    %9 = vector.shape_cast %8 : vector<1x1x32xf32> to vector<1x32xf32>
    %10 = vector.broadcast %9 : vector<1x32xf32> to vector<16x32xf32>
    %11 = arith.addf %7, %10 : vector<16x32xf32>
    %c0_10 = arith.constant 0 : index
    %c0_11 = arith.constant 0 : index
    %c0_12 = arith.constant 0 : index
    %12 = vector.load %arg5[%c0_10, %c0_11, %c0_12] : memref<1x16x32xf32, #tpu.memory_space<vmem>>, vector<1x16x32xf32>
    %13 = vector.shape_cast %12 : vector<1x16x32xf32> to vector<16x32xf32>
    %14 = vector.shape_cast %11 : vector<16x32xf32> to vector<1x16x32xf32>
    tpu.vector_store %arg5[%c0_10, %c0_11, %c0_12], %14 {strides = array<i32>} : memref<1x16x32xf32, #tpu.memory_space<vmem>>, vector<1x16x32xf32>,
    return
  }
  func.func @transform_0(%arg0: i32) -> (i32, i32, i32) {
    %c0_i32 = arith.constant 0 : i32
    %c0_i32_0 = arith.constant 0 : i32
    %c0_i32_1 = arith.constant 0 : i32
    return %arg0, %c0_i32, %c0_i32_0 : i32, i32, i32
  }
  func.func @transform_1(%arg0: i32) -> (i32, i32) {
    %c0_i32 = arith.constant 0 : i32
    %c0_i32_0 = arith.constant 0 : i32
    %c0_i32_1 = arith.constant 0 : i32
    return %c0_i32, %c0_i32_0 : i32, i32
  }
  func.func @transform_2(%arg0: i32) -> (i32, i32, i32) {
    %c0_i32 = arith.constant 0 : i32
    %c0_i32_0 = arith.constant 0 : i32
    %c0_i32_1 = arith.constant 0 : i32
    %c0_i32_2 = arith.constant 0 : i32
    return %c0_i32, %c0_i32_0, %c0_i32_1 : i32, i32, i32
  }
  func.func @transform_3(%arg0: i32) -> (i32, i32, i32) {
    %c0_i32 = arith.constant 0 : i32
    %c0_i32_0 = arith.constant 0 : i32
    %c0_i32_1 = arith.constant 0 : i32
    return %arg0, %c0_i32, %c0_i32_0 : i32, i32, i32
  }
  func.func @transform_4(%arg0: i32) -> (i32, i32, i32) {
    %c0_i32 = arith.constant 0 : i32
    %c0_i32_0 = arith.constant 0 : i32
    %c0_i32_1 = arith.constant 0 : i32
    return %arg0, %c0_i32, %c0_i32_0 : i32, i32, i32
  }
}

module attributes {stable_mosaic.version = 11 : i64} {
  func.func @_gemm_kernel(%arg0: i32, %arg1: memref<1x64x16xbf16, #tpu.memory_space<vmem>>, %arg2: memref<16x32xbf16, #tpu.memory_space<vmem>>, %arg3: memref<1x1x32xf32, #tpu.memory_space<vmem>>, %arg4: memref<1x1x32xf32, #tpu.memory_space<vmem>>, %arg5: memref<1x64x32xf32, #tpu.memory_space<vmem>>) attributes {dimension_semantics = [#tpu.dimension_semantics<parallel>], iteration_bounds = array<i64: 2>, scalar_prefetch = 0 : i64, scratch_operands = 0 : i64, tpu.core_type = #tpu.core_type<tc>, window_params = [{transform_indices = @transform_0, window_bounds = array<i64: 1, 64, 16>}, {pipeline_mode = #tpu.pipeline_mode<synchronous>, transform_indices = @transform_1, window_bounds = array<i64: 16, 32>}, {pipeline_mode = #tpu.pipeline_mode<synchronous>, transform_indices = @transform_2, window_bounds = array<i64: 1, 1, 32>}, {transform_indices = @transform_3, window_bounds = array<i64: 1, 1, 32>}, {transform_indices = @transform_4, window_bounds = array<i64: 1, 64, 32>}]} {
    %c0 = arith.constant 0 : index
    %c0_0 = arith.constant 0 : index
    %c0_1 = arith.constant 0 : index
    %0 = vector.load %arg1[%c0, %c0_0, %c0_1] : memref<1x64x16xbf16, #tpu.memory_space<vmem>>, vector<1x64x16xbf16>
    %1 = vector.shape_cast %0 : vector<1x64x16xbf16> to vector<64x16xbf16>
    %c0_2 = arith.constant 0 : index
    %c0_3 = arith.constant 0 : index
    %2 = vector.load %arg2[%c0_2, %c0_3] : memref<16x32xbf16, #tpu.memory_space<vmem>>, vector<16x32xbf16>
    %cst = arith.constant dense<0.000000e+00> : vector<64x32xf32>
    %3 = tpu.matmul %1, %2, %cst {dimension_numbers = #tpu.dot_dimension_numbers<[1], [0], [0], [1], [0, 0, 1, 1], [], []>} : vector<64x16xbf16>, vector<16x32xbf16>, vector<64x32xf32> -> vector<64x32xf32>
    %c0_4 = arith.constant 0 : index
    %c0_5 = arith.constant 0 : index
    %c0_6 = arith.constant 0 : index
    %4 = vector.load %arg3[%c0_4, %c0_5, %c0_6] : memref<1x1x32xf32, #tpu.memory_space<vmem>>, vector<1x1x32xf32>
    %5 = vector.shape_cast %4 : vector<1x1x32xf32> to vector<1x32xf32>
    %6 = vector.broadcast %5 : vector<1x32xf32> to vector<64x32xf32>
    %7 = arith.addf %3, %6 : vector<64x32xf32>
    %c0_7 = arith.constant 0 : index
    %c0_8 = arith.constant 0 : index
    %c0_9 = arith.constant 0 : index
    %8 = vector.load %arg4[%c0_7, %c0_8, %c0_9] : memref<1x1x32xf32, #tpu.memory_space<vmem>>, vector<1x1x32xf32>
    %9 = vector.shape_cast %8 : vector<1x1x32xf32> to vector<1x32xf32>
    %10 = vector.broadcast %9 : vector<1x32xf32> to vector<64x32xf32>
    %11 = arith.addf %7, %10 : vector<64x32xf32>
    %c0_10 = arith.constant 0 : index
    %c0_11 = arith.constant 0 : index
    %c0_12 = arith.constant 0 : index
    %12 = vector.load %arg5[%c0_10, %c0_11, %c0_12] : memref<1x64x32xf32, #tpu.memory_space<vmem>>, vector<1x64x32xf32>
    %13 = vector.shape_cast %12 : vector<1x64x32xf32> to vector<64x32xf32>
    %14 = vector.shape_cast %11 : vector<64x32xf32> to vector<1x64x32xf32>
    tpu.vector_store %arg5[%c0_10, %c0_11, %c0_12], %14 {strides = array<i32>} : memref<1x64x32xf32, #tpu.memory_space<vmem>>, vector<1x64x32xf32>,
    return
  }
  func.func @transform_0(%arg0: i32) -> (i32, i32, i32) {
    %c0_i32 = arith.constant 0 : i32
    %c0_i32_0 = arith.constant 0 : i32
    %c0_i32_1 = arith.constant 0 : i32
    return %arg0, %c0_i32, %c0_i32_0 : i32, i32, i32
  }
  func.func @transform_1(%arg0: i32) -> (i32, i32) {
    %c0_i32 = arith.constant 0 : i32
    %c0_i32_0 = arith.constant 0 : i32
    %c0_i32_1 = arith.constant 0 : i32
    return %c0_i32, %c0_i32_0 : i32, i32
  }
  func.func @transform_2(%arg0: i32) -> (i32, i32, i32) {
    %c0_i32 = arith.constant 0 : i32
    %c0_i32_0 = arith.constant 0 : i32
    %c0_i32_1 = arith.constant 0 : i32
    %c0_i32_2 = arith.constant 0 : i32
    return %c0_i32, %c0_i32_0, %c0_i32_1 : i32, i32, i32
  }
  func.func @transform_3(%arg0: i32) -> (i32, i32, i32) {
    %c0_i32 = arith.constant 0 : i32
    %c0_i32_0 = arith.constant 0 : i32
    %c0_i32_1 = arith.constant 0 : i32
    return %arg0, %c0_i32, %c0_i32_0 : i32, i32, i32
  }
  func.func @transform_4(%arg0: i32) -> (i32, i32, i32) {
    %c0_i32 = arith.constant 0 : i32
    %c0_i32_0 = arith.constant 0 : i32
    %c0_i32_1 = arith.constant 0 : i32
    return %arg0, %c0_i32, %c0_i32_0 : i32, i32, i32
  }
}

module attributes {stable_mosaic.version = 11 : i64} {
  func.func @_gemm_kernel(%arg0: i32, %arg1: memref<1x64x288xbf16, #tpu.memory_space<vmem>>, %arg2: memref<288x16xbf16, #tpu.memory_space<vmem>>, %arg3: memref<1x1x16xf32, #tpu.memory_space<vmem>>, %arg4: memref<1x1x16xf32, #tpu.memory_space<vmem>>, %arg5: memref<1x64x16xf32, #tpu.memory_space<vmem>>) attributes {dimension_semantics = [#tpu.dimension_semantics<parallel>], iteration_bounds = array<i64: 2>, scalar_prefetch = 0 : i64, scratch_operands = 0 : i64, tpu.core_type = #tpu.core_type<tc>, window_params = [{transform_indices = @transform_0, window_bounds = array<i64: 1, 64, 288>}, {pipeline_mode = #tpu.pipeline_mode<synchronous>, transform_indices = @transform_1, window_bounds = array<i64: 288, 16>}, {pipeline_mode = #tpu.pipeline_mode<synchronous>, transform_indices = @transform_2, window_bounds = array<i64: 1, 1, 16>}, {transform_indices = @transform_3, window_bounds = array<i64: 1, 1, 16>}, {transform_indices = @transform_4, window_bounds = array<i64: 1, 64, 16>}]} {
    %c0 = arith.constant 0 : index
    %c0_0 = arith.constant 0 : index
    %c0_1 = arith.constant 0 : index
    %0 = vector.load %arg1[%c0, %c0_0, %c0_1] : memref<1x64x288xbf16, #tpu.memory_space<vmem>>, vector<1x64x288xbf16>
    %1 = vector.shape_cast %0 : vector<1x64x288xbf16> to vector<64x288xbf16>
    %c0_2 = arith.constant 0 : index
    %c0_3 = arith.constant 0 : index
    %2 = vector.load %arg2[%c0_2, %c0_3] : memref<288x16xbf16, #tpu.memory_space<vmem>>, vector<288x16xbf16>
    %cst = arith.constant dense<0.000000e+00> : vector<64x16xf32>
    %3 = tpu.matmul %1, %2, %cst {dimension_numbers = #tpu.dot_dimension_numbers<[1], [0], [0], [1], [0, 0, 1, 1], [], []>} : vector<64x288xbf16>, vector<288x16xbf16>, vector<64x16xf32> -> vector<64x16xf32>
    %c0_4 = arith.constant 0 : index
    %c0_5 = arith.constant 0 : index
    %c0_6 = arith.constant 0 : index
    %4 = vector.load %arg3[%c0_4, %c0_5, %c0_6] : memref<1x1x16xf32, #tpu.memory_space<vmem>>, vector<1x1x16xf32>
    %5 = vector.shape_cast %4 : vector<1x1x16xf32> to vector<1x16xf32>
    %6 = vector.broadcast %5 : vector<1x16xf32> to vector<64x16xf32>
    %7 = arith.addf %3, %6 : vector<64x16xf32>
    %c0_7 = arith.constant 0 : index
    %c0_8 = arith.constant 0 : index
    %c0_9 = arith.constant 0 : index
    %8 = vector.load %arg4[%c0_7, %c0_8, %c0_9] : memref<1x1x16xf32, #tpu.memory_space<vmem>>, vector<1x1x16xf32>
    %9 = vector.shape_cast %8 : vector<1x1x16xf32> to vector<1x16xf32>
    %10 = vector.broadcast %9 : vector<1x16xf32> to vector<64x16xf32>
    %11 = arith.addf %7, %10 : vector<64x16xf32>
    %12 = arith.negf %11 : vector<64x16xf32>
    %13 = math.exp %12 : vector<64x16xf32>
    %cst_10 = arith.constant 1.000000e+00 : f32
    %14 = vector.broadcast %cst_10 : f32 to vector<64x16xf32>
    %15 = arith.addf %14, %13 : vector<64x16xf32>
    %16 = arith.divf %14, %15 : vector<64x16xf32>
    %17 = arith.mulf %11, %16 : vector<64x16xf32>
    %c0_11 = arith.constant 0 : index
    %c0_12 = arith.constant 0 : index
    %c0_13 = arith.constant 0 : index
    %18 = vector.load %arg5[%c0_11, %c0_12, %c0_13] : memref<1x64x16xf32, #tpu.memory_space<vmem>>, vector<1x64x16xf32>
    %19 = vector.shape_cast %18 : vector<1x64x16xf32> to vector<64x16xf32>
    %20 = vector.shape_cast %17 : vector<64x16xf32> to vector<1x64x16xf32>
    tpu.vector_store %arg5[%c0_11, %c0_12, %c0_13], %20 {strides = array<i32>} : memref<1x64x16xf32, #tpu.memory_space<vmem>>, vector<1x64x16xf32>,
    return
  }
  func.func @transform_0(%arg0: i32) -> (i32, i32, i32) {
    %c0_i32 = arith.constant 0 : i32
    %c0_i32_0 = arith.constant 0 : i32
    %c0_i32_1 = arith.constant 0 : i32
    return %arg0, %c0_i32, %c0_i32_0 : i32, i32, i32
  }
  func.func @transform_1(%arg0: i32) -> (i32, i32) {
    %c0_i32 = arith.constant 0 : i32
    %c0_i32_0 = arith.constant 0 : i32
    %c0_i32_1 = arith.constant 0 : i32
    return %c0_i32, %c0_i32_0 : i32, i32
  }
  func.func @transform_2(%arg0: i32) -> (i32, i32, i32) {
    %c0_i32 = arith.constant 0 : i32
    %c0_i32_0 = arith.constant 0 : i32
    %c0_i32_1 = arith.constant 0 : i32
    %c0_i32_2 = arith.constant 0 : i32
    return %c0_i32, %c0_i32_0, %c0_i32_1 : i32, i32, i32
  }
  func.func @transform_3(%arg0: i32) -> (i32, i32, i32) {
    %c0_i32 = arith.constant 0 : i32
    %c0_i32_0 = arith.constant 0 : i32
    %c0_i32_1 = arith.constant 0 : i32
    return %arg0, %c0_i32, %c0_i32_0 : i32, i32, i32
  }
  func.func @transform_4(%arg0: i32) -> (i32, i32, i32) {
    %c0_i32 = arith.constant 0 : i32
    %c0_i32_0 = arith.constant 0 : i32
    %c0_i32_1 = arith.constant 0 : i32
    return %arg0, %c0_i32, %c0_i32_0 : i32, i32, i32
  }
}

module attributes {stable_mosaic.version = 11 : i64} {
  func.func @_gemm_kernel(%arg0: i32, %arg1: memref<1x64x8xbf16, #tpu.memory_space<vmem>>, %arg2: memref<8x16xbf16, #tpu.memory_space<vmem>>, %arg3: memref<1x1x16xf32, #tpu.memory_space<vmem>>, %arg4: memref<1x1x16xf32, #tpu.memory_space<vmem>>, %arg5: memref<1x64x16xf32, #tpu.memory_space<vmem>>) attributes {dimension_semantics = [#tpu.dimension_semantics<parallel>], iteration_bounds = array<i64: 2>, scalar_prefetch = 0 : i64, scratch_operands = 0 : i64, tpu.core_type = #tpu.core_type<tc>, window_params = [{transform_indices = @transform_0, window_bounds = array<i64: 1, 64, 8>}, {pipeline_mode = #tpu.pipeline_mode<synchronous>, transform_indices = @transform_1, window_bounds = array<i64: 8, 16>}, {pipeline_mode = #tpu.pipeline_mode<synchronous>, transform_indices = @transform_2, window_bounds = array<i64: 1, 1, 16>}, {transform_indices = @transform_3, window_bounds = array<i64: 1, 1, 16>}, {transform_indices = @transform_4, window_bounds = array<i64: 1, 64, 16>}]} {
    %c0 = arith.constant 0 : index
    %c0_0 = arith.constant 0 : index
    %c0_1 = arith.constant 0 : index
    %0 = vector.load %arg1[%c0, %c0_0, %c0_1] : memref<1x64x8xbf16, #tpu.memory_space<vmem>>, vector<1x64x8xbf16>
    %1 = vector.shape_cast %0 : vector<1x64x8xbf16> to vector<64x8xbf16>
    %c0_2 = arith.constant 0 : index
    %c0_3 = arith.constant 0 : index
    %2 = vector.load %arg2[%c0_2, %c0_3] : memref<8x16xbf16, #tpu.memory_space<vmem>>, vector<8x16xbf16>
    %cst = arith.constant dense<0.000000e+00> : vector<64x16xf32>
    %3 = tpu.matmul %1, %2, %cst {dimension_numbers = #tpu.dot_dimension_numbers<[1], [0], [0], [1], [0, 0, 1, 1], [], []>} : vector<64x8xbf16>, vector<8x16xbf16>, vector<64x16xf32> -> vector<64x16xf32>
    %c0_4 = arith.constant 0 : index
    %c0_5 = arith.constant 0 : index
    %c0_6 = arith.constant 0 : index
    %4 = vector.load %arg3[%c0_4, %c0_5, %c0_6] : memref<1x1x16xf32, #tpu.memory_space<vmem>>, vector<1x1x16xf32>
    %5 = vector.shape_cast %4 : vector<1x1x16xf32> to vector<1x16xf32>
    %6 = vector.broadcast %5 : vector<1x16xf32> to vector<64x16xf32>
    %7 = arith.addf %3, %6 : vector<64x16xf32>
    %c0_7 = arith.constant 0 : index
    %c0_8 = arith.constant 0 : index
    %c0_9 = arith.constant 0 : index
    %8 = vector.load %arg4[%c0_7, %c0_8, %c0_9] : memref<1x1x16xf32, #tpu.memory_space<vmem>>, vector<1x1x16xf32>
    %9 = vector.shape_cast %8 : vector<1x1x16xf32> to vector<1x16xf32>
    %10 = vector.broadcast %9 : vector<1x16xf32> to vector<64x16xf32>
    %11 = arith.addf %7, %10 : vector<64x16xf32>
    %c0_10 = arith.constant 0 : index
    %c0_11 = arith.constant 0 : index
    %c0_12 = arith.constant 0 : index
    %12 = vector.load %arg5[%c0_10, %c0_11, %c0_12] : memref<1x64x16xf32, #tpu.memory_space<vmem>>, vector<1x64x16xf32>
    %13 = vector.shape_cast %12 : vector<1x64x16xf32> to vector<64x16xf32>
    %14 = vector.shape_cast %11 : vector<64x16xf32> to vector<1x64x16xf32>
    tpu.vector_store %arg5[%c0_10, %c0_11, %c0_12], %14 {strides = array<i32>} : memref<1x64x16xf32, #tpu.memory_space<vmem>>, vector<1x64x16xf32>,
    return
  }
  func.func @transform_0(%arg0: i32) -> (i32, i32, i32) {
    %c0_i32 = arith.constant 0 : i32
    %c0_i32_0 = arith.constant 0 : i32
    %c0_i32_1 = arith.constant 0 : i32
    return %arg0, %c0_i32, %c0_i32_0 : i32, i32, i32
  }
  func.func @transform_1(%arg0: i32) -> (i32, i32) {
    %c0_i32 = arith.constant 0 : i32
    %c0_i32_0 = arith.constant 0 : i32
    %c0_i32_1 = arith.constant 0 : i32
    return %c0_i32, %c0_i32_0 : i32, i32
  }
  func.func @transform_2(%arg0: i32) -> (i32, i32, i32) {
    %c0_i32 = arith.constant 0 : i32
    %c0_i32_0 = arith.constant 0 : i32
    %c0_i32_1 = arith.constant 0 : i32
    %c0_i32_2 = arith.constant 0 : i32
    return %c0_i32, %c0_i32_0, %c0_i32_1 : i32, i32, i32
  }
  func.func @transform_3(%arg0: i32) -> (i32, i32, i32) {
    %c0_i32 = arith.constant 0 : i32
    %c0_i32_0 = arith.constant 0 : i32
    %c0_i32_1 = arith.constant 0 : i32
    return %arg0, %c0_i32, %c0_i32_0 : i32, i32, i32
  }
  func.func @transform_4(%arg0: i32) -> (i32, i32, i32) {
    %c0_i32 = arith.constant 0 : i32
    %c0_i32_0 = arith.constant 0 : i32
    %c0_i32_1 = arith.constant 0 : i32
    return %arg0, %c0_i32, %c0_i32_0 : i32, i32, i32
  }
}

module attributes {stable_mosaic.version = 11 : i64} {
  func.func @_gemm_kernel(%arg0: i32, %arg1: memref<1x256x8xbf16, #tpu.memory_space<vmem>>, %arg2: memref<8x16xbf16, #tpu.memory_space<vmem>>, %arg3: memref<1x1x16xf32, #tpu.memory_space<vmem>>, %arg4: memref<1x1x16xf32, #tpu.memory_space<vmem>>, %arg5: memref<1x256x16xf32, #tpu.memory_space<vmem>>) attributes {dimension_semantics = [#tpu.dimension_semantics<parallel>], iteration_bounds = array<i64: 2>, scalar_prefetch = 0 : i64, scratch_operands = 0 : i64, tpu.core_type = #tpu.core_type<tc>, window_params = [{transform_indices = @transform_0, window_bounds = array<i64: 1, 256, 8>}, {pipeline_mode = #tpu.pipeline_mode<synchronous>, transform_indices = @transform_1, window_bounds = array<i64: 8, 16>}, {pipeline_mode = #tpu.pipeline_mode<synchronous>, transform_indices = @transform_2, window_bounds = array<i64: 1, 1, 16>}, {transform_indices = @transform_3, window_bounds = array<i64: 1, 1, 16>}, {transform_indices = @transform_4, window_bounds = array<i64: 1, 256, 16>}]} {
    %c0 = arith.constant 0 : index
    %c0_0 = arith.constant 0 : index
    %c0_1 = arith.constant 0 : index
    %0 = vector.load %arg1[%c0, %c0_0, %c0_1] : memref<1x256x8xbf16, #tpu.memory_space<vmem>>, vector<1x256x8xbf16>
    %1 = vector.shape_cast %0 : vector<1x256x8xbf16> to vector<256x8xbf16>
    %c0_2 = arith.constant 0 : index
    %c0_3 = arith.constant 0 : index
    %2 = vector.load %arg2[%c0_2, %c0_3] : memref<8x16xbf16, #tpu.memory_space<vmem>>, vector<8x16xbf16>
    %cst = arith.constant dense<0.000000e+00> : vector<256x16xf32>
    %3 = tpu.matmul %1, %2, %cst {dimension_numbers = #tpu.dot_dimension_numbers<[1], [0], [0], [1], [0, 0, 1, 1], [], []>} : vector<256x8xbf16>, vector<8x16xbf16>, vector<256x16xf32> -> vector<256x16xf32>
    %c0_4 = arith.constant 0 : index
    %c0_5 = arith.constant 0 : index
    %c0_6 = arith.constant 0 : index
    %4 = vector.load %arg3[%c0_4, %c0_5, %c0_6] : memref<1x1x16xf32, #tpu.memory_space<vmem>>, vector<1x1x16xf32>
    %5 = vector.shape_cast %4 : vector<1x1x16xf32> to vector<1x16xf32>
    %6 = vector.broadcast %5 : vector<1x16xf32> to vector<256x16xf32>
    %7 = arith.addf %3, %6 : vector<256x16xf32>
    %c0_7 = arith.constant 0 : index
    %c0_8 = arith.constant 0 : index
    %c0_9 = arith.constant 0 : index
    %8 = vector.load %arg4[%c0_7, %c0_8, %c0_9] : memref<1x1x16xf32, #tpu.memory_space<vmem>>, vector<1x1x16xf32>
    %9 = vector.shape_cast %8 : vector<1x1x16xf32> to vector<1x16xf32>
    %10 = vector.broadcast %9 : vector<1x16xf32> to vector<256x16xf32>
    %11 = arith.addf %7, %10 : vector<256x16xf32>
    %c0_10 = arith.constant 0 : index
    %c0_11 = arith.constant 0 : index
    %c0_12 = arith.constant 0 : index
    %12 = vector.load %arg5[%c0_10, %c0_11, %c0_12] : memref<1x256x16xf32, #tpu.memory_space<vmem>>, vector<1x256x16xf32>
    %13 = vector.shape_cast %12 : vector<1x256x16xf32> to vector<256x16xf32>
    %14 = vector.shape_cast %11 : vector<256x16xf32> to vector<1x256x16xf32>
    tpu.vector_store %arg5[%c0_10, %c0_11, %c0_12], %14 {strides = array<i32>} : memref<1x256x16xf32, #tpu.memory_space<vmem>>, vector<1x256x16xf32>,
    return
  }
  func.func @transform_0(%arg0: i32) -> (i32, i32, i32) {
    %c0_i32 = arith.constant 0 : i32
    %c0_i32_0 = arith.constant 0 : i32
    %c0_i32_1 = arith.constant 0 : i32
    return %arg0, %c0_i32, %c0_i32_0 : i32, i32, i32
  }
  func.func @transform_1(%arg0: i32) -> (i32, i32) {
    %c0_i32 = arith.constant 0 : i32
    %c0_i32_0 = arith.constant 0 : i32
    %c0_i32_1 = arith.constant 0 : i32
    return %c0_i32, %c0_i32_0 : i32, i32
  }
  func.func @transform_2(%arg0: i32) -> (i32, i32, i32) {
    %c0_i32 = arith.constant 0 : i32
    %c0_i32_0 = arith.constant 0 : i32
    %c0_i32_1 = arith.constant 0 : i32
    %c0_i32_2 = arith.constant 0 : i32
    return %c0_i32, %c0_i32_0, %c0_i32_1 : i32, i32, i32
  }
  func.func @transform_3(%arg0: i32) -> (i32, i32, i32) {
    %c0_i32 = arith.constant 0 : i32
    %c0_i32_0 = arith.constant 0 : i32
    %c0_i32_1 = arith.constant 0 : i32
    return %arg0, %c0_i32, %c0_i32_0 : i32, i32, i32
  }
  func.func @transform_4(%arg0: i32) -> (i32, i32, i32) {
    %c0_i32 = arith.constant 0 : i32
    %c0_i32_0 = arith.constant 0 : i32
    %c0_i32_1 = arith.constant 0 : i32
    return %arg0, %c0_i32, %c0_i32_0 : i32, i32, i32
  }
}

module attributes {stable_mosaic.version = 11 : i64} {
  func.func @_gemm_kernel(%arg0: i32, %arg1: memref<1x256x144xbf16, #tpu.memory_space<vmem>>, %arg2: memref<144x8xbf16, #tpu.memory_space<vmem>>, %arg3: memref<1x1x8xf32, #tpu.memory_space<vmem>>, %arg4: memref<1x1x8xf32, #tpu.memory_space<vmem>>, %arg5: memref<1x256x8xf32, #tpu.memory_space<vmem>>) attributes {dimension_semantics = [#tpu.dimension_semantics<parallel>], iteration_bounds = array<i64: 2>, scalar_prefetch = 0 : i64, scratch_operands = 0 : i64, tpu.core_type = #tpu.core_type<tc>, window_params = [{transform_indices = @transform_0, window_bounds = array<i64: 1, 256, 144>}, {pipeline_mode = #tpu.pipeline_mode<synchronous>, transform_indices = @transform_1, window_bounds = array<i64: 144, 8>}, {pipeline_mode = #tpu.pipeline_mode<synchronous>, transform_indices = @transform_2, window_bounds = array<i64: 1, 1, 8>}, {transform_indices = @transform_3, window_bounds = array<i64: 1, 1, 8>}, {transform_indices = @transform_4, window_bounds = array<i64: 1, 256, 8>}]} {
    %c0 = arith.constant 0 : index
    %c0_0 = arith.constant 0 : index
    %c0_1 = arith.constant 0 : index
    %0 = vector.load %arg1[%c0, %c0_0, %c0_1] : memref<1x256x144xbf16, #tpu.memory_space<vmem>>, vector<1x256x144xbf16>
    %1 = vector.shape_cast %0 : vector<1x256x144xbf16> to vector<256x144xbf16>
    %c0_2 = arith.constant 0 : index
    %c0_3 = arith.constant 0 : index
    %2 = vector.load %arg2[%c0_2, %c0_3] : memref<144x8xbf16, #tpu.memory_space<vmem>>, vector<144x8xbf16>
    %cst = arith.constant dense<0.000000e+00> : vector<256x8xf32>
    %3 = tpu.matmul %1, %2, %cst {dimension_numbers = #tpu.dot_dimension_numbers<[1], [0], [0], [1], [0, 0, 1, 1], [], []>} : vector<256x144xbf16>, vector<144x8xbf16>, vector<256x8xf32> -> vector<256x8xf32>
    %c0_4 = arith.constant 0 : index
    %c0_5 = arith.constant 0 : index
    %c0_6 = arith.constant 0 : index
    %4 = vector.load %arg3[%c0_4, %c0_5, %c0_6] : memref<1x1x8xf32, #tpu.memory_space<vmem>>, vector<1x1x8xf32>
    %5 = vector.shape_cast %4 : vector<1x1x8xf32> to vector<1x8xf32>
    %6 = vector.broadcast %5 : vector<1x8xf32> to vector<256x8xf32>
    %7 = arith.addf %3, %6 : vector<256x8xf32>
    %c0_7 = arith.constant 0 : index
    %c0_8 = arith.constant 0 : index
    %c0_9 = arith.constant 0 : index
    %8 = vector.load %arg4[%c0_7, %c0_8, %c0_9] : memref<1x1x8xf32, #tpu.memory_space<vmem>>, vector<1x1x8xf32>
    %9 = vector.shape_cast %8 : vector<1x1x8xf32> to vector<1x8xf32>
    %10 = vector.broadcast %9 : vector<1x8xf32> to vector<256x8xf32>
    %11 = arith.addf %7, %10 : vector<256x8xf32>
    %12 = arith.negf %11 : vector<256x8xf32>
    %13 = math.exp %12 : vector<256x8xf32>
    %cst_10 = arith.constant 1.000000e+00 : f32
    %14 = vector.broadcast %cst_10 : f32 to vector<256x8xf32>
    %15 = arith.addf %14, %13 : vector<256x8xf32>
    %16 = arith.divf %14, %15 : vector<256x8xf32>
    %17 = arith.mulf %11, %16 : vector<256x8xf32>
    %c0_11 = arith.constant 0 : index
    %c0_12 = arith.constant 0 : index
    %c0_13 = arith.constant 0 : index
    %18 = vector.load %arg5[%c0_11, %c0_12, %c0_13] : memref<1x256x8xf32, #tpu.memory_space<vmem>>, vector<1x256x8xf32>
    %19 = vector.shape_cast %18 : vector<1x256x8xf32> to vector<256x8xf32>
    %20 = vector.shape_cast %17 : vector<256x8xf32> to vector<1x256x8xf32>
    tpu.vector_store %arg5[%c0_11, %c0_12, %c0_13], %20 {strides = array<i32>} : memref<1x256x8xf32, #tpu.memory_space<vmem>>, vector<1x256x8xf32>,
    return
  }
  func.func @transform_0(%arg0: i32) -> (i32, i32, i32) {
    %c0_i32 = arith.constant 0 : i32
    %c0_i32_0 = arith.constant 0 : i32
    %c0_i32_1 = arith.constant 0 : i32
    return %arg0, %c0_i32, %c0_i32_0 : i32, i32, i32
  }
  func.func @transform_1(%arg0: i32) -> (i32, i32) {
    %c0_i32 = arith.constant 0 : i32
    %c0_i32_0 = arith.constant 0 : i32
    %c0_i32_1 = arith.constant 0 : i32
    return %c0_i32, %c0_i32_0 : i32, i32
  }
  func.func @transform_2(%arg0: i32) -> (i32, i32, i32) {
    %c0_i32 = arith.constant 0 : i32
    %c0_i32_0 = arith.constant 0 : i32
    %c0_i32_1 = arith.constant 0 : i32
    %c0_i32_2 = arith.constant 0 : i32
    return %c0_i32, %c0_i32_0, %c0_i32_1 : i32, i32, i32
  }
  func.func @transform_3(%arg0: i32) -> (i32, i32, i32) {
    %c0_i32 = arith.constant 0 : i32
    %c0_i32_0 = arith.constant 0 : i32
    %c0_i32_1 = arith.constant 0 : i32
    return %arg0, %c0_i32, %c0_i32_0 : i32, i32, i32
  }
  func.func @transform_4(%arg0: i32) -> (i32, i32, i32) {
    %c0_i32 = arith.constant 0 : i32
    %c0_i32_0 = arith.constant 0 : i32
    %c0_i32_1 = arith.constant 0 : i32
    return %arg0, %c0_i32, %c0_i32_0 : i32, i32, i32
  }
}

module attributes {stable_mosaic.version = 11 : i64} {
  func.func @_gemm_kernel(%arg0: i32, %arg1: memref<1x256x72xbf16, #tpu.memory_space<vmem>>, %arg2: memref<72x4xbf16, #tpu.memory_space<vmem>>, %arg3: memref<1x1x4xf32, #tpu.memory_space<vmem>>, %arg4: memref<1x1x4xf32, #tpu.memory_space<vmem>>, %arg5: memref<1x256x4xf32, #tpu.memory_space<vmem>>) attributes {dimension_semantics = [#tpu.dimension_semantics<parallel>], iteration_bounds = array<i64: 2>, scalar_prefetch = 0 : i64, scratch_operands = 0 : i64, tpu.core_type = #tpu.core_type<tc>, window_params = [{transform_indices = @transform_0, window_bounds = array<i64: 1, 256, 72>}, {pipeline_mode = #tpu.pipeline_mode<synchronous>, transform_indices = @transform_1, window_bounds = array<i64: 72, 4>}, {pipeline_mode = #tpu.pipeline_mode<synchronous>, transform_indices = @transform_2, window_bounds = array<i64: 1, 1, 4>}, {transform_indices = @transform_3, window_bounds = array<i64: 1, 1, 4>}, {transform_indices = @transform_4, window_bounds = array<i64: 1, 256, 4>}]} {
    %c0 = arith.constant 0 : index
    %c0_0 = arith.constant 0 : index
    %c0_1 = arith.constant 0 : index
    %0 = vector.load %arg1[%c0, %c0_0, %c0_1] : memref<1x256x72xbf16, #tpu.memory_space<vmem>>, vector<1x256x72xbf16>
    %1 = vector.shape_cast %0 : vector<1x256x72xbf16> to vector<256x72xbf16>
    %c0_2 = arith.constant 0 : index
    %c0_3 = arith.constant 0 : index
    %2 = vector.load %arg2[%c0_2, %c0_3] : memref<72x4xbf16, #tpu.memory_space<vmem>>, vector<72x4xbf16>
    %cst = arith.constant dense<0.000000e+00> : vector<256x4xf32>
    %3 = tpu.matmul %1, %2, %cst {dimension_numbers = #tpu.dot_dimension_numbers<[1], [0], [0], [1], [0, 0, 1, 1], [], []>} : vector<256x72xbf16>, vector<72x4xbf16>, vector<256x4xf32> -> vector<256x4xf32>
    %c0_4 = arith.constant 0 : index
    %c0_5 = arith.constant 0 : index
    %c0_6 = arith.constant 0 : index
    %4 = vector.load %arg3[%c0_4, %c0_5, %c0_6] : memref<1x1x4xf32, #tpu.memory_space<vmem>>, vector<1x1x4xf32>
    %5 = vector.shape_cast %4 : vector<1x1x4xf32> to vector<1x4xf32>
    %6 = vector.broadcast %5 : vector<1x4xf32> to vector<256x4xf32>
    %7 = arith.addf %3, %6 : vector<256x4xf32>
    %c0_7 = arith.constant 0 : index
    %c0_8 = arith.constant 0 : index
    %c0_9 = arith.constant 0 : index
    %8 = vector.load %arg4[%c0_7, %c0_8, %c0_9] : memref<1x1x4xf32, #tpu.memory_space<vmem>>, vector<1x1x4xf32>
    %9 = vector.shape_cast %8 : vector<1x1x4xf32> to vector<1x4xf32>
    %10 = vector.broadcast %9 : vector<1x4xf32> to vector<256x4xf32>
    %11 = arith.addf %7, %10 : vector<256x4xf32>
    %c0_10 = arith.constant 0 : index
    %c0_11 = arith.constant 0 : index
    %c0_12 = arith.constant 0 : index
    %12 = vector.load %arg5[%c0_10, %c0_11, %c0_12] : memref<1x256x4xf32, #tpu.memory_space<vmem>>, vector<1x256x4xf32>
    %13 = vector.shape_cast %12 : vector<1x256x4xf32> to vector<256x4xf32>
    %14 = vector.shape_cast %11 : vector<256x4xf32> to vector<1x256x4xf32>
    tpu.vector_store %arg5[%c0_10, %c0_11, %c0_12], %14 {strides = array<i32>} : memref<1x256x4xf32, #tpu.memory_space<vmem>>, vector<1x256x4xf32>,
    return
  }
  func.func @transform_0(%arg0: i32) -> (i32, i32, i32) {
    %c0_i32 = arith.constant 0 : i32
    %c0_i32_0 = arith.constant 0 : i32
    %c0_i32_1 = arith.constant 0 : i32
    return %arg0, %c0_i32, %c0_i32_0 : i32, i32, i32
  }
  func.func @transform_1(%arg0: i32) -> (i32, i32) {
    %c0_i32 = arith.constant 0 : i32
    %c0_i32_0 = arith.constant 0 : i32
    %c0_i32_1 = arith.constant 0 : i32
    return %c0_i32, %c0_i32_0 : i32, i32
  }
  func.func @transform_2(%arg0: i32) -> (i32, i32, i32) {
    %c0_i32 = arith.constant 0 : i32
    %c0_i32_0 = arith.constant 0 : i32
    %c0_i32_1 = arith.constant 0 : i32
    %c0_i32_2 = arith.constant 0 : i32
    return %c0_i32, %c0_i32_0, %c0_i32_1 : i32, i32, i32
  }
  func.func @transform_3(%arg0: i32) -> (i32, i32, i32) {
    %c0_i32 = arith.constant 0 : i32
    %c0_i32_0 = arith.constant 0 : i32
    %c0_i32_1 = arith.constant 0 : i32
    return %arg0, %c0_i32, %c0_i32_0 : i32, i32, i32
  }
  func.func @transform_4(%arg0: i32) -> (i32, i32, i32) {
    %c0_i32 = arith.constant 0 : i32
    %c0_i32_0 = arith.constant 0 : i32
    %c0_i32_1 = arith.constant 0 : i32
    return %arg0, %c0_i32, %c0_i32_0 : i32, i32, i32
  }
}

module attributes {stable_mosaic.version = 11 : i64} {
  func.func @_sum_kernel(%arg0: memref<168x128xf32, #tpu.memory_space<vmem>>, %arg1: memref<1x1xf32, #tpu.memory_space<vmem>>) attributes {dimension_semantics = [], scalar_prefetch = 0 : i64, scratch_operands = 0 : i64, tpu.core_type = #tpu.core_type<tc>} {
    %c0 = arith.constant 0 : index
    %c0_0 = arith.constant 0 : index
    %0 = vector.load %arg0[%c0, %c0_0] : memref<168x128xf32, #tpu.memory_space<vmem>>, vector<168x128xf32>
    %1 = vector.shape_cast %0 : vector<168x128xf32> to vector<1x168x128xf32>
    %cst = arith.constant dense<0.000000e+00> : vector<1xf32>
    %2 = vector.multi_reduction <add>, %1, %cst [1, 2] : vector<1x168x128xf32> to vector<1xf32>
    %3 = vector.shape_cast %2 : vector<1xf32> to vector<1x1x1xf32>
    %4 = vector.extract %3[0, 0, 0] : f32 from vector<1x1x1xf32>
    %5 = vector.broadcast %4 : f32 to vector<1x1xf32>
    %c0_1 = arith.constant 0 : index
    %c0_2 = arith.constant 0 : index
    %6 = vector.load %arg1[%c0_1, %c0_2] : memref<1x1xf32, #tpu.memory_space<vmem>>, vector<1x1xf32>
    tpu.vector_store %arg1[%c0_1, %c0_2], %5 {strides = array<i32>} : memref<1x1xf32, #tpu.memory_space<vmem>>, vector<1x1xf32>,
    return
  }
}

</mosaic_0001>

<bundles_post_ra>
// kernel: _fwd.38
= control target key start
LH: loop header
LB: loop body
LE: loop exit
PB: predicated region body
PF: predicated region fallthrough
CT: control target
= control target key end

     0   :  { %s877_s15 = smov 0   ;;  %s1082_s0 = inlined_call_operand.vmem [shape: bf16[2,256,36], index: 0, kind: input, shape index: {}]   ;;  %s1083_s1 = inlined_call_operand.vmem [shape: bf16[36,8], index: 1, kind: input, shape index: {}]   ;;  %s1084_s2 = inlined_call_operand.vmem [shape: f32[1,1,8], index: 2, kind: input, shape index: {}]   ;;  %s1085_s3 = inlined_call_operand.vmem [shape: f32[2,1,8], index: 3, kind: input, shape index: {}]   ;;  %s1086_s4 = inlined_call_operand.vmem [shape: f32[2,256,8], index: 4, kind: output, shape index: {}]  }
   0x1 LB: > { %s702_s16 = sadd.s32 4294967295, %s850_s15   ;;  %p706_p0 = scmp.ge.s32.totalorder %s850_s15, 1  ;;  %s850_s15 = sphi %s877_s15, %s14_s15  }
   0x2   : > { %p170_p1 = scmp.lt.s32.totalorder %s850_s15, 3 }
   0x4   : > { %p171_p2 = pnand %p706_p0, %p170_p1 }
   0x5   : > { %v825_v0 = vld [vmem:[%s1083_s1] sm:$0xff] (!%p171_p2)   ;;  %v826_v1 = vld [vmem:[%s1083_s1 + $0x8] sm:$0xff] (!%p171_p2)   ;;  %p199_p3 = scmp.lt.s32.totalorder (!%p171_p2), %s702_s16, 1  ;;  %v827_v2 = vld [vmem:[%s1083_s1 + $0x10] ss:$0 sps:$4 sm:$0x33] (!%p171_p2)  }
   0x6   : > { %174 = sbr.rel (%p171_p2) target bundleno = 263 (0x107), region = 36  ;;  %771 = vmatprep.subr.bf16.mxu0 (!%p171_p2), %v825_v0  ;;  %809 = vmatprep.subr.bf16.mxu1 (!%p171_p2), %v825_v0  ;;  %vm401_vm0 = vcmask (!%p171_p2), 1041408   ;;  %vm352_vm1 = vcmask (!%p171_p2), 293888   ;;  %v941_v20 = vld [vmem:[%s1084_s2] ss:$0 sm:$0xff] (!%p171_p2)  ;;  %vm605_vm2 = vcmask (!%p171_p2), 64512  }
   0x7   : > { %772 = vmatpush3.bf16.msra.mxu0 (!%p171_p2), %v825_v0  ;;  %812 = vmatpush3.bf16.msra.mxu1 (!%p171_p2), %v825_v0  ;;  %v403_v4 = vsel (!%p171_p2), %vm401_vm0, %v827_v2, 0 }
   0x8   : > { %773 = vmatprep.subr.bf16.mxu0 (!%p171_p2), %v826_v1  ;;  %810 = vmatprep.subr.bf16.mxu1 (!%p171_p2), %v826_v1 }
   0xb   : > { %774 = vmatpush3.bf16.msra.mxu0 (!%p171_p2), %v826_v1  ;;  %813 = vmatpush3.bf16.msra.mxu1 (!%p171_p2), %v826_v1 }
   0xc   : > { %815 = vmatprep.subr.msk.bf16.mxu0 (!%p171_p2), %vm401_vm0, %v827_v2  ;;  %816 = vmatprep.subr.msk.bf16.mxu1 (!%p171_p2), %vm401_vm0, %v827_v2 }
   0xd   : > { %s1088_s16 = smov (!%p199_p3, %s702_s16), 1 }
   0xe   : > { %s750_s23 = sshll.u32 %s1088_s16, 7  ;;  %s206_s29 = scalar_lea.vmem %s1085_s3, %s1088_s16 }
   0xf   : > { %s900_s26 = scalar_lea.vmem %s1082_s0, %s750_s23  ;;  %776 = vmatpush3.bf16.msra.mxu0 %v403_v4  ;;  %814 = vmatpush3.bf16.msra.mxu1 %v403_v4  ;;  %s751_s6 = sshll.u32 %s1088_s16, 8  ;;  %v944_v22 = vld [vmem:[%s206_s29] ss:$0 sm:$0xff] }
  0x10   : > { %v828_v3 = vld [vmem:[%s900_s26] sm:$0xff]   ;;  %v830_v6 = vld [vmem:[%s900_s26 + $0x8] sm:$0xff]   ;;  %v832_v8 = vld [vmem:[%s900_s26 + $0x10] sm:$0xff]   ;;  %s951_s9 = scalar_lea.vmem %s1086_s4, %s751_s6 }
  0x11   : > { %v829_v5 = vld [vmem:[%s900_s26 + $0x40] sm:$0xff]   ;;  %777 = vmatprep.mubr.msk.bf16.mxu0 %vm352_vm1, %v828_v3  ;;  %v831_v7 = vld [vmem:[%s900_s26 + $0x48] sm:$0xff]   ;;  %v833_v9 = vld [vmem:[%s900_s26 + $0x50] sm:$0xff]  }
  0x12   : > { %793 = vmatprep.mubr.msk.bf16.mxu1 %vm352_vm1, %v829_v5  ;;  %778 = vmatmul.mubr.msk.bf16.vlgmr.msra.gmra.mrb[0].mxu0 %vm352_vm1, %v830_v6  ;;  %v834_v10 = vld [vmem:[%s900_s26 + $0x18] sm:$0xff]   ;;  %v836_v12 = vld [vmem:[%s900_s26 + $0x20] sm:$0xff]   ;;  %v838_v14 = vld [vmem:[%s900_s26 + $0x28] sm:$0xff]  }
  0x13   : > { %794 = vmatmul.mubr.msk.bf16.vlgmr.msra.gmra.mrb[0].mxu1 %vm352_vm1, %v831_v7  ;;  %781 = vmatprep.mubr.msk.bf16.mxu0 %vm352_vm1, %v832_v8  ;;  %v835_v11 = vld [vmem:[%s900_s26 + $0x58] sm:$0xff]   ;;  %v837_v13 = vld [vmem:[%s900_s26 + $0x60] sm:$0xff]   ;;  %v839_v15 = vld [vmem:[%s900_s26 + $0x68] sm:$0xff]  }
  0x14   : > { %797 = vmatprep.mubr.msk.bf16.mxu1 %vm352_vm1, %v833_v9  ;;  %v840_v16 = vld [vmem:[%s900_s26 + $0x30] sm:$0xff]   ;;  %v842_v18 = vld [vmem:[%s900_s26 + $0x38] sm:$0xff]  }
  0x15   : > { %v841_v17 = vld [vmem:[%s900_s26 + $0x70] sm:$0xff]   ;;  %v843_v19 = vld [vmem:[%s900_s26 + $0x78] sm:$0xff]  }
  0x1a   : > { %782 = vmatmul.mubr.msk.bf16.gmra.mrb[4].mxu0 %vm352_vm1, %v834_v10 }
  0x1b   : > { %798 = vmatmul.mubr.msk.bf16.gmra.mrb[4].mxu1 %vm352_vm1, %v835_v11  ;;  %785 = vmatprep.mubr.msk.bf16.mxu0 %vm352_vm1, %v836_v12 }
  0x1c   : > { %801 = vmatprep.mubr.msk.bf16.mxu1 %vm352_vm1, %v837_v13 }
  0x22   : > { %786 = vmatmul.mubr.msk.bf16.gmra.mrb[8].mxu0 %vm352_vm1, %v838_v14 }
  0x23   : > { %802 = vmatmul.mubr.msk.bf16.gmra.mrb[8].mxu1 %vm352_vm1, %v839_v15  ;;  %789 = vmatprep.mubr.msk.bf16.mxu0 %vm352_vm1, %v840_v16 }
  0x24   : > { %805 = vmatprep.mubr.msk.bf16.mxu1 %vm352_vm1, %v841_v17 }
  0x2a   : > { %790 = vmatmul.mubr.msk.bf16.gmra.mrb[12].mxu0 %vm352_vm1, %v842_v18 }
  0x2b   : > { %806 = vmatmul.mubr.msk.bf16.gmra.mrb[12].mxu1 %vm352_vm1, %v843_v19 }
  0xe5   : > { %v779_v21 = vpop.f32.mrb[0].mxu0 }
  0xe6   : > { %v795_v23 = vpop.f32.mrb[0].mxu1  ;;  %v448_v24 = vadd.f32 %v779_v21, %v941_v20  ;;  %v439_v26 = vpop.f32.mrb[1].mxu0 }
  0xe7   : > { %v512_v25 = vadd.f32 %v795_v23, %v941_v20  ;;  %v503_v27 = vpop.f32.mrb[1].mxu1  ;;  %v440_v28 = vadd.f32 %v941_v20, %v439_v26  ;;  %v780_v30 = vpop.f32.mrb[2].mxu0 }
  0xe8   : > { %v504_v29 = vadd.f32 %v941_v20, %v503_v27  ;;  %v796_v31 = vpop.f32.mrb[2].mxu1  ;;  %v575_v32 = vadd.f32 %v944_v22, %v448_v24  ;;  %v451_v34 = vadd.f32 %v780_v30, %v941_v20  ;;  %v442_v36 = vpop.f32.mrb[3].mxu0 }
  0xe9   : > { %v591_v33 = vadd.f32 %v944_v22, %v512_v25  ;;  %v515_v35 = vadd.f32 %v796_v31, %v941_v20  ;;  %v506_v37 = vpop.f32.mrb[3].mxu1  ;;  %v573_v38 = vadd.f32 %v944_v22, %v440_v28  ;;  %v443_v40 = vadd.f32 %v941_v20, %v442_v36 }
  0xea   : > { %v589_v39 = vadd.f32 %v944_v22, %v504_v29  ;;  %v507_v41 = vadd.f32 %v941_v20, %v506_v37  ;;  %608 = vst.msk [vmem:[%s951_s9 + $0x10] sm:$0xff] %vm605_vm2, %v575_v32  ;;  %v576_v42 = vadd.f32 %v944_v22, %v451_v34 }
  0xeb   : > { %624 = vst.msk [vmem:[%s951_s9 + $0x90] sm:$0xff] %vm605_vm2, %v591_v33  ;;  %v592_v43 = vadd.f32 %v944_v22, %v515_v35  ;;  %606 = vst.msk [vmem:[%s951_s9] sm:$0xff] %vm605_vm2, %v573_v38  ;;  %v574_v44 = vadd.f32 %v944_v22, %v443_v40 }
  0xec   : > { %622 = vst.msk [vmem:[%s951_s9 + $0x80] sm:$0xff] %vm605_vm2, %v589_v39  ;;  %v590_v45 = vadd.f32 %v944_v22, %v507_v41  ;;  %609 = vst.msk [vmem:[%s951_s9 + $0x18] sm:$0xff] %vm605_vm2, %v576_v42 }
  0xed   : > { %625 = vst.msk [vmem:[%s951_s9 + $0x98] sm:$0xff] %vm605_vm2, %v592_v43  ;;  %607 = vst.msk [vmem:[%s951_s9 + $0x8] sm:$0xff] %vm605_vm2, %v574_v44  ;;  %v783_v46 = vpop.f32.mrb[4].mxu0 }
  0xee   : > { %623 = vst.msk [vmem:[%s951_s9 + $0x88] sm:$0xff] %vm605_vm2, %v590_v45  ;;  %v799_v47 = vpop.f32.mrb[4].mxu1  ;;  %v464_v48 = vadd.f32 %v783_v46, %v941_v20  ;;  %v455_v50 = vpop.f32.mrb[5].mxu0 }
  0xef   : > { %v528_v49 = vadd.f32 %v799_v47, %v941_v20  ;;  %v519_v51 = vpop.f32.mrb[5].mxu1  ;;  %v456_v52 = vadd.f32 %v941_v20, %v455_v50  ;;  %v784_v54 = vpop.f32.mrb[6].mxu0 }
  0xf0   : > { %v520_v53 = vadd.f32 %v941_v20, %v519_v51  ;;  %v800_v55 = vpop.f32.mrb[6].mxu1  ;;  %v579_v56 = vadd.f32 %v944_v22, %v464_v48  ;;  %v467_v58 = vadd.f32 %v784_v54, %v941_v20  ;;  %v458_v60 = vpop.f32.mrb[7].mxu0 }
  0xf1   : > { %v595_v57 = vadd.f32 %v944_v22, %v528_v49  ;;  %v531_v59 = vadd.f32 %v800_v55, %v941_v20  ;;  %v522_v61 = vpop.f32.mrb[7].mxu1  ;;  %v577_v62 = vadd.f32 %v944_v22, %v456_v52  ;;  %v459_v0 = vadd.f32 %v941_v20, %v458_v60 }
  0xf2   : > { %v593_v63 = vadd.f32 %v944_v22, %v520_v53  ;;  %v523_v1 = vadd.f32 %v941_v20, %v522_v61  ;;  %612 = vst.msk [vmem:[%s951_s9 + $0x30] sm:$0xff] %vm605_vm2, %v579_v56  ;;  %v580_v2 = vadd.f32 %v944_v22, %v467_v58 }
  0xf3   : > { %628 = vst.msk [vmem:[%s951_s9 + $0xb0] sm:$0xff] %vm605_vm2, %v595_v57  ;;  %v596_v3 = vadd.f32 %v944_v22, %v531_v59  ;;  %610 = vst.msk [vmem:[%s951_s9 + $0x20] sm:$0xff] %vm605_vm2, %v577_v62  ;;  %v578_v4 = vadd.f32 %v944_v22, %v459_v0 }
  0xf4   : > { %626 = vst.msk [vmem:[%s951_s9 + $0xa0] sm:$0xff] %vm605_vm2, %v593_v63  ;;  %v594_v5 = vadd.f32 %v944_v22, %v523_v1  ;;  %613 = vst.msk [vmem:[%s951_s9 + $0x38] sm:$0xff] %vm605_vm2, %v580_v2 }
  0xf5   : > { %629 = vst.msk [vmem:[%s951_s9 + $0xb8] sm:$0xff] %vm605_vm2, %v596_v3  ;;  %611 = vst.msk [vmem:[%s951_s9 + $0x28] sm:$0xff] %vm605_vm2, %v578_v4  ;;  %v787_v6 = vpop.f32.mrb[8].mxu0 }
  0xf6   : > { %627 = vst.msk [vmem:[%s951_s9 + $0xa8] sm:$0xff] %vm605_vm2, %v594_v5  ;;  %v803_v7 = vpop.f32.mrb[8].mxu1  ;;  %v480_v8 = vadd.f32 %v787_v6, %v941_v20  ;;  %v471_v10 = vpop.f32.mrb[9].mxu0 }
  0xf7   : > { %v544_v9 = vadd.f32 %v803_v7, %v941_v20  ;;  %v535_v11 = vpop.f32.mrb[9].mxu1  ;;  %v472_v12 = vadd.f32 %v941_v20, %v471_v10  ;;  %v788_v14 = vpop.f32.mrb[10].mxu0 }
  0xf8   : > { %v536_v13 = vadd.f32 %v941_v20, %v535_v11  ;;  %v804_v15 = vpop.f32.mrb[10].mxu1  ;;  %v583_v16 = vadd.f32 %v944_v22, %v480_v8  ;;  %v483_v18 = vadd.f32 %v788_v14, %v941_v20  ;;  %v474_v21 = vpop.f32.mrb[11].mxu0 }
  0xf9   : > { %v599_v17 = vadd.f32 %v944_v22, %v544_v9  ;;  %v547_v19 = vadd.f32 %v804_v15, %v941_v20  ;;  %v538_v23 = vpop.f32.mrb[11].mxu1  ;;  %v581_v24 = vadd.f32 %v944_v22, %v472_v12  ;;  %v475_v26 = vadd.f32 %v941_v20, %v474_v21 }
  0xfa   : > { %v597_v25 = vadd.f32 %v944_v22, %v536_v13  ;;  %v539_v27 = vadd.f32 %v941_v20, %v538_v23  ;;  %616 = vst.msk [vmem:[%s951_s9 + $0x50] sm:$0xff] %vm605_vm2, %v583_v16  ;;  %v584_v28 = vadd.f32 %v944_v22, %v483_v18 }
  0xfb   : > { %632 = vst.msk [vmem:[%s951_s9 + $0xd0] sm:$0xff] %vm605_vm2, %v599_v17  ;;  %v600_v29 = vadd.f32 %v944_v22, %v547_v19  ;;  %614 = vst.msk [vmem:[%s951_s9 + $0x40] sm:$0xff] %vm605_vm2, %v581_v24  ;;  %v582_v30 = vadd.f32 %v944_v22, %v475_v26 }
  0xfc   : > { %630 = vst.msk [vmem:[%s951_s9 + $0xc0] sm:$0xff] %vm605_vm2, %v597_v25  ;;  %v598_v31 = vadd.f32 %v944_v22, %v539_v27  ;;  %617 = vst.msk [vmem:[%s951_s9 + $0x58] sm:$0xff] %vm605_vm2, %v584_v28 }
  0xfd   : > { %633 = vst.msk [vmem:[%s951_s9 + $0xd8] sm:$0xff] %vm605_vm2, %v600_v29  ;;  %615 = vst.msk [vmem:[%s951_s9 + $0x48] sm:$0xff] %vm605_vm2, %v582_v30  ;;  %v791_v32 = vpop.f32.mrb[12].mxu0 }
  0xfe   : > { %631 = vst.msk [vmem:[%s951_s9 + $0xc8] sm:$0xff] %vm605_vm2, %v598_v31  ;;  %v807_v33 = vpop.f32.mrb[12].mxu1  ;;  %v496_v34 = vadd.f32 %v791_v32, %v941_v20  ;;  %v487_v36 = vpop.f32.mrb[13].mxu0 }
  0xff   : > { %v560_v35 = vadd.f32 %v807_v33, %v941_v20  ;;  %v551_v37 = vpop.f32.mrb[13].mxu1  ;;  %v488_v38 = vadd.f32 %v941_v20, %v487_v36  ;;  %v792_v40 = vpop.f32.mrb[14].mxu0 }
 0x100   : > { %v552_v39 = vadd.f32 %v941_v20, %v551_v37  ;;  %v808_v41 = vpop.f32.mrb[14].mxu1  ;;  %v587_v42 = vadd.f32 %v944_v22, %v496_v34  ;;  %v499_v44 = vadd.f32 %v792_v40, %v941_v20  ;;  %v490_v46 = vpop.f32.mrb[15].mxu0 }
 0x101   : > { %v603_v43 = vadd.f32 %v944_v22, %v560_v35  ;;  %v563_v45 = vadd.f32 %v808_v41, %v941_v20  ;;  %v554_v47 = vpop.f32.mrb[15].mxu1  ;;  %v585_v48 = vadd.f32 %v944_v22, %v488_v38  ;;  %v491_v50 = vadd.f32 %v941_v20, %v490_v46 }
 0x102   : > { %v601_v49 = vadd.f32 %v944_v22, %v552_v39  ;;  %v555_v51 = vadd.f32 %v941_v20, %v554_v47  ;;  %620 = vst.msk [vmem:[%s951_s9 + $0x70] sm:$0xff] %vm605_vm2, %v587_v42  ;;  %v588_v52 = vadd.f32 %v944_v22, %v499_v44 }
 0x103   : > { %636 = vst.msk [vmem:[%s951_s9 + $0xf0] sm:$0xff] %vm605_vm2, %v603_v43  ;;  %v604_v53 = vadd.f32 %v944_v22, %v563_v45  ;;  %618 = vst.msk [vmem:[%s951_s9 + $0x60] sm:$0xff] %vm605_vm2, %v585_v48  ;;  %v586_v54 = vadd.f32 %v944_v22, %v491_v50 }
 0x104   : > { %634 = vst.msk [vmem:[%s951_s9 + $0xe0] sm:$0xff] %vm605_vm2, %v601_v49  ;;  %v602_v55 = vadd.f32 %v944_v22, %v555_v51  ;;  %621 = vst.msk [vmem:[%s951_s9 + $0x78] sm:$0xff] %vm605_vm2, %v588_v52 }
 0x105   : > { %637 = vst.msk [vmem:[%s951_s9 + $0xf8] sm:$0xff] %vm605_vm2, %v604_v53  ;;  %619 = vst.msk [vmem:[%s951_s9 + $0x68] sm:$0xff] %vm605_vm2, %v586_v54 }
 0x106   : > { %635 = vst.msk [vmem:[%s951_s9 + $0xe8] sm:$0xff] %vm605_vm2, %v602_v55 }
 0x107 PF: > { %s14_s15 = sadd.s32 1, %s850_s15  }
 0x108   : > { %p11_p4 = scmp.ge.s32.totalorder %s14_s15, 4  }
 0x10a   :  { %13 = sbr.rel (!%p11_p4) target bundleno = 1 (0x1), region = 69 }

// kernel: _fwd.36
= control target key start
LH: loop header
LB: loop body
LE: loop exit
PB: predicated region body
PF: predicated region fallthrough
CT: control target
= control target key end

     0   :  { %v198_v0 = vmov 0.0   ;;  %vm199_vm0 = vmmov 0   ;;  %vm37_vm1 = vcmask 130048   ;;  %vm112_vm2 = vcmask 261120   ;;  %s251_s1 = inlined_call_operand.vmem [shape: bf16[16,32], index: 1, kind: input, shape index: {}]   ;;  %s252_s0 = inlined_call_operand.vmem [shape: bf16[2,16], index: 0, kind: input, shape index: {}]   ;;  %s253_s3 = inlined_call_operand.vmem [shape: bf16[32,32], index: 3, kind: input, shape index: {}]   ;;  %s254_s2 = inlined_call_operand.vmem [shape: f32[1,32], index: 2, kind: input, shape index: {}, may-alias: {2,4}]   ;;  %s255_s4 = inlined_call_operand.vmem [shape: f32[1,32], index: 4, kind: input, shape index: {}, may-alias: {2,4}]   ;;  %s256_s5 = inlined_call_operand.vmem [shape: f32[2,32], index: 5, kind: output, shape index: {}]  }
   0x1   :  { %175 = vmatprep.subr.bf16.mxu0 %v198_v0  ;;  %v191_v1 = vld [vmem:[%s251_s1] sm:$0xff]   ;;  %177 = vmatprep.mubr.msk.bf16.mxu0 %vm199_vm0, %v198_v0  ;;  %v193_v4 = vld [vmem:[%s253_s3 + $0x8] sm:$0xff]   ;;  %vm156_vm3 = vcmask 254976  }
   0x2   :  { %181 = vmatprep.subr.bf16.mxu1 %v198_v0  ;;  %185 = vmatprep.mubr.msk.bf16.mxu1 %vm199_vm0, %v198_v0  ;;  %v21_v2 = vld [vmem:[%s252_s0] sm:$0x1] }
   0x3   :  { %176 = vmatpush3.bf16.msra.mxu0 %v191_v1  ;;  %v192_v3 = vld [vmem:[%s253_s3] sm:$0xff]  }
   0x4   :  { %182 = vmatpush3.bf16.msra.mxu1 %v192_v3  ;;  %v162_v5 = vld [vmem:[%s254_s2] ss:$0 sm:$0xff] }
   0x5   :  { %183 = vmatprep.subr.bf16.mxu1 %v198_v0  ;;  %v166_v17 = vld [vmem:[%s255_s4] ss:$0 sm:$0xff] }
   0x6   :  { %178 = vmatmul.mubr.msk.bf16.vlgmr.msra.gmra.mrb[0].mxu0 %vm37_vm1, %v21_v2 }
   0x8   :  { %184 = vmatpush3.bf16.msra.mxu1 %v193_v4 }
  0xd9   :  { %v75_v6 = vpop.f32.mrb[0].mxu0 }
  0xda   :  { %v76_v7 = vadd.f32 %v162_v5, %v75_v6  ;;  %v179_v8 = vpop.f32.mrb[1].mxu0 }
  0xdb   :  { %v78_v9 = vpop.f32.mrb[2].mxu0 }
  0xdc   :  { %v165_v10 = vmul.f32 -1.442695, %v76_v7  ;;  %v180_v11 = vpop.f32.mrb[3].mxu0 }
  0xde   :  { %194 = vpow2.f32 %v165_v10 }
  0xe8   :  { %v195_v12 = vpop.eup %194 }
  0xe9   :  { %v84_v13 = vadd.f32 1.0, %v195_v12 }
  0xeb   :  { %196 = vrcp.f32 %v84_v13 }
  0xf5   :  { %v197_v14 = vpop.eup %196 }
  0xf6   :  { %v87_v15 = vmul.f32 %v197_v14, %v76_v7 }
  0xf8   :  { %v88_v16 = vpack.c.bf16 %v87_v15, %v87_v15 }
  0xfa   :  { %186 = vmatmul.mubr.msk.bf16.vlgmr.msra.gmra.mrb[0].mxu1 %vm112_vm2, %v88_v16 }
 0x1cd   :  { %v150_v18 = vpop.f32.mrb[0].mxu1 }
 0x1ce   :  { %v151_v19 = vadd.f32 %v166_v17, %v150_v18  ;;  %v187_v20 = vpop.f32.mrb[1].mxu1 }
 0x1cf   :  { %v153_v21 = vpop.f32.mrb[2].mxu1 }
 0x1d0   :  { %157 = vst.msk [vmem:[%s256_s5] sm:$0x3] %vm156_vm3, %v151_v19  ;;  %v188_v22 = vpop.f32.mrb[3].mxu1 }

// kernel: _fwd.37
= control target key start
LH: loop header
LB: loop body
LE: loop exit
PB: predicated region body
PF: predicated region fallthrough
CT: control target
= control target key end

     0   :  { %v223_v1 = vmov 0   ;;  %vm86_vm0 = vcmask 261120   ;;  %v26_v10 = vlaneseq  ;;  %v224_v16 = vmov 1983009808   ;;  %s278_s1 = inlined_call_operand.vmem [shape: bf16[32,512], index: 1, kind: input, shape index: {}]   ;;  %s279_s0 = inlined_call_operand.vmem [shape: bf16[2,32], index: 0, kind: input, shape index: {}]   ;;  %s280_s2 = inlined_call_operand.vmem [shape: f32[1,512], index: 2, kind: input, shape index: {}]   ;;  %s281_s3 = inlined_call_operand.vmem [shape: f32[2,512], index: 3, kind: output, shape index: {}]  }
   0x1   :  { %v211_v0 = vld [vmem:[%s278_s1 + $0x4] ss:$16 sps:$4 sm:$0xff]   ;;  %122 = vmatprep.mubr.bf16.mxu0 %v223_v1  ;;  %163 = vmatprep.mubr.bf16.mxu1 %v223_v1  ;;  %v213_v2 = vld [vmem:[%s278_s1 + $0xc] ss:$16 sps:$4 sm:$0xff]   ;;  %v215_v3 = vld [vmem:[%s278_s1] ss:$16 sps:$4 sm:$0xff]   ;;  %v179_v17 = vunpack.c.l.s4 %v224_v16 }
   0x2   :  { %90 = vmatprep.subr.bf16.mxu0 %v211_v0  ;;  %v216_v4 = vld [vmem:[%s278_s1 + $0x8] ss:$16 sps:$4 sm:$0xff]   ;;  %131 = vmatprep.subr.bf16.mxu1 %v213_v2  ;;  %v217_v5 = vld [vmem:[%s278_s1 + $0x24] ss:$16 sps:$4 sm:$0xff]   ;;  %v219_v6 = vld [vmem:[%s278_s1 + $0x2c] ss:$16 sps:$4 sm:$0xff]  }
   0x3   :  { %91 = vmatpush1.bf16.msra.mxu0 %v215_v3  ;;  %132 = vmatpush1.bf16.msra.mxu1 %v216_v4  ;;  %v221_v7 = vld [vmem:[%s278_s1 + $0x20] ss:$16 sps:$4 sm:$0xff]   ;;  %v222_v8 = vld [vmem:[%s278_s1 + $0x28] ss:$16 sps:$4 sm:$0xff]   ;;  %v27_v11 = vshrl.u32 %v26_v10, 7  ;;  %v180_v22 = vunpack.c.0.s8 %v179_v17 }
   0x4   :  { %92 = vmatprep.subr.bf16.mxu0 %v217_v5  ;;  %133 = vmatprep.subr.bf16.mxu1 %v219_v6  ;;  %v15_v9 = vld [vmem:[%s279_s0] sm:$0x1] }
   0x5   :  { %v28_v12 = vsub.s32 0, %v27_v11  ;;  %v36_v13 = vsub.s32 2, %v27_v11  ;;  %v24_v14 = vld [vmem:[%s280_s2] sm:$0xf]  ;;  %v32_v15 = vsub.s32 1, %v27_v11  ;;  %v40_v18 = vsub.s32 3, %v27_v11 }
   0x6   :  { %v183_v31 = vsub.s32 %v180_v22, %v27_v11 }
   0x7   :  { %93 = vmatpush1.bf16.msra.mxu0 %v221_v7  ;;  %134 = vmatpush1.bf16.msra.mxu1 %v222_v8  ;;  %v29_v19 = vrot.slane %v24_v14, %v28_v12  ;;  %v37_v20 = vrot.slane %v24_v14, %v36_v13  ;;  %v33_v21 = vrot.slane %v24_v14, %v32_v15 }
   0x8   :  { %v41_v23 = vrot.slane %v24_v14, %v40_v18 }
   0xa   :  { %207 = vmatmul.mubr.msk.bf16.vlgmr.msra.gmra.mrb[0].mxu0 %vm86_vm0, %v15_v9  ;;  %208 = vmatmul.mubr.msk.bf16.vlgmr.msra.gmra.mrb[0].mxu1 %vm86_vm0, %v15_v9 }
  0xdd   :  { %v124_v24 = vpop.f32.mrb[0].mxu0  ;;  %v165_v25 = vpop.f32.mrb[0].mxu1 }
  0xde   :  { %v125_v26 = vadd.f32 %v124_v24, %v29_v19  ;;  %v166_v27 = vadd.f32 %v165_v25, %v37_v20  ;;  %v126_v28 = vpop.f32.mrb[1].mxu0  ;;  %v167_v29 = vpop.f32.mrb[1].mxu1 }
  0xdf   :  { %v127_v30 = vadd.f32 %v126_v28, %v33_v21  ;;  %v168_v32 = vadd.f32 %v167_v29, %v41_v23  ;;  %v128_v33 = vpop.f32.mrb[2].mxu0  ;;  %v169_v34 = vpop.f32.mrb[2].mxu1 }
  0xe0   :  { %v129_v35 = vpop.f32.mrb[3].mxu0  ;;  %v170_v36 = vpop.f32.mrb[3].mxu1 }
  0xe1   :  { %v176_v37 = vcombine.low %v125_v26, %v127_v30  ;;  %v177_v38 = vcombine.low %v166_v27, %v168_v32 }
  0xe3   :  { %v184_v39 = vrot.slane %v176_v37, %v183_v31  ;;  %v191_v40 = vrot.slane %v177_v38, %v183_v31 }
  0xe5   :  { %v192_v41 = vcombine.low %v184_v39, %v191_v40 }
  0xe7   :  { %194 = vst [vmem:[%s281_s3] sm:$0xff] %v192_v41 }

// kernel: _fwd.39
= control target key start
LH: loop header
LB: loop body
LE: loop exit
PB: predicated region body
PF: predicated region fallthrough
CT: control target
= control target key end

     0   :  { %s1291_s15 = smov 0   ;;  %s1639_s0 = inlined_call_operand.vmem [shape: bf16[2,256,72], index: 0, kind: input, shape index: {}]   ;;  %s1640_s1 = inlined_call_operand.vmem [shape: bf16[72,8], index: 1, kind: input, shape index: {}]   ;;  %s1641_s2 = inlined_call_operand.vmem [shape: f32[1,1,8], index: 2, kind: input, shape index: {}]   ;;  %s1642_s3 = inlined_call_operand.vmem [shape: f32[2,1,8], index: 3, kind: input, shape index: {}]   ;;  %s1643_s4 = inlined_call_operand.vmem [shape: f32[2,256,8], index: 4, kind: output, shape index: {}]  }
   0x1 LB: > { %s942_s16 = sadd.s32 4294967295, %s1264_s15   ;;  %p946_p0 = scmp.ge.s32.totalorder %s1264_s15, 1  ;;  %s1264_s15 = sphi %s1291_s15, %s14_s15  }
   0x2   : > { %p170_p1 = scmp.lt.s32.totalorder %s1264_s15, 3 }
   0x4   : > { %p171_p2 = pnand %p946_p0, %p170_p1 }
   0x5   : > { %v1109_v0 = vld [vmem:[%s1640_s1] sm:$0xff] (!%p171_p2)   ;;  %v1110_v1 = vld [vmem:[%s1640_s1 + $0x8] sm:$0xff] (!%p171_p2)   ;;  %p199_p3 = scmp.lt.s32.totalorder (!%p171_p2), %s942_s16, 1  ;;  %v1111_v2 = vld [vmem:[%s1640_s1 + $0x10] sm:$0xff] (!%p171_p2)   ;;  %vm368_vm0 = vcmask (!%p171_p2), 588800   ;;  %vm417_vm1 = vcmask (!%p171_p2), 1043456  }
   0x6   : > { %174 = sbr.rel (%p171_p2) target bundleno = 330 (0x14a), region = 36  ;;  %1047 = vmatprep.subr.bf16.mxu0 (!%p171_p2), %v1109_v0  ;;  %1089 = vmatprep.subr.bf16.mxu1 (!%p171_p2), %v1109_v0  ;;  %v1112_v3 = vld [vmem:[%s1640_s1 + $0x18] sm:$0xff] (!%p171_p2)   ;;  %v1113_v6 = vld [vmem:[%s1640_s1 + $0x20] ss:$0 sps:$4 sm:$0xff] (!%p171_p2)   ;;  %vm845_vm2 = vcmask (!%p171_p2), 64512  }
   0x7   : > { %1048 = vmatpush3.bf16.msra.mxu0 (!%p171_p2), %v1109_v0  ;;  %1094 = vmatpush3.bf16.msra.mxu1 (!%p171_p2), %v1109_v0  ;;  %v419_v7 = vsel (!%p171_p2), %vm417_vm1, %v1113_v6, 0  ;;  %v1361_v22 = vld [vmem:[%s1641_s2] ss:$0 sm:$0xff] (!%p171_p2) }
   0x8   : > { %1049 = vmatprep.subr.bf16.mxu0 (!%p171_p2), %v1110_v1  ;;  %1090 = vmatprep.subr.bf16.mxu1 (!%p171_p2), %v1110_v1 }
   0xb   : > { %1050 = vmatpush3.bf16.msra.mxu0 (!%p171_p2), %v1110_v1  ;;  %1095 = vmatpush3.bf16.msra.mxu1 (!%p171_p2), %v1110_v1 }
   0xc   : > { %1051 = vmatprep.subr.bf16.mxu0 (!%p171_p2), %v1111_v2  ;;  %1091 = vmatprep.subr.bf16.mxu1 (!%p171_p2), %v1111_v2 }
   0xd   : > { %s1645_s16 = smov (!%p199_p3, %s942_s16), 1 }
   0xe   : > { %s1024_s23 = sshll.u32 %s1645_s16, 7  ;;  %s206_s7 = scalar_lea.vmem %s1642_s3, %s1645_s16 }
   0xf   : > { %s1317_s28 = scalar_lea.vmem %s1639_s0, %s1024_s23  ;;  %1052 = vmatpush3.bf16.msra.mxu0 %v1111_v2  ;;  %1096 = vmatpush3.bf16.msra.mxu1 %v1111_v2  ;;  %v1363_v24 = vld [vmem:[%s206_s7] ss:$0 sm:$0xff]  ;;  %s1025_s10 = sshll.u32 %s1645_s16, 8 }
  0x10   : > { %v1114_v4 = vld [vmem:[%s1317_s28] sm:$0xff]   ;;  %1053 = vmatprep.subr.bf16.mxu0 %v1112_v3  ;;  %1092 = vmatprep.subr.bf16.mxu1 %v1112_v3  ;;  %v1116_v8 = vld [vmem:[%s1317_s28 + $0x8] sm:$0xff]   ;;  %v1118_v10 = vld [vmem:[%s1317_s28 + $0x10] sm:$0xff]   ;;  %s1490_s13 = scalar_lea.vmem %s1643_s4, %s1025_s10 }
  0x11   : > { %v1115_v5 = vld [vmem:[%s1317_s28 + $0x40] sm:$0xff]   ;;  %1057 = vmatprep.mubr.msk.bf16.mxu0 %vm368_vm0, %v1114_v4  ;;  %v1117_v9 = vld [vmem:[%s1317_s28 + $0x48] sm:$0xff]   ;;  %v1119_v11 = vld [vmem:[%s1317_s28 + $0x50] sm:$0xff]  }
  0x12   : > { %1073 = vmatprep.mubr.msk.bf16.mxu1 %vm368_vm0, %v1115_v5  ;;  %v1120_v12 = vld [vmem:[%s1317_s28 + $0x18] sm:$0xff]   ;;  %v1122_v14 = vld [vmem:[%s1317_s28 + $0x20] sm:$0xff]   ;;  %v1124_v16 = vld [vmem:[%s1317_s28 + $0x28] sm:$0xff]  }
  0x13   : > { %1054 = vmatpush3.bf16.msra.mxu0 %v1112_v3  ;;  %1097 = vmatpush3.bf16.msra.mxu1 %v1112_v3  ;;  %v1121_v13 = vld [vmem:[%s1317_s28 + $0x58] sm:$0xff]   ;;  %v1123_v15 = vld [vmem:[%s1317_s28 + $0x60] sm:$0xff]   ;;  %v1125_v17 = vld [vmem:[%s1317_s28 + $0x68] sm:$0xff]  }
  0x14   : > { %1099 = vmatprep.subr.msk.bf16.mxu0 %vm417_vm1, %v1113_v6  ;;  %1100 = vmatprep.subr.msk.bf16.mxu1 %vm417_vm1, %v1113_v6  ;;  %v1126_v18 = vld [vmem:[%s1317_s28 + $0x30] sm:$0xff]   ;;  %v1128_v20 = vld [vmem:[%s1317_s28 + $0x38] sm:$0xff]  }
  0x15   : > { %v1127_v19 = vld [vmem:[%s1317_s28 + $0x70] sm:$0xff]   ;;  %v1129_v21 = vld [vmem:[%s1317_s28 + $0x78] sm:$0xff]  }
  0x17   : > { %1056 = vmatpush3.bf16.msra.mxu0 %v419_v7  ;;  %1098 = vmatpush3.bf16.msra.mxu1 %v419_v7 }
  0x1a   : > { %1058 = vmatmul.mubr.msk.bf16.vlgmr.msra.gmra.mrb[0].mxu0 %vm368_vm0, %v1116_v8  ;;  %1074 = vmatmul.mubr.msk.bf16.vlgmr.msra.gmra.mrb[0].mxu1 %vm368_vm0, %v1117_v9 }
  0x1b   : > { %1061 = vmatprep.mubr.msk.bf16.mxu0 %vm368_vm0, %v1118_v10  ;;  %1077 = vmatprep.mubr.msk.bf16.mxu1 %vm368_vm0, %v1119_v11 }
  0x22   : > { %1062 = vmatmul.mubr.msk.bf16.gmra.mrb[4].mxu0 %vm368_vm0, %v1120_v12  ;;  %1078 = vmatmul.mubr.msk.bf16.gmra.mrb[4].mxu1 %vm368_vm0, %v1121_v13 }
  0x23   : > { %1065 = vmatprep.mubr.msk.bf16.mxu0 %vm368_vm0, %v1122_v14  ;;  %1081 = vmatprep.mubr.msk.bf16.mxu1 %vm368_vm0, %v1123_v15 }
  0x2a   : > { %1066 = vmatmul.mubr.msk.bf16.gmra.mrb[8].mxu0 %vm368_vm0, %v1124_v16  ;;  %1082 = vmatmul.mubr.msk.bf16.gmra.mrb[8].mxu1 %vm368_vm0, %v1125_v17 }
  0x2b   : > { %1069 = vmatprep.mubr.msk.bf16.mxu0 %vm368_vm0, %v1126_v18  ;;  %1085 = vmatprep.mubr.msk.bf16.mxu1 %vm368_vm0, %v1127_v19 }
  0x32   : > { %1070 = vmatmul.mubr.msk.bf16.gmra.mrb[12].mxu0 %vm368_vm0, %v1128_v20  ;;  %1086 = vmatmul.mubr.msk.bf16.gmra.mrb[12].mxu1 %vm368_vm0, %v1129_v21 }
  0xed   : > { %v1059_v23 = vpop.f32.mrb[0].mxu0  ;;  %v1075_v25 = vpop.f32.mrb[0].mxu1 }
  0xee   : > { %v464_v26 = vadd.f32 %v1059_v23, %v1361_v22  ;;  %v528_v27 = vadd.f32 %v1075_v25, %v1361_v22  ;;  %v455_v28 = vpop.f32.mrb[1].mxu0  ;;  %v519_v29 = vpop.f32.mrb[1].mxu1 }
  0xef   : > { %v456_v30 = vadd.f32 %v1361_v22, %v455_v28  ;;  %v520_v31 = vadd.f32 %v1361_v22, %v519_v29  ;;  %v1060_v32 = vpop.f32.mrb[2].mxu0  ;;  %v1076_v33 = vpop.f32.mrb[2].mxu1 }
  0xf0   : > { %v1370_v34 = vadd.f32 %v1363_v24, %v464_v26  ;;  %v1373_v35 = vadd.f32 %v1363_v24, %v528_v27  ;;  %v467_v36 = vadd.f32 %v1060_v32, %v1361_v22  ;;  %v531_v37 = vadd.f32 %v1076_v33, %v1361_v22  ;;  %v458_v38 = vpop.f32.mrb[3].mxu0  ;;  %v522_v39 = vpop.f32.mrb[3].mxu1 }
  0xf1   : > { %v1378_v40 = vadd.f32 %v1363_v24, %v456_v30  ;;  %v1381_v41 = vadd.f32 %v1363_v24, %v520_v31  ;;  %v459_v42 = vadd.f32 %v1361_v22, %v458_v38  ;;  %v523_v43 = vadd.f32 %v1361_v22, %v522_v39 }
  0xf2   : > { %v992_v44 = vmul.f32 -1.442695, %v1370_v34  ;;  %v1008_v45 = vmul.f32 -1.442695, %v1373_v35  ;;  %v1388_v46 = vadd.f32 %v1363_v24, %v467_v36  ;;  %v1391_v47 = vadd.f32 %v1363_v24, %v531_v37 }
  0xf3   : > { %v990_v48 = vmul.f32 -1.442695, %v1378_v40  ;;  %v1006_v49 = vmul.f32 -1.442695, %v1381_v41  ;;  %v1396_v50 = vadd.f32 %v1363_v24, %v459_v42  ;;  %v1399_v51 = vadd.f32 %v1363_v24, %v523_v43 }
  0xf4   : > { %1130 = vpow2.f32 %v992_v44  ;;  %v993_v52 = vmul.f32 -1.442695, %v1388_v46  ;;  %v1009_v53 = vmul.f32 -1.442695, %v1391_v47 }
  0xf5   : > { %1132 = vpow2.f32 %v1008_v45  ;;  %v1063_v54 = vpop.f32.mrb[4].mxu0  ;;  %v1079_v55 = vpop.f32.mrb[4].mxu1  ;;  %v991_v56 = vmul.f32 -1.442695, %v1396_v50  ;;  %v1007_v61 = vmul.f32 -1.442695, %v1399_v51 }
  0xf6   : > { %1134 = vpow2.f32 %v990_v48  ;;  %v480_v57 = vadd.f32 %v1063_v54, %v1361_v22  ;;  %v544_v58 = vadd.f32 %v1079_v55, %v1361_v22  ;;  %v471_v59 = vpop.f32.mrb[5].mxu0  ;;  %v535_v60 = vpop.f32.mrb[5].mxu1 }
  0xf7   : > { %1136 = vpow2.f32 %v1006_v49  ;;  %v472_v62 = vadd.f32 %v1361_v22, %v471_v59  ;;  %v536_v63 = vadd.f32 %v1361_v22, %v535_v60  ;;  %v1064_v0 = vpop.f32.mrb[6].mxu0  ;;  %v1080_v1 = vpop.f32.mrb[6].mxu1 }
  0xf8   : > { %1138 = vpow2.f32 %v993_v52  ;;  %v1410_v2 = vadd.f32 %v1363_v24, %v480_v57  ;;  %v1413_v3 = vadd.f32 %v1363_v24, %v544_v58  ;;  %v483_v4 = vadd.f32 %v1064_v0, %v1361_v22  ;;  %v474_v5 = vpop.f32.mrb[7].mxu0  ;;  %v538_v6 = vpop.f32.mrb[7].mxu1 }
  0xf9   : > { %1140 = vpow2.f32 %v1009_v53  ;;  %v1417_v7 = vadd.f32 %v1363_v24, %v472_v62  ;;  %v1420_v8 = vadd.f32 %v1363_v24, %v536_v63  ;;  %v547_v9 = vadd.f32 %v1080_v1, %v1361_v22 }
  0xfa   : > { %1142 = vpow2.f32 %v991_v56  ;;  %v996_v10 = vmul.f32 -1.442695, %v1410_v2  ;;  %v1012_v11 = vmul.f32 -1.442695, %v1413_v3  ;;  %v1426_v12 = vadd.f32 %v1363_v24, %v483_v4 }
  0xfb   : > { %1144 = vpow2.f32 %v1007_v61  ;;  %v994_v13 = vmul.f32 -1.442695, %v1417_v7  ;;  %v1010_v14 = vmul.f32 -1.442695, %v1420_v8  ;;  %v1431_v15 = vadd.f32 %v1363_v24, %v547_v9 }
  0xfc   : > { %1146 = vpow2.f32 %v996_v10  ;;  %v997_v16 = vmul.f32 -1.442695, %v1426_v12  ;;  %v475_v17 = vadd.f32 %v1361_v22, %v474_v5  ;;  %v539_v18 = vadd.f32 %v1361_v22, %v538_v6 }
  0xfd   : > { %1148 = vpow2.f32 %v1012_v11  ;;  %v1067_v19 = vpop.f32.mrb[8].mxu0  ;;  %v1083_v20 = vpop.f32.mrb[8].mxu1  ;;  %v1456_v57 = vmul.f32 -1.442695, %v1431_v15 }
  0xfe   : > { %v1131_v21 = vpop.eup %1130  ;;  %1150 = vpow2.f32 %v994_v13  ;;  %v1437_v23 = vadd.f32 %v1363_v24, %v475_v17  ;;  %v1440_v25 = vadd.f32 %v1363_v24, %v539_v18  ;;  %v496_v26 = vadd.f32 %v1067_v19, %v1361_v22  ;;  %v487_v27 = vpop.f32.mrb[9].mxu0 }
  0xff   : > { %v551_v28 = vpop.f32.mrb[9].mxu1  ;;  %v1133_v29 = vpop.eup %1132  ;;  %v719_v30 = vadd.f32 1.0, %v1131_v21  ;;  %1152 = vpow2.f32 %v1010_v14  ;;  %v560_v31 = vadd.f32 %v1083_v20, %v1361_v22  ;;  %v488_v32 = vadd.f32 %v1361_v22, %v487_v27 }
 0x100   : > { %v1068_v33 = vpop.f32.mrb[10].mxu0  ;;  %v1084_v36 = vpop.f32.mrb[10].mxu1  ;;  %v735_v38 = vadd.f32 1.0, %v1133_v29  ;;  %1154 = vpow2.f32 %v997_v16  ;;  %v1446_v44 = vadd.f32 %v1363_v24, %v496_v26  ;;  %v552_v54 = vadd.f32 %v1361_v22, %v551_v28 }
 0x101   : > { %v1135_v37 = vpop.eup %1134  ;;  %v490_v39 = vpop.f32.mrb[11].mxu0  ;;  %1156 = vrcp.f32 %v719_v30  ;;  %v1449_v45 = vadd.f32 %v1363_v24, %v560_v31  ;;  %v1452_v53 = vadd.f32 %v1363_v24, %v488_v32  ;;  %v1459_v60 = vmul.f32 -1.442695, %v1437_v23 }
 0x102   : > { %v1137_v42 = vpop.eup %1136  ;;  %v717_v43 = vadd.f32 1.0, %v1135_v37  ;;  %v554_v48 = vpop.f32.mrb[11].mxu1  ;;  %1158 = vrcp.f32 %v735_v38  ;;  %v1462_v61 = vadd.f32 %v1363_v24, %v552_v54  ;;  %v499_v0 = vadd.f32 %v1068_v33, %v1361_v22 }
 0x103   : > { %v1139_v49 = vpop.eup %1138  ;;  %v733_v52 = vadd.f32 1.0, %v1137_v42  ;;  %v563_v1 = vadd.f32 %v1084_v36, %v1361_v22  ;;  %v1011_v10 = vmul.f32 -1.442695, %v1440_v25  ;;  %v491_v11 = vadd.f32 %v1361_v22, %v490_v39 }
 0x104   : > { %v1141_v55 = vpop.eup %1140  ;;  %1160 = vrcp.f32 %v717_v43  ;;  %v720_v56 = vadd.f32 1.0, %v1139_v49  ;;  %v1469_v18 = vadd.f32 %v1363_v24, %v499_v0  ;;  %v555_v29 = vadd.f32 %v1361_v22, %v554_v48 }
 0x105   : > { %v1143_v58 = vpop.eup %1142  ;;  %1162 = vrcp.f32 %v733_v52  ;;  %v736_v59 = vadd.f32 1.0, %v1141_v55  ;;  %v1071_v4 = vpop.f32.mrb[12].mxu0  ;;  %v1472_v19 = vadd.f32 %v1363_v24, %v563_v1  ;;  %v1476_v28 = vadd.f32 %v1363_v24, %v491_v11 }
 0x106   : > { %v1145_v62 = vpop.eup %1144  ;;  %1164 = vrcp.f32 %v720_v56  ;;  %v718_v63 = vadd.f32 1.0, %v1143_v58  ;;  %v1087_v5 = vpop.f32.mrb[12].mxu1  ;;  %v1000_v36 = vmul.f32 -1.442695, %v1446_v44  ;;  %v1016_v37 = vmul.f32 -1.442695, %v1449_v45 }
 0x107   : > { %v1147_v6 = vpop.eup %1146  ;;  %1166 = vrcp.f32 %v736_v59  ;;  %v734_v9 = vadd.f32 1.0, %v1145_v62  ;;  %v503_v13 = vpop.f32.mrb[13].mxu0  ;;  %v998_v42 = vmul.f32 -1.442695, %v1452_v53  ;;  %v1485_v43 = vadd.f32 %v1363_v24, %v555_v29 }
 0x108   : > { %v567_v14 = vpop.f32.mrb[13].mxu1  ;;  %v1149_v16 = vpop.eup %1148  ;;  %1168 = vrcp.f32 %v718_v63  ;;  %v723_v17 = vadd.f32 1.0, %v1147_v6  ;;  %v512_v52 = vadd.f32 %v1071_v4, %v1361_v22  ;;  %v576_v54 = vadd.f32 %v1087_v5, %v1361_v22 }
 0x109   : > { %v1072_v20 = vpop.f32.mrb[14].mxu0  ;;  %v1088_v21 = vpop.f32.mrb[14].mxu1  ;;  %1170 = vrcp.f32 %v734_v9  ;;  %v739_v27 = vadd.f32 1.0, %v1149_v16  ;;  %v1014_v58 = vmul.f32 -1.442695, %v1462_v61  ;;  %v504_v59 = vadd.f32 %v1361_v22, %v503_v13 }
 0x10a   : > { %v1151_v26 = vpop.eup %1150  ;;  %v506_v30 = vpop.f32.mrb[15].mxu0  ;;  %1172 = vrcp.f32 %v723_v17  ;;  %v1499_v0 = vadd.f32 %v1363_v24, %v512_v52  ;;  %v1502_v1 = vadd.f32 %v1363_v24, %v576_v54  ;;  %v1001_v11 = vmul.f32 -1.442695, %v1469_v18 }
 0x10b   : > { %v1479_v31 = vpop.f32.mrb[15].mxu1  ;;  %v1153_v32 = vpop.eup %1152  ;;  %v721_v33 = vadd.f32 1.0, %v1151_v26  ;;  %1174 = vrcp.f32 %v739_v27  ;;  %v1509_v5 = vadd.f32 %v1363_v24, %v504_v59  ;;  %v515_v17 = vadd.f32 %v1072_v20, %v1361_v22 }
 0x10c   : > { %v1155_v38 = vpop.eup %1154  ;;  %v737_v39 = vadd.f32 1.0, %v1153_v32  ;;  %v579_v26 = vadd.f32 %v1088_v21, %v1361_v22  ;;  %v507_v29 = vadd.f32 %v1361_v22, %v506_v30 }
 0x10d   : > { %v1157_v49 = vpop.eup %1156  ;;  %1176 = vrcp.f32 %v721_v33  ;;  %v724_v48 = vadd.f32 1.0, %v1155_v38  ;;  %v1539_v20 = vadd.f32 %v1363_v24, %v515_v17  ;;  %v1004_v38 = vmul.f32 -1.442695, %v1499_v0 }
 0x10e   : > { %v1159_v55 = vpop.eup %1158  ;;  %v815_v56 = vmul.f32 %v1157_v49, %v1370_v34  ;;  %1178 = vrcp.f32 %v737_v39  ;;  %v1542_v21 = vadd.f32 %v1363_v24, %v579_v26  ;;  %v1548_v30 = vadd.f32 %v1363_v24, %v507_v29 }
 0x10f   : > { %v1161_v62 = vpop.eup %1160  ;;  %v831_v63 = vmul.f32 %v1159_v55, %v1373_v35  ;;  %1180 = vrcp.f32 %v724_v48  ;;  %v568_v35 = vadd.f32 %v1361_v22, %v567_v14  ;;  %v999_v14 = vmul.f32 -1.442695, %v1476_v28 }
 0x110   : > { %v1163_v4 = vpop.eup %1162  ;;  %848 = vst.msk [vmem:[%s1490_s13 + $0x10] sm:$0xff] %vm845_vm2, %v815_v56  ;;  %v813_v34 = vmul.f32 %v1161_v62, %v1378_v40  ;;  %1182 = vpow2.f32 %v1456_v57  ;;  %v1017_v40 = vmul.f32 -1.442695, %v1472_v19  ;;  %v1002_v17 = vmul.f32 -1.442695, %v1509_v5 }
 0x111   : > { %v1165_v6 = vpop.eup %1164  ;;  %864 = vst.msk [vmem:[%s1490_s13 + $0x90] sm:$0xff] %vm845_vm2, %v831_v63  ;;  %v829_v9 = vmul.f32 %v1163_v4, %v1381_v41  ;;  %1184 = vpow2.f32 %v1459_v60  ;;  %v1523_v16 = vadd.f32 %v1363_v24, %v568_v35 }
 0x112   : > { %v1167_v13 = vpop.eup %1166  ;;  %846 = vst.msk [vmem:[%s1490_s13] sm:$0xff] %vm845_vm2, %v813_v34  ;;  %v816_v57 = vmul.f32 %v1165_v6, %v1388_v46  ;;  %1186 = vpow2.f32 %v1011_v10  ;;  %v1015_v10 = vmul.f32 -1.442695, %v1485_v43 }
 0x113   : > { %v1169_v41 = vpop.eup %1168  ;;  %862 = vst.msk [vmem:[%s1490_s13 + $0x80] sm:$0xff] %vm845_vm2, %v829_v9  ;;  %v832_v60 = vmul.f32 %v1167_v13, %v1391_v47  ;;  %1188 = vpow2.f32 %v1000_v36 }
 0x114   : > { %v1171_v27 = vpop.eup %1170  ;;  %849 = vst.msk [vmem:[%s1490_s13 + $0x18] sm:$0xff] %vm845_vm2, %v816_v57  ;;  %v814_v46 = vmul.f32 %v1169_v41, %v1396_v50  ;;  %1190 = vpow2.f32 %v1016_v37 }
 0x115   : > { %v1173_v32 = vpop.eup %1172  ;;  %865 = vst.msk [vmem:[%s1490_s13 + $0x98] sm:$0xff] %vm845_vm2, %v832_v60  ;;  %v830_v47 = vmul.f32 %v1171_v27, %v1399_v51  ;;  %1192 = vpow2.f32 %v998_v42  ;;  %v571_v51 = vadd.f32 %v1361_v22, %v1479_v31  ;;  %v1020_v42 = vmul.f32 -1.442695, %v1502_v1 }
 0x116   : > { %v1175_v50 = vpop.eup %1174  ;;  %847 = vst.msk [vmem:[%s1490_s13 + $0x8] sm:$0xff] %vm845_vm2, %v814_v46  ;;  %v819_v33 = vmul.f32 %v1173_v32, %v1410_v2  ;;  %1194 = vpow2.f32 %v1014_v58  ;;  %v1018_v46 = vmul.f32 -1.442695, %v1523_v16  ;;  %v1005_v32 = vmul.f32 -1.442695, %v1539_v20 }
 0x117   : > { %v1177_v36 = vpop.eup %1176  ;;  %863 = vst.msk [vmem:[%s1490_s13 + $0x88] sm:$0xff] %vm845_vm2, %v830_v47  ;;  %v835_v37 = vmul.f32 %v1175_v50, %v1413_v3  ;;  %1196 = vpow2.f32 %v1001_v11  ;;  %v1561_v22 = vadd.f32 %v1363_v24, %v571_v51 }
 0x118   : > { %v1179_v39 = vpop.eup %1178  ;;  %852 = vst.msk [vmem:[%s1490_s13 + $0x30] sm:$0xff] %vm845_vm2, %v819_v33  ;;  %v817_v2 = vmul.f32 %v1177_v36, %v1417_v7  ;;  %1198 = vpow2.f32 %v1017_v40  ;;  %v1021_v33 = vmul.f32 -1.442695, %v1542_v21 }
 0x119   : > { %v1181_v31 = vpop.eup %1180  ;;  %868 = vst.msk [vmem:[%s1490_s13 + $0xb0] sm:$0xff] %vm845_vm2, %v835_v37  ;;  %v833_v3 = vmul.f32 %v1179_v39, %v1420_v8  ;;  %1200 = vpow2.f32 %v999_v14 }
 0x11a   : > { %v1183_v49 = vpop.eup %1182  ;;  %850 = vst.msk [vmem:[%s1490_s13 + $0x20] sm:$0xff] %vm845_vm2, %v817_v2  ;;  %v820_v48 = vmul.f32 %v1181_v31, %v1426_v12  ;;  %1202 = vpow2.f32 %v1015_v10 }
 0x11b   : > { %v1185_v7 = vpop.eup %1184  ;;  %866 = vst.msk [vmem:[%s1490_s13 + $0xa0] sm:$0xff] %vm845_vm2, %v833_v3  ;;  %v740_v52 = vadd.f32 1.0, %v1183_v49  ;;  %1204 = vpow2.f32 %v1004_v38 }
 0x11c   : > { %v1187_v54 = vpop.eup %1186  ;;  %853 = vst.msk [vmem:[%s1490_s13 + $0x38] sm:$0xff] %vm845_vm2, %v820_v48  ;;  %v722_v24 = vadd.f32 1.0, %v1185_v7  ;;  %1206 = vpow2.f32 %v1020_v42 }
 0x11d   : > { %v1189_v55 = vpop.eup %1188  ;;  %1208 = vrcp.f32 %v740_v52  ;;  %v738_v8 = vadd.f32 1.0, %v1187_v54 }
 0x11e   : > { %v1191_v56 = vpop.eup %1190  ;;  %1210 = vrcp.f32 %v722_v24  ;;  %v727_v58 = vadd.f32 1.0, %v1189_v55 }
 0x11f   : > { %v1193_v59 = vpop.eup %1192  ;;  %1212 = vrcp.f32 %v738_v8  ;;  %v743_v12 = vadd.f32 1.0, %v1191_v56 }
 0x120   : > { %v1195_v62 = vpop.eup %1194  ;;  %1214 = vrcp.f32 %v727_v58  ;;  %v725_v63 = vadd.f32 1.0, %v1193_v59 }
 0x121   : > { %v1197_v4 = vpop.eup %1196  ;;  %1216 = vrcp.f32 %v743_v12  ;;  %v741_v34 = vadd.f32 1.0, %v1195_v62 }
 0x122   : > { %v1199_v35 = vpop.eup %1198  ;;  %1218 = vrcp.f32 %v725_v63  ;;  %v728_v6 = vadd.f32 1.0, %v1197_v4 }
 0x123   : > { %v1201_v9 = vpop.eup %1200  ;;  %1220 = vrcp.f32 %v741_v34  ;;  %v744_v11 = vadd.f32 1.0, %v1199_v35 }
 0x124   : > { %v1203_v40 = vpop.eup %1202  ;;  %1222 = vrcp.f32 %v728_v6  ;;  %v726_v13 = vadd.f32 1.0, %v1201_v9 }
 0x125   : > { %v1205_v57 = vpop.eup %1204  ;;  %1224 = vrcp.f32 %v744_v11  ;;  %v742_v14 = vadd.f32 1.0, %v1203_v40 }
 0x126   : > { %v1207_v41 = vpop.eup %1206  ;;  %1226 = vrcp.f32 %v726_v13  ;;  %v731_v60 = vadd.f32 1.0, %v1205_v57 }
 0x127   : > { %v1209_v26 = vpop.eup %1208  ;;  %1228 = vrcp.f32 %v742_v14  ;;  %v747_v27 = vadd.f32 1.0, %v1207_v41 }
 0x128   : > { %v1211_v10 = vpop.eup %1210  ;;  %v836_v29 = vmul.f32 %v1209_v26, %v1431_v15  ;;  %1230 = vrcp.f32 %v731_v60  ;;  %v1003_v15 = vmul.f32 -1.442695, %v1548_v30 }
 0x129   : > { %v1213_v47 = vpop.eup %1212  ;;  %v818_v50 = vmul.f32 %v1211_v10, %v1437_v23  ;;  %1232 = vrcp.f32 %v747_v27  ;;  %v1019_v23 = vmul.f32 -1.442695, %v1561_v22 }
 0x12a   : > { %v1215_v51 = vpop.eup %1214  ;;  %869 = vst.msk [vmem:[%s1490_s13 + $0xb8] sm:$0xff] %vm845_vm2, %v836_v29  ;;  %v834_v36 = vmul.f32 %v1213_v47, %v1440_v25  ;;  %1234 = vpow2.f32 %v1002_v17 }
 0x12b   : > { %v1217_v37 = vpop.eup %1216  ;;  %851 = vst.msk [vmem:[%s1490_s13 + $0x28] sm:$0xff] %vm845_vm2, %v818_v50  ;;  %v823_v38 = vmul.f32 %v1215_v51, %v1446_v44  ;;  %1236 = vpow2.f32 %v1018_v46 }
 0x12c   : > { %v1219_v39 = vpop.eup %1218  ;;  %867 = vst.msk [vmem:[%s1490_s13 + $0xa8] sm:$0xff] %vm845_vm2, %v834_v36  ;;  %v839_v2 = vmul.f32 %v1217_v37, %v1449_v45  ;;  %1238 = vpow2.f32 %v1005_v32 }
 0x12d   : > { %v1221_v25 = vpop.eup %1220  ;;  %856 = vst.msk [vmem:[%s1490_s13 + $0x50] sm:$0xff] %vm845_vm2, %v823_v38  ;;  %v821_v42 = vmul.f32 %v1219_v39, %v1452_v53  ;;  %1240 = vpow2.f32 %v1021_v33 }
 0x12e   : > { %v1223_v44 = vpop.eup %1222  ;;  %872 = vst.msk [vmem:[%s1490_s13 + $0xd0] sm:$0xff] %vm845_vm2, %v839_v2  ;;  %v837_v31 = vmul.f32 %v1221_v25, %v1462_v61  ;;  %1242 = vpow2.f32 %v1003_v15 }
 0x12f   : > { %v1225_v3 = vpop.eup %1224  ;;  %854 = vst.msk [vmem:[%s1490_s13 + $0x40] sm:$0xff] %vm845_vm2, %v821_v42  ;;  %v824_v45 = vmul.f32 %v1223_v44, %v1469_v18  ;;  %1244 = vpow2.f32 %v1019_v23 }
 0x130   : > { %v1227_v49 = vpop.eup %1226  ;;  %870 = vst.msk [vmem:[%s1490_s13 + $0xc0] sm:$0xff] %vm845_vm2, %v837_v31  ;;  %v840_v53 = vmul.f32 %v1225_v3, %v1472_v19 }
 0x131   : > { %v1229_v48 = vpop.eup %1228  ;;  %857 = vst.msk [vmem:[%s1490_s13 + $0x58] sm:$0xff] %vm845_vm2, %v824_v45  ;;  %v822_v61 = vmul.f32 %v1227_v49, %v1476_v28 }
 0x132   : > { %v1231_v7 = vpop.eup %1230  ;;  %873 = vst.msk [vmem:[%s1490_s13 + $0xd8] sm:$0xff] %vm845_vm2, %v840_v53  ;;  %v838_v52 = vmul.f32 %v1229_v48, %v1485_v43 }
 0x133   : > { %v1233_v54 = vpop.eup %1232  ;;  %855 = vst.msk [vmem:[%s1490_s13 + $0x48] sm:$0xff] %vm845_vm2, %v822_v61  ;;  %v827_v18 = vmul.f32 %v1231_v7, %v1499_v0 }
 0x134   : > { %v1235_v24 = vpop.eup %1234  ;;  %871 = vst.msk [vmem:[%s1490_s13 + $0xc8] sm:$0xff] %vm845_vm2, %v838_v52  ;;  %v843_v19 = vmul.f32 %v1233_v54, %v1502_v1 }
 0x135   : > { %v1237_v55 = vpop.eup %1236  ;;  %860 = vst.msk [vmem:[%s1490_s13 + $0x70] sm:$0xff] %vm845_vm2, %v827_v18  ;;  %v729_v8 = vadd.f32 1.0, %v1235_v24 }
 0x136   : > { %v1239_v28 = vpop.eup %1238  ;;  %876 = vst.msk [vmem:[%s1490_s13 + $0xf0] sm:$0xff] %vm845_vm2, %v843_v19  ;;  %v745_v56 = vadd.f32 1.0, %v1237_v55 }
 0x137   : > { %v1241_v58 = vpop.eup %1240  ;;  %1246 = vrcp.f32 %v729_v8  ;;  %v732_v43 = vadd.f32 1.0, %v1239_v28 }
 0x138   : > { %v1243_v59 = vpop.eup %1242  ;;  %1248 = vrcp.f32 %v745_v56  ;;  %v748_v0 = vadd.f32 1.0, %v1241_v58 }
 0x139   : > { %v1245_v12 = vpop.eup %1244  ;;  %1250 = vrcp.f32 %v732_v43  ;;  %v730_v62 = vadd.f32 1.0, %v1243_v59 }
 0x13a   : > { %1252 = vrcp.f32 %v748_v0  ;;  %v746_v1 = vadd.f32 1.0, %v1245_v12 }
 0x13b   : > { %1254 = vrcp.f32 %v730_v62 }
 0x13c   : > { %1256 = vrcp.f32 %v746_v1 }
 0x141   : > { %v1247_v63 = vpop.eup %1246 }
 0x142   : > { %v1249_v4 = vpop.eup %1248  ;;  %v825_v34 = vmul.f32 %v1247_v63, %v1509_v5 }
 0x143   : > { %v1251_v35 = vpop.eup %1250  ;;  %v841_v6 = vmul.f32 %v1249_v4, %v1523_v16 }
 0x144   : > { %v1253_v9 = vpop.eup %1252  ;;  %858 = vst.msk [vmem:[%s1490_s13 + $0x60] sm:$0xff] %vm845_vm2, %v825_v34  ;;  %v828_v11 = vmul.f32 %v1251_v35, %v1539_v20 }
 0x145   : > { %v1255_v40 = vpop.eup %1254  ;;  %874 = vst.msk [vmem:[%s1490_s13 + $0xe0] sm:$0xff] %vm845_vm2, %v841_v6  ;;  %v844_v13 = vmul.f32 %v1253_v9, %v1542_v21 }
 0x146   : > { %v1257_v57 = vpop.eup %1256  ;;  %861 = vst.msk [vmem:[%s1490_s13 + $0x78] sm:$0xff] %vm845_vm2, %v828_v11  ;;  %v826_v14 = vmul.f32 %v1255_v40, %v1548_v30 }
 0x147   : > { %877 = vst.msk [vmem:[%s1490_s13 + $0xf8] sm:$0xff] %vm845_vm2, %v844_v13  ;;  %v842_v5 = vmul.f32 %v1257_v57, %v1561_v22 }
 0x148   : > { %859 = vst.msk [vmem:[%s1490_s13 + $0x68] sm:$0xff] %vm845_vm2, %v826_v14 }
 0x149   : > { %875 = vst.msk [vmem:[%s1490_s13 + $0xe8] sm:$0xff] %vm845_vm2, %v842_v5 }
 0x14a PF: > { %s14_s15 = sadd.s32 1, %s1264_s15  }
 0x14b   : > { %p11_p4 = scmp.ge.s32.totalorder %s14_s15, 4  }
 0x14d   :  { %13 = sbr.rel (!%p11_p4) target bundleno = 1 (0x1), region = 69 }

// kernel: _fwd.41
= control target key start
LH: loop header
LB: loop body
LE: loop exit
PB: predicated region body
PF: predicated region fallthrough
CT: control target
= control target key end

     0   :  { %s571_s15 = smov 0   ;;  %s626_s0 = inlined_call_operand.vmem [shape: bf16[2,64,72], index: 0, kind: input, shape index: {}]   ;;  %s627_s1 = inlined_call_operand.vmem [shape: bf16[72,8], index: 1, kind: input, shape index: {}]   ;;  %s628_s2 = inlined_call_operand.vmem [shape: f32[1,1,8], index: 2, kind: input, shape index: {}]   ;;  %s629_s3 = inlined_call_operand.vmem [shape: f32[2,1,8], index: 3, kind: input, shape index: {}]   ;;  %s630_s4 = inlined_call_operand.vmem [shape: f32[2,64,8], index: 4, kind: output, shape index: {}]  }
   0x1 LB: > { %s454_s16 = sadd.s32 4294967295, %s544_s15   ;;  %p458_p0 = scmp.ge.s32.totalorder %s544_s15, 1  ;;  %s544_s15 = sphi %s571_s15, %s14_s15  }
   0x2   : > { %p170_p1 = scmp.lt.s32.totalorder %s544_s15, 3 }
   0x4   : > { %p171_p2 = pnand %p458_p0, %p170_p1 }
   0x5   : > { %v529_v0 = vld [vmem:[%s627_s1] sm:$0xff] (!%p171_p2)   ;;  %v530_v1 = vld [vmem:[%s627_s1 + $0x8] sm:$0xff] (!%p171_p2)   ;;  %p199_p3 = scmp.lt.s32.totalorder (!%p171_p2), %s454_s16, 1  ;;  %v531_v2 = vld [vmem:[%s627_s1 + $0x10] sm:$0xff] (!%p171_p2)   ;;  %vm284_vm0 = vcmask (!%p171_p2), 588800   ;;  %vm297_vm1 = vcmask (!%p171_p2), 1043456  }
   0x6   : > { %174 = sbr.rel (%p171_p2) target bundleno = 246 (0xf6), region = 36  ;;  %491 = vmatprep.subr.bf16.mxu0 (!%p171_p2), %v529_v0  ;;  %509 = vmatprep.subr.bf16.mxu1 (!%p171_p2), %v529_v0  ;;  %v532_v3 = vld [vmem:[%s627_s1 + $0x18] sm:$0xff] (!%p171_p2)   ;;  %v533_v6 = vld [vmem:[%s627_s1 + $0x20] ss:$0 sps:$4 sm:$0xff] (!%p171_p2)   ;;  %vm381_vm2 = vcmask (!%p171_p2), 64512  }
   0x7   : > { %492 = vmatpush3.bf16.msra.mxu0 (!%p171_p2), %v529_v0  ;;  %514 = vmatpush3.bf16.msra.mxu1 (!%p171_p2), %v529_v0  ;;  %v299_v7 = vsel (!%p171_p2), %vm297_vm1, %v533_v6, 0  ;;  %v463_v10 = vld [vmem:[%s628_s2] ss:$0 sm:$0xff] (!%p171_p2) }
   0x8   : > { %493 = vmatprep.subr.bf16.mxu0 (!%p171_p2), %v530_v1  ;;  %510 = vmatprep.subr.bf16.mxu1 (!%p171_p2), %v530_v1 }
   0xb   : > { %494 = vmatpush3.bf16.msra.mxu0 (!%p171_p2), %v530_v1  ;;  %515 = vmatpush3.bf16.msra.mxu1 (!%p171_p2), %v530_v1 }
   0xc   : > { %495 = vmatprep.subr.bf16.mxu0 (!%p171_p2), %v531_v2  ;;  %511 = vmatprep.subr.bf16.mxu1 (!%p171_p2), %v531_v2 }
   0xd   : > { %s632_s16 = smov (!%p199_p3, %s454_s16), 1 }
   0xe   : > { %s480_s23 = sshll.u32 %s632_s16, 5  ;;  %s206_s7 = scalar_lea.vmem %s629_s3, %s632_s16 }
   0xf   : > { %s203_s28 = scalar_lea.vmem %s626_s0, %s480_s23  ;;  %496 = vmatpush3.bf16.msra.mxu0 %v531_v2  ;;  %516 = vmatpush3.bf16.msra.mxu1 %v531_v2  ;;  %s481_s10 = sshll.u32 %s632_s16, 6  ;;  %v477_v12 = vld [vmem:[%s206_s7] ss:$0 sm:$0xff] }
  0x10   : > { %v534_v4 = vld [vmem:[%s203_s28] sm:$0xff]   ;;  %v535_v5 = vld [vmem:[%s203_s28 + $0x10] sm:$0xff]   ;;  %497 = vmatprep.subr.bf16.mxu0 %v532_v3  ;;  %512 = vmatprep.subr.bf16.mxu1 %v532_v3  ;;  %v536_v8 = vld [vmem:[%s203_s28 + $0x8] sm:$0xff]   ;;  %s211_s13 = scalar_lea.vmem %s630_s4, %s481_s10 }
  0x11   : > { %501 = vmatprep.mubr.msk.bf16.mxu0 %vm284_vm0, %v534_v4  ;;  %505 = vmatprep.mubr.msk.bf16.mxu1 %vm284_vm0, %v535_v5  ;;  %v537_v9 = vld [vmem:[%s203_s28 + $0x18] sm:$0xff]  }
  0x13   : > { %498 = vmatpush3.bf16.msra.mxu0 %v532_v3  ;;  %517 = vmatpush3.bf16.msra.mxu1 %v532_v3 }
  0x14   : > { %519 = vmatprep.subr.msk.bf16.mxu0 %vm297_vm1, %v533_v6  ;;  %520 = vmatprep.subr.msk.bf16.mxu1 %vm297_vm1, %v533_v6 }
  0x17   : > { %500 = vmatpush3.bf16.msra.mxu0 %v299_v7  ;;  %518 = vmatpush3.bf16.msra.mxu1 %v299_v7 }
  0x1a   : > { %502 = vmatmul.mubr.msk.bf16.vlgmr.msra.gmra.mrb[0].mxu0 %vm284_vm0, %v536_v8  ;;  %506 = vmatmul.mubr.msk.bf16.vlgmr.msra.gmra.mrb[0].mxu1 %vm284_vm0, %v537_v9 }
  0xed   : > { %v503_v11 = vpop.f32.mrb[0].mxu0  ;;  %v507_v13 = vpop.f32.mrb[0].mxu1 }
  0xee   : > { %v344_v14 = vadd.f32 %v503_v11, %v463_v10  ;;  %v360_v15 = vadd.f32 %v507_v13, %v463_v10  ;;  %v335_v16 = vpop.f32.mrb[1].mxu0  ;;  %v351_v17 = vpop.f32.mrb[1].mxu1 }
  0xef   : > { %v336_v18 = vadd.f32 %v463_v10, %v335_v16  ;;  %v352_v19 = vadd.f32 %v463_v10, %v351_v17  ;;  %v504_v20 = vpop.f32.mrb[2].mxu0  ;;  %v508_v21 = vpop.f32.mrb[2].mxu1 }
  0xf0   : > { %v375_v22 = vadd.f32 %v477_v12, %v344_v14  ;;  %v379_v23 = vadd.f32 %v477_v12, %v360_v15  ;;  %v347_v24 = vadd.f32 %v504_v20, %v463_v10  ;;  %v363_v25 = vadd.f32 %v508_v21, %v463_v10  ;;  %v338_v26 = vpop.f32.mrb[3].mxu0  ;;  %v354_v27 = vpop.f32.mrb[3].mxu1 }
  0xf1   : > { %v373_v28 = vadd.f32 %v477_v12, %v336_v18  ;;  %v377_v29 = vadd.f32 %v477_v12, %v352_v19  ;;  %v339_v30 = vadd.f32 %v463_v10, %v338_v26  ;;  %v355_v31 = vadd.f32 %v463_v10, %v354_v27 }
  0xf2   : > { %384 = vst.msk [vmem:[%s211_s13 + $0x10] sm:$0xff] %vm381_vm2, %v375_v22  ;;  %388 = vst.msk [vmem:[%s211_s13 + $0x30] sm:$0xff] %vm381_vm2, %v379_v23  ;;  %v376_v32 = vadd.f32 %v477_v12, %v347_v24  ;;  %v380_v33 = vadd.f32 %v477_v12, %v363_v25 }
  0xf3   : > { %382 = vst.msk [vmem:[%s211_s13] sm:$0xff] %vm381_vm2, %v373_v28  ;;  %386 = vst.msk [vmem:[%s211_s13 + $0x20] sm:$0xff] %vm381_vm2, %v377_v29  ;;  %v374_v34 = vadd.f32 %v477_v12, %v339_v30  ;;  %v378_v35 = vadd.f32 %v477_v12, %v355_v31 }
  0xf4   : > { %385 = vst.msk [vmem:[%s211_s13 + $0x18] sm:$0xff] %vm381_vm2, %v376_v32  ;;  %389 = vst.msk [vmem:[%s211_s13 + $0x38] sm:$0xff] %vm381_vm2, %v380_v33 }
  0xf5   : > { %383 = vst.msk [vmem:[%s211_s13 + $0x8] sm:$0xff] %vm381_vm2, %v374_v34  ;;  %387 = vst.msk [vmem:[%s211_s13 + $0x28] sm:$0xff] %vm381_vm2, %v378_v35 }
  0xf6 PF: > { %s14_s15 = sadd.s32 1, %s544_s15  }
  0xf7   : > { %p11_p4 = scmp.ge.s32.totalorder %s14_s15, 4  }
  0xf9   :  { %13 = sbr.rel (!%p11_p4) target bundleno = 1 (0x1), region = 69 }

// kernel: _fwd.42
= control target key start
LH: loop header
LB: loop body
LE: loop exit
PB: predicated region body
PF: predicated region fallthrough
CT: control target
= control target key end

     0   :  { %s667_s15 = smov 0   ;;  %s722_s0 = inlined_call_operand.vmem [shape: bf16[2,64,72], index: 0, kind: input, shape index: {}]   ;;  %s723_s1 = inlined_call_operand.vmem [shape: bf16[72,16], index: 1, kind: input, shape index: {}]   ;;  %s724_s2 = inlined_call_operand.vmem [shape: f32[1,1,16], index: 2, kind: input, shape index: {}]   ;;  %s725_s3 = inlined_call_operand.vmem [shape: f32[2,1,16], index: 3, kind: input, shape index: {}]   ;;  %s726_s4 = inlined_call_operand.vmem [shape: f32[2,64,16], index: 4, kind: output, shape index: {}]  }
   0x1 LB: > { %s510_s16 = sadd.s32 4294967295, %s640_s15   ;;  %p514_p0 = scmp.ge.s32.totalorder %s640_s15, 1  ;;  %s640_s15 = sphi %s667_s15, %s14_s15  }
   0x2   : > { %p170_p1 = scmp.lt.s32.totalorder %s640_s15, 3 }
   0x4   : > { %p171_p2 = pnand %p514_p0, %p170_p1 }
   0x5   : > { %v593_v0 = vld [vmem:[%s723_s1] sm:$0xff] (!%p171_p2)   ;;  %v594_v1 = vld [vmem:[%s723_s1 + $0x8] sm:$0xff] (!%p171_p2)   ;;  %p199_p3 = scmp.lt.s32.totalorder (!%p171_p2), %s510_s16, 1  ;;  %v595_v2 = vld [vmem:[%s723_s1 + $0x10] sm:$0xff] (!%p171_p2)   ;;  %vm284_vm0 = vcmask (!%p171_p2), 588800   ;;  %vm297_vm1 = vcmask (!%p171_p2), 1043456  }
   0x6   : > { %174 = sbr.rel (%p171_p2) target bundleno = 278 (0x116), region = 36  ;;  %555 = vmatprep.subr.bf16.mxu0 (!%p171_p2), %v593_v0  ;;  %573 = vmatprep.subr.bf16.mxu1 (!%p171_p2), %v593_v0  ;;  %v596_v3 = vld [vmem:[%s723_s1 + $0x18] sm:$0xff] (!%p171_p2)   ;;  %v597_v6 = vld [vmem:[%s723_s1 + $0x20] ss:$0 sps:$4 sm:$0xff] (!%p171_p2)   ;;  %vm437_vm2 = vcmask (!%p171_p2), 130048  }
   0x7   : > { %556 = vmatpush3.bf16.msra.mxu0 (!%p171_p2), %v593_v0  ;;  %578 = vmatpush3.bf16.msra.mxu1 (!%p171_p2), %v593_v0  ;;  %v299_v7 = vsel (!%p171_p2), %vm297_vm1, %v597_v6, 0  ;;  %v519_v10 = vld [vmem:[%s724_s2] ss:$0 sm:$0xff] (!%p171_p2) }
   0x8   : > { %557 = vmatprep.subr.bf16.mxu0 (!%p171_p2), %v594_v1  ;;  %574 = vmatprep.subr.bf16.mxu1 (!%p171_p2), %v594_v1 }
   0xb   : > { %558 = vmatpush3.bf16.msra.mxu0 (!%p171_p2), %v594_v1  ;;  %579 = vmatpush3.bf16.msra.mxu1 (!%p171_p2), %v594_v1 }
   0xc   : > { %559 = vmatprep.subr.bf16.mxu0 (!%p171_p2), %v595_v2  ;;  %575 = vmatprep.subr.bf16.mxu1 (!%p171_p2), %v595_v2 }
   0xd   : > { %s728_s16 = smov (!%p199_p3, %s510_s16), 1 }
   0xe   : > { %s544_s23 = sshll.u32 %s728_s16, 5  ;;  %s206_s7 = scalar_lea.vmem %s725_s3, %s728_s16 }
   0xf   : > { %s203_s28 = scalar_lea.vmem %s722_s0, %s544_s23  ;;  %560 = vmatpush3.bf16.msra.mxu0 %v595_v2  ;;  %580 = vmatpush3.bf16.msra.mxu1 %v595_v2  ;;  %v533_v12 = vld [vmem:[%s206_s7] ss:$0 sm:$0xff]  ;;  %s545_s10 = sshll.u32 %s728_s16, 6 }
  0x10   : > { %v598_v4 = vld [vmem:[%s203_s28] sm:$0xff]   ;;  %v599_v5 = vld [vmem:[%s203_s28 + $0x10] sm:$0xff]   ;;  %561 = vmatprep.subr.bf16.mxu0 %v596_v3  ;;  %576 = vmatprep.subr.bf16.mxu1 %v596_v3  ;;  %v600_v8 = vld [vmem:[%s203_s28 + $0x8] sm:$0xff]   ;;  %s211_s13 = scalar_lea.vmem %s726_s4, %s545_s10 }
  0x11   : > { %565 = vmatprep.mubr.msk.bf16.mxu0 %vm284_vm0, %v598_v4  ;;  %569 = vmatprep.mubr.msk.bf16.mxu1 %vm284_vm0, %v599_v5  ;;  %v601_v9 = vld [vmem:[%s203_s28 + $0x18] sm:$0xff]  }
  0x13   : > { %562 = vmatpush3.bf16.msra.mxu0 %v596_v3  ;;  %581 = vmatpush3.bf16.msra.mxu1 %v596_v3 }
  0x14   : > { %583 = vmatprep.subr.msk.bf16.mxu0 %vm297_vm1, %v597_v6  ;;  %584 = vmatprep.subr.msk.bf16.mxu1 %vm297_vm1, %v597_v6 }
  0x17   : > { %564 = vmatpush3.bf16.msra.mxu0 %v299_v7  ;;  %582 = vmatpush3.bf16.msra.mxu1 %v299_v7 }
  0x1a   : > { %566 = vmatmul.mubr.msk.bf16.vlgmr.msra.gmra.mrb[0].mxu0 %vm284_vm0, %v600_v8  ;;  %570 = vmatmul.mubr.msk.bf16.vlgmr.msra.gmra.mrb[0].mxu1 %vm284_vm0, %v601_v9 }
  0xed   : > { %v567_v11 = vpop.f32.mrb[0].mxu0  ;;  %v571_v13 = vpop.f32.mrb[0].mxu1 }
  0xee   : > { %v344_v14 = vadd.f32 %v567_v11, %v519_v10  ;;  %v360_v15 = vadd.f32 %v571_v13, %v519_v10  ;;  %v335_v16 = vpop.f32.mrb[1].mxu0  ;;  %v351_v17 = vpop.f32.mrb[1].mxu1 }
  0xef   : > { %v336_v18 = vadd.f32 %v519_v10, %v335_v16  ;;  %v352_v19 = vadd.f32 %v519_v10, %v351_v17  ;;  %v568_v20 = vpop.f32.mrb[2].mxu0  ;;  %v572_v21 = vpop.f32.mrb[2].mxu1 }
  0xf0   : > { %v375_v22 = vadd.f32 %v533_v12, %v344_v14  ;;  %v379_v23 = vadd.f32 %v533_v12, %v360_v15  ;;  %v347_v24 = vadd.f32 %v568_v20, %v519_v10  ;;  %v363_v25 = vadd.f32 %v572_v21, %v519_v10  ;;  %v338_v26 = vpop.f32.mrb[3].mxu0  ;;  %v354_v27 = vpop.f32.mrb[3].mxu1 }
  0xf1   : > { %v373_v28 = vadd.f32 %v533_v12, %v336_v18  ;;  %v377_v29 = vadd.f32 %v533_v12, %v352_v19  ;;  %v339_v30 = vadd.f32 %v519_v10, %v338_v26  ;;  %v355_v31 = vadd.f32 %v519_v10, %v354_v27 }
  0xf2   : > { %v536_v32 = vmul.f32 -1.442695, %v375_v22  ;;  %v540_v33 = vmul.f32 -1.442695, %v379_v23  ;;  %v376_v34 = vadd.f32 %v533_v12, %v347_v24  ;;  %v380_v35 = vadd.f32 %v533_v12, %v363_v25 }
  0xf3   : > { %v534_v36 = vmul.f32 -1.442695, %v373_v28  ;;  %v538_v37 = vmul.f32 -1.442695, %v377_v29  ;;  %v374_v38 = vadd.f32 %v533_v12, %v339_v30  ;;  %v378_v39 = vadd.f32 %v533_v12, %v355_v31 }
  0xf4   : > { %602 = vpow2.f32 %v536_v32  ;;  %v537_v40 = vmul.f32 -1.442695, %v376_v34  ;;  %v541_v41 = vmul.f32 -1.442695, %v380_v35 }
  0xf5   : > { %604 = vpow2.f32 %v540_v33  ;;  %v535_v42 = vmul.f32 -1.442695, %v374_v38  ;;  %v539_v43 = vmul.f32 -1.442695, %v378_v39 }
  0xf6   : > { %606 = vpow2.f32 %v534_v36 }
  0xf7   : > { %608 = vpow2.f32 %v538_v37 }
  0xf8   : > { %610 = vpow2.f32 %v537_v40 }
  0xf9   : > { %612 = vpow2.f32 %v541_v41 }
  0xfa   : > { %614 = vpow2.f32 %v535_v42 }
  0xfb   : > { %616 = vpow2.f32 %v539_v43 }
  0xfe   : > { %v603_v44 = vpop.eup %602 }
  0xff   : > { %v605_v45 = vpop.eup %604  ;;  %v407_v46 = vadd.f32 1.0, %v603_v44 }
 0x100   : > { %v607_v47 = vpop.eup %606  ;;  %v411_v48 = vadd.f32 1.0, %v605_v45 }
 0x101   : > { %v609_v49 = vpop.eup %608  ;;  %618 = vrcp.f32 %v407_v46  ;;  %v405_v50 = vadd.f32 1.0, %v607_v47 }
 0x102   : > { %v611_v51 = vpop.eup %610  ;;  %620 = vrcp.f32 %v411_v48  ;;  %v409_v52 = vadd.f32 1.0, %v609_v49 }
 0x103   : > { %v613_v53 = vpop.eup %612  ;;  %622 = vrcp.f32 %v405_v50  ;;  %v408_v54 = vadd.f32 1.0, %v611_v51 }
 0x104   : > { %v615_v55 = vpop.eup %614  ;;  %624 = vrcp.f32 %v409_v52  ;;  %v412_v56 = vadd.f32 1.0, %v613_v53 }
 0x105   : > { %v617_v57 = vpop.eup %616  ;;  %626 = vrcp.f32 %v408_v54  ;;  %v406_v58 = vadd.f32 1.0, %v615_v55 }
 0x106   : > { %628 = vrcp.f32 %v412_v56  ;;  %v410_v59 = vadd.f32 1.0, %v617_v57 }
 0x107   : > { %630 = vrcp.f32 %v406_v58 }
 0x108   : > { %632 = vrcp.f32 %v410_v59 }
 0x10b   : > { %v619_v60 = vpop.eup %618 }
 0x10c   : > { %v621_v61 = vpop.eup %620  ;;  %v431_v62 = vmul.f32 %v619_v60, %v375_v22 }
 0x10d   : > { %v623_v63 = vpop.eup %622  ;;  %v435_v0 = vmul.f32 %v621_v61, %v379_v23 }
 0x10e   : > { %v625_v1 = vpop.eup %624  ;;  %440 = vst.msk [vmem:[%s211_s13 + $0x10] sm:$0xff] %vm437_vm2, %v431_v62  ;;  %v429_v2 = vmul.f32 %v623_v63, %v373_v28 }
 0x10f   : > { %v627_v3 = vpop.eup %626  ;;  %444 = vst.msk [vmem:[%s211_s13 + $0x30] sm:$0xff] %vm437_vm2, %v435_v0  ;;  %v433_v4 = vmul.f32 %v625_v1, %v377_v29 }
 0x110   : > { %v629_v5 = vpop.eup %628  ;;  %438 = vst.msk [vmem:[%s211_s13] sm:$0xff] %vm437_vm2, %v429_v2  ;;  %v432_v6 = vmul.f32 %v627_v3, %v376_v34 }
 0x111   : > { %v631_v7 = vpop.eup %630  ;;  %442 = vst.msk [vmem:[%s211_s13 + $0x20] sm:$0xff] %vm437_vm2, %v433_v4  ;;  %v436_v8 = vmul.f32 %v629_v5, %v380_v35 }
 0x112   : > { %v633_v9 = vpop.eup %632  ;;  %441 = vst.msk [vmem:[%s211_s13 + $0x18] sm:$0xff] %vm437_vm2, %v432_v6  ;;  %v430_v10 = vmul.f32 %v631_v7, %v374_v38 }
 0x113   : > { %445 = vst.msk [vmem:[%s211_s13 + $0x38] sm:$0xff] %vm437_vm2, %v436_v8  ;;  %v434_v11 = vmul.f32 %v633_v9, %v378_v39 }
 0x114   : > { %439 = vst.msk [vmem:[%s211_s13 + $0x8] sm:$0xff] %vm437_vm2, %v430_v10 }
 0x115   : > { %443 = vst.msk [vmem:[%s211_s13 + $0x28] sm:$0xff] %vm437_vm2, %v434_v11 }
 0x116 PF: > { %s14_s15 = sadd.s32 1, %s640_s15  }
 0x117   : > { %p11_p4 = scmp.ge.s32.totalorder %s14_s15, 4  }
 0x119   :  { %13 = sbr.rel (!%p11_p4) target bundleno = 1 (0x1), region = 69 }

// kernel: _fwd.43
= control target key start
LH: loop header
LB: loop body
LE: loop exit
PB: predicated region body
PF: predicated region fallthrough
CT: control target
= control target key end

     0   :  { %s715_s15 = smov 0   ;;  %s811_s0 = inlined_call_operand.vmem [shape: bf16[2,64,144], index: 0, kind: input, shape index: {}]   ;;  %s812_s1 = inlined_call_operand.vmem [shape: bf16[144,16], index: 1, kind: input, shape index: {}]   ;;  %s813_s2 = inlined_call_operand.vmem [shape: f32[1,1,16], index: 2, kind: input, shape index: {}]   ;;  %s814_s3 = inlined_call_operand.vmem [shape: f32[2,1,16], index: 3, kind: input, shape index: {}]   ;;  %s815_s4 = inlined_call_operand.vmem [shape: f32[2,64,16], index: 4, kind: output, shape index: {}]  }
   0x1 LB: > { %s557_s16 = sadd.s32 4294967295, %s687_s15   ;;  %p561_p0 = scmp.ge.s32.totalorder %s687_s15, 1  ;;  %s687_s15 = sphi %s715_s15, %s14_s15  }
   0x2   : > { %p170_p1 = scmp.lt.s32.totalorder %s687_s15, 3 }
   0x4   : > { %p171_p2 = pnand %p561_p0, %p170_p1 }
   0x5   : > { %v628_v0 = vld [vmem:[%s812_s1] sm:$0xff] (!%p171_p2)   ;;  %v689_v1 = vmov (!%p171_p2), 0   ;;  %p199_p3 = scmp.lt.s32.totalorder (!%p171_p2), %s557_s16, 1  ;;  %v629_v2 = vld [vmem:[%s812_s1 + $0x8] sm:$0xff] (!%p171_p2)   ;;  %v630_v3 = vld [vmem:[%s812_s1 + $0x10] sm:$0xff] (!%p171_p2)   ;;  %vm336_vm0 = vcmask (!%p171_p2), 130048  }
   0x6   : > { %174 = sbr.rel (%p171_p2) target bundleno = 298 (0x12a), region = 36  ;;  %349 = vmatprep.subr.bf16.mxu0 (!%p171_p2), %v689_v1  ;;  %601 = vmatprep.subr.bf16.mxu1 (!%p171_p2), %v689_v1  ;;  %v631_v4 = vld [vmem:[%s812_s1 + $0x18] sm:$0xff] (!%p171_p2)   ;;  %v632_v7 = vld [vmem:[%s812_s1 + $0x20] sm:$0xff] (!%p171_p2)   ;;  %v633_v8 = vld [vmem:[%s812_s1 + $0x28] sm:$0xff] (!%p171_p2)  }
   0x7   : > { %350 = vmatpush1.bf16.msra.mxu0 (!%p171_p2), %v628_v0  ;;  %610 = vmatpush1.bf16.msra.mxu1 (!%p171_p2), %v628_v0  ;;  %v634_v9 = vld [vmem:[%s812_s1 + $0x30] sm:$0xff] (!%p171_p2)   ;;  %v635_v10 = vld [vmem:[%s812_s1 + $0x38] sm:$0xff] (!%p171_p2)   ;;  %v636_v11 = vld [vmem:[%s812_s1 + $0x40] sm:$0xff] (!%p171_p2)  }
   0x8   : > { %351 = vmatprep.subr.bf16.mxu0 (!%p171_p2), %v689_v1  ;;  %602 = vmatprep.subr.bf16.mxu1 (!%p171_p2), %v689_v1  ;;  %v566_v18 = vld [vmem:[%s813_s2] ss:$0 sm:$0xff] (!%p171_p2) }
   0xb   : > { %352 = vmatpush1.bf16.msra.mxu0 (!%p171_p2), %v629_v2  ;;  %611 = vmatpush1.bf16.msra.mxu1 (!%p171_p2), %v629_v2 }
   0xc   : > { %353 = vmatprep.subr.bf16.mxu0 (!%p171_p2), %v689_v1  ;;  %603 = vmatprep.subr.bf16.mxu1 (!%p171_p2), %v689_v1 }
   0xd   : > { %s817_s16 = smov (!%p199_p3, %s557_s16), 1 }
   0xe   : > { %s599_s21 = sshll.u32 %s817_s16, 6  ;;  %s206_s17 = scalar_lea.vmem %s814_s3, %s817_s16 }
   0xf   : > { %s740_s26 = scalar_lea.vmem %s811_s0, %s599_s21  ;;  %354 = vmatpush1.bf16.msra.mxu0 %v630_v3  ;;  %612 = vmatpush1.bf16.msra.mxu1 %v630_v3  ;;  %v588_v20 = vld [vmem:[%s206_s17] ss:$0 sm:$0xff]  ;;  %s211_s23 = scalar_lea.vmem %s815_s4, %s599_s21 }
  0x10   : > { %v639_v5 = vld [vmem:[%s740_s26 + $0x4] ss:$8 sps:$4 sm:$0xff]   ;;  %355 = vmatprep.subr.bf16.mxu0 %v689_v1  ;;  %604 = vmatprep.subr.bf16.mxu1 %v689_v1  ;;  %v637_v12 = vld [vmem:[%s740_s26] ss:$8 sps:$4 sm:$0xff]   ;;  %v643_v14 = vld [vmem:[%s740_s26 + $0x14] ss:$8 sps:$4 sm:$0xff]  }
  0x11   : > { %v642_v6 = vld [vmem:[%s740_s26 + $0x24] ss:$8 sps:$4 sm:$0xff]   ;;  %584 = vmatprep.mubr.msk.bf16.mxu0 %vm336_vm0, %v639_v5  ;;  %v640_v13 = vld [vmem:[%s740_s26 + $0x20] ss:$8 sps:$4 sm:$0xff]   ;;  %v645_v15 = vld [vmem:[%s740_s26 + $0x34] ss:$8 sps:$4 sm:$0xff]  }
  0x12   : > { %586 = vmatprep.mubr.msk.bf16.mxu1 %vm336_vm0, %v642_v6  ;;  %v647_v16 = vld [vmem:[%s740_s26 + $0x10] ss:$8 sps:$4 sm:$0xff]  }
  0x13   : > { %356 = vmatpush1.bf16.msra.mxu0 %v631_v4  ;;  %613 = vmatpush1.bf16.msra.mxu1 %v631_v4  ;;  %v648_v17 = vld [vmem:[%s740_s26 + $0x30] ss:$8 sps:$4 sm:$0xff]  }
  0x14   : > { %357 = vmatprep.subr.bf16.mxu0 %v689_v1  ;;  %605 = vmatprep.subr.bf16.mxu1 %v689_v1 }
  0x17   : > { %358 = vmatpush1.bf16.msra.mxu0 %v632_v7  ;;  %614 = vmatpush1.bf16.msra.mxu1 %v632_v7 }
  0x18   : > { %359 = vmatprep.subr.bf16.mxu0 %v689_v1  ;;  %606 = vmatprep.subr.bf16.mxu1 %v689_v1 }
  0x1b   : > { %360 = vmatpush1.bf16.msra.mxu0 %v633_v8  ;;  %615 = vmatpush1.bf16.msra.mxu1 %v633_v8 }
  0x1c   : > { %361 = vmatprep.subr.bf16.mxu0 %v689_v1  ;;  %607 = vmatprep.subr.bf16.mxu1 %v689_v1 }
  0x1f   : > { %362 = vmatpush1.bf16.msra.mxu0 %v634_v9  ;;  %616 = vmatpush1.bf16.msra.mxu1 %v634_v9 }
  0x20   : > { %363 = vmatprep.subr.bf16.mxu0 %v689_v1  ;;  %608 = vmatprep.subr.bf16.mxu1 %v689_v1 }
  0x23   : > { %364 = vmatpush1.bf16.msra.mxu0 %v635_v10  ;;  %617 = vmatpush1.bf16.msra.mxu1 %v635_v10 }
  0x24   : > { %365 = vmatprep.subr.bf16.mxu0 %v689_v1  ;;  %609 = vmatprep.subr.bf16.mxu1 %v689_v1 }
  0x27   : > { %366 = vmatpush1.bf16.msra.mxu0 %v636_v11  ;;  %618 = vmatpush1.bf16.msra.mxu1 %v636_v11 }
  0x2a   : > { %382 = vmatmul.mubr.bf16.vlgmr.msra.gmra.mrb[0].mxu0 %v637_v12  ;;  %398 = vmatmul.mubr.bf16.vlgmr.msra.gmra.mrb[0].mxu1 %v640_v13 }
  0x2b   : > { %585 = vmatprep.mubr.msk.bf16.mxu0 %vm336_vm0, %v643_v14  ;;  %587 = vmatprep.mubr.msk.bf16.mxu1 %vm336_vm0, %v645_v15 }
  0x32   : > { %390 = vmatmul.mubr.bf16.gmra.mrb[4].mxu0 %v647_v16  ;;  %406 = vmatmul.mubr.bf16.gmra.mrb[4].mxu1 %v648_v17 }
  0xfd   : > { %v383_v19 = vpop.f32.mrb[0].mxu0  ;;  %v399_v21 = vpop.f32.mrb[0].mxu1 }
  0xfe   : > { %v384_v22 = vadd.f32 %v566_v18, %v383_v19  ;;  %v400_v23 = vadd.f32 %v566_v18, %v399_v21  ;;  %v385_v24 = vpop.f32.mrb[1].mxu0  ;;  %v401_v25 = vpop.f32.mrb[1].mxu1 }
  0xff   : > { %v386_v26 = vpop.f32.mrb[2].mxu0  ;;  %v402_v27 = vpop.f32.mrb[2].mxu1 }
 0x100   : > { %v779_v28 = vadd.f32 %v588_v20, %v384_v22  ;;  %v781_v29 = vadd.f32 %v588_v20, %v400_v23  ;;  %v387_v30 = vadd.f32 %v566_v18, %v386_v26  ;;  %v403_v31 = vadd.f32 %v566_v18, %v402_v27  ;;  %v388_v32 = vpop.f32.mrb[3].mxu0  ;;  %v404_v33 = vpop.f32.mrb[3].mxu1 }
 0x102   : > { %v589_v34 = vmul.f32 -1.442695, %v779_v28  ;;  %v593_v35 = vmul.f32 -1.442695, %v781_v29  ;;  %v785_v36 = vadd.f32 %v588_v20, %v387_v30  ;;  %v787_v37 = vadd.f32 %v588_v20, %v403_v31 }
 0x104   : > { %649 = vpow2.f32 %v589_v34  ;;  %v590_v38 = vmul.f32 -1.442695, %v785_v36  ;;  %v594_v39 = vmul.f32 -1.442695, %v787_v37 }
 0x105   : > { %651 = vpow2.f32 %v593_v35  ;;  %v391_v40 = vpop.f32.mrb[4].mxu0  ;;  %v407_v41 = vpop.f32.mrb[4].mxu1 }
 0x106   : > { %653 = vpow2.f32 %v590_v38  ;;  %v392_v42 = vadd.f32 %v566_v18, %v391_v40  ;;  %v408_v43 = vadd.f32 %v566_v18, %v407_v41  ;;  %v393_v44 = vpop.f32.mrb[5].mxu0  ;;  %v409_v45 = vpop.f32.mrb[5].mxu1 }
 0x107   : > { %655 = vpow2.f32 %v594_v39  ;;  %v394_v46 = vpop.f32.mrb[6].mxu0  ;;  %v410_v47 = vpop.f32.mrb[6].mxu1 }
 0x108   : > { %v423_v48 = vadd.f32 %v588_v20, %v392_v42  ;;  %v427_v49 = vadd.f32 %v588_v20, %v408_v43  ;;  %v395_v50 = vadd.f32 %v566_v18, %v394_v46  ;;  %v411_v51 = vadd.f32 %v566_v18, %v410_v47  ;;  %v396_v52 = vpop.f32.mrb[7].mxu0  ;;  %v412_v53 = vpop.f32.mrb[7].mxu1 }
 0x10a   : > { %v591_v54 = vmul.f32 -1.442695, %v423_v48  ;;  %v595_v55 = vmul.f32 -1.442695, %v427_v49  ;;  %v424_v56 = vadd.f32 %v588_v20, %v395_v50  ;;  %v428_v57 = vadd.f32 %v588_v20, %v411_v51 }
 0x10c   : > { %657 = vpow2.f32 %v591_v54  ;;  %v592_v58 = vmul.f32 -1.442695, %v424_v56  ;;  %v596_v59 = vmul.f32 -1.442695, %v428_v57 }
 0x10d   : > { %659 = vpow2.f32 %v595_v55 }
 0x10e   : > { %v650_v60 = vpop.eup %649  ;;  %661 = vpow2.f32 %v592_v58 }
 0x10f   : > { %v652_v61 = vpop.eup %651  ;;  %v453_v62 = vadd.f32 1.0, %v650_v60  ;;  %663 = vpow2.f32 %v596_v59 }
 0x110   : > { %v654_v63 = vpop.eup %653  ;;  %v457_v0 = vadd.f32 1.0, %v652_v61 }
 0x111   : > { %v656_v1 = vpop.eup %655  ;;  %665 = vrcp.f32 %v453_v62  ;;  %v454_v2 = vadd.f32 1.0, %v654_v63 }
 0x112   : > { %667 = vrcp.f32 %v457_v0  ;;  %v458_v3 = vadd.f32 1.0, %v656_v1 }
 0x113   : > { %669 = vrcp.f32 %v454_v2 }
 0x114   : > { %671 = vrcp.f32 %v458_v3 }
 0x116   : > { %v658_v4 = vpop.eup %657 }
 0x117   : > { %v660_v5 = vpop.eup %659  ;;  %v455_v6 = vadd.f32 1.0, %v658_v4 }
 0x118   : > { %v662_v7 = vpop.eup %661  ;;  %v459_v8 = vadd.f32 1.0, %v660_v5 }
 0x119   : > { %v664_v9 = vpop.eup %663  ;;  %673 = vrcp.f32 %v455_v6  ;;  %v456_v10 = vadd.f32 1.0, %v662_v7 }
 0x11a   : > { %675 = vrcp.f32 %v459_v8  ;;  %v460_v11 = vadd.f32 1.0, %v664_v9 }
 0x11b   : > { %v666_v12 = vpop.eup %665  ;;  %677 = vrcp.f32 %v456_v10 }
 0x11c   : > { %v668_v13 = vpop.eup %667  ;;  %v477_v14 = vmul.f32 %v666_v12, %v779_v28  ;;  %679 = vrcp.f32 %v460_v11 }
 0x11d   : > { %v670_v15 = vpop.eup %669  ;;  %v481_v16 = vmul.f32 %v668_v13, %v781_v29 }
 0x11e   : > { %v672_v17 = vpop.eup %671  ;;  %485 = vst.msk [vmem:[%s211_s23] sm:$0xff] %vm336_vm0, %v477_v14  ;;  %v478_v18 = vmul.f32 %v670_v15, %v785_v36 }
 0x11f   : > { %489 = vst.msk [vmem:[%s211_s23 + $0x20] sm:$0xff] %vm336_vm0, %v481_v16  ;;  %v482_v19 = vmul.f32 %v672_v17, %v787_v37 }
 0x120   : > { %486 = vst.msk [vmem:[%s211_s23 + $0x8] sm:$0xff] %vm336_vm0, %v478_v18 }
 0x121   : > { %490 = vst.msk [vmem:[%s211_s23 + $0x28] sm:$0xff] %vm336_vm0, %v482_v19 }
 0x123   : > { %v674_v20 = vpop.eup %673 }
 0x124   : > { %v676_v21 = vpop.eup %675  ;;  %v479_v22 = vmul.f32 %v674_v20, %v423_v48 }
 0x125   : > { %v678_v23 = vpop.eup %677  ;;  %v483_v24 = vmul.f32 %v676_v21, %v427_v49 }
 0x126   : > { %v680_v25 = vpop.eup %679  ;;  %487 = vst.msk [vmem:[%s211_s23 + $0x10] sm:$0xff] %vm336_vm0, %v479_v22  ;;  %v480_v26 = vmul.f32 %v678_v23, %v424_v56 }
 0x127   : > { %491 = vst.msk [vmem:[%s211_s23 + $0x30] sm:$0xff] %vm336_vm0, %v483_v24  ;;  %v484_v27 = vmul.f32 %v680_v25, %v428_v57 }
 0x128   : > { %488 = vst.msk [vmem:[%s211_s23 + $0x18] sm:$0xff] %vm336_vm0, %v480_v26 }
 0x129   : > { %492 = vst.msk [vmem:[%s211_s23 + $0x38] sm:$0xff] %vm336_vm0, %v484_v27 }
 0x12a PF: > { %s14_s15 = sadd.s32 1, %s687_s15  }
 0x12b   : > { %p11_p4 = scmp.ge.s32.totalorder %s14_s15, 4  }
 0x12d   :  { %13 = sbr.rel (!%p11_p4) target bundleno = 1 (0x1), region = 69 }

// kernel: _fwd.44
= control target key start
LH: loop header
LB: loop body
LE: loop exit
PB: predicated region body
PF: predicated region fallthrough
CT: control target
= control target key end

     0   :  { %s505_s15 = smov 0   ;;  %s566_s0 = inlined_call_operand.vmem [shape: bf16[2,16,144], index: 0, kind: input, shape index: {}]   ;;  %s567_s1 = inlined_call_operand.vmem [shape: bf16[144,16], index: 1, kind: input, shape index: {}]   ;;  %s568_s2 = inlined_call_operand.vmem [shape: f32[1,1,16], index: 2, kind: input, shape index: {}]   ;;  %s569_s3 = inlined_call_operand.vmem [shape: f32[2,1,16], index: 3, kind: input, shape index: {}]   ;;  %s570_s4 = inlined_call_operand.vmem [shape: f32[2,16,16], index: 4, kind: output, shape index: {}]  }
   0x1 LB: > { %s423_s16 = sadd.s32 4294967295, %s477_s15   ;;  %p427_p0 = scmp.ge.s32.totalorder %s477_s15, 1  ;;  %s477_s15 = sphi %s505_s15, %s14_s15  }
   0x2   : > { %p170_p1 = scmp.lt.s32.totalorder %s477_s15, 3 }
   0x4   : > { %p171_p2 = pnand %p427_p0, %p170_p1 }
   0x5   : > { %v459_v0 = vld [vmem:[%s567_s1] sm:$0xff] (!%p171_p2)   ;;  %v479_v1 = vmov (!%p171_p2), 0   ;;  %p199_p3 = scmp.lt.s32.totalorder (!%p171_p2), %s423_s16, 1  ;;  %v460_v2 = vld [vmem:[%s567_s1 + $0x8] sm:$0xff] (!%p171_p2)   ;;  %v461_v3 = vld [vmem:[%s567_s1 + $0x10] sm:$0xff] (!%p171_p2)   ;;  %vm303_vm0 = vcmask (!%p171_p2), 130048  }
   0x6   : > { %174 = sbr.rel (%p171_p2) target bundleno = 261 (0x105), region = 36  ;;  %307 = vmatprep.subr.bf16.mxu0 (!%p171_p2), %v479_v1  ;;  %v462_v4 = vld [vmem:[%s567_s1 + $0x18] sm:$0xff] (!%p171_p2)   ;;  %v463_v6 = vld [vmem:[%s567_s1 + $0x20] sm:$0xff] (!%p171_p2)   ;;  %v464_v7 = vld [vmem:[%s567_s1 + $0x28] sm:$0xff] (!%p171_p2)  }
   0x7   : > { %308 = vmatpush1.bf16.msra.mxu0 (!%p171_p2), %v459_v0  ;;  %v465_v8 = vld [vmem:[%s567_s1 + $0x30] sm:$0xff] (!%p171_p2)   ;;  %v466_v9 = vld [vmem:[%s567_s1 + $0x38] sm:$0xff] (!%p171_p2)   ;;  %v467_v10 = vld [vmem:[%s567_s1 + $0x40] sm:$0xff] (!%p171_p2)  }
   0x8   : > { %309 = vmatprep.subr.bf16.mxu0 (!%p171_p2), %v479_v1  ;;  %v432_v12 = vld [vmem:[%s568_s2] ss:$0 sm:$0xff] (!%p171_p2) }
   0xb   : > { %310 = vmatpush1.bf16.msra.mxu0 (!%p171_p2), %v460_v2 }
   0xc   : > { %311 = vmatprep.subr.bf16.mxu0 (!%p171_p2), %v479_v1 }
   0xd   : > { %s572_s16 = smov (!%p199_p3, %s423_s16), 1 }
   0xe   : > { %s448_s21 = sshll.u32 %s572_s16, 4  ;;  %s206_s17 = scalar_lea.vmem %s569_s3, %s572_s16 }
   0xf   : > { %s203_s26 = scalar_lea.vmem %s566_s0, %s448_s21  ;;  %312 = vmatpush1.bf16.msra.mxu0 %v461_v3  ;;  %v445_v14 = vld [vmem:[%s206_s17] ss:$0 sm:$0xff]  ;;  %s211_s23 = scalar_lea.vmem %s570_s4, %s448_s21 }
  0x10   : > { %v470_v5 = vld [vmem:[%s203_s26 + $0x4] ss:$8 sps:$4 sm:$0xff]   ;;  %313 = vmatprep.subr.bf16.mxu0 %v479_v1  ;;  %v468_v11 = vld [vmem:[%s203_s26] ss:$8 sps:$4 sm:$0xff]  }
  0x11   : > { %444 = vmatprep.mubr.msk.bf16.mxu0 %vm303_vm0, %v470_v5 }
  0x13   : > { %314 = vmatpush1.bf16.msra.mxu0 %v462_v4 }
  0x14   : > { %315 = vmatprep.subr.bf16.mxu0 %v479_v1 }
  0x17   : > { %316 = vmatpush1.bf16.msra.mxu0 %v463_v6 }
  0x18   : > { %317 = vmatprep.subr.bf16.mxu0 %v479_v1 }
  0x1b   : > { %318 = vmatpush1.bf16.msra.mxu0 %v464_v7 }
  0x1c   : > { %319 = vmatprep.subr.bf16.mxu0 %v479_v1 }
  0x1f   : > { %320 = vmatpush1.bf16.msra.mxu0 %v465_v8 }
  0x20   : > { %321 = vmatprep.subr.bf16.mxu0 %v479_v1 }
  0x23   : > { %322 = vmatpush1.bf16.msra.mxu0 %v466_v9 }
  0x24   : > { %323 = vmatprep.subr.bf16.mxu0 %v479_v1 }
  0x27   : > { %324 = vmatpush1.bf16.msra.mxu0 %v467_v10 }
  0x2a   : > { %340 = vmatmul.mubr.bf16.vlgmr.msra.gmra.mrb[0].mxu0 %v468_v11 }
  0xfd   : > { %v341_v13 = vpop.f32.mrb[0].mxu0 }
  0xfe   : > { %v342_v15 = vadd.f32 %v432_v12, %v341_v13  ;;  %v343_v16 = vpop.f32.mrb[1].mxu0 }
  0xff   : > { %v344_v17 = vpop.f32.mrb[2].mxu0 }
 0x100   : > { %v355_v18 = vadd.f32 %v445_v14, %v342_v15  ;;  %v345_v19 = vadd.f32 %v432_v12, %v344_v17  ;;  %v346_v20 = vpop.f32.mrb[3].mxu0 }
 0x102   : > { %357 = vst.msk [vmem:[%s211_s23] sm:$0xff] %vm303_vm0, %v355_v18  ;;  %v356_v21 = vadd.f32 %v445_v14, %v345_v19 }
 0x104   : > { %358 = vst.msk [vmem:[%s211_s23 + $0x8] sm:$0xff] %vm303_vm0, %v356_v21 }
 0x105 PF: > { %s14_s15 = sadd.s32 1, %s477_s15  }
 0x106   : > { %p11_p4 = scmp.ge.s32.totalorder %s14_s15, 4  }
 0x108   :  { %13 = sbr.rel (!%p11_p4) target bundleno = 1 (0x1), region = 69 }

// kernel: _fwd.45
= control target key start
LH: loop header
LB: loop body
LE: loop exit
PB: predicated region body
PF: predicated region fallthrough
CT: control target
= control target key end

     0   :  { %s530_s15 = smov 0   ;;  %s588_s0 = inlined_call_operand.vmem [shape: bf16[2,16,144], index: 0, kind: input, shape index: {}]   ;;  %s589_s1 = inlined_call_operand.vmem [shape: bf16[144,32], index: 1, kind: input, shape index: {}]   ;;  %s590_s2 = inlined_call_operand.vmem [shape: f32[1,1,32], index: 2, kind: input, shape index: {}]   ;;  %s591_s3 = inlined_call_operand.vmem [shape: f32[2,1,32], index: 3, kind: input, shape index: {}]   ;;  %s592_s4 = inlined_call_operand.vmem [shape: f32[2,16,32], index: 4, kind: output, shape index: {}]  }
   0x1 LB: > { %s438_s16 = sadd.s32 4294967295, %s502_s15   ;;  %p442_p0 = scmp.ge.s32.totalorder %s502_s15, 1  ;;  %s502_s15 = sphi %s530_s15, %s14_s15  }
   0x2   : > { %p170_p1 = scmp.lt.s32.totalorder %s502_s15, 3 }
   0x4   : > { %p171_p2 = pnand %p442_p0, %p170_p1 }
   0x5   : > { %v476_v0 = vld [vmem:[%s589_s1] sm:$0xff] (!%p171_p2)   ;;  %v504_v1 = vmov (!%p171_p2), 0   ;;  %p199_p3 = scmp.lt.s32.totalorder (!%p171_p2), %s438_s16, 1  ;;  %v477_v2 = vld [vmem:[%s589_s1 + $0x8] sm:$0xff] (!%p171_p2)   ;;  %v478_v3 = vld [vmem:[%s589_s1 + $0x10] sm:$0xff] (!%p171_p2)   ;;  %vm303_vm0 = vcmask (!%p171_p2), 130048  }
   0x6   : > { %174 = sbr.rel (%p171_p2) target bundleno = 289 (0x121), region = 36  ;;  %307 = vmatprep.subr.bf16.mxu0 (!%p171_p2), %v504_v1  ;;  %v479_v4 = vld [vmem:[%s589_s1 + $0x18] sm:$0xff] (!%p171_p2)   ;;  %v480_v6 = vld [vmem:[%s589_s1 + $0x20] sm:$0xff] (!%p171_p2)   ;;  %v481_v7 = vld [vmem:[%s589_s1 + $0x28] sm:$0xff] (!%p171_p2)   ;;  %vm371_vm1 = vcmask (!%p171_p2), 261120  }
   0x7   : > { %308 = vmatpush1.bf16.msra.mxu0 (!%p171_p2), %v476_v0  ;;  %v482_v8 = vld [vmem:[%s589_s1 + $0x30] sm:$0xff] (!%p171_p2)   ;;  %v483_v9 = vld [vmem:[%s589_s1 + $0x38] sm:$0xff] (!%p171_p2)   ;;  %v484_v10 = vld [vmem:[%s589_s1 + $0x40] sm:$0xff] (!%p171_p2)  }
   0x8   : > { %309 = vmatprep.subr.bf16.mxu0 (!%p171_p2), %v504_v1  ;;  %v447_v12 = vld [vmem:[%s590_s2] ss:$0 sm:$0xff] (!%p171_p2) }
   0xb   : > { %310 = vmatpush1.bf16.msra.mxu0 (!%p171_p2), %v477_v2 }
   0xc   : > { %311 = vmatprep.subr.bf16.mxu0 (!%p171_p2), %v504_v1 }
   0xd   : > { %s594_s16 = smov (!%p199_p3, %s438_s16), 1 }
   0xe   : > { %s465_s21 = sshll.u32 %s594_s16, 4  ;;  %s206_s17 = scalar_lea.vmem %s591_s3, %s594_s16 }
   0xf   : > { %s203_s26 = scalar_lea.vmem %s588_s0, %s465_s21  ;;  %312 = vmatpush1.bf16.msra.mxu0 %v478_v3  ;;  %v460_v14 = vld [vmem:[%s206_s17] ss:$0 sm:$0xff]  ;;  %s211_s23 = scalar_lea.vmem %s592_s4, %s465_s21 }
  0x10   : > { %v487_v5 = vld [vmem:[%s203_s26 + $0x4] ss:$8 sps:$4 sm:$0xff]   ;;  %313 = vmatprep.subr.bf16.mxu0 %v504_v1  ;;  %v485_v11 = vld [vmem:[%s203_s26] ss:$8 sps:$4 sm:$0xff]  }
  0x11   : > { %459 = vmatprep.mubr.msk.bf16.mxu0 %vm303_vm0, %v487_v5 }
  0x13   : > { %314 = vmatpush1.bf16.msra.mxu0 %v479_v4 }
  0x14   : > { %315 = vmatprep.subr.bf16.mxu0 %v504_v1 }
  0x17   : > { %316 = vmatpush1.bf16.msra.mxu0 %v480_v6 }
  0x18   : > { %317 = vmatprep.subr.bf16.mxu0 %v504_v1 }
  0x1b   : > { %318 = vmatpush1.bf16.msra.mxu0 %v481_v7 }
  0x1c   : > { %319 = vmatprep.subr.bf16.mxu0 %v504_v1 }
  0x1f   : > { %320 = vmatpush1.bf16.msra.mxu0 %v482_v8 }
  0x20   : > { %321 = vmatprep.subr.bf16.mxu0 %v504_v1 }
  0x23   : > { %322 = vmatpush1.bf16.msra.mxu0 %v483_v9 }
  0x24   : > { %323 = vmatprep.subr.bf16.mxu0 %v504_v1 }
  0x27   : > { %324 = vmatpush1.bf16.msra.mxu0 %v484_v10 }
  0x2a   : > { %340 = vmatmul.mubr.bf16.vlgmr.msra.gmra.mrb[0].mxu0 %v485_v11 }
  0xfd   : > { %v341_v13 = vpop.f32.mrb[0].mxu0 }
  0xfe   : > { %v342_v15 = vadd.f32 %v447_v12, %v341_v13  ;;  %v343_v16 = vpop.f32.mrb[1].mxu0 }
  0xff   : > { %v344_v17 = vpop.f32.mrb[2].mxu0 }
 0x100   : > { %v355_v18 = vadd.f32 %v460_v14, %v342_v15  ;;  %v345_v19 = vadd.f32 %v447_v12, %v344_v17  ;;  %v346_v20 = vpop.f32.mrb[3].mxu0 }
 0x102   : > { %v461_v21 = vmul.f32 -1.442695, %v355_v18  ;;  %v356_v22 = vadd.f32 %v460_v14, %v345_v19 }
 0x104   : > { %488 = vpow2.f32 %v461_v21  ;;  %v462_v23 = vmul.f32 -1.442695, %v356_v22 }
 0x106   : > { %490 = vpow2.f32 %v462_v23 }
 0x10e   : > { %v489_v24 = vpop.eup %488 }
 0x10f   : > { %v363_v25 = vadd.f32 1.0, %v489_v24 }
 0x110   : > { %v491_v26 = vpop.eup %490 }
 0x111   : > { %492 = vrcp.f32 %v363_v25  ;;  %v364_v27 = vadd.f32 1.0, %v491_v26 }
 0x113   : > { %494 = vrcp.f32 %v364_v27 }
 0x11b   : > { %v493_v28 = vpop.eup %492 }
 0x11c   : > { %v369_v29 = vmul.f32 %v493_v28, %v355_v18 }
 0x11d   : > { %v495_v30 = vpop.eup %494 }
 0x11e   : > { %372 = vst.msk [vmem:[%s211_s23] sm:$0xff] %vm371_vm1, %v369_v29  ;;  %v370_v31 = vmul.f32 %v495_v30, %v356_v22 }
 0x120   : > { %373 = vst.msk [vmem:[%s211_s23 + $0x8] sm:$0xff] %vm371_vm1, %v370_v31 }
 0x121 PF: > { %s14_s15 = sadd.s32 1, %s502_s15  }
 0x122   : > { %p11_p4 = scmp.ge.s32.totalorder %s14_s15, 4  }
 0x124   :  { %13 = sbr.rel (!%p11_p4) target bundleno = 1 (0x1), region = 69 }

// kernel: _fwd.46
= control target key start
LH: loop header
LB: loop body
LE: loop exit
PB: predicated region body
PF: predicated region fallthrough
CT: control target
= control target key end

     0   :  { %s704_s15 = smov 0   ;;  %s789_s0 = inlined_call_operand.vmem [shape: bf16[2,16,288], index: 0, kind: input, shape index: {}]   ;;  %s790_s1 = inlined_call_operand.vmem [shape: bf16[288,32], index: 1, kind: input, shape index: {}]   ;;  %s791_s2 = inlined_call_operand.vmem [shape: f32[1,1,32], index: 2, kind: input, shape index: {}]   ;;  %s792_s3 = inlined_call_operand.vmem [shape: f32[2,1,32], index: 3, kind: input, shape index: {}]   ;;  %s793_s4 = inlined_call_operand.vmem [shape: f32[2,16,32], index: 4, kind: output, shape index: {}]  }
   0x1 LB: > { %s558_s16 = sadd.s32 4294967295, %s675_s15   ;;  %p562_p0 = scmp.ge.s32.totalorder %s675_s15, 1  ;;  %s675_s15 = sphi %s704_s15, %s14_s15  }
   0x2   : > { %p170_p1 = scmp.lt.s32.totalorder %s675_s15, 3 }
   0x4   : > { %p171_p2 = pnand %p562_p0, %p170_p1 }
   0x5   : > { %v639_v0 = vld [vmem:[%s790_s1 + $0x40] sm:$0xff] (!%p171_p2)   ;;  %v677_v2 = vmov (!%p171_p2), 0.0   ;;  %v641_v3 = vld [vmem:[%s790_s1 + $0x48] sm:$0xff] (!%p171_p2)   ;;  %p199_p3 = scmp.lt.s32.totalorder (!%p171_p2), %s558_s16, 1  ;;  %vm678_vm0 = vmmov (!%p171_p2), 0   ;;  %v643_v5 = vld [vmem:[%s790_s1 + $0x50] sm:$0xff] (!%p171_p2)  }
   0x6   : > { %174 = sbr.rel (%p171_p2) target bundleno = 290 (0x122), region = 36  ;;  %v640_v1 = vld [vmem:[%s790_s1] sm:$0xff] (!%p171_p2)   ;;  %620 = vmatprep.subr.bf16.mxu1 (!%p171_p2), %v677_v2  ;;  %595 = vmatprep.subr.bf16.mxu0 (!%p171_p2), %v639_v0  ;;  %v642_v4 = vld [vmem:[%s790_s1 + $0x8] sm:$0xff] (!%p171_p2)   ;;  %v644_v6 = vld [vmem:[%s790_s1 + $0x10] sm:$0xff] (!%p171_p2)   ;;  %vm383_vm1 = vcmask (!%p171_p2), 261120  }
   0x7   : > { %596 = vmatpush3.bf16.msra.mxu0 (!%p171_p2), %v640_v1  ;;  %624 = vmatprep.mubr.msk.bf16.mxu1 (!%p171_p2), %vm678_vm0, %v677_v2  ;;  %v645_v7 = vld [vmem:[%s790_s1 + $0x58] sm:$0xff] (!%p171_p2)   ;;  %v647_v9 = vld [vmem:[%s790_s1 + $0x60] sm:$0xff] (!%p171_p2)   ;;  %v649_v12 = vld [vmem:[%s790_s1 + $0x68] sm:$0xff] (!%p171_p2)  }
   0x8   : > { %597 = vmatprep.subr.bf16.mxu0 (!%p171_p2), %v641_v3  ;;  %v646_v8 = vld [vmem:[%s790_s1 + $0x18] sm:$0xff] (!%p171_p2)   ;;  %v653_v10 = vld [vmem:[%s790_s1 + $0x80] sm:$0xff] (!%p171_p2)   ;;  %v650_v13 = vld [vmem:[%s790_s1 + $0x28] sm:$0xff] (!%p171_p2)  }
   0x9   : > { %v648_v11 = vld [vmem:[%s790_s1 + $0x20] sm:$0xff] (!%p171_p2)   ;;  %621 = vmatpush3.bf16.msra.mxu1 (!%p171_p2), %v653_v10  ;;  %v659_v15 = vld [vmem:[%s790_s1 + $0x88] sm:$0xff] (!%p171_p2)   ;;  %v651_v16 = vld [vmem:[%s790_s1 + $0x70] sm:$0xff] (!%p171_p2)  }
   0xa   : > { %622 = vmatprep.subr.bf16.mxu1 (!%p171_p2), %v677_v2  ;;  %v652_v18 = vld [vmem:[%s790_s1 + $0x30] sm:$0xff] (!%p171_p2)   ;;  %v654_v19 = vld [vmem:[%s790_s1 + $0x78] sm:$0xff] (!%p171_p2)   ;;  %v566_v28 = vld [vmem:[%s791_s2] ss:$0 sm:$0xff] (!%p171_p2) }
   0xb   : > { %598 = vmatpush3.bf16.msra.mxu0 (!%p171_p2), %v642_v4  ;;  %v655_v20 = vld [vmem:[%s790_s1 + $0x38] sm:$0xff] (!%p171_p2)  }
   0xc   : > { %599 = vmatprep.subr.bf16.mxu0 (!%p171_p2), %v643_v5 }
   0xd   : > { %s795_s16 = smov (!%p199_p3, %s558_s16), 1  ;;  %623 = vmatpush3.bf16.msra.mxu1 %v659_v15 }
   0xe   : > { %s628_s7 = smul.u32 24, %s795_s16  ;;  %s206_s11 = scalar_lea.vmem %s792_s3, %s795_s16 }
   0xf   : > { %600 = vmatpush3.bf16.msra.mxu0 %v644_v6  ;;  %v589_v34 = vld [vmem:[%s206_s11] ss:$0 sm:$0xff]  ;;  %s594_s12 = sshll.u32 %s795_s16, 4 }
  0x10   : > { %601 = vmatprep.subr.bf16.mxu0 %v645_v7  ;;  %s203_s18 = scalar_lea.vmem %s789_s0, %s628_s7  ;;  %s211_s17 = scalar_lea.vmem %s793_s4, %s594_s12 }
  0x11   : > { %v658_v14 = vld [vmem:[%s203_s18 + $0x4] ss:$12 sps:$4 sm:$0xff]   ;;  %v660_v17 = vld [vmem:[%s203_s18 + $0x8] ss:$12 sps:$4 sm:$0xff]   ;;  %v656_v21 = vld [vmem:[%s203_s18] ss:$12 sps:$4 sm:$0xff]  }
  0x12   : > { %419 = vmatprep.mubr.bf16.mxu0 %v658_v14  ;;  %625 = vmatmul.mubr.msk.bf16.vlgmr.msra.gmra.mrb[0].mxu1 %vm383_vm1, %v660_v17 }
  0x13   : > { %602 = vmatpush3.bf16.msra.mxu0 %v646_v8 }
  0x14   : > { %603 = vmatprep.subr.bf16.mxu0 %v647_v9 }
  0x17   : > { %604 = vmatpush3.bf16.msra.mxu0 %v648_v11 }
  0x18   : > { %605 = vmatprep.subr.bf16.mxu0 %v649_v12 }
  0x1b   : > { %606 = vmatpush3.bf16.msra.mxu0 %v650_v13 }
  0x1c   : > { %607 = vmatprep.subr.bf16.mxu0 %v651_v16 }
  0x1f   : > { %608 = vmatpush3.bf16.msra.mxu0 %v652_v18 }
  0x20   : > { %609 = vmatprep.subr.bf16.mxu0 %v654_v19 }
  0x23   : > { %610 = vmatpush3.bf16.msra.mxu0 %v655_v20 }
  0x26   : > { %420 = vmatmul.mubr.bf16.vlgmr.msra.gmra.mrb[0].mxu0 %v656_v21 }
  0xe5   : > { %v462_v22 = vpop.f32.mrb[0].mxu1 }
  0xe6   : > { %v626_v23 = vpop.f32.mrb[1].mxu1 }
  0xe7   : > { %v465_v24 = vpop.f32.mrb[2].mxu1 }
  0xe8   : > { %v627_v25 = vpop.f32.mrb[3].mxu1 }
  0xf9   : > { %v611_v26 = vpop.f32.mrb[0].mxu0 }
  0xfa   : > { %v612_v27 = vpop.f32.mrb[1].mxu0 }
  0xfb   : > { %v613_v29 = vadd.f32 %v612_v27, %v611_v26  ;;  %v614_v30 = vpop.f32.mrb[2].mxu0 }
  0xfc   : > { %v615_v31 = vpop.f32.mrb[3].mxu0 }
  0xfd   : > { %v422_v32 = vadd.f32 %v613_v29, %v566_v28  ;;  %v616_v33 = vadd.f32 %v615_v31, %v614_v30 }
  0xff   : > { %v463_v35 = vadd.f32 %v462_v22, %v422_v32  ;;  %v425_v36 = vadd.f32 %v616_v33, %v566_v28 }
 0x101   : > { %v476_v37 = vadd.f32 %v589_v34, %v463_v35  ;;  %v466_v38 = vadd.f32 %v465_v24, %v425_v36 }
 0x103   : > { %v590_v39 = vmul.f32 -1.442695, %v476_v37  ;;  %v477_v40 = vadd.f32 %v589_v34, %v466_v38 }
 0x105   : > { %661 = vpow2.f32 %v590_v39  ;;  %v591_v41 = vmul.f32 -1.442695, %v477_v40 }
 0x107   : > { %663 = vpow2.f32 %v591_v41 }
 0x10f   : > { %v662_v42 = vpop.eup %661 }
 0x110   : > { %v484_v43 = vadd.f32 1.0, %v662_v42 }
 0x111   : > { %v664_v44 = vpop.eup %663 }
 0x112   : > { %665 = vrcp.f32 %v484_v43  ;;  %v485_v45 = vadd.f32 1.0, %v664_v44 }
 0x114   : > { %667 = vrcp.f32 %v485_v45 }
 0x11c   : > { %v666_v46 = vpop.eup %665 }
 0x11d   : > { %v490_v47 = vmul.f32 %v666_v46, %v476_v37 }
 0x11e   : > { %v668_v48 = vpop.eup %667 }
 0x11f   : > { %492 = vst.msk [vmem:[%s211_s17] sm:$0xff] %vm383_vm1, %v490_v47  ;;  %v491_v49 = vmul.f32 %v668_v48, %v477_v40 }
 0x121   : > { %493 = vst.msk [vmem:[%s211_s17 + $0x8] sm:$0xff] %vm383_vm1, %v491_v49 }
 0x122 PF: > { %s14_s15 = sadd.s32 1, %s675_s15  }
 0x123   : > { %p11_p4 = scmp.ge.s32.totalorder %s14_s15, 4  }
 0x125   :  { %13 = sbr.rel (!%p11_p4) target bundleno = 1 (0x1), region = 69 }

// kernel: _fwd.47
= control target key start
LH: loop header
LB: loop body
LE: loop exit
PB: predicated region body
PF: predicated region fallthrough
CT: control target
= control target key end

     0   :  { %s668_s15 = smov 0   ;;  %s750_s0 = inlined_call_operand.vmem [shape: bf16[2,4,288], index: 0, kind: input, shape index: {}]   ;;  %s751_s1 = inlined_call_operand.vmem [shape: bf16[288,32], index: 1, kind: input, shape index: {}]   ;;  %s752_s2 = inlined_call_operand.vmem [shape: f32[1,1,32], index: 2, kind: input, shape index: {}]   ;;  %s753_s3 = inlined_call_operand.vmem [shape: f32[2,1,32], index: 3, kind: input, shape index: {}]   ;;  %s754_s4 = inlined_call_operand.vmem [shape: f32[2,4,32], index: 4, kind: output, shape index: {}]  }
   0x1 LB: > { %s538_s16 = sadd.s32 4294967295, %s638_s15   ;;  %p542_p0 = scmp.ge.s32.totalorder %s638_s15, 1  ;;  %s638_s15 = sphi %s668_s15, %s14_s15  }
   0x2   : > { %p170_p1 = scmp.lt.s32.totalorder %s638_s15, 3 }
   0x4   : > { %p171_p2 = pnand %p542_p0, %p170_p1 }
   0x5   : > { %v613_v0 = vld [vmem:[%s751_s1 + $0x40] sm:$0xff] (!%p171_p2)   ;;  %v640_v2 = vmov (!%p171_p2), 0.0   ;;  %v615_v3 = vld [vmem:[%s751_s1 + $0x48] sm:$0xff] (!%p171_p2)   ;;  %p198_p3 = scmp.lt.s32.totalorder (!%p171_p2), %s538_s16, 1  ;;  %v617_v5 = vld [vmem:[%s751_s1 + $0x50] sm:$0xff] (!%p171_p2)   ;;  %vm641_vm0 = vmmov (!%p171_p2), 0   ;;  %v260_v11 = vlaneseq (!%p171_p2) }
   0x6   : > { %174 = sbr.rel (%p171_p2) target bundleno = 260 (0x104), region = 36  ;;  %v614_v1 = vld [vmem:[%s751_s1] sm:$0xff] (!%p171_p2)   ;;  %593 = vmatprep.subr.bf16.mxu1 (!%p171_p2), %v640_v2  ;;  %568 = vmatprep.subr.bf16.mxu0 (!%p171_p2), %v613_v0  ;;  %v616_v4 = vld [vmem:[%s751_s1 + $0x8] sm:$0xff] (!%p171_p2)   ;;  %v618_v6 = vld [vmem:[%s751_s1 + $0x10] sm:$0xff] (!%p171_p2)   ;;  %v642_v14 = vmov (!%p171_p2), 1983009808  }
   0x7   : > { %569 = vmatpush3.bf16.msra.mxu0 (!%p171_p2), %v614_v1  ;;  %597 = vmatprep.mubr.msk.bf16.mxu1 (!%p171_p2), %vm641_vm0, %v640_v2  ;;  %v619_v7 = vld [vmem:[%s751_s1 + $0x58] sm:$0xff] (!%p171_p2)   ;;  %v621_v9 = vld [vmem:[%s751_s1 + $0x60] sm:$0xff] (!%p171_p2)   ;;  %v623_v13 = vld [vmem:[%s751_s1 + $0x68] sm:$0xff] (!%p171_p2)   ;;  %v258_v15 = vunpack.c.l.s4 (!%p171_p2), %v642_v14  ;;  %v261_v16 = vshrl.u32 (!%p171_p2), %v260_v11, 7  ;;  %vm382_vm1 = vcmask (!%p171_p2), 261120   ;;  %vm474_vm2 = vcmask (!%p171_p2), 257024  }
   0x8   : > { %570 = vmatprep.subr.bf16.mxu0 (!%p171_p2), %v615_v3  ;;  %v620_v8 = vld [vmem:[%s751_s1 + $0x18] sm:$0xff] (!%p171_p2)   ;;  %v627_v10 = vld [vmem:[%s751_s1 + $0x80] sm:$0xff] (!%p171_p2)   ;;  %v631_v17 = vld [vmem:[%s751_s1 + $0x88] sm:$0xff] (!%p171_p2)  }
   0x9   : > { %v622_v12 = vld [vmem:[%s751_s1 + $0x20] sm:$0xff] (!%p171_p2)   ;;  %594 = vmatpush3.bf16.msra.mxu1 (!%p171_p2), %v627_v10  ;;  %v624_v18 = vld [vmem:[%s751_s1 + $0x28] sm:$0xff] (!%p171_p2)   ;;  %v625_v20 = vld [vmem:[%s751_s1 + $0x70] sm:$0xff] (!%p171_p2)   ;;  %v259_v22 = vunpack.c.0.s8 (!%p171_p2), %v258_v15 }
   0xa   : > { %595 = vmatprep.subr.bf16.mxu1 (!%p171_p2), %v640_v2  ;;  %v626_v24 = vld [vmem:[%s751_s1 + $0x30] sm:$0xff] (!%p171_p2)   ;;  %v628_v25 = vld [vmem:[%s751_s1 + $0x78] sm:$0xff] (!%p171_p2)   ;;  %v545_v36 = vld [vmem:[%s752_s2] ss:$0 sm:$0xff] (!%p171_p2) }
   0xb   : > { %571 = vmatpush3.bf16.msra.mxu0 (!%p171_p2), %v616_v4  ;;  %v262_v23 = vsub.s32 (!%p171_p2), %v259_v22, %v261_v16  ;;  %v629_v29 = vld [vmem:[%s751_s1 + $0x38] sm:$0xff] (!%p171_p2)  }
   0xc   : > { %572 = vmatprep.subr.bf16.mxu0 (!%p171_p2), %v617_v5 }
   0xd   : > { %s756_s16 = smov (!%p198_p3, %s538_s16), 1  ;;  %596 = vmatpush3.bf16.msra.mxu1 %v631_v17 }
   0xe   : > { %s601_s9 = smul.u32 6, %s756_s16  ;;  %s205_s11 = scalar_lea.vmem %s753_s3, %s756_s16 }
   0xf   : > { %573 = vmatpush3.bf16.msra.mxu0 %v618_v6  ;;  %s544_s12 = sshll.u32 %s756_s16, 2  ;;  %v565_v41 = vld [vmem:[%s205_s11] ss:$0 sm:$0xff] }
  0x10   : > { %574 = vmatprep.subr.bf16.mxu0 %v619_v7  ;;  %s202_s20 = scalar_lea.vmem %s750_s0, %s601_s9  ;;  %s209_s17 = scalar_lea.vmem %s754_s4, %s544_s12 }
  0x11   : > { %v211_v19 = vld [vmem:[%s202_s20] sm:$0x3f] }
  0x12   : > { %v256_v21 = vcombine.high %v211_v19, %v211_v19  ;;  %v263_v26 = vrot.slane %v211_v19, %v262_v23 }
  0x13   : > { %575 = vmatpush3.bf16.msra.mxu0 %v620_v8 }
  0x14   : > { %576 = vmatprep.subr.bf16.mxu0 %v621_v9  ;;  %v270_v27 = vrot.slane %v256_v21, %v262_v23  ;;  %v271_v28 = vcombine.high %v263_v26, %v263_v26 }
  0x16   : > { %598 = vmatmul.mubr.msk.bf16.vlgmr.msra.gmra.mrb[0].mxu1 %vm382_vm1, %v270_v27  ;;  %418 = vmatprep.mubr.bf16.mxu0 %v271_v28 }
  0x17   : > { %577 = vmatpush3.bf16.msra.mxu0 %v622_v12 }
  0x18   : > { %578 = vmatprep.subr.bf16.mxu0 %v623_v13 }
  0x1b   : > { %579 = vmatpush3.bf16.msra.mxu0 %v624_v18 }
  0x1c   : > { %580 = vmatprep.subr.bf16.mxu0 %v625_v20 }
  0x1f   : > { %581 = vmatpush3.bf16.msra.mxu0 %v626_v24 }
  0x20   : > { %582 = vmatprep.subr.bf16.mxu0 %v628_v25 }
  0x23   : > { %583 = vmatpush3.bf16.msra.mxu0 %v629_v29 }
  0x26   : > { %419 = vmatmul.mubr.bf16.vlgmr.msra.gmra.mrb[0].mxu0 %v263_v26 }
  0xe9   : > { %v460_v30 = vpop.f32.mrb[0].mxu1 }
  0xea   : > { %v599_v31 = vpop.f32.mrb[1].mxu1 }
  0xeb   : > { %v463_v32 = vpop.f32.mrb[2].mxu1 }
  0xec   : > { %v600_v33 = vpop.f32.mrb[3].mxu1 }
  0xf9   : > { %v584_v34 = vpop.f32.mrb[0].mxu0 }
  0xfa   : > { %v585_v35 = vpop.f32.mrb[1].mxu0 }
  0xfb   : > { %v586_v37 = vadd.f32 %v585_v35, %v584_v34  ;;  %v587_v38 = vpop.f32.mrb[2].mxu0 }
  0xfc   : > { %v588_v39 = vpop.f32.mrb[3].mxu0 }
  0xfd   : > { %v421_v40 = vadd.f32 %v586_v37, %v545_v36 }
  0xff   : > { %v461_v42 = vadd.f32 %v460_v30, %v421_v40 }
 0x101   : > { %v473_v43 = vadd.f32 %v565_v41, %v461_v42 }
 0x103   : > { %475 = vst.msk [vmem:[%s209_s17] sm:$0xf] %vm474_vm2, %v473_v43 }
 0x104 PF: > { %s14_s15 = sadd.s32 1, %s638_s15  }
 0x105   : > { %p11_p4 = scmp.ge.s32.totalorder %s14_s15, 4  }
 0x107   :  { %13 = sbr.rel (!%p11_p4) target bundleno = 1 (0x1), region = 69 }

// kernel: _fwd.51
= control target key start
LH: loop header
LB: loop body
LE: loop exit
PB: predicated region body
PF: predicated region fallthrough
CT: control target
= control target key end

     0   :  { %s1044_s13 = smov 0   ;;  %s1138_s0 = inlined_call_operand.vmem [shape: f32[2,4,32], index: 0, kind: input, shape index: {}]   ;;  %s1139_s1 = inlined_call_operand.vmem [shape: bf16[2,8,32], index: 1, kind: input, shape index: {}]   ;;  %s1140_s2 = inlined_call_operand.vmem [shape: bf16[32,32], index: 2, kind: input, shape index: {}]   ;;  %s1141_s3 = inlined_call_operand.vmem [shape: f32[1,1,32], index: 3, kind: input, shape index: {}, may-alias: {3,5,7,9}]   ;;  %s1142_s4 = inlined_call_operand.vmem [shape: bf16[32,32], index: 4, kind: input, shape index: {}]   ;;  %s1143_s5 = inlined_call_operand.vmem [shape: f32[1,1,32], index: 5, kind: input, shape index: {}, may-alias: {3,5,7,9}]   ;;  %s1144_s6 = inlined_call_operand.vmem [shape: bf16[32,32], index: 6, kind: input, shape index: {}]   ;;  %s1145_s7 = inlined_call_operand.vmem [shape: f32[1,1,32], index: 7, kind: input, shape index: {}, may-alias: {3,5,7,9}]   ;;  %s1146_s8 = inlined_call_operand.vmem [shape: bf16[32,32], index: 8, kind: input, shape index: {}]   ;;  %s1147_s9 = inlined_call_operand.vmem [shape: f32[1,1,32], index: 9, kind: input, shape index: {}, may-alias: {3,5,7,9}]   ;;  %s1148_s10 = inlined_call_operand.vmem [shape: f32[2,4,32], index: 10, kind: output, shape index: {}]  }
   0x1 LB: > { %s870_s14 = sadd.s32 4294967295, %s985_s13   ;;  %p874_p0 = scmp.ge.s32.totalorder %s985_s13, 1  ;;  %s985_s13 = sphi %s1044_s13, %s20_s13  }
   0x2   : > { %p320_p1 = scmp.lt.s32.totalorder %s985_s13, 3 }
   0x4   : > { %p321_p2 = pnand %p874_p0, %p320_p1 }
   0x5   : > { %v967_v0 = vld [vmem:[%s1142_s4] sm:$0xff] (!%p321_p2)   ;;  %v987_v1 = vmov (!%p321_p2), 0.0   ;;  %v969_v3 = vld [vmem:[%s1142_s4 + $0x8] sm:$0xff] (!%p321_p2)   ;;  %vm988_vm0 = vmmov (!%p321_p2), 0   ;;  %p360_p3 = scmp.lt.s32.totalorder (!%p321_p2), %s870_s14, 1  ;;  %vm399_vm1 = vcmask (!%p321_p2), 261120  }
   0x6   : > { %324 = sbr.rel (%p321_p2) target bundleno = 1193 (0x4a9), region = 60  ;;  %923 = vmatprep.subr.bf16.mxu1 (!%p321_p2), %v987_v1  ;;  %915 = vmatprep.subr.bf16.mxu0 (!%p321_p2), %v987_v1  ;;  %v968_v2 = vld [vmem:[%s1140_s2] sm:$0xff] (!%p321_p2)   ;;  %v970_v4 = vld [vmem:[%s1140_s2 + $0x8] sm:$0xff] (!%p321_p2)   ;;  %vm649_vm2 = vcmask (!%p321_p2), 60416   ;;  %vm661_vm3 = vcmask (!%p321_p2), 64512   ;;  %vm803_vm4 = vcmask (!%p321_p2), 257024  }
   0x7   : > { %924 = vmatpush3.bf16.msra.mxu1 (!%p321_p2), %v967_v0  ;;  %927 = vmatprep.mubr.msk.bf16.mxu1 (!%p321_p2), %vm988_vm0, %v987_v1  ;;  %v882_v8 = vld [vmem:[%s1143_s5] ss:$0 sm:$0xff] (!%p321_p2)  ;;  %v972_v21 = vld [vmem:[%s1144_s6 + $0x8] sm:$0xff] (!%p321_p2)  }
   0x8   : > { %916 = vmatpush3.bf16.msra.mxu0 (!%p321_p2), %v968_v2  ;;  %925 = vmatprep.subr.bf16.mxu1 (!%p321_p2), %v987_v1  ;;  %v878_v10 = vld [vmem:[%s1141_s3] ss:$0 sm:$0xff] (!%p321_p2)  ;;  %v974_v41 = vld [vmem:[%s1146_s8 + $0x8] sm:$0xff] (!%p321_p2)  }
   0x9   : > { %917 = vmatprep.subr.bf16.mxu0 (!%p321_p2), %v987_v1  ;;  %919 = vmatprep.mubr.msk.bf16.mxu0 (!%p321_p2), %vm988_vm0, %v987_v1  ;;  %v971_v20 = vld [vmem:[%s1144_s6] sm:$0xff] (!%p321_p2)  }
   0xa   : > { %v886_v34 = vld [vmem:[%s1145_s7] ss:$0 sm:$0xff] (!%p321_p2) }
   0xb   : > { %926 = vmatpush3.bf16.msra.mxu1 (!%p321_p2), %v969_v3  ;;  %v973_v37 = vld [vmem:[%s1146_s8] sm:$0xff] (!%p321_p2)  }
   0xc   : > { %918 = vmatpush3.bf16.msra.mxu0 (!%p321_p2), %v970_v4  ;;  %939 = vmatprep.subr.mxu1 (!%p321_p2), %v987_v1  ;;  %v893_v45 = vld [vmem:[%s1147_s9] ss:$0 sm:$0xff] (!%p321_p2) }
   0xd   : > { %s1150_s14 = smov (!%p360_p3, %s870_s14), 1  ;;  %931 = vmatprep.subr.bf16.mxu0 %v987_v1 }
   0xe   : > { %s1072_s23 = sshll.u32 %s1150_s14, 2 }
   0xf   : > { %s363_s26 = scalar_lea.vmem %s1138_s0, %s1072_s23  ;;  %s367_s29 = scalar_lea.vmem %s1139_s1, %s1072_s23 }
  0x10   : > { %v374_v5 = vld [vmem:[%s367_s29] sm:$0xf]  ;;  %s371_s30 = scalar_lea.vmem %s1148_s10, %s1072_s23 }
  0x11   : > { %v1083_v6 = vld [vmem:[%s363_s26] sm:$0xf]  ;;  %928 = vmatmul.mubr.msk.bf16.vlgmr.msra.gmra.mrb[0].mxu1 %vm399_vm1, %v374_v5 }
  0x12   : > { %v375_v7 = vpack.c.bf16 %v1083_v6, %v1083_v6  ;;  %941 = vmatprep.mubr.msk.f32.mxu1 %vm988_vm0, %v987_v1 }
  0x14   : > { %920 = vmatmul.mubr.msk.bf16.vlgmr.msra.gmra.mrb[0].mxu0 %vm399_vm1, %v375_v7 }
  0x15   : > { %935 = vmatprep.mubr.msk.bf16.mxu0 %vm988_vm0, %v987_v1  ;;  %932 = vmatpush3.bf16.msra.mxu0 %v971_v20 }
  0x16   : > { %933 = vmatprep.subr.bf16.mxu0 %v987_v1 }
  0x19   : > { %934 = vmatpush3.bf16.msra.mxu0 %v972_v21 }
  0x1a   : > { %949 = vmatprep.subr.bf16.mxu0 %v987_v1 }
  0x1c   : > { %936 = vmatmul.mubr.msk.bf16.vlgmr.msra.gmra.mrb[4].mxu0 %vm399_vm1, %v374_v5 }
  0x1d   : > { %953 = vmatprep.mubr.msk.bf16.mxu0 %vm988_vm0, %v987_v1  ;;  %950 = vmatpush3.bf16.msra.mxu0 %v973_v37 }
  0x1e   : > { %951 = vmatprep.subr.bf16.mxu0 %v987_v1 }
  0x21   : > { %952 = vmatpush3.bf16.msra.mxu0 %v974_v41 }
  0xe4   : > { %v503_v9 = vpop.f32.mrb[0].mxu1 }
  0xe5   : > { %v504_v11 = vadd.f32 %v882_v8, %v503_v9  ;;  %v929_v12 = vpop.f32.mrb[1].mxu1 }
  0xe6   : > { %v506_v13 = vpop.f32.mrb[2].mxu1 }
  0xe7   : > { %v437_v14 = vpop.f32.mrb[0].mxu0  ;;  %v930_v16 = vpop.f32.mrb[3].mxu1  ;;  %940 = vmatpush3.xpose.msk.msra.mxu1 %vm399_vm1, %v504_v11 }
  0xe8   : > { %v438_v15 = vadd.f32 %v878_v10, %v437_v14  ;;  %v921_v17 = vpop.f32.mrb[1].mxu0  ;;  %944 = vmatprep.subr.mxu1 %v987_v1 }
  0xe9   : > { %v440_v18 = vpop.f32.mrb[2].mxu0 }
  0xea   : > { %v922_v19 = vpop.f32.mrb[3].mxu0  ;;  %942 = vmatmul.mubr.msk.f32.vlgmr.msra.gmra.mrb[4].mxu1 %vm399_vm1, %v438_v15 }
  0xeb   : > { %946 = vmatprep.mubr.msk.f32.mxu1 %vm988_vm0, %v987_v1 }
  0xef   : > { %v566_v31 = vpop.f32.mrb[4].mxu0 }
  0xf0   : > { %v937_v32 = vpop.f32.mrb[5].mxu0  ;;  %v567_v36 = vadd.f32 %v886_v34, %v566_v31 }
  0xf1   : > { %v569_v33 = vpop.f32.mrb[6].mxu0 }
  0xf2   : > { %v938_v35 = vpop.f32.mrb[7].mxu0  ;;  %945 = vmatpush3.msra.mxu1 %v567_v36 }
 0x1bd   : > { %v644_v22 = vpop.f32.mrb[4].mxu1 }
 0x1be   : > { %v648_v23 = vmul.f32 0.17677669, %v644_v22  ;;  %v943_v24 = vpop.f32.mrb[5].mxu1 }
 0x1c0   : > { %v650_v25 = vsel %vm649_vm2, %v648_v23, -inf }
 0x1c1   : > { %651 = vmax.xlane.f32.xlu0 %v650_v25 }
 0x24e   : > { %v652_v26 = vpop.xlane.xlu0 %651 }
 0x24f   : > { %v653_v27 = vsub.f32 %v648_v23, %v652_v26 }
 0x251   : > { %v654_v28 = vmul.f32 1.442695, %v653_v27 }
 0x253   : > { %975 = vpow2.f32 %v654_v28 }
 0x25d   : > { %v976_v29 = vpop.eup %975 }
 0x25e   : > { %v656_v30 = vsel %vm649_vm2, %v976_v29, 0.0 }
 0x25f   : > { %657 = vadd.xlane.f32.xlu0 %v656_v30 }
 0x2ec   : > { %v658_v38 = vpop.xlane.xlu0 %657 }
 0x2ed   : > { %977 = vrcp.f32 %v658_v38 }
 0x2f7   : > { %v978_v39 = vpop.eup %977 }
 0x2f8   : > { %v660_v40 = vmul.f32 %v978_v39, %v976_v29 }
 0x2fa   : > { %947 = vmatmul.mubr.msk.f32.vlgmr.msra.gmra.mrb[6].mxu1 %vm661_vm3, %v660_v40 }
 0x3cd   : > { %v731_v42 = vpop.f32.mrb[6].mxu1 }
 0x3ce   : > { %v735_v43 = vpack.c.bf16 %v731_v42, %v731_v42  ;;  %v948_v44 = vpop.f32.mrb[7].mxu1 }
 0x3d0   : > { %954 = vmatmul.mubr.msk.bf16.vlgmr.msra.gmra.mrb[8].mxu0 %vm399_vm1, %v735_v43 }
 0x4a3   : > { %v796_v46 = vpop.f32.mrb[8].mxu0 }
 0x4a4   : > { %v797_v47 = vadd.f32 %v893_v45, %v796_v46  ;;  %v955_v48 = vpop.f32.mrb[9].mxu0 }
 0x4a5   : > { %v799_v49 = vpop.f32.mrb[10].mxu0 }
 0x4a6   : > { %v802_v50 = vadd.f32 %v797_v47, %v1083_v6  ;;  %v956_v51 = vpop.f32.mrb[11].mxu0 }
 0x4a8   : > { %804 = vst.msk [vmem:[%s371_s30] sm:$0xf] %vm803_vm4, %v802_v50 }
 0x4a9 PF: > { %s20_s13 = sadd.s32 1, %s985_s13  }
 0x4aa   : > { %p17_p4 = scmp.ge.s32.totalorder %s20_s13, 4  }
 0x4ac   :  { %19 = sbr.rel (!%p17_p4) target bundleno = 1 (0x1), region = 93 }

// kernel: _fwd.48
= control target key start
LH: loop header
LB: loop body
LE: loop exit
PB: predicated region body
PF: predicated region fallthrough
CT: control target
= control target key end

     0   :  { %s680_s15 = smov 0   ;;  %s762_s0 = inlined_call_operand.vmem [shape: bf16[2,4,288], index: 0, kind: input, shape index: {}]   ;;  %s763_s1 = inlined_call_operand.vmem [shape: bf16[288,32], index: 1, kind: input, shape index: {}]   ;;  %s764_s2 = inlined_call_operand.vmem [shape: f32[1,1,32], index: 2, kind: input, shape index: {}]   ;;  %s765_s3 = inlined_call_operand.vmem [shape: f32[2,1,32], index: 3, kind: input, shape index: {}]   ;;  %s766_s4 = inlined_call_operand.vmem [shape: f32[2,4,32], index: 4, kind: output, shape index: {}]  }
   0x1 LB: > { %s545_s16 = sadd.s32 4294967295, %s650_s15   ;;  %p549_p0 = scmp.ge.s32.totalorder %s650_s15, 1  ;;  %s650_s15 = sphi %s680_s15, %s14_s15  }
   0x2   : > { %p170_p1 = scmp.lt.s32.totalorder %s650_s15, 3 }
   0x4   : > { %p171_p2 = pnand %p549_p0, %p170_p1 }
   0x5   : > { %v621_v0 = vld [vmem:[%s763_s1 + $0x40] sm:$0xff] (!%p171_p2)   ;;  %v652_v2 = vmov (!%p171_p2), 0.0   ;;  %v623_v3 = vld [vmem:[%s763_s1 + $0x48] sm:$0xff] (!%p171_p2)   ;;  %p198_p3 = scmp.lt.s32.totalorder (!%p171_p2), %s545_s16, 1  ;;  %v625_v5 = vld [vmem:[%s763_s1 + $0x50] sm:$0xff] (!%p171_p2)   ;;  %vm653_vm0 = vmmov (!%p171_p2), 0   ;;  %v260_v11 = vlaneseq (!%p171_p2) }
   0x6   : > { %174 = sbr.rel (%p171_p2) target bundleno = 288 (0x120), region = 36  ;;  %v622_v1 = vld [vmem:[%s763_s1] sm:$0xff] (!%p171_p2)   ;;  %601 = vmatprep.subr.bf16.mxu1 (!%p171_p2), %v652_v2  ;;  %576 = vmatprep.subr.bf16.mxu0 (!%p171_p2), %v621_v0  ;;  %v624_v4 = vld [vmem:[%s763_s1 + $0x8] sm:$0xff] (!%p171_p2)   ;;  %v626_v6 = vld [vmem:[%s763_s1 + $0x10] sm:$0xff] (!%p171_p2)   ;;  %v654_v14 = vmov (!%p171_p2), 1983009808  }
   0x7   : > { %577 = vmatpush3.bf16.msra.mxu0 (!%p171_p2), %v622_v1  ;;  %605 = vmatprep.mubr.msk.bf16.mxu1 (!%p171_p2), %vm653_vm0, %v652_v2  ;;  %v627_v7 = vld [vmem:[%s763_s1 + $0x58] sm:$0xff] (!%p171_p2)   ;;  %v629_v9 = vld [vmem:[%s763_s1 + $0x60] sm:$0xff] (!%p171_p2)   ;;  %v631_v13 = vld [vmem:[%s763_s1 + $0x68] sm:$0xff] (!%p171_p2)   ;;  %v258_v15 = vunpack.c.l.s4 (!%p171_p2), %v654_v14  ;;  %v261_v16 = vshrl.u32 (!%p171_p2), %v260_v11, 7  ;;  %vm382_vm1 = vcmask (!%p171_p2), 261120   ;;  %vm481_vm2 = vcmask (!%p171_p2), 257024  }
   0x8   : > { %578 = vmatprep.subr.bf16.mxu0 (!%p171_p2), %v623_v3  ;;  %v628_v8 = vld [vmem:[%s763_s1 + $0x18] sm:$0xff] (!%p171_p2)   ;;  %v635_v10 = vld [vmem:[%s763_s1 + $0x80] sm:$0xff] (!%p171_p2)   ;;  %v639_v17 = vld [vmem:[%s763_s1 + $0x88] sm:$0xff] (!%p171_p2)  }
   0x9   : > { %v630_v12 = vld [vmem:[%s763_s1 + $0x20] sm:$0xff] (!%p171_p2)   ;;  %602 = vmatpush3.bf16.msra.mxu1 (!%p171_p2), %v635_v10  ;;  %v632_v18 = vld [vmem:[%s763_s1 + $0x28] sm:$0xff] (!%p171_p2)   ;;  %v633_v20 = vld [vmem:[%s763_s1 + $0x70] sm:$0xff] (!%p171_p2)   ;;  %v259_v22 = vunpack.c.0.s8 (!%p171_p2), %v258_v15 }
   0xa   : > { %603 = vmatprep.subr.bf16.mxu1 (!%p171_p2), %v652_v2  ;;  %v634_v24 = vld [vmem:[%s763_s1 + $0x30] sm:$0xff] (!%p171_p2)   ;;  %v636_v25 = vld [vmem:[%s763_s1 + $0x78] sm:$0xff] (!%p171_p2)   ;;  %v552_v36 = vld [vmem:[%s764_s2] ss:$0 sm:$0xff] (!%p171_p2) }
   0xb   : > { %579 = vmatpush3.bf16.msra.mxu0 (!%p171_p2), %v624_v4  ;;  %v262_v23 = vsub.s32 (!%p171_p2), %v259_v22, %v261_v16  ;;  %v637_v29 = vld [vmem:[%s763_s1 + $0x38] sm:$0xff] (!%p171_p2)  }
   0xc   : > { %580 = vmatprep.subr.bf16.mxu0 (!%p171_p2), %v625_v5 }
   0xd   : > { %s768_s16 = smov (!%p198_p3, %s545_s16), 1  ;;  %604 = vmatpush3.bf16.msra.mxu1 %v639_v17 }
   0xe   : > { %s609_s9 = smul.u32 6, %s768_s16  ;;  %s205_s11 = scalar_lea.vmem %s765_s3, %s768_s16 }
   0xf   : > { %581 = vmatpush3.bf16.msra.mxu0 %v626_v6  ;;  %v572_v41 = vld [vmem:[%s205_s11] ss:$0 sm:$0xff]  ;;  %s551_s12 = sshll.u32 %s768_s16, 2 }
  0x10   : > { %582 = vmatprep.subr.bf16.mxu0 %v627_v7  ;;  %s202_s20 = scalar_lea.vmem %s762_s0, %s609_s9  ;;  %s209_s17 = scalar_lea.vmem %s766_s4, %s551_s12 }
  0x11   : > { %v211_v19 = vld [vmem:[%s202_s20] sm:$0x3f] }
  0x12   : > { %v256_v21 = vcombine.high %v211_v19, %v211_v19  ;;  %v263_v26 = vrot.slane %v211_v19, %v262_v23 }
  0x13   : > { %583 = vmatpush3.bf16.msra.mxu0 %v628_v8 }
  0x14   : > { %584 = vmatprep.subr.bf16.mxu0 %v629_v9  ;;  %v270_v27 = vrot.slane %v256_v21, %v262_v23  ;;  %v271_v28 = vcombine.high %v263_v26, %v263_v26 }
  0x16   : > { %606 = vmatmul.mubr.msk.bf16.vlgmr.msra.gmra.mrb[0].mxu1 %vm382_vm1, %v270_v27  ;;  %418 = vmatprep.mubr.bf16.mxu0 %v271_v28 }
  0x17   : > { %585 = vmatpush3.bf16.msra.mxu0 %v630_v12 }
  0x18   : > { %586 = vmatprep.subr.bf16.mxu0 %v631_v13 }
  0x1b   : > { %587 = vmatpush3.bf16.msra.mxu0 %v632_v18 }
  0x1c   : > { %588 = vmatprep.subr.bf16.mxu0 %v633_v20 }
  0x1f   : > { %589 = vmatpush3.bf16.msra.mxu0 %v634_v24 }
  0x20   : > { %590 = vmatprep.subr.bf16.mxu0 %v636_v25 }
  0x23   : > { %591 = vmatpush3.bf16.msra.mxu0 %v637_v29 }
  0x26   : > { %419 = vmatmul.mubr.bf16.vlgmr.msra.gmra.mrb[0].mxu0 %v263_v26 }
  0xe9   : > { %v460_v30 = vpop.f32.mrb[0].mxu1 }
  0xea   : > { %v607_v31 = vpop.f32.mrb[1].mxu1 }
  0xeb   : > { %v463_v32 = vpop.f32.mrb[2].mxu1 }
  0xec   : > { %v608_v33 = vpop.f32.mrb[3].mxu1 }
  0xf9   : > { %v592_v34 = vpop.f32.mrb[0].mxu0 }
  0xfa   : > { %v593_v35 = vpop.f32.mrb[1].mxu0 }
  0xfb   : > { %v594_v37 = vadd.f32 %v593_v35, %v592_v34  ;;  %v595_v38 = vpop.f32.mrb[2].mxu0 }
  0xfc   : > { %v596_v39 = vpop.f32.mrb[3].mxu0 }
  0xfd   : > { %v421_v40 = vadd.f32 %v594_v37, %v552_v36 }
  0xff   : > { %v461_v42 = vadd.f32 %v460_v30, %v421_v40 }
 0x101   : > { %v473_v43 = vadd.f32 %v572_v41, %v461_v42 }
 0x103   : > { %v573_v44 = vmul.f32 -1.442695, %v473_v43 }
 0x105   : > { %640 = vpow2.f32 %v573_v44 }
 0x10f   : > { %v641_v45 = vpop.eup %640 }
 0x110   : > { %v477_v46 = vadd.f32 1.0, %v641_v45 }
 0x112   : > { %642 = vrcp.f32 %v477_v46 }
 0x11c   : > { %v643_v47 = vpop.eup %642 }
 0x11d   : > { %v480_v48 = vmul.f32 %v643_v47, %v473_v43 }
 0x11f   : > { %482 = vst.msk [vmem:[%s209_s17] sm:$0xf] %vm481_vm2, %v480_v48 }
 0x120 PF: > { %s14_s15 = sadd.s32 1, %s650_s15  }
 0x121   : > { %p11_p4 = scmp.ge.s32.totalorder %s14_s15, 4  }
 0x123   :  { %13 = sbr.rel (!%p11_p4) target bundleno = 1 (0x1), region = 69 }

// kernel: _fwd.58
= control target key start
LH: loop header
LB: loop body
LE: loop exit
PB: predicated region body
PF: predicated region fallthrough
CT: control target
= control target key end

     0   :  { %s429_s15 = smov 0   ;;  %s455_s0 = inlined_call_operand.vmem [shape: bf16[2,16,16], index: 0, kind: input, shape index: {}]   ;;  %s456_s1 = inlined_call_operand.vmem [shape: bf16[16,32], index: 1, kind: input, shape index: {}]   ;;  %s457_s2 = inlined_call_operand.vmem [shape: f32[1,1,32], index: 2, kind: input, shape index: {}]   ;;  %s458_s3 = inlined_call_operand.vmem [shape: f32[2,1,32], index: 3, kind: input, shape index: {}]   ;;  %s459_s4 = inlined_call_operand.vmem [shape: f32[2,16,32], index: 4, kind: output, shape index: {}]  }
   0x1 LB: > { %s356_s16 = sadd.s32 4294967295, %s400_s15   ;;  %p360_p0 = scmp.ge.s32.totalorder %s400_s15, 1  ;;  %s400_s15 = sphi %s429_s15, %s14_s15  }
   0x2   : > { %p170_p1 = scmp.lt.s32.totalorder %s400_s15, 3 }
   0x4   : > { %p171_p2 = pnand %p360_p0, %p170_p1 }
   0x5   : > { %v392_v0 = vld [vmem:[%s456_s1] sm:$0xff] (!%p171_p2)   ;;  %v402_v1 = vmov (!%p171_p2), 0.0   ;;  %p199_p3 = scmp.lt.s32.totalorder (!%p171_p2), %s356_s16, 1  ;;  %vm403_vm0 = vmmov (!%p171_p2), 0   ;;  %vm235_vm1 = vcmask (!%p171_p2), 130048   ;;  %vm289_vm2 = vcmask (!%p171_p2), 261120  }
   0x6   : > { %174 = sbr.rel (%p171_p2) target bundleno = 236 (0xec), region = 36  ;;  %376 = vmatprep.subr.bf16.mxu0 (!%p171_p2), %v402_v1  ;;  %378 = vmatprep.mubr.msk.bf16.mxu0 (!%p171_p2), %vm403_vm0, %v402_v1  ;;  %v365_v3 = vld [vmem:[%s457_s2] ss:$0 sm:$0xff] (!%p171_p2) }
   0x7   : > { %377 = vmatpush3.bf16.msra.mxu0 (!%p171_p2), %v392_v0 }
   0xd   : > { %s461_s16 = smov (!%p199_p3, %s356_s16), 1 }
   0xe   : > { %s372_s19 = sshll.u32 %s461_s16, 3  ;;  %s206_s25 = scalar_lea.vmem %s458_s3, %s461_s16 }
   0xf   : > { %s203_s22 = scalar_lea.vmem %s455_s0, %s372_s19  ;;  %s373_s28 = sshll.u32 %s461_s16, 4  ;;  %v369_v5 = vld [vmem:[%s206_s25] ss:$0 sm:$0xff] }
  0x10   : > { %v393_v2 = vld [vmem:[%s203_s22] sm:$0xff]   ;;  %s211_s5 = scalar_lea.vmem %s459_s4, %s373_s28 }
  0x11   : > { %379 = vmatmul.mubr.msk.bf16.vlgmr.msra.gmra.mrb[0].mxu0 %vm235_vm1, %v393_v2 }
  0xe4   : > { %v273_v4 = vpop.f32.mrb[0].mxu0 }
  0xe5   : > { %v274_v6 = vadd.f32 %v365_v3, %v273_v4  ;;  %v380_v7 = vpop.f32.mrb[1].mxu0 }
  0xe6   : > { %v276_v8 = vpop.f32.mrb[2].mxu0 }
  0xe7   : > { %v287_v9 = vadd.f32 %v369_v5, %v274_v6  ;;  %v277_v10 = vadd.f32 %v365_v3, %v276_v8  ;;  %v381_v11 = vpop.f32.mrb[3].mxu0 }
  0xe9   : > { %290 = vst.msk [vmem:[%s211_s5] sm:$0xff] %vm289_vm2, %v287_v9  ;;  %v288_v12 = vadd.f32 %v369_v5, %v277_v10 }
  0xeb   : > { %291 = vst.msk [vmem:[%s211_s5 + $0x8] sm:$0xff] %vm289_vm2, %v288_v12 }
  0xec PF: > { %s14_s15 = sadd.s32 1, %s400_s15  }
  0xed   : > { %p11_p4 = scmp.ge.s32.totalorder %s14_s15, 4  }
  0xef   :  { %13 = sbr.rel (!%p11_p4) target bundleno = 1 (0x1), region = 69 }

// kernel: _fwd.60
= control target key start
LH: loop header
LB: loop body
LE: loop exit
PB: predicated region body
PF: predicated region fallthrough
CT: control target
= control target key end

     0   :  { %s509_s15 = smov 0   ;;  %s543_s0 = inlined_call_operand.vmem [shape: bf16[2,64,16], index: 0, kind: input, shape index: {}]   ;;  %s544_s1 = inlined_call_operand.vmem [shape: bf16[16,32], index: 1, kind: input, shape index: {}]   ;;  %s545_s2 = inlined_call_operand.vmem [shape: f32[1,1,32], index: 2, kind: input, shape index: {}]   ;;  %s546_s3 = inlined_call_operand.vmem [shape: f32[2,1,32], index: 3, kind: input, shape index: {}]   ;;  %s547_s4 = inlined_call_operand.vmem [shape: f32[2,64,32], index: 4, kind: output, shape index: {}]  }
   0x1 LB: > { %s422_s16 = sadd.s32 4294967295, %s482_s15   ;;  %p426_p0 = scmp.ge.s32.totalorder %s482_s15, 1  ;;  %s482_s15 = sphi %s509_s15, %s14_s15  }
   0x2   : > { %p170_p1 = scmp.lt.s32.totalorder %s482_s15, 3 }
   0x4   : > { %p171_p2 = pnand %p426_p0, %p170_p1 }
   0x5   : > { %v471_v0 = vld [vmem:[%s544_s1] sm:$0xff] (!%p171_p2)   ;;  %p199_p3 = scmp.lt.s32.totalorder (!%p171_p2), %s422_s16, 1  ;;  %vm256_vm0 = vcmask (!%p171_p2), 130048   ;;  %vm349_vm1 = vcmask (!%p171_p2), 261120  }
   0x6   : > { %174 = sbr.rel (%p171_p2) target bundleno = 238 (0xee), region = 36  ;;  %451 = vmatprep.subr.bf16.mxu0 (!%p171_p2), %v471_v0  ;;  %461 = vmatprep.subr.bf16.mxu1 (!%p171_p2), %v471_v0  ;;  %v431_v5 = vld [vmem:[%s545_s2] ss:$0 sm:$0xff] (!%p171_p2) }
   0x7   : > { %452 = vmatpush3.bf16.msra.mxu0 (!%p171_p2), %v471_v0  ;;  %462 = vmatpush3.bf16.msra.mxu1 (!%p171_p2), %v471_v0 }
   0xd   : > { %s549_s16 = smov (!%p199_p3, %s422_s16), 1 }
   0xe   : > { %s444_s19 = sshll.u32 %s549_s16, 5  ;;  %s206_s25 = scalar_lea.vmem %s546_s3, %s549_s16 }
   0xf   : > { %s203_s22 = scalar_lea.vmem %s543_s0, %s444_s19  ;;  %s445_s28 = sshll.u32 %s549_s16, 6  ;;  %v441_v7 = vld [vmem:[%s206_s25] ss:$0 sm:$0xff] }
  0x10   : > { %v472_v1 = vld [vmem:[%s203_s22] sm:$0xff]   ;;  %v473_v2 = vld [vmem:[%s203_s22 + $0x10] sm:$0xff]   ;;  %v474_v3 = vld [vmem:[%s203_s22 + $0x8] sm:$0xff]   ;;  %s211_s5 = scalar_lea.vmem %s547_s4, %s445_s28 }
  0x11   : > { %453 = vmatprep.mubr.msk.bf16.mxu0 %vm256_vm0, %v472_v1  ;;  %457 = vmatprep.mubr.msk.bf16.mxu1 %vm256_vm0, %v473_v2  ;;  %v475_v4 = vld [vmem:[%s203_s22 + $0x18] sm:$0xff]  }
  0x12   : > { %454 = vmatmul.mubr.msk.bf16.vlgmr.msra.gmra.mrb[0].mxu0 %vm256_vm0, %v474_v3  ;;  %458 = vmatmul.mubr.msk.bf16.vlgmr.msra.gmra.mrb[0].mxu1 %vm256_vm0, %v475_v4 }
  0xe5   : > { %v455_v6 = vpop.f32.mrb[0].mxu0  ;;  %v459_v9 = vpop.f32.mrb[0].mxu1 }
  0xe6   : > { %v312_v8 = vadd.f32 %v455_v6, %v431_v5  ;;  %v303_v10 = vpop.f32.mrb[1].mxu0  ;;  %v328_v11 = vadd.f32 %v459_v9, %v431_v5  ;;  %v319_v13 = vpop.f32.mrb[1].mxu1 }
  0xe7   : > { %v304_v12 = vadd.f32 %v431_v5, %v303_v10  ;;  %v456_v14 = vpop.f32.mrb[2].mxu0  ;;  %v320_v16 = vadd.f32 %v431_v5, %v319_v13  ;;  %v460_v18 = vpop.f32.mrb[2].mxu1 }
  0xe8   : > { %v343_v15 = vadd.f32 %v441_v7, %v312_v8  ;;  %v315_v17 = vadd.f32 %v456_v14, %v431_v5  ;;  %v306_v19 = vpop.f32.mrb[3].mxu0  ;;  %v347_v20 = vadd.f32 %v441_v7, %v328_v11  ;;  %v331_v22 = vadd.f32 %v460_v18, %v431_v5  ;;  %v322_v24 = vpop.f32.mrb[3].mxu1 }
  0xe9   : > { %v341_v21 = vadd.f32 %v441_v7, %v304_v12  ;;  %v307_v23 = vadd.f32 %v431_v5, %v306_v19  ;;  %v345_v25 = vadd.f32 %v441_v7, %v320_v16  ;;  %v323_v27 = vadd.f32 %v431_v5, %v322_v24 }
  0xea   : > { %352 = vst.msk [vmem:[%s211_s5 + $0x10] sm:$0xff] %vm349_vm1, %v343_v15  ;;  %v344_v26 = vadd.f32 %v441_v7, %v315_v17  ;;  %356 = vst.msk [vmem:[%s211_s5 + $0x30] sm:$0xff] %vm349_vm1, %v347_v20  ;;  %v348_v28 = vadd.f32 %v441_v7, %v331_v22 }
  0xeb   : > { %350 = vst.msk [vmem:[%s211_s5] sm:$0xff] %vm349_vm1, %v341_v21  ;;  %v342_v29 = vadd.f32 %v441_v7, %v307_v23  ;;  %354 = vst.msk [vmem:[%s211_s5 + $0x20] sm:$0xff] %vm349_vm1, %v345_v25  ;;  %v346_v30 = vadd.f32 %v441_v7, %v323_v27 }
  0xec   : > { %353 = vst.msk [vmem:[%s211_s5 + $0x18] sm:$0xff] %vm349_vm1, %v344_v26  ;;  %357 = vst.msk [vmem:[%s211_s5 + $0x38] sm:$0xff] %vm349_vm1, %v348_v28 }
  0xed   : > { %351 = vst.msk [vmem:[%s211_s5 + $0x8] sm:$0xff] %vm349_vm1, %v342_v29  ;;  %355 = vst.msk [vmem:[%s211_s5 + $0x28] sm:$0xff] %vm349_vm1, %v346_v30 }
  0xee PF: > { %s14_s15 = sadd.s32 1, %s482_s15  }
  0xef   : > { %p11_p4 = scmp.ge.s32.totalorder %s14_s15, 4  }
  0xf1   :  { %13 = sbr.rel (!%p11_p4) target bundleno = 1 (0x1), region = 69 }

// kernel: _fwd.61
= control target key start
LH: loop header
LB: loop body
LE: loop exit
PB: predicated region body
PF: predicated region fallthrough
CT: control target
= control target key end

     0   :  { %s964_s15 = smov 0   ;;  %s1088_s0 = inlined_call_operand.vmem [shape: bf16[2,64,288], index: 0, kind: input, shape index: {}]   ;;  %s1089_s1 = inlined_call_operand.vmem [shape: bf16[288,16], index: 1, kind: input, shape index: {}]   ;;  %s1090_s2 = inlined_call_operand.vmem [shape: f32[1,1,16], index: 2, kind: input, shape index: {}]   ;;  %s1091_s3 = inlined_call_operand.vmem [shape: f32[2,1,16], index: 3, kind: input, shape index: {}]   ;;  %s1092_s4 = inlined_call_operand.vmem [shape: f32[2,64,16], index: 4, kind: output, shape index: {}]  }
   0x1 LB: > { %s727_s16 = sadd.s32 4294967295, %s937_s15   ;;  %p731_p0 = scmp.ge.s32.totalorder %s937_s15, 1  ;;  %s937_s15 = sphi %s964_s15, %s14_s15  }
   0x2   : > { %p170_p1 = scmp.lt.s32.totalorder %s937_s15, 3 }
   0x4   : > { %p171_p2 = pnand %p731_p0, %p170_p1 }
   0x5   : > { %v865_v0 = vld [vmem:[%s1089_s1 + $0x40] sm:$0xff] (!%p171_p2)   ;;  %v867_v2 = vld [vmem:[%s1089_s1 + $0x48] sm:$0xff] (!%p171_p2)   ;;  %p199_p3 = scmp.lt.s32.totalorder (!%p171_p2), %s727_s16, 1  ;;  %v869_v4 = vld [vmem:[%s1089_s1 + $0x50] sm:$0xff] (!%p171_p2)   ;;  %vm440_vm0 = vcmask (!%p171_p2), 261120   ;;  %vm654_vm1 = vcmask (!%p171_p2), 130048  }
   0x6   : > { %174 = sbr.rel (%p171_p2) target bundleno = 306 (0x132), region = 36  ;;  %v866_v1 = vld [vmem:[%s1089_s1] sm:$0xff] (!%p171_p2)   ;;  %782 = vmatprep.subr.bf16.mxu0 (!%p171_p2), %v865_v0  ;;  %840 = vmatprep.subr.bf16.mxu1 (!%p171_p2), %v865_v0  ;;  %v868_v3 = vld [vmem:[%s1089_s1 + $0x8] sm:$0xff] (!%p171_p2)   ;;  %v870_v5 = vld [vmem:[%s1089_s1 + $0x10] sm:$0xff] (!%p171_p2)  }
   0x7   : > { %783 = vmatpush3.bf16.msra.mxu0 (!%p171_p2), %v866_v1  ;;  %848 = vmatpush3.bf16.msra.mxu1 (!%p171_p2), %v866_v1  ;;  %v871_v6 = vld [vmem:[%s1089_s1 + $0x58] sm:$0xff] (!%p171_p2)   ;;  %v873_v8 = vld [vmem:[%s1089_s1 + $0x60] sm:$0xff] (!%p171_p2)   ;;  %v875_v10 = vld [vmem:[%s1089_s1 + $0x68] sm:$0xff] (!%p171_p2)  }
   0x8   : > { %784 = vmatprep.subr.bf16.mxu0 (!%p171_p2), %v867_v2  ;;  %841 = vmatprep.subr.bf16.mxu1 (!%p171_p2), %v867_v2  ;;  %v872_v7 = vld [vmem:[%s1089_s1 + $0x18] sm:$0xff] (!%p171_p2)   ;;  %v874_v9 = vld [vmem:[%s1089_s1 + $0x20] sm:$0xff] (!%p171_p2)   ;;  %v876_v13 = vld [vmem:[%s1089_s1 + $0x28] sm:$0xff] (!%p171_p2)  }
   0x9   : > { %v877_v14 = vld [vmem:[%s1089_s1 + $0x70] sm:$0xff] (!%p171_p2)   ;;  %v879_v16 = vld [vmem:[%s1089_s1 + $0x78] sm:$0xff] (!%p171_p2)   ;;  %v887_v18 = vld [vmem:[%s1089_s1 + $0x80] sm:$0xff] (!%p171_p2)  }
   0xa   : > { %v878_v15 = vld [vmem:[%s1089_s1 + $0x30] sm:$0xff] (!%p171_p2)   ;;  %v880_v17 = vld [vmem:[%s1089_s1 + $0x38] sm:$0xff] (!%p171_p2)   ;;  %v888_v22 = vld [vmem:[%s1089_s1 + $0x88] sm:$0xff] (!%p171_p2)  }
   0xb   : > { %785 = vmatpush3.bf16.msra.mxu0 (!%p171_p2), %v868_v3  ;;  %849 = vmatpush3.bf16.msra.mxu1 (!%p171_p2), %v868_v3  ;;  %v735_v42 = vld [vmem:[%s1090_s2] ss:$0 sm:$0xff] (!%p171_p2) }
   0xc   : > { %786 = vmatprep.subr.bf16.mxu0 (!%p171_p2), %v869_v4  ;;  %842 = vmatprep.subr.bf16.mxu1 (!%p171_p2), %v869_v4 }
   0xd   : > { %s1094_s16 = smov (!%p199_p3, %s727_s16), 1 }
   0xe   : > { %s856_s5 = smul.u32 96, %s1094_s16  ;;  %s206_s11 = scalar_lea.vmem %s1091_s3, %s1094_s16 }
   0xf   : > { %787 = vmatpush3.bf16.msra.mxu0 %v870_v5  ;;  %850 = vmatpush3.bf16.msra.mxu1 %v870_v5  ;;  %v770_v47 = vld [vmem:[%s206_s11] ss:$0 sm:$0xff] }
  0x10   : > { %788 = vmatprep.subr.bf16.mxu0 %v871_v6  ;;  %843 = vmatprep.subr.bf16.mxu1 %v871_v6  ;;  %s1005_s12 = scalar_lea.vmem %s1088_s0, %s856_s5 }
  0x11   : > { %v883_v11 = vld [vmem:[%s1005_s12 + $0x4] ss:$12 sps:$4 sm:$0xff]   ;;  %v886_v12 = vld [vmem:[%s1005_s12 + $0x4c] ss:$12 sps:$4 sm:$0xff]   ;;  %v884_v20 = vld [vmem:[%s1005_s12 + $0x48] ss:$12 sps:$4 sm:$0xff]  }
  0x12   : > { %485 = vmatprep.mubr.bf16.mxu0 %v883_v11  ;;  %509 = vmatprep.mubr.bf16.mxu1 %v886_v12  ;;  %v881_v19 = vld [vmem:[%s1005_s12] ss:$12 sps:$4 sm:$0xff]   ;;  %v889_v21 = vld [vmem:[%s1005_s12 + $0x1c] ss:$12 sps:$4 sm:$0xff]   ;;  %v892_v24 = vld [vmem:[%s1005_s12 + $0x18] ss:$12 sps:$4 sm:$0xff]  }
  0x13   : > { %789 = vmatpush3.bf16.msra.mxu0 %v872_v7  ;;  %851 = vmatpush3.bf16.msra.mxu1 %v872_v7  ;;  %v891_v23 = vld [vmem:[%s1005_s12 + $0x8] ss:$12 sps:$4 sm:$0xff]   ;;  %v893_v25 = vld [vmem:[%s1005_s12 + $0x20] ss:$12 sps:$4 sm:$0xff]   ;;  %v896_v27 = vld [vmem:[%s1005_s12 + $0x38] ss:$12 sps:$4 sm:$0xff]  }
  0x14   : > { %790 = vmatprep.subr.bf16.mxu0 %v873_v8  ;;  %844 = vmatprep.subr.bf16.mxu1 %v873_v8  ;;  %v894_v26 = vld [vmem:[%s1005_s12 + $0x34] ss:$12 sps:$4 sm:$0xff]   ;;  %v897_v28 = vld [vmem:[%s1005_s12 + $0x30] ss:$12 sps:$4 sm:$0xff]  }
  0x15   : > { %v898_v29 = vld [vmem:[%s1005_s12 + $0x50] ss:$12 sps:$4 sm:$0xff]   ;;  %s781_s12 = sshll.u32 %s1094_s16, 6 }
  0x16   : > { %s211_s17 = scalar_lea.vmem %s1092_s4, %s781_s12 }
  0x17   : > { %791 = vmatpush3.bf16.msra.mxu0 %v874_v9  ;;  %852 = vmatpush3.bf16.msra.mxu1 %v874_v9 }
  0x18   : > { %792 = vmatprep.subr.bf16.mxu0 %v875_v10  ;;  %845 = vmatprep.subr.bf16.mxu1 %v875_v10 }
  0x1b   : > { %793 = vmatpush3.bf16.msra.mxu0 %v876_v13  ;;  %853 = vmatpush3.bf16.msra.mxu1 %v876_v13 }
  0x1c   : > { %794 = vmatprep.subr.bf16.mxu0 %v877_v14  ;;  %846 = vmatprep.subr.bf16.mxu1 %v877_v14 }
  0x1f   : > { %795 = vmatpush3.bf16.msra.mxu0 %v878_v15  ;;  %854 = vmatpush3.bf16.msra.mxu1 %v878_v15 }
  0x20   : > { %796 = vmatprep.subr.bf16.mxu0 %v879_v16  ;;  %847 = vmatprep.subr.bf16.mxu1 %v879_v16 }
  0x23   : > { %797 = vmatpush3.bf16.msra.mxu0 %v880_v17  ;;  %855 = vmatpush3.bf16.msra.mxu1 %v880_v17 }
  0x24   : > { %828 = vmatprep.subr.bf16.mxu1 %v887_v18 }
  0x26   : > { %486 = vmatmul.mubr.bf16.vlgmr.msra.gmra.mrb[0].mxu0 %v881_v19  ;;  %510 = vmatmul.mubr.bf16.vlgmr.msra.gmra.mrb[0].mxu1 %v884_v20 }
  0x27   : > { %829 = vmatpush3.bf16.msra.mxu1 %v887_v18  ;;  %493 = vmatprep.mubr.bf16.mxu0 %v889_v21 }
  0x28   : > { %830 = vmatprep.subr.bf16.mxu1 %v888_v22  ;;  %832 = vmatprep.mubr.msk.bf16.mxu1 %vm440_vm0, %v891_v23 }
  0x2b   : > { %831 = vmatpush3.bf16.msra.mxu1 %v888_v22 }
  0x2e   : > { %494 = vmatmul.mubr.bf16.gmra.mrb[4].mxu0 %v892_v24  ;;  %833 = vmatmul.mubr.msk.bf16.vlgmr.msra.gmra.mrb[4].mxu1 %vm440_vm0, %v893_v25 }
  0x2f   : > { %501 = vmatprep.mubr.bf16.mxu0 %v894_v26  ;;  %836 = vmatprep.mubr.msk.bf16.mxu1 %vm440_vm0, %v896_v27 }
  0x36   : > { %502 = vmatmul.mubr.bf16.gmra.mrb[8].mxu0 %v897_v28  ;;  %837 = vmatmul.mubr.msk.bf16.gmra.mrb[8].mxu1 %vm440_vm0, %v898_v29 }
  0xf9   : > { %v798_v30 = vpop.f32.mrb[0].mxu0  ;;  %v816_v31 = vpop.f32.mrb[0].mxu1 }
  0xfa   : > { %v799_v32 = vpop.f32.mrb[1].mxu0  ;;  %v817_v33 = vpop.f32.mrb[1].mxu1 }
  0xfb   : > { %v800_v34 = vadd.f32 %v799_v32, %v798_v30  ;;  %v801_v35 = vpop.f32.mrb[2].mxu0  ;;  %v818_v36 = vadd.f32 %v817_v33, %v816_v31  ;;  %v819_v37 = vpop.f32.mrb[2].mxu1 }
  0xfc   : > { %v802_v38 = vpop.f32.mrb[3].mxu0  ;;  %v820_v39 = vpop.f32.mrb[3].mxu1 }
  0xfd   : > { %v803_v40 = vadd.f32 %v802_v38, %v801_v35  ;;  %v821_v41 = vadd.f32 %v820_v39, %v819_v37  ;;  %v488_v45 = vadd.f32 %v800_v34, %v735_v42  ;;  %v512_v0 = vadd.f32 %v818_v36, %v735_v42 }
  0xff   : > { %v491_v53 = vadd.f32 %v803_v40, %v735_v42  ;;  %v515_v9 = vadd.f32 %v821_v41, %v735_v42 }
 0x101   : > { %v804_v43 = vpop.f32.mrb[4].mxu0  ;;  %v834_v44 = vpop.f32.mrb[4].mxu1 }
 0x102   : > { %v805_v46 = vpop.f32.mrb[5].mxu0  ;;  %v552_v48 = vpop.f32.mrb[5].mxu1 }
 0x103   : > { %v806_v49 = vadd.f32 %v805_v46, %v804_v43  ;;  %v553_v50 = vadd.f32 %v552_v48, %v488_v45  ;;  %v807_v51 = vpop.f32.mrb[6].mxu0  ;;  %v835_v52 = vpop.f32.mrb[6].mxu1 }
 0x104   : > { %v808_v54 = vpop.f32.mrb[7].mxu0  ;;  %v555_v55 = vpop.f32.mrb[7].mxu1 }
 0x105   : > { %v496_v56 = vadd.f32 %v806_v49, %v735_v42  ;;  %v1057_v57 = vadd.f32 %v770_v47, %v553_v50  ;;  %v809_v58 = vadd.f32 %v808_v54, %v807_v51  ;;  %v556_v59 = vadd.f32 %v555_v55, %v491_v53 }
 0x107   : > { %v561_v60 = vadd.f32 %v834_v44, %v496_v56  ;;  %v771_v61 = vmul.f32 -1.442695, %v1057_v57  ;;  %v499_v62 = vadd.f32 %v809_v58, %v735_v42  ;;  %v1060_v63 = vadd.f32 %v770_v47, %v556_v59 }
 0x109   : > { %v1062_v1 = vadd.f32 %v770_v47, %v561_v60  ;;  %899 = vpow2.f32 %v771_v61  ;;  %v564_v2 = vadd.f32 %v835_v52, %v499_v62  ;;  %v772_v3 = vmul.f32 -1.442695, %v1060_v63  ;;  %v810_v4 = vpop.f32.mrb[8].mxu0  ;;  %v838_v5 = vpop.f32.mrb[8].mxu1 }
 0x10a   : > { %v577_v6 = vadd.f32 %v838_v5, %v512_v0  ;;  %v811_v7 = vpop.f32.mrb[9].mxu0  ;;  %v568_v8 = vpop.f32.mrb[9].mxu1 }
 0x10b   : > { %v773_v10 = vmul.f32 -1.442695, %v1062_v1  ;;  %v1066_v11 = vadd.f32 %v770_v47, %v564_v2  ;;  %901 = vpow2.f32 %v772_v3  ;;  %v812_v12 = vadd.f32 %v811_v7, %v810_v4  ;;  %v813_v13 = vpop.f32.mrb[10].mxu0  ;;  %v839_v14 = vpop.f32.mrb[10].mxu1 }
 0x10c   : > { %v596_v15 = vadd.f32 %v770_v47, %v577_v6  ;;  %v580_v16 = vadd.f32 %v839_v14, %v515_v9  ;;  %v814_v17 = vpop.f32.mrb[11].mxu0  ;;  %v571_v18 = vpop.f32.mrb[11].mxu1 }
 0x10d   : > { %903 = vpow2.f32 %v773_v10  ;;  %v774_v19 = vmul.f32 -1.442695, %v1066_v11  ;;  %v504_v20 = vadd.f32 %v812_v12, %v735_v42  ;;  %v815_v21 = vadd.f32 %v814_v17, %v813_v13 }
 0x10e   : > { %v777_v22 = vmul.f32 -1.442695, %v596_v15  ;;  %v597_v23 = vadd.f32 %v770_v47, %v580_v16 }
 0x10f   : > { %905 = vpow2.f32 %v774_v19  ;;  %v569_v24 = vadd.f32 %v568_v8, %v504_v20  ;;  %v507_v25 = vadd.f32 %v815_v21, %v735_v42 }
 0x110   : > { %907 = vpow2.f32 %v777_v22  ;;  %v778_v26 = vmul.f32 -1.442695, %v597_v23 }
 0x111   : > { %v594_v27 = vadd.f32 %v770_v47, %v569_v24  ;;  %v572_v28 = vadd.f32 %v571_v18, %v507_v25 }
 0x112   : > { %909 = vpow2.f32 %v778_v26 }
 0x113   : > { %v900_v29 = vpop.eup %899  ;;  %v775_v30 = vmul.f32 -1.442695, %v594_v27  ;;  %v595_v31 = vadd.f32 %v770_v47, %v572_v28 }
 0x114   : > { %v622_v32 = vadd.f32 1.0, %v900_v29 }
 0x115   : > { %v902_v33 = vpop.eup %901  ;;  %911 = vpow2.f32 %v775_v30  ;;  %v776_v34 = vmul.f32 -1.442695, %v595_v31 }
 0x116   : > { %913 = vrcp.f32 %v622_v32  ;;  %v623_v35 = vadd.f32 1.0, %v902_v33 }
 0x117   : > { %v904_v36 = vpop.eup %903  ;;  %915 = vpow2.f32 %v776_v34 }
 0x118   : > { %v624_v37 = vadd.f32 1.0, %v904_v36  ;;  %917 = vrcp.f32 %v623_v35 }
 0x119   : > { %v906_v38 = vpop.eup %905 }
 0x11a   : > { %v908_v39 = vpop.eup %907  ;;  %919 = vrcp.f32 %v624_v37  ;;  %v625_v40 = vadd.f32 1.0, %v906_v38 }
 0x11b   : > { %v628_v41 = vadd.f32 1.0, %v908_v39 }
 0x11c   : > { %v910_v42 = vpop.eup %909  ;;  %921 = vrcp.f32 %v625_v40 }
 0x11d   : > { %923 = vrcp.f32 %v628_v41  ;;  %v629_v43 = vadd.f32 1.0, %v910_v42 }
 0x11f   : > { %v912_v44 = vpop.eup %911  ;;  %925 = vrcp.f32 %v629_v43 }
 0x120   : > { %v914_v45 = vpop.eup %913  ;;  %v626_v46 = vadd.f32 1.0, %v912_v44 }
 0x121   : > { %v916_v47 = vpop.eup %915  ;;  %v646_v48 = vmul.f32 %v914_v45, %v1057_v57 }
 0x122   : > { %v918_v49 = vpop.eup %917  ;;  %927 = vrcp.f32 %v626_v46  ;;  %v627_v50 = vadd.f32 1.0, %v916_v47 }
 0x123   : > { %655 = vst.msk [vmem:[%s211_s17] sm:$0xff] %vm654_vm1, %v646_v48  ;;  %v647_v51 = vmul.f32 %v918_v49, %v1060_v63 }
 0x124   : > { %v920_v52 = vpop.eup %919  ;;  %929 = vrcp.f32 %v627_v50 }
 0x125   : > { %v648_v53 = vmul.f32 %v920_v52, %v1062_v1  ;;  %656 = vst.msk [vmem:[%s211_s17 + $0x8] sm:$0xff] %vm654_vm1, %v647_v51 }
 0x126   : > { %v922_v54 = vpop.eup %921 }
 0x127   : > { %v924_v55 = vpop.eup %923  ;;  %657 = vst.msk [vmem:[%s211_s17 + $0x10] sm:$0xff] %vm654_vm1, %v648_v53  ;;  %v649_v56 = vmul.f32 %v922_v54, %v1066_v11 }
 0x128   : > { %v652_v57 = vmul.f32 %v924_v55, %v596_v15 }
 0x129   : > { %v926_v58 = vpop.eup %925  ;;  %658 = vst.msk [vmem:[%s211_s17 + $0x18] sm:$0xff] %vm654_vm1, %v649_v56 }
 0x12a   : > { %661 = vst.msk [vmem:[%s211_s17 + $0x30] sm:$0xff] %vm654_vm1, %v652_v57  ;;  %v653_v59 = vmul.f32 %v926_v58, %v597_v23 }
 0x12c   : > { %v928_v60 = vpop.eup %927  ;;  %662 = vst.msk [vmem:[%s211_s17 + $0x38] sm:$0xff] %vm654_vm1, %v653_v59 }
 0x12d   : > { %v650_v61 = vmul.f32 %v928_v60, %v594_v27 }
 0x12e   : > { %v930_v62 = vpop.eup %929 }
 0x12f   : > { %659 = vst.msk [vmem:[%s211_s17 + $0x20] sm:$0xff] %vm654_vm1, %v650_v61  ;;  %v651_v63 = vmul.f32 %v930_v62, %v595_v31 }
 0x131   : > { %660 = vst.msk [vmem:[%s211_s17 + $0x28] sm:$0xff] %vm654_vm1, %v651_v63 }
 0x132 PF: > { %s14_s15 = sadd.s32 1, %s937_s15  }
 0x133   : > { %p11_p4 = scmp.ge.s32.totalorder %s14_s15, 4  }
 0x135   :  { %13 = sbr.rel (!%p11_p4) target bundleno = 1 (0x1), region = 69 }

// kernel: _fwd.63
= control target key start
LH: loop header
LB: loop body
LE: loop exit
PB: predicated region body
PF: predicated region fallthrough
CT: control target
= control target key end

     0   :  { %s506_s15 = smov 0   ;;  %s540_s0 = inlined_call_operand.vmem [shape: bf16[2,64,8], index: 0, kind: input, shape index: {}]   ;;  %s541_s1 = inlined_call_operand.vmem [shape: bf16[8,16], index: 1, kind: input, shape index: {}]   ;;  %s542_s2 = inlined_call_operand.vmem [shape: f32[1,1,16], index: 2, kind: input, shape index: {}]   ;;  %s543_s3 = inlined_call_operand.vmem [shape: f32[2,1,16], index: 3, kind: input, shape index: {}]   ;;  %s544_s4 = inlined_call_operand.vmem [shape: f32[2,64,16], index: 4, kind: output, shape index: {}]  }
   0x1 LB: > { %s419_s16 = sadd.s32 4294967295, %s479_s15   ;;  %p423_p0 = scmp.ge.s32.totalorder %s479_s15, 1  ;;  %s479_s15 = sphi %s506_s15, %s14_s15  }
   0x2   : > { %p170_p1 = scmp.lt.s32.totalorder %s479_s15, 3 }
   0x4   : > { %p171_p2 = pnand %p423_p0, %p170_p1 }
   0x5   : > { %v221_v0 = vld [vmem:[%s541_s1] sm:$0xf] (!%p171_p2)  ;;  %vm262_vm0 = vcmask (!%p171_p2), 1043456   ;;  %p199_p3 = scmp.lt.s32.totalorder (!%p171_p2), %s419_s16, 1  ;;  %vm249_vm1 = vcmask (!%p171_p2), 64512   ;;  %vm346_vm2 = vcmask (!%p171_p2), 130048  }
   0x6   : > { %174 = sbr.rel (%p171_p2) target bundleno = 238 (0xee), region = 36  ;;  %459 = vmatprep.subr.msk.bf16.mxu0 (!%p171_p2), %vm262_vm0, %v221_v0  ;;  %460 = vmatprep.subr.msk.bf16.mxu1 (!%p171_p2), %vm262_vm0, %v221_v0  ;;  %v264_v1 = vsel (!%p171_p2), %vm262_vm0, %v221_v0, 0  ;;  %v428_v6 = vld [vmem:[%s542_s2] ss:$0 sm:$0xff] (!%p171_p2) }
   0x7   : > { %448 = vmatpush3.bf16.msra.mxu0 (!%p171_p2), %v264_v1  ;;  %458 = vmatpush3.bf16.msra.mxu1 (!%p171_p2), %v264_v1 }
   0xd   : > { %s546_s16 = smov (!%p199_p3, %s419_s16), 1 }
   0xe   : > { %s440_s19 = sshll.u32 %s546_s16, 5  ;;  %s206_s25 = scalar_lea.vmem %s543_s3, %s546_s16 }
   0xf   : > { %s203_s22 = scalar_lea.vmem %s540_s0, %s440_s19  ;;  %s441_s28 = sshll.u32 %s546_s16, 6  ;;  %v437_v8 = vld [vmem:[%s206_s25] ss:$0 sm:$0xff] }
  0x10   : > { %v469_v2 = vld [vmem:[%s203_s22] sm:$0xff]   ;;  %v470_v3 = vld [vmem:[%s203_s22 + $0x10] sm:$0xff]   ;;  %v471_v4 = vld [vmem:[%s203_s22 + $0x8] sm:$0xff]   ;;  %s211_s5 = scalar_lea.vmem %s544_s4, %s441_s28 }
  0x11   : > { %449 = vmatprep.mubr.msk.bf16.mxu0 %vm249_vm1, %v469_v2  ;;  %453 = vmatprep.mubr.msk.bf16.mxu1 %vm249_vm1, %v470_v3  ;;  %v472_v5 = vld [vmem:[%s203_s22 + $0x18] sm:$0xff]  }
  0x12   : > { %450 = vmatmul.mubr.msk.bf16.vlgmr.msra.gmra.mrb[0].mxu0 %vm249_vm1, %v471_v4  ;;  %454 = vmatmul.mubr.msk.bf16.vlgmr.msra.gmra.mrb[0].mxu1 %vm249_vm1, %v472_v5 }
  0xe5   : > { %v451_v7 = vpop.f32.mrb[0].mxu0  ;;  %v455_v10 = vpop.f32.mrb[0].mxu1 }
  0xe6   : > { %v309_v9 = vadd.f32 %v451_v7, %v428_v6  ;;  %v300_v11 = vpop.f32.mrb[1].mxu0  ;;  %v325_v12 = vadd.f32 %v455_v10, %v428_v6  ;;  %v316_v14 = vpop.f32.mrb[1].mxu1 }
  0xe7   : > { %v301_v13 = vadd.f32 %v428_v6, %v300_v11  ;;  %v452_v15 = vpop.f32.mrb[2].mxu0  ;;  %v317_v17 = vadd.f32 %v428_v6, %v316_v14  ;;  %v456_v19 = vpop.f32.mrb[2].mxu1 }
  0xe8   : > { %v340_v16 = vadd.f32 %v437_v8, %v309_v9  ;;  %v312_v18 = vadd.f32 %v452_v15, %v428_v6  ;;  %v303_v20 = vpop.f32.mrb[3].mxu0  ;;  %v344_v21 = vadd.f32 %v437_v8, %v325_v12  ;;  %v328_v23 = vadd.f32 %v456_v19, %v428_v6  ;;  %v319_v25 = vpop.f32.mrb[3].mxu1 }
  0xe9   : > { %v338_v22 = vadd.f32 %v437_v8, %v301_v13  ;;  %v304_v24 = vadd.f32 %v428_v6, %v303_v20  ;;  %v342_v26 = vadd.f32 %v437_v8, %v317_v17  ;;  %v320_v28 = vadd.f32 %v428_v6, %v319_v25 }
  0xea   : > { %349 = vst.msk [vmem:[%s211_s5 + $0x10] sm:$0xff] %vm346_vm2, %v340_v16  ;;  %v341_v27 = vadd.f32 %v437_v8, %v312_v18  ;;  %353 = vst.msk [vmem:[%s211_s5 + $0x30] sm:$0xff] %vm346_vm2, %v344_v21  ;;  %v345_v29 = vadd.f32 %v437_v8, %v328_v23 }
  0xeb   : > { %347 = vst.msk [vmem:[%s211_s5] sm:$0xff] %vm346_vm2, %v338_v22  ;;  %v339_v30 = vadd.f32 %v437_v8, %v304_v24  ;;  %351 = vst.msk [vmem:[%s211_s5 + $0x20] sm:$0xff] %vm346_vm2, %v342_v26  ;;  %v343_v31 = vadd.f32 %v437_v8, %v320_v28 }
  0xec   : > { %350 = vst.msk [vmem:[%s211_s5 + $0x18] sm:$0xff] %vm346_vm2, %v341_v27  ;;  %354 = vst.msk [vmem:[%s211_s5 + $0x38] sm:$0xff] %vm346_vm2, %v345_v29 }
  0xed   : > { %348 = vst.msk [vmem:[%s211_s5 + $0x8] sm:$0xff] %vm346_vm2, %v339_v30  ;;  %352 = vst.msk [vmem:[%s211_s5 + $0x28] sm:$0xff] %vm346_vm2, %v343_v31 }
  0xee PF: > { %s14_s15 = sadd.s32 1, %s479_s15  }
  0xef   : > { %p11_p4 = scmp.ge.s32.totalorder %s14_s15, 4  }
  0xf1   :  { %13 = sbr.rel (!%p11_p4) target bundleno = 1 (0x1), region = 69 }

// kernel: _fwd.65
= control target key start
LH: loop header
LB: loop body
LE: loop exit
PB: predicated region body
PF: predicated region fallthrough
CT: control target
= control target key end

     0   :  { %s842_s15 = smov 0   ;;  %s1041_s0 = inlined_call_operand.vmem [shape: bf16[2,256,8], index: 0, kind: input, shape index: {}]   ;;  %s1042_s1 = inlined_call_operand.vmem [shape: bf16[8,16], index: 1, kind: input, shape index: {}]   ;;  %s1043_s2 = inlined_call_operand.vmem [shape: f32[1,1,16], index: 2, kind: input, shape index: {}]   ;;  %s1044_s3 = inlined_call_operand.vmem [shape: f32[2,1,16], index: 3, kind: input, shape index: {}]   ;;  %s1045_s4 = inlined_call_operand.vmem [shape: f32[2,256,16], index: 4, kind: output, shape index: {}]  }
   0x1 LB: > { %s683_s16 = sadd.s32 4294967295, %s815_s15   ;;  %p687_p0 = scmp.ge.s32.totalorder %s815_s15, 1  ;;  %s815_s15 = sphi %s842_s15, %s14_s15  }
   0x2   : > { %p170_p1 = scmp.lt.s32.totalorder %s815_s15, 3 }
   0x4   : > { %p171_p2 = pnand %p687_p0, %p170_p1 }
   0x5   : > { %v245_v0 = vld [vmem:[%s1042_s1] sm:$0xf] (!%p171_p2)  ;;  %vm382_vm0 = vcmask (!%p171_p2), 1043456   ;;  %p199_p3 = scmp.lt.s32.totalorder (!%p171_p2), %s683_s16, 1  ;;  %vm333_vm1 = vcmask (!%p171_p2), 64512   ;;  %vm586_vm2 = vcmask (!%p171_p2), 130048  }
   0x6   : > { %174 = sbr.rel (%p171_p2) target bundleno = 263 (0x107), region = 36  ;;  %783 = vmatprep.subr.msk.bf16.mxu0 (!%p171_p2), %vm382_vm0, %v245_v0  ;;  %784 = vmatprep.subr.msk.bf16.mxu1 (!%p171_p2), %vm382_vm0, %v245_v0  ;;  %v384_v1 = vsel (!%p171_p2), %vm382_vm0, %v245_v0, 0  ;;  %v900_v18 = vld [vmem:[%s1043_s2] ss:$0 sm:$0xff] (!%p171_p2) }
   0x7   : > { %748 = vmatpush3.bf16.msra.mxu0 (!%p171_p2), %v384_v1  ;;  %782 = vmatpush3.bf16.msra.mxu1 (!%p171_p2), %v384_v1 }
   0xd   : > { %s1047_s16 = smov (!%p199_p3, %s683_s16), 1 }
   0xe   : > { %s728_s19 = sshll.u32 %s1047_s16, 7  ;;  %s206_s25 = scalar_lea.vmem %s1044_s3, %s1047_s16 }
   0xf   : > { %s859_s22 = scalar_lea.vmem %s1041_s0, %s728_s19  ;;  %s729_s28 = sshll.u32 %s1047_s16, 8  ;;  %v903_v20 = vld [vmem:[%s206_s25] ss:$0 sm:$0xff] }
  0x10   : > { %v793_v2 = vld [vmem:[%s859_s22] sm:$0xff]   ;;  %v795_v4 = vld [vmem:[%s859_s22 + $0x8] sm:$0xff]   ;;  %v797_v6 = vld [vmem:[%s859_s22 + $0x10] sm:$0xff]   ;;  %s909_s5 = scalar_lea.vmem %s1045_s4, %s729_s28 }
  0x11   : > { %v794_v3 = vld [vmem:[%s859_s22 + $0x40] sm:$0xff]   ;;  %749 = vmatprep.mubr.msk.bf16.mxu0 %vm333_vm1, %v793_v2  ;;  %v796_v5 = vld [vmem:[%s859_s22 + $0x48] sm:$0xff]   ;;  %v798_v7 = vld [vmem:[%s859_s22 + $0x50] sm:$0xff]  }
  0x12   : > { %765 = vmatprep.mubr.msk.bf16.mxu1 %vm333_vm1, %v794_v3  ;;  %750 = vmatmul.mubr.msk.bf16.vlgmr.msra.gmra.mrb[0].mxu0 %vm333_vm1, %v795_v4  ;;  %v799_v8 = vld [vmem:[%s859_s22 + $0x18] sm:$0xff]   ;;  %v801_v10 = vld [vmem:[%s859_s22 + $0x20] sm:$0xff]   ;;  %v803_v12 = vld [vmem:[%s859_s22 + $0x28] sm:$0xff]  }
  0x13   : > { %766 = vmatmul.mubr.msk.bf16.vlgmr.msra.gmra.mrb[0].mxu1 %vm333_vm1, %v796_v5  ;;  %753 = vmatprep.mubr.msk.bf16.mxu0 %vm333_vm1, %v797_v6  ;;  %v800_v9 = vld [vmem:[%s859_s22 + $0x58] sm:$0xff]   ;;  %v802_v11 = vld [vmem:[%s859_s22 + $0x60] sm:$0xff]   ;;  %v804_v13 = vld [vmem:[%s859_s22 + $0x68] sm:$0xff]  }
  0x14   : > { %769 = vmatprep.mubr.msk.bf16.mxu1 %vm333_vm1, %v798_v7  ;;  %v805_v14 = vld [vmem:[%s859_s22 + $0x30] sm:$0xff]   ;;  %v807_v16 = vld [vmem:[%s859_s22 + $0x38] sm:$0xff]  }
  0x15   : > { %v806_v15 = vld [vmem:[%s859_s22 + $0x70] sm:$0xff]   ;;  %v808_v17 = vld [vmem:[%s859_s22 + $0x78] sm:$0xff]  }
  0x1a   : > { %754 = vmatmul.mubr.msk.bf16.gmra.mrb[4].mxu0 %vm333_vm1, %v799_v8 }
  0x1b   : > { %770 = vmatmul.mubr.msk.bf16.gmra.mrb[4].mxu1 %vm333_vm1, %v800_v9  ;;  %757 = vmatprep.mubr.msk.bf16.mxu0 %vm333_vm1, %v801_v10 }
  0x1c   : > { %773 = vmatprep.mubr.msk.bf16.mxu1 %vm333_vm1, %v802_v11 }
  0x22   : > { %758 = vmatmul.mubr.msk.bf16.gmra.mrb[8].mxu0 %vm333_vm1, %v803_v12 }
  0x23   : > { %774 = vmatmul.mubr.msk.bf16.gmra.mrb[8].mxu1 %vm333_vm1, %v804_v13  ;;  %761 = vmatprep.mubr.msk.bf16.mxu0 %vm333_vm1, %v805_v14 }
  0x24   : > { %777 = vmatprep.mubr.msk.bf16.mxu1 %vm333_vm1, %v806_v15 }
  0x2a   : > { %762 = vmatmul.mubr.msk.bf16.gmra.mrb[12].mxu0 %vm333_vm1, %v807_v16 }
  0x2b   : > { %778 = vmatmul.mubr.msk.bf16.gmra.mrb[12].mxu1 %vm333_vm1, %v808_v17 }
  0xe5   : > { %v751_v19 = vpop.f32.mrb[0].mxu0 }
  0xe6   : > { %v429_v21 = vadd.f32 %v751_v19, %v900_v18  ;;  %v767_v22 = vpop.f32.mrb[0].mxu1  ;;  %v420_v23 = vpop.f32.mrb[1].mxu0 }
  0xe7   : > { %v493_v24 = vadd.f32 %v767_v22, %v900_v18  ;;  %v421_v25 = vadd.f32 %v900_v18, %v420_v23  ;;  %v484_v26 = vpop.f32.mrb[1].mxu1  ;;  %v752_v27 = vpop.f32.mrb[2].mxu0 }
  0xe8   : > { %v556_v28 = vadd.f32 %v903_v20, %v429_v21  ;;  %v485_v29 = vadd.f32 %v900_v18, %v484_v26  ;;  %v432_v30 = vadd.f32 %v752_v27, %v900_v18  ;;  %v768_v31 = vpop.f32.mrb[2].mxu1  ;;  %v423_v32 = vpop.f32.mrb[3].mxu0 }
  0xe9   : > { %v572_v33 = vadd.f32 %v903_v20, %v493_v24  ;;  %v554_v34 = vadd.f32 %v903_v20, %v421_v25  ;;  %v496_v35 = vadd.f32 %v768_v31, %v900_v18  ;;  %v424_v36 = vadd.f32 %v900_v18, %v423_v32  ;;  %v487_v37 = vpop.f32.mrb[3].mxu1 }
  0xea   : > { %589 = vst.msk [vmem:[%s909_s5 + $0x10] sm:$0xff] %vm586_vm2, %v556_v28  ;;  %v570_v38 = vadd.f32 %v903_v20, %v485_v29  ;;  %v557_v39 = vadd.f32 %v903_v20, %v432_v30  ;;  %v488_v40 = vadd.f32 %v900_v18, %v487_v37 }
  0xeb   : > { %605 = vst.msk [vmem:[%s909_s5 + $0x90] sm:$0xff] %vm586_vm2, %v572_v33  ;;  %587 = vst.msk [vmem:[%s909_s5] sm:$0xff] %vm586_vm2, %v554_v34  ;;  %v573_v41 = vadd.f32 %v903_v20, %v496_v35  ;;  %v555_v42 = vadd.f32 %v903_v20, %v424_v36 }
  0xec   : > { %603 = vst.msk [vmem:[%s909_s5 + $0x80] sm:$0xff] %vm586_vm2, %v570_v38  ;;  %590 = vst.msk [vmem:[%s909_s5 + $0x18] sm:$0xff] %vm586_vm2, %v557_v39  ;;  %v571_v43 = vadd.f32 %v903_v20, %v488_v40 }
  0xed   : > { %606 = vst.msk [vmem:[%s909_s5 + $0x98] sm:$0xff] %vm586_vm2, %v573_v41  ;;  %588 = vst.msk [vmem:[%s909_s5 + $0x8] sm:$0xff] %vm586_vm2, %v555_v42  ;;  %v755_v44 = vpop.f32.mrb[4].mxu0 }
  0xee   : > { %604 = vst.msk [vmem:[%s909_s5 + $0x88] sm:$0xff] %vm586_vm2, %v571_v43  ;;  %v445_v45 = vadd.f32 %v755_v44, %v900_v18  ;;  %v771_v46 = vpop.f32.mrb[4].mxu1  ;;  %v436_v47 = vpop.f32.mrb[5].mxu0 }
  0xef   : > { %v509_v48 = vadd.f32 %v771_v46, %v900_v18  ;;  %v437_v49 = vadd.f32 %v900_v18, %v436_v47  ;;  %v500_v50 = vpop.f32.mrb[5].mxu1  ;;  %v756_v51 = vpop.f32.mrb[6].mxu0 }
  0xf0   : > { %v560_v52 = vadd.f32 %v903_v20, %v445_v45  ;;  %v501_v53 = vadd.f32 %v900_v18, %v500_v50  ;;  %v448_v54 = vadd.f32 %v756_v51, %v900_v18  ;;  %v772_v55 = vpop.f32.mrb[6].mxu1  ;;  %v439_v56 = vpop.f32.mrb[7].mxu0 }
  0xf1   : > { %v576_v57 = vadd.f32 %v903_v20, %v509_v48  ;;  %v558_v58 = vadd.f32 %v903_v20, %v437_v49  ;;  %v512_v59 = vadd.f32 %v772_v55, %v900_v18  ;;  %v440_v60 = vadd.f32 %v900_v18, %v439_v56  ;;  %v503_v61 = vpop.f32.mrb[7].mxu1 }
  0xf2   : > { %593 = vst.msk [vmem:[%s909_s5 + $0x30] sm:$0xff] %vm586_vm2, %v560_v52  ;;  %v574_v62 = vadd.f32 %v903_v20, %v501_v53  ;;  %v561_v63 = vadd.f32 %v903_v20, %v448_v54  ;;  %v504_v0 = vadd.f32 %v900_v18, %v503_v61 }
  0xf3   : > { %609 = vst.msk [vmem:[%s909_s5 + $0xb0] sm:$0xff] %vm586_vm2, %v576_v57  ;;  %591 = vst.msk [vmem:[%s909_s5 + $0x20] sm:$0xff] %vm586_vm2, %v558_v58  ;;  %v577_v1 = vadd.f32 %v903_v20, %v512_v59  ;;  %v559_v2 = vadd.f32 %v903_v20, %v440_v60 }
  0xf4   : > { %607 = vst.msk [vmem:[%s909_s5 + $0xa0] sm:$0xff] %vm586_vm2, %v574_v62  ;;  %594 = vst.msk [vmem:[%s909_s5 + $0x38] sm:$0xff] %vm586_vm2, %v561_v63  ;;  %v575_v3 = vadd.f32 %v903_v20, %v504_v0 }
  0xf5   : > { %610 = vst.msk [vmem:[%s909_s5 + $0xb8] sm:$0xff] %vm586_vm2, %v577_v1  ;;  %592 = vst.msk [vmem:[%s909_s5 + $0x28] sm:$0xff] %vm586_vm2, %v559_v2  ;;  %v759_v4 = vpop.f32.mrb[8].mxu0 }
  0xf6   : > { %608 = vst.msk [vmem:[%s909_s5 + $0xa8] sm:$0xff] %vm586_vm2, %v575_v3  ;;  %v461_v5 = vadd.f32 %v759_v4, %v900_v18  ;;  %v775_v6 = vpop.f32.mrb[8].mxu1  ;;  %v452_v7 = vpop.f32.mrb[9].mxu0 }
  0xf7   : > { %v525_v8 = vadd.f32 %v775_v6, %v900_v18  ;;  %v453_v9 = vadd.f32 %v900_v18, %v452_v7  ;;  %v516_v10 = vpop.f32.mrb[9].mxu1  ;;  %v760_v11 = vpop.f32.mrb[10].mxu0 }
  0xf8   : > { %v564_v12 = vadd.f32 %v903_v20, %v461_v5  ;;  %v517_v13 = vadd.f32 %v900_v18, %v516_v10  ;;  %v464_v14 = vadd.f32 %v760_v11, %v900_v18  ;;  %v776_v15 = vpop.f32.mrb[10].mxu1  ;;  %v455_v16 = vpop.f32.mrb[11].mxu0 }
  0xf9   : > { %v580_v17 = vadd.f32 %v903_v20, %v525_v8  ;;  %v562_v19 = vadd.f32 %v903_v20, %v453_v9  ;;  %v528_v21 = vadd.f32 %v776_v15, %v900_v18  ;;  %v456_v22 = vadd.f32 %v900_v18, %v455_v16  ;;  %v519_v23 = vpop.f32.mrb[11].mxu1 }
  0xfa   : > { %597 = vst.msk [vmem:[%s909_s5 + $0x50] sm:$0xff] %vm586_vm2, %v564_v12  ;;  %v578_v24 = vadd.f32 %v903_v20, %v517_v13  ;;  %v565_v25 = vadd.f32 %v903_v20, %v464_v14  ;;  %v520_v26 = vadd.f32 %v900_v18, %v519_v23 }
  0xfb   : > { %613 = vst.msk [vmem:[%s909_s5 + $0xd0] sm:$0xff] %vm586_vm2, %v580_v17  ;;  %595 = vst.msk [vmem:[%s909_s5 + $0x40] sm:$0xff] %vm586_vm2, %v562_v19  ;;  %v581_v27 = vadd.f32 %v903_v20, %v528_v21  ;;  %v563_v28 = vadd.f32 %v903_v20, %v456_v22 }
  0xfc   : > { %611 = vst.msk [vmem:[%s909_s5 + $0xc0] sm:$0xff] %vm586_vm2, %v578_v24  ;;  %598 = vst.msk [vmem:[%s909_s5 + $0x58] sm:$0xff] %vm586_vm2, %v565_v25  ;;  %v579_v29 = vadd.f32 %v903_v20, %v520_v26 }
  0xfd   : > { %614 = vst.msk [vmem:[%s909_s5 + $0xd8] sm:$0xff] %vm586_vm2, %v581_v27  ;;  %596 = vst.msk [vmem:[%s909_s5 + $0x48] sm:$0xff] %vm586_vm2, %v563_v28  ;;  %v763_v30 = vpop.f32.mrb[12].mxu0 }
  0xfe   : > { %612 = vst.msk [vmem:[%s909_s5 + $0xc8] sm:$0xff] %vm586_vm2, %v579_v29  ;;  %v477_v31 = vadd.f32 %v763_v30, %v900_v18  ;;  %v779_v32 = vpop.f32.mrb[12].mxu1  ;;  %v468_v33 = vpop.f32.mrb[13].mxu0 }
  0xff   : > { %v541_v34 = vadd.f32 %v779_v32, %v900_v18  ;;  %v469_v35 = vadd.f32 %v900_v18, %v468_v33  ;;  %v532_v36 = vpop.f32.mrb[13].mxu1  ;;  %v764_v37 = vpop.f32.mrb[14].mxu0 }
 0x100   : > { %v568_v38 = vadd.f32 %v903_v20, %v477_v31  ;;  %v533_v39 = vadd.f32 %v900_v18, %v532_v36  ;;  %v480_v40 = vadd.f32 %v764_v37, %v900_v18  ;;  %v780_v41 = vpop.f32.mrb[14].mxu1  ;;  %v471_v42 = vpop.f32.mrb[15].mxu0 }
 0x101   : > { %v584_v43 = vadd.f32 %v903_v20, %v541_v34  ;;  %v566_v44 = vadd.f32 %v903_v20, %v469_v35  ;;  %v544_v45 = vadd.f32 %v780_v41, %v900_v18  ;;  %v472_v46 = vadd.f32 %v900_v18, %v471_v42  ;;  %v535_v47 = vpop.f32.mrb[15].mxu1 }
 0x102   : > { %601 = vst.msk [vmem:[%s909_s5 + $0x70] sm:$0xff] %vm586_vm2, %v568_v38  ;;  %v582_v48 = vadd.f32 %v903_v20, %v533_v39  ;;  %v569_v49 = vadd.f32 %v903_v20, %v480_v40  ;;  %v536_v50 = vadd.f32 %v900_v18, %v535_v47 }
 0x103   : > { %617 = vst.msk [vmem:[%s909_s5 + $0xf0] sm:$0xff] %vm586_vm2, %v584_v43  ;;  %599 = vst.msk [vmem:[%s909_s5 + $0x60] sm:$0xff] %vm586_vm2, %v566_v44  ;;  %v585_v51 = vadd.f32 %v903_v20, %v544_v45  ;;  %v567_v52 = vadd.f32 %v903_v20, %v472_v46 }
 0x104   : > { %615 = vst.msk [vmem:[%s909_s5 + $0xe0] sm:$0xff] %vm586_vm2, %v582_v48  ;;  %602 = vst.msk [vmem:[%s909_s5 + $0x78] sm:$0xff] %vm586_vm2, %v569_v49  ;;  %v583_v53 = vadd.f32 %v903_v20, %v536_v50 }
 0x105   : > { %618 = vst.msk [vmem:[%s909_s5 + $0xf8] sm:$0xff] %vm586_vm2, %v585_v51  ;;  %600 = vst.msk [vmem:[%s909_s5 + $0x68] sm:$0xff] %vm586_vm2, %v567_v52 }
 0x106   : > { %616 = vst.msk [vmem:[%s909_s5 + $0xe8] sm:$0xff] %vm586_vm2, %v583_v53 }
 0x107 PF: > { %s14_s15 = sadd.s32 1, %s815_s15  }
 0x108   : > { %p11_p4 = scmp.ge.s32.totalorder %s14_s15, 4  }
 0x10a   :  { %13 = sbr.rel (!%p11_p4) target bundleno = 1 (0x1), region = 69 }

// kernel: _fwd.66
= control target key start
LH: loop header
LB: loop body
LE: loop exit
PB: predicated region body
PF: predicated region fallthrough
CT: control target
= control target key end

     0   :  { %s1388_s15 = smov 0   ;;  %s1758_s0 = inlined_call_operand.vmem [shape: bf16[2,256,144], index: 0, kind: input, shape index: {}]   ;;  %s1759_s1 = inlined_call_operand.vmem [shape: bf16[144,8], index: 1, kind: input, shape index: {}]   ;;  %s1760_s2 = inlined_call_operand.vmem [shape: f32[1,1,8], index: 2, kind: input, shape index: {}]   ;;  %s1761_s3 = inlined_call_operand.vmem [shape: f32[2,1,8], index: 3, kind: input, shape index: {}]   ;;  %s1762_s4 = inlined_call_operand.vmem [shape: f32[2,256,8], index: 4, kind: output, shape index: {}]  }
   0x1 LB: > { %s1038_s16 = sadd.s32 4294967295, %s1360_s15   ;;  %p1042_p0 = scmp.ge.s32.totalorder %s1360_s15, 1  ;;  %s1360_s15 = sphi %s1388_s15, %s14_s15  }
   0x2   : > { %p170_p1 = scmp.lt.s32.totalorder %s1360_s15, 3 }
   0x4   : > { %p171_p2 = pnand %p1042_p0, %p170_p1 }
   0x5   : > { %v1169_v0 = vld [vmem:[%s1759_s1] sm:$0xff] (!%p171_p2)   ;;  %v1362_v1 = vmov (!%p171_p2), 0   ;;  %p199_p3 = scmp.lt.s32.totalorder (!%p171_p2), %s1038_s16, 1  ;;  %v1170_v2 = vld [vmem:[%s1759_s1 + $0x8] sm:$0xff] (!%p171_p2)   ;;  %v1171_v3 = vld [vmem:[%s1759_s1 + $0x10] sm:$0xff] (!%p171_p2)   ;;  %vm468_vm0 = vcmask (!%p171_p2), 130048  }
   0x6   : > { %174 = sbr.rel (%p171_p2) target bundleno = 352 (0x160), region = 36  ;;  %517 = vmatprep.subr.bf16.mxu0 (!%p171_p2), %v1362_v1  ;;  %1142 = vmatprep.subr.bf16.mxu1 (!%p171_p2), %v1362_v1  ;;  %v1172_v4 = vld [vmem:[%s1759_s1 + $0x18] sm:$0xff] (!%p171_p2)   ;;  %v1173_v7 = vld [vmem:[%s1759_s1 + $0x20] sm:$0xff] (!%p171_p2)   ;;  %v1174_v8 = vld [vmem:[%s1759_s1 + $0x28] sm:$0xff] (!%p171_p2)   ;;  %vm941_vm1 = vcmask (!%p171_p2), 64512  }
   0x7   : > { %518 = vmatpush1.bf16.msra.mxu0 (!%p171_p2), %v1169_v0  ;;  %1151 = vmatpush1.bf16.msra.mxu1 (!%p171_p2), %v1169_v0  ;;  %v1175_v9 = vld [vmem:[%s1759_s1 + $0x30] sm:$0xff] (!%p171_p2)   ;;  %v1176_v10 = vld [vmem:[%s1759_s1 + $0x38] sm:$0xff] (!%p171_p2)   ;;  %v1177_v11 = vld [vmem:[%s1759_s1 + $0x40] sm:$0xff] (!%p171_p2)  }
   0x8   : > { %519 = vmatprep.subr.bf16.mxu0 (!%p171_p2), %v1362_v1  ;;  %1143 = vmatprep.subr.bf16.mxu1 (!%p171_p2), %v1362_v1  ;;  %v1488_v42 = vld [vmem:[%s1760_s2] ss:$0 sm:$0xff] (!%p171_p2) }
   0xb   : > { %520 = vmatpush1.bf16.msra.mxu0 (!%p171_p2), %v1170_v2  ;;  %1152 = vmatpush1.bf16.msra.mxu1 (!%p171_p2), %v1170_v2 }
   0xc   : > { %521 = vmatprep.subr.bf16.mxu0 (!%p171_p2), %v1362_v1  ;;  %1144 = vmatprep.subr.bf16.mxu1 (!%p171_p2), %v1362_v1 }
   0xd   : > { %s1764_s16 = smov (!%p199_p3, %s1038_s16), 1 }
   0xe   : > { %s1140_s21 = sshll.u32 %s1764_s16, 8  ;;  %s206_s17 = scalar_lea.vmem %s1761_s3, %s1764_s16 }
   0xf   : > { %s1413_s26 = scalar_lea.vmem %s1758_s0, %s1140_s21  ;;  %522 = vmatpush1.bf16.msra.mxu0 %v1171_v3  ;;  %1153 = vmatpush1.bf16.msra.mxu1 %v1171_v3  ;;  %v1490_v44 = vld [vmem:[%s206_s17] ss:$0 sm:$0xff]  ;;  %s1569_s23 = scalar_lea.vmem %s1762_s4, %s1140_s21 }
  0x10   : > { %v1180_v5 = vld [vmem:[%s1413_s26 + $0x4] ss:$8 sps:$4 sm:$0xff]   ;;  %523 = vmatprep.subr.bf16.mxu0 %v1362_v1  ;;  %1145 = vmatprep.subr.bf16.mxu1 %v1362_v1  ;;  %v1178_v12 = vld [vmem:[%s1413_s26] ss:$8 sps:$4 sm:$0xff]   ;;  %v1184_v14 = vld [vmem:[%s1413_s26 + $0x14] ss:$8 sps:$4 sm:$0xff]  }
  0x11   : > { %v1183_v6 = vld [vmem:[%s1413_s26 + $0x84] ss:$8 sps:$4 sm:$0xff]   ;;  %1089 = vmatprep.mubr.msk.bf16.mxu0 %vm468_vm0, %v1180_v5  ;;  %v1181_v13 = vld [vmem:[%s1413_s26 + $0x80] ss:$8 sps:$4 sm:$0xff]   ;;  %v1186_v15 = vld [vmem:[%s1413_s26 + $0x94] ss:$8 sps:$4 sm:$0xff]  }
  0x12   : > { %1097 = vmatprep.mubr.msk.bf16.mxu1 %vm468_vm0, %v1183_v6  ;;  %v1188_v16 = vld [vmem:[%s1413_s26 + $0x10] ss:$8 sps:$4 sm:$0xff]   ;;  %v1190_v18 = vld [vmem:[%s1413_s26 + $0x24] ss:$8 sps:$4 sm:$0xff]   ;;  %v1194_v20 = vld [vmem:[%s1413_s26 + $0x20] ss:$8 sps:$4 sm:$0xff]  }
  0x13   : > { %524 = vmatpush1.bf16.msra.mxu0 %v1172_v4  ;;  %1154 = vmatpush1.bf16.msra.mxu1 %v1172_v4  ;;  %v1189_v17 = vld [vmem:[%s1413_s26 + $0x90] ss:$8 sps:$4 sm:$0xff]   ;;  %v1192_v19 = vld [vmem:[%s1413_s26 + $0xa4] ss:$8 sps:$4 sm:$0xff]   ;;  %v1195_v21 = vld [vmem:[%s1413_s26 + $0xa0] ss:$8 sps:$4 sm:$0xff]  }
  0x14   : > { %525 = vmatprep.subr.bf16.mxu0 %v1362_v1  ;;  %1146 = vmatprep.subr.bf16.mxu1 %v1362_v1  ;;  %v1196_v22 = vld [vmem:[%s1413_s26 + $0x34] ss:$8 sps:$4 sm:$0xff]   ;;  %v1200_v24 = vld [vmem:[%s1413_s26 + $0x30] ss:$8 sps:$4 sm:$0xff]   ;;  %v1202_v26 = vld [vmem:[%s1413_s26 + $0x44] ss:$8 sps:$4 sm:$0xff]  }
  0x15   : > { %v1198_v23 = vld [vmem:[%s1413_s26 + $0xb4] ss:$8 sps:$4 sm:$0xff]   ;;  %v1201_v25 = vld [vmem:[%s1413_s26 + $0xb0] ss:$8 sps:$4 sm:$0xff]   ;;  %v1204_v27 = vld [vmem:[%s1413_s26 + $0xc4] ss:$8 sps:$4 sm:$0xff]  }
  0x16   : > { %v1206_v28 = vld [vmem:[%s1413_s26 + $0x40] ss:$8 sps:$4 sm:$0xff]   ;;  %v1208_v30 = vld [vmem:[%s1413_s26 + $0x54] ss:$8 sps:$4 sm:$0xff]   ;;  %v1212_v32 = vld [vmem:[%s1413_s26 + $0x50] ss:$8 sps:$4 sm:$0xff]  }
  0x17   : > { %526 = vmatpush1.bf16.msra.mxu0 %v1173_v7  ;;  %1155 = vmatpush1.bf16.msra.mxu1 %v1173_v7  ;;  %v1207_v29 = vld [vmem:[%s1413_s26 + $0xc0] ss:$8 sps:$4 sm:$0xff]   ;;  %v1210_v31 = vld [vmem:[%s1413_s26 + $0xd4] ss:$8 sps:$4 sm:$0xff]   ;;  %v1213_v33 = vld [vmem:[%s1413_s26 + $0xd0] ss:$8 sps:$4 sm:$0xff]  }
  0x18   : > { %527 = vmatprep.subr.bf16.mxu0 %v1362_v1  ;;  %1147 = vmatprep.subr.bf16.mxu1 %v1362_v1  ;;  %v1214_v34 = vld [vmem:[%s1413_s26 + $0x64] ss:$8 sps:$4 sm:$0xff]   ;;  %v1218_v36 = vld [vmem:[%s1413_s26 + $0x60] ss:$8 sps:$4 sm:$0xff]   ;;  %v1220_v38 = vld [vmem:[%s1413_s26 + $0x74] ss:$8 sps:$4 sm:$0xff]  }
  0x19   : > { %v1216_v35 = vld [vmem:[%s1413_s26 + $0xe4] ss:$8 sps:$4 sm:$0xff]   ;;  %v1219_v37 = vld [vmem:[%s1413_s26 + $0xe0] ss:$8 sps:$4 sm:$0xff]   ;;  %v1222_v39 = vld [vmem:[%s1413_s26 + $0xf4] ss:$8 sps:$4 sm:$0xff]  }
  0x1a   : > { %v1224_v40 = vld [vmem:[%s1413_s26 + $0x70] ss:$8 sps:$4 sm:$0xff]  }
  0x1b   : > { %528 = vmatpush1.bf16.msra.mxu0 %v1174_v8  ;;  %1156 = vmatpush1.bf16.msra.mxu1 %v1174_v8  ;;  %v1225_v41 = vld [vmem:[%s1413_s26 + $0xf0] ss:$8 sps:$4 sm:$0xff]  }
  0x1c   : > { %529 = vmatprep.subr.bf16.mxu0 %v1362_v1  ;;  %1148 = vmatprep.subr.bf16.mxu1 %v1362_v1 }
  0x1f   : > { %530 = vmatpush1.bf16.msra.mxu0 %v1175_v9  ;;  %1157 = vmatpush1.bf16.msra.mxu1 %v1175_v9 }
  0x20   : > { %531 = vmatprep.subr.bf16.mxu0 %v1362_v1  ;;  %1149 = vmatprep.subr.bf16.mxu1 %v1362_v1 }
  0x23   : > { %532 = vmatpush1.bf16.msra.mxu0 %v1176_v10  ;;  %1158 = vmatpush1.bf16.msra.mxu1 %v1176_v10 }
  0x24   : > { %533 = vmatprep.subr.bf16.mxu0 %v1362_v1  ;;  %1150 = vmatprep.subr.bf16.mxu1 %v1362_v1 }
  0x27   : > { %534 = vmatpush1.bf16.msra.mxu0 %v1177_v11  ;;  %1159 = vmatpush1.bf16.msra.mxu1 %v1177_v11 }
  0x2a   : > { %550 = vmatmul.mubr.bf16.vlgmr.msra.gmra.mrb[0].mxu0 %v1178_v12  ;;  %614 = vmatmul.mubr.bf16.vlgmr.msra.gmra.mrb[0].mxu1 %v1181_v13 }
  0x2b   : > { %1090 = vmatprep.mubr.msk.bf16.mxu0 %vm468_vm0, %v1184_v14  ;;  %1098 = vmatprep.mubr.msk.bf16.mxu1 %vm468_vm0, %v1186_v15 }
  0x32   : > { %558 = vmatmul.mubr.bf16.gmra.mrb[4].mxu0 %v1188_v16  ;;  %622 = vmatmul.mubr.bf16.gmra.mrb[4].mxu1 %v1189_v17 }
  0x33   : > { %1091 = vmatprep.mubr.msk.bf16.mxu0 %vm468_vm0, %v1190_v18  ;;  %1099 = vmatprep.mubr.msk.bf16.mxu1 %vm468_vm0, %v1192_v19 }
  0x3a   : > { %566 = vmatmul.mubr.bf16.gmra.mrb[8].mxu0 %v1194_v20  ;;  %630 = vmatmul.mubr.bf16.gmra.mrb[8].mxu1 %v1195_v21 }
  0x3b   : > { %1092 = vmatprep.mubr.msk.bf16.mxu0 %vm468_vm0, %v1196_v22  ;;  %1100 = vmatprep.mubr.msk.bf16.mxu1 %vm468_vm0, %v1198_v23 }
  0x42   : > { %574 = vmatmul.mubr.bf16.gmra.mrb[12].mxu0 %v1200_v24  ;;  %638 = vmatmul.mubr.bf16.gmra.mrb[12].mxu1 %v1201_v25 }
  0x43   : > { %1093 = vmatprep.mubr.msk.bf16.mxu0 %vm468_vm0, %v1202_v26  ;;  %1101 = vmatprep.mubr.msk.bf16.mxu1 %vm468_vm0, %v1204_v27 }
  0x4a   : > { %582 = vmatmul.mubr.bf16.gmra.mrb[16].mxu0 %v1206_v28  ;;  %646 = vmatmul.mubr.bf16.gmra.mrb[16].mxu1 %v1207_v29 }
  0x4b   : > { %1094 = vmatprep.mubr.msk.bf16.mxu0 %vm468_vm0, %v1208_v30  ;;  %1102 = vmatprep.mubr.msk.bf16.mxu1 %vm468_vm0, %v1210_v31 }
  0x52   : > { %590 = vmatmul.mubr.bf16.gmra.mrb[20].mxu0 %v1212_v32  ;;  %654 = vmatmul.mubr.bf16.gmra.mrb[20].mxu1 %v1213_v33 }
  0x53   : > { %1095 = vmatprep.mubr.msk.bf16.mxu0 %vm468_vm0, %v1214_v34  ;;  %1103 = vmatprep.mubr.msk.bf16.mxu1 %vm468_vm0, %v1216_v35 }
  0x5a   : > { %598 = vmatmul.mubr.bf16.gmra.mrb[24].mxu0 %v1218_v36  ;;  %662 = vmatmul.mubr.bf16.gmra.mrb[24].mxu1 %v1219_v37 }
  0x5b   : > { %1096 = vmatprep.mubr.msk.bf16.mxu0 %vm468_vm0, %v1220_v38  ;;  %1104 = vmatprep.mubr.msk.bf16.mxu1 %vm468_vm0, %v1222_v39 }
  0x62   : > { %606 = vmatmul.mubr.bf16.gmra.mrb[28].mxu0 %v1224_v40  ;;  %670 = vmatmul.mubr.bf16.gmra.mrb[28].mxu1 %v1225_v41 }
  0xfd   : > { %v551_v43 = vpop.f32.mrb[0].mxu0  ;;  %v615_v45 = vpop.f32.mrb[0].mxu1 }
  0xfe   : > { %v552_v46 = vadd.f32 %v1488_v42, %v551_v43  ;;  %v616_v47 = vadd.f32 %v1488_v42, %v615_v45  ;;  %v553_v48 = vpop.f32.mrb[1].mxu0  ;;  %v617_v49 = vpop.f32.mrb[1].mxu1 }
  0xff   : > { %v554_v50 = vpop.f32.mrb[2].mxu0  ;;  %v618_v51 = vpop.f32.mrb[2].mxu1 }
 0x100   : > { %v1495_v52 = vadd.f32 %v1490_v44, %v552_v46  ;;  %v1498_v53 = vadd.f32 %v1490_v44, %v616_v47  ;;  %v555_v54 = vadd.f32 %v1488_v42, %v554_v50  ;;  %v619_v55 = vadd.f32 %v1488_v42, %v618_v51  ;;  %v556_v56 = vpop.f32.mrb[3].mxu0  ;;  %v620_v57 = vpop.f32.mrb[3].mxu1 }
 0x102   : > { %v1106_v58 = vmul.f32 -1.442695, %v1495_v52  ;;  %v1122_v59 = vmul.f32 -1.442695, %v1498_v53  ;;  %v1505_v60 = vadd.f32 %v1490_v44, %v555_v54  ;;  %v1508_v61 = vadd.f32 %v1490_v44, %v619_v55 }
 0x104   : > { %1226 = vpow2.f32 %v1106_v58  ;;  %v1107_v62 = vmul.f32 -1.442695, %v1505_v60  ;;  %v1123_v63 = vmul.f32 -1.442695, %v1508_v61 }
 0x105   : > { %1228 = vpow2.f32 %v1122_v59  ;;  %v559_v0 = vpop.f32.mrb[4].mxu0  ;;  %v623_v1 = vpop.f32.mrb[4].mxu1 }
 0x106   : > { %1230 = vpow2.f32 %v1107_v62  ;;  %v560_v2 = vadd.f32 %v1488_v42, %v559_v0  ;;  %v624_v3 = vadd.f32 %v1488_v42, %v623_v1  ;;  %v561_v4 = vpop.f32.mrb[5].mxu0  ;;  %v625_v5 = vpop.f32.mrb[5].mxu1 }
 0x107   : > { %1232 = vpow2.f32 %v1123_v63  ;;  %v562_v6 = vpop.f32.mrb[6].mxu0  ;;  %v626_v7 = vpop.f32.mrb[6].mxu1 }
 0x108   : > { %v1515_v8 = vadd.f32 %v1490_v44, %v560_v2  ;;  %v1518_v9 = vadd.f32 %v1490_v44, %v624_v3  ;;  %v563_v10 = vadd.f32 %v1488_v42, %v562_v6  ;;  %v627_v11 = vadd.f32 %v1488_v42, %v626_v7  ;;  %v564_v12 = vpop.f32.mrb[7].mxu0  ;;  %v628_v13 = vpop.f32.mrb[7].mxu1 }
 0x10a   : > { %v1108_v14 = vmul.f32 -1.442695, %v1515_v8  ;;  %v1124_v15 = vmul.f32 -1.442695, %v1518_v9  ;;  %v1525_v16 = vadd.f32 %v1490_v44, %v563_v10  ;;  %v1528_v17 = vadd.f32 %v1490_v44, %v627_v11 }
 0x10c   : > { %1234 = vpow2.f32 %v1108_v14  ;;  %v1109_v18 = vmul.f32 -1.442695, %v1525_v16  ;;  %v1125_v19 = vmul.f32 -1.442695, %v1528_v17 }
 0x10d   : > { %1236 = vpow2.f32 %v1124_v15  ;;  %v567_v20 = vpop.f32.mrb[8].mxu0  ;;  %v631_v21 = vpop.f32.mrb[8].mxu1 }
 0x10e   : > { %v1227_v22 = vpop.eup %1226  ;;  %1238 = vpow2.f32 %v1109_v18  ;;  %v568_v23 = vadd.f32 %v1488_v42, %v567_v20  ;;  %v632_v24 = vadd.f32 %v1488_v42, %v631_v21  ;;  %v569_v25 = vpop.f32.mrb[9].mxu0 }
 0x10f   : > { %v633_v26 = vpop.f32.mrb[9].mxu1  ;;  %v1229_v27 = vpop.eup %1228  ;;  %v813_v28 = vadd.f32 1.0, %v1227_v22  ;;  %1240 = vpow2.f32 %v1125_v19 }
 0x110   : > { %v570_v29 = vpop.f32.mrb[10].mxu0  ;;  %v634_v30 = vpop.f32.mrb[10].mxu1  ;;  %v829_v32 = vadd.f32 1.0, %v1229_v27  ;;  %v1535_v33 = vadd.f32 %v1490_v44, %v568_v23  ;;  %v1538_v34 = vadd.f32 %v1490_v44, %v632_v24 }
 0x111   : > { %v1231_v31 = vpop.eup %1230  ;;  %v571_v35 = vadd.f32 %v1488_v42, %v570_v29  ;;  %v572_v36 = vpop.f32.mrb[11].mxu0  ;;  %1242 = vrcp.f32 %v813_v28  ;;  %v635_v40 = vadd.f32 %v1488_v42, %v634_v30 }
 0x112   : > { %v636_v37 = vpop.f32.mrb[11].mxu1  ;;  %v1233_v38 = vpop.eup %1232  ;;  %v814_v39 = vadd.f32 1.0, %v1231_v31  ;;  %1244 = vrcp.f32 %v829_v32  ;;  %v1110_v43 = vmul.f32 -1.442695, %v1535_v33  ;;  %v1126_v45 = vmul.f32 -1.442695, %v1538_v34 }
 0x113   : > { %v830_v41 = vadd.f32 1.0, %v1233_v38  ;;  %v1545_v46 = vadd.f32 %v1490_v44, %v571_v35  ;;  %v1548_v47 = vadd.f32 %v1490_v44, %v635_v40 }
 0x114   : > { %1246 = vrcp.f32 %v814_v39 }
 0x115   : > { %1248 = vrcp.f32 %v830_v41  ;;  %v1111_v48 = vmul.f32 -1.442695, %v1545_v46  ;;  %v1127_v49 = vmul.f32 -1.442695, %v1548_v47  ;;  %v575_v50 = vpop.f32.mrb[12].mxu0  ;;  %v639_v51 = vpop.f32.mrb[12].mxu1 }
 0x116   : > { %1250 = vpow2.f32 %v1110_v43  ;;  %v1235_v54 = vpop.eup %1234  ;;  %v576_v55 = vadd.f32 %v1488_v42, %v575_v50  ;;  %v640_v56 = vadd.f32 %v1488_v42, %v639_v51  ;;  %v577_v57 = vpop.f32.mrb[13].mxu0 }
 0x117   : > { %1252 = vpow2.f32 %v1126_v45  ;;  %v641_v58 = vpop.f32.mrb[13].mxu1  ;;  %v1237_v59 = vpop.eup %1236  ;;  %v815_v62 = vadd.f32 1.0, %v1235_v54 }
 0x118   : > { %1254 = vpow2.f32 %v1111_v48  ;;  %v578_v63 = vpop.f32.mrb[14].mxu0  ;;  %v642_v0 = vpop.f32.mrb[14].mxu1  ;;  %v831_v2 = vadd.f32 1.0, %v1237_v59  ;;  %v1555_v3 = vadd.f32 %v1490_v44, %v576_v55  ;;  %v1558_v4 = vadd.f32 %v1490_v44, %v640_v56 }
 0x119   : > { %v1239_v1 = vpop.eup %1238  ;;  %1256 = vpow2.f32 %v1127_v49  ;;  %v580_v5 = vpop.f32.mrb[15].mxu0  ;;  %v579_v11 = vadd.f32 %v1488_v42, %v578_v63  ;;  %v643_v12 = vadd.f32 %v1488_v42, %v642_v0 }
 0x11a   : > { %v644_v6 = vpop.f32.mrb[15].mxu1  ;;  %v1241_v7 = vpop.eup %1240  ;;  %1258 = vrcp.f32 %v815_v62  ;;  %v816_v10 = vadd.f32 1.0, %v1239_v1  ;;  %v1112_v14 = vmul.f32 -1.442695, %v1555_v3  ;;  %v1128_v15 = vmul.f32 -1.442695, %v1558_v4 }
 0x11b   : > { %1260 = vrcp.f32 %v831_v2  ;;  %v832_v13 = vadd.f32 1.0, %v1241_v7  ;;  %v1243_v18 = vpop.eup %1242  ;;  %v1572_v19 = vadd.f32 %v1490_v44, %v579_v11  ;;  %v1575_v20 = vadd.f32 %v1490_v44, %v643_v12 }
 0x11c   : > { %1262 = vrcp.f32 %v816_v10  ;;  %v1245_v21 = vpop.eup %1244  ;;  %v909_v22 = vmul.f32 %v1243_v18, %v1495_v52 }
 0x11d   : > { %1264 = vrcp.f32 %v832_v13  ;;  %v925_v24 = vmul.f32 %v1245_v21, %v1498_v53  ;;  %v1113_v25 = vmul.f32 -1.442695, %v1572_v19  ;;  %v1129_v26 = vmul.f32 -1.442695, %v1575_v20  ;;  %v583_v27 = vpop.f32.mrb[16].mxu0  ;;  %v647_v28 = vpop.f32.mrb[16].mxu1 }
 0x11e   : > { %v1247_v23 = vpop.eup %1246  ;;  %1266 = vpow2.f32 %v1112_v14  ;;  %942 = vst.msk [vmem:[%s1569_s23] sm:$0xff] %vm941_vm1, %v909_v22  ;;  %v584_v52 = vadd.f32 %v1488_v42, %v583_v27  ;;  %v648_v31 = vadd.f32 %v1488_v42, %v647_v28  ;;  %v585_v32 = vpop.f32.mrb[17].mxu0 }
 0x11f   : > { %v1249_v29 = vpop.eup %1248  ;;  %v910_v30 = vmul.f32 %v1247_v23, %v1505_v60  ;;  %1268 = vpow2.f32 %v1128_v15  ;;  %v649_v53 = vpop.f32.mrb[17].mxu1  ;;  %958 = vst.msk [vmem:[%s1569_s23 + $0x80] sm:$0xff] %vm941_vm1, %v925_v24 }
 0x120   : > { %v1251_v35 = vpop.eup %1250  ;;  %v926_v36 = vmul.f32 %v1249_v29, %v1508_v61  ;;  %1270 = vpow2.f32 %v1113_v25  ;;  %v586_v37 = vpop.f32.mrb[18].mxu0  ;;  %v1592_v40 = vadd.f32 %v1490_v44, %v584_v52  ;;  %v1595_v41 = vadd.f32 %v1490_v44, %v648_v31 }
 0x121   : > { %v650_v38 = vpop.f32.mrb[18].mxu1  ;;  %v1253_v39 = vpop.eup %1252  ;;  %943 = vst.msk [vmem:[%s1569_s23 + $0x8] sm:$0xff] %vm941_vm1, %v910_v30  ;;  %v817_v60 = vadd.f32 1.0, %v1251_v35  ;;  %1272 = vpow2.f32 %v1129_v26  ;;  %v587_v49 = vadd.f32 %v1488_v42, %v586_v37 }
 0x122   : > { %v588_v43 = vpop.f32.mrb[19].mxu0  ;;  %v652_v45 = vpop.f32.mrb[19].mxu1  ;;  %959 = vst.msk [vmem:[%s1569_s23 + $0x88] sm:$0xff] %vm941_vm1, %v926_v36  ;;  %v833_v61 = vadd.f32 1.0, %v1253_v39  ;;  %v651_v50 = vadd.f32 %v1488_v42, %v650_v38  ;;  %v1114_v55 = vmul.f32 -1.442695, %v1592_v40 }
 0x123   : > { %v1255_v48 = vpop.eup %1254  ;;  %1274 = vrcp.f32 %v817_v60  ;;  %v1130_v56 = vmul.f32 -1.442695, %v1595_v41  ;;  %v1604_v59 = vadd.f32 %v1490_v44, %v587_v49 }
 0x124   : > { %v1257_v51 = vpop.eup %1256  ;;  %v818_v54 = vadd.f32 1.0, %v1255_v48  ;;  %1276 = vrcp.f32 %v833_v61  ;;  %v1607_v62 = vadd.f32 %v1490_v44, %v651_v50 }
 0x125   : > { %v1259_v57 = vpop.eup %1258  ;;  %v834_v58 = vadd.f32 1.0, %v1257_v51  ;;  %v1115_v5 = vmul.f32 -1.442695, %v1604_v59  ;;  %v591_v7 = vpop.f32.mrb[20].mxu0 }
 0x126   : > { %v1261_v63 = vpop.eup %1260  ;;  %v911_v0 = vmul.f32 %v1259_v57, %v1515_v8  ;;  %1278 = vrcp.f32 %v818_v54  ;;  %v1131_v6 = vmul.f32 -1.442695, %v1607_v62  ;;  %v655_v10 = vpop.f32.mrb[20].mxu1  ;;  %v592_v8 = vadd.f32 %v1488_v42, %v591_v7 }
 0x127   : > { %v1263_v1 = vpop.eup %1262  ;;  %v927_v2 = vmul.f32 %v1261_v63, %v1518_v9  ;;  %1280 = vrcp.f32 %v834_v58  ;;  %v656_v13 = vadd.f32 %v1488_v42, %v655_v10  ;;  %v593_v14 = vpop.f32.mrb[21].mxu0 }
 0x128   : > { %v1265_v11 = vpop.eup %1264  ;;  %944 = vst.msk [vmem:[%s1569_s23 + $0x10] sm:$0xff] %vm941_vm1, %v911_v0  ;;  %v912_v12 = vmul.f32 %v1263_v1, %v1525_v16  ;;  %1282 = vpow2.f32 %v1114_v55  ;;  %v657_v9 = vpop.f32.mrb[21].mxu1  ;;  %v1624_v24 = vadd.f32 %v1490_v44, %v592_v8 }
 0x129   : > { %v1267_v15 = vpop.eup %1266  ;;  %960 = vst.msk [vmem:[%s1569_s23 + $0x90] sm:$0xff] %vm941_vm1, %v927_v2  ;;  %v928_v18 = vmul.f32 %v1265_v11, %v1528_v17  ;;  %1284 = vpow2.f32 %v1130_v56  ;;  %v594_v21 = vpop.f32.mrb[22].mxu0  ;;  %v1627_v25 = vadd.f32 %v1490_v44, %v656_v13 }
 0x12a   : > { %v658_v22 = vpop.f32.mrb[22].mxu1  ;;  %v1269_v23 = vpop.eup %1268  ;;  %945 = vst.msk [vmem:[%s1569_s23 + $0x18] sm:$0xff] %vm941_vm1, %v912_v12  ;;  %v819_v16 = vadd.f32 1.0, %v1267_v15  ;;  %1286 = vpow2.f32 %v1115_v5  ;;  %v595_v29 = vadd.f32 %v1488_v42, %v594_v21  ;;  %v1116_v32 = vmul.f32 -1.442695, %v1624_v24 }
 0x12b   : > { %v596_v26 = vpop.f32.mrb[23].mxu0  ;;  %v660_v27 = vpop.f32.mrb[23].mxu1  ;;  %961 = vst.msk [vmem:[%s1569_s23 + $0x98] sm:$0xff] %vm941_vm1, %v928_v18  ;;  %v835_v17 = vadd.f32 1.0, %v1269_v23  ;;  %1288 = vpow2.f32 %v1131_v6  ;;  %v659_v30 = vadd.f32 %v1488_v42, %v658_v22  ;;  %v1132_v53 = vmul.f32 -1.442695, %v1627_v25 }
 0x12c   : > { %v1271_v28 = vpop.eup %1270  ;;  %1290 = vrcp.f32 %v819_v16  ;;  %v1636_v36 = vadd.f32 %v1490_v44, %v595_v29 }
 0x12d   : > { %v1273_v52 = vpop.eup %1272  ;;  %v820_v31 = vadd.f32 1.0, %v1271_v28  ;;  %1292 = vrcp.f32 %v835_v17  ;;  %v1639_v37 = vadd.f32 %v1490_v44, %v659_v30  ;;  %v599_v48 = vpop.f32.mrb[24].mxu0 }
 0x12e   : > { %v836_v35 = vadd.f32 1.0, %v1273_v52  ;;  %v1275_v38 = vpop.eup %1274  ;;  %v1117_v43 = vmul.f32 -1.442695, %v1636_v36  ;;  %v663_v61 = vpop.f32.mrb[24].mxu1  ;;  %v600_v51 = vadd.f32 %v1488_v42, %v599_v48 }
 0x12f   : > { %1294 = vrcp.f32 %v820_v31  ;;  %v1277_v39 = vpop.eup %1276  ;;  %v913_v60 = vmul.f32 %v1275_v38, %v1535_v33  ;;  %v1133_v45 = vmul.f32 -1.442695, %v1639_v37  ;;  %v664_v54 = vadd.f32 %v1488_v42, %v663_v61  ;;  %v601_v55 = vpop.f32.mrb[25].mxu0 }
 0x130   : > { %1296 = vrcp.f32 %v836_v35  ;;  %v1279_v49 = vpop.eup %1278  ;;  %v929_v50 = vmul.f32 %v1277_v39, %v1538_v34  ;;  %v665_v56 = vpop.f32.mrb[25].mxu1  ;;  %v1654_v1 = vadd.f32 %v1490_v44, %v600_v51 }
 0x131   : > { %1298 = vpow2.f32 %v1116_v32  ;;  %v1281_v33 = vpop.eup %1280  ;;  %946 = vst.msk [vmem:[%s1569_s23 + $0x20] sm:$0xff] %vm941_vm1, %v913_v60  ;;  %v914_v57 = vmul.f32 %v1279_v49, %v1545_v46  ;;  %v602_v58 = vpop.f32.mrb[26].mxu0  ;;  %v1657_v2 = vadd.f32 %v1490_v44, %v664_v54 }
 0x132   : > { %1300 = vpow2.f32 %v1132_v53  ;;  %v666_v63 = vpop.f32.mrb[26].mxu1  ;;  %v1283_v0 = vpop.eup %1282  ;;  %962 = vst.msk [vmem:[%s1569_s23 + $0xa0] sm:$0xff] %vm941_vm1, %v929_v50  ;;  %v930_v34 = vmul.f32 %v1281_v33, %v1548_v47  ;;  %v603_v10 = vadd.f32 %v1488_v42, %v602_v58  ;;  %v1118_v8 = vmul.f32 -1.442695, %v1654_v1 }
 0x133   : > { %1302 = vpow2.f32 %v1117_v43  ;;  %v604_v5 = vpop.f32.mrb[27].mxu0  ;;  %v668_v6 = vpop.f32.mrb[27].mxu1  ;;  %947 = vst.msk [vmem:[%s1569_s23 + $0x28] sm:$0xff] %vm941_vm1, %v914_v57  ;;  %v821_v46 = vadd.f32 1.0, %v1283_v0  ;;  %v667_v11 = vadd.f32 %v1488_v42, %v666_v63  ;;  %v1134_v22 = vmul.f32 -1.442695, %v1657_v2 }
 0x134   : > { %v1285_v7 = vpop.eup %1284  ;;  %1304 = vpow2.f32 %v1133_v45  ;;  %963 = vst.msk [vmem:[%s1569_s23 + $0xa8] sm:$0xff] %vm941_vm1, %v930_v34  ;;  %v1667_v9 = vadd.f32 %v1490_v44, %v603_v10 }
 0x135   : > { %v1287_v12 = vpop.eup %1286  ;;  %v837_v47 = vadd.f32 1.0, %v1285_v7  ;;  %1306 = vrcp.f32 %v821_v46  ;;  %v1670_v15 = vadd.f32 %v1490_v44, %v667_v11  ;;  %v607_v28 = vpop.f32.mrb[28].mxu0 }
 0x136   : > { %v1289_v13 = vpop.eup %1288  ;;  %v822_v14 = vadd.f32 1.0, %v1287_v12  ;;  %v1119_v26 = vmul.f32 -1.442695, %v1667_v9  ;;  %v671_v17 = vpop.f32.mrb[28].mxu1  ;;  %v608_v52 = vadd.f32 %v1488_v42, %v607_v28 }
 0x137   : > { %v1291_v18 = vpop.eup %1290  ;;  %1308 = vrcp.f32 %v837_v47  ;;  %v838_v21 = vadd.f32 1.0, %v1289_v13  ;;  %v1135_v27 = vmul.f32 -1.442695, %v1670_v15  ;;  %v672_v31 = vadd.f32 %v1488_v42, %v671_v17  ;;  %v609_v32 = vpop.f32.mrb[29].mxu0 }
 0x138   : > { %v1293_v23 = vpop.eup %1292  ;;  %v915_v16 = vmul.f32 %v1291_v18, %v1555_v3  ;;  %1310 = vrcp.f32 %v822_v14  ;;  %v673_v53 = vpop.f32.mrb[29].mxu1  ;;  %v1686_v43 = vadd.f32 %v1490_v44, %v608_v52 }
 0x139   : > { %v1295_v29 = vpop.eup %1294  ;;  %v931_v30 = vmul.f32 %v1293_v23, %v1558_v4  ;;  %1312 = vrcp.f32 %v838_v21  ;;  %v610_v38 = vpop.f32.mrb[30].mxu0  ;;  %v1689_v45 = vadd.f32 %v1490_v44, %v672_v31 }
 0x13a   : > { %v1297_v3 = vpop.eup %1296  ;;  %948 = vst.msk [vmem:[%s1569_s23 + $0x30] sm:$0xff] %vm941_vm1, %v915_v16  ;;  %v916_v35 = vmul.f32 %v1295_v29, %v1572_v19  ;;  %1314 = vpow2.f32 %v1118_v8  ;;  %v674_v39 = vpop.f32.mrb[30].mxu1  ;;  %v611_v50 = vadd.f32 %v1488_v42, %v610_v38  ;;  %v1120_v55 = vmul.f32 -1.442695, %v1686_v43 }
 0x13b   : > { %v1299_v60 = vpop.eup %1298  ;;  %964 = vst.msk [vmem:[%s1569_s23 + $0xb0] sm:$0xff] %vm941_vm1, %v931_v30  ;;  %v932_v4 = vmul.f32 %v1297_v3, %v1575_v20  ;;  %1316 = vpow2.f32 %v1134_v22  ;;  %v612_v48 = vpop.f32.mrb[31].mxu0  ;;  %v675_v51 = vadd.f32 %v1488_v42, %v674_v39  ;;  %v1136_v42 = vmul.f32 -1.442695, %v1689_v45 }
 0x13c   : > { %v676_v61 = vpop.f32.mrb[31].mxu1  ;;  %v1301_v49 = vpop.eup %1300  ;;  %949 = vst.msk [vmem:[%s1569_s23 + $0x38] sm:$0xff] %vm941_vm1, %v916_v35  ;;  %v823_v19 = vadd.f32 1.0, %v1299_v60  ;;  %1318 = vpow2.f32 %v1119_v26  ;;  %v1699_v57 = vadd.f32 %v1490_v44, %v611_v50 }
 0x13d   : > { %v1303_v54 = vpop.eup %1302  ;;  %965 = vst.msk [vmem:[%s1569_s23 + $0xb8] sm:$0xff] %vm941_vm1, %v932_v4  ;;  %v839_v20 = vadd.f32 1.0, %v1301_v49  ;;  %1320 = vpow2.f32 %v1135_v27  ;;  %v1702_v58 = vadd.f32 %v1490_v44, %v675_v51 }
 0x13e   : > { %v1305_v56 = vpop.eup %1304  ;;  %1322 = vrcp.f32 %v823_v19  ;;  %v824_v33 = vadd.f32 1.0, %v1303_v54  ;;  %v1121_v34 = vmul.f32 -1.442695, %v1699_v57 }
 0x13f   : > { %1324 = vrcp.f32 %v839_v20  ;;  %v840_v63 = vadd.f32 1.0, %v1305_v56  ;;  %v1307_v0 = vpop.eup %1306  ;;  %v1137_v7 = vmul.f32 -1.442695, %v1702_v58 }
 0x140   : > { %1326 = vrcp.f32 %v824_v33  ;;  %v917_v6 = vmul.f32 %v1307_v0, %v1592_v40 }
 0x141   : > { %v1309_v5 = vpop.eup %1308  ;;  %1328 = vrcp.f32 %v840_v63 }
 0x142   : > { %v1311_v46 = vpop.eup %1310  ;;  %v933_v44 = vmul.f32 %v1309_v5, %v1595_v41  ;;  %1330 = vpow2.f32 %v1120_v55  ;;  %950 = vst.msk [vmem:[%s1569_s23 + $0x40] sm:$0xff] %vm941_vm1, %v917_v6 }
 0x143   : > { %v1313_v10 = vpop.eup %1312  ;;  %v918_v11 = vmul.f32 %v1311_v46, %v1604_v59  ;;  %1332 = vpow2.f32 %v1136_v42 }
 0x144   : > { %v1315_v12 = vpop.eup %1314  ;;  %966 = vst.msk [vmem:[%s1569_s23 + $0xc0] sm:$0xff] %vm941_vm1, %v933_v44  ;;  %v934_v47 = vmul.f32 %v1313_v10, %v1607_v62  ;;  %1334 = vpow2.f32 %v1121_v34 }
 0x145   : > { %v1317_v40 = vpop.eup %1316  ;;  %951 = vst.msk [vmem:[%s1569_s23 + $0x48] sm:$0xff] %vm941_vm1, %v918_v11  ;;  %v825_v8 = vadd.f32 1.0, %v1315_v12  ;;  %1336 = vpow2.f32 %v1137_v7 }
 0x146   : > { %v1319_v13 = vpop.eup %1318  ;;  %967 = vst.msk [vmem:[%s1569_s23 + $0xc8] sm:$0xff] %vm941_vm1, %v934_v47  ;;  %v841_v41 = vadd.f32 1.0, %v1317_v40 }
 0x147   : > { %v1321_v14 = vpop.eup %1320  ;;  %1338 = vrcp.f32 %v825_v8  ;;  %v826_v59 = vadd.f32 1.0, %v1319_v13 }
 0x148   : > { %v1323_v18 = vpop.eup %1322  ;;  %1340 = vrcp.f32 %v841_v41  ;;  %v842_v21 = vadd.f32 1.0, %v1321_v14 }
 0x149   : > { %v1325_v62 = vpop.eup %1324  ;;  %v919_v22 = vmul.f32 %v1323_v18, %v1624_v24  ;;  %1342 = vrcp.f32 %v826_v59 }
 0x14a   : > { %v1327_v23 = vpop.eup %1326  ;;  %v935_v16 = vmul.f32 %v1325_v62, %v1627_v25  ;;  %1344 = vrcp.f32 %v842_v21 }
 0x14b   : > { %v1329_v26 = vpop.eup %1328  ;;  %952 = vst.msk [vmem:[%s1569_s23 + $0x50] sm:$0xff] %vm941_vm1, %v919_v22  ;;  %v920_v27 = vmul.f32 %v1327_v23, %v1636_v36 }
 0x14c   : > { %v1331_v28 = vpop.eup %1330  ;;  %968 = vst.msk [vmem:[%s1569_s23 + $0xd0] sm:$0xff] %vm941_vm1, %v935_v16  ;;  %v936_v17 = vmul.f32 %v1329_v26, %v1639_v37 }
 0x14d   : > { %v1333_v29 = vpop.eup %1332  ;;  %953 = vst.msk [vmem:[%s1569_s23 + $0x58] sm:$0xff] %vm941_vm1, %v920_v27  ;;  %v827_v30 = vadd.f32 1.0, %v1331_v28 }
 0x14e   : > { %v1335_v24 = vpop.eup %1334  ;;  %969 = vst.msk [vmem:[%s1569_s23 + $0xd8] sm:$0xff] %vm941_vm1, %v936_v17  ;;  %v843_v25 = vadd.f32 1.0, %v1333_v29 }
 0x14f   : > { %v1337_v52 = vpop.eup %1336  ;;  %1346 = vrcp.f32 %v827_v30  ;;  %v828_v31 = vadd.f32 1.0, %v1335_v24 }
 0x150   : > { %1348 = vrcp.f32 %v843_v25  ;;  %v844_v36 = vadd.f32 1.0, %v1337_v52 }
 0x151   : > { %v1339_v32 = vpop.eup %1338  ;;  %1350 = vrcp.f32 %v828_v31 }
 0x152   : > { %v1341_v37 = vpop.eup %1340  ;;  %v921_v53 = vmul.f32 %v1339_v32, %v1654_v1  ;;  %1352 = vrcp.f32 %v844_v36 }
 0x153   : > { %v1343_v3 = vpop.eup %1342  ;;  %v937_v35 = vmul.f32 %v1341_v37, %v1657_v2 }
 0x154   : > { %v1345_v38 = vpop.eup %1344  ;;  %954 = vst.msk [vmem:[%s1569_s23 + $0x60] sm:$0xff] %vm941_vm1, %v921_v53  ;;  %v922_v39 = vmul.f32 %v1343_v3, %v1667_v9 }
 0x155   : > { %970 = vst.msk [vmem:[%s1569_s23 + $0xe0] sm:$0xff] %vm941_vm1, %v937_v35  ;;  %v938_v60 = vmul.f32 %v1345_v38, %v1670_v15 }
 0x156   : > { %955 = vst.msk [vmem:[%s1569_s23 + $0x68] sm:$0xff] %vm941_vm1, %v922_v39 }
 0x157   : > { %971 = vst.msk [vmem:[%s1569_s23 + $0xe8] sm:$0xff] %vm941_vm1, %v938_v60 }
 0x159   : > { %v1347_v1 = vpop.eup %1346 }
 0x15a   : > { %v1349_v4 = vpop.eup %1348  ;;  %v923_v2 = vmul.f32 %v1347_v1, %v1686_v43 }
 0x15b   : > { %v1351_v48 = vpop.eup %1350  ;;  %v939_v61 = vmul.f32 %v1349_v4, %v1689_v45 }
 0x15c   : > { %v1353_v49 = vpop.eup %1352  ;;  %956 = vst.msk [vmem:[%s1569_s23 + $0x70] sm:$0xff] %vm941_vm1, %v923_v2  ;;  %v924_v9 = vmul.f32 %v1351_v48, %v1699_v57 }
 0x15d   : > { %972 = vst.msk [vmem:[%s1569_s23 + $0xf0] sm:$0xff] %vm941_vm1, %v939_v61  ;;  %v940_v15 = vmul.f32 %v1353_v49, %v1702_v58 }
 0x15e   : > { %957 = vst.msk [vmem:[%s1569_s23 + $0x78] sm:$0xff] %vm941_vm1, %v924_v9 }
 0x15f   : > { %973 = vst.msk [vmem:[%s1569_s23 + $0xf8] sm:$0xff] %vm941_vm1, %v940_v15 }
 0x160 PF: > { %s14_s15 = sadd.s32 1, %s1360_s15  }
 0x161   : > { %p11_p4 = scmp.ge.s32.totalorder %s14_s15, 4  }
 0x163   :  { %13 = sbr.rel (!%p11_p4) target bundleno = 1 (0x1), region = 69 }

// kernel: _fwd.69
= control target key start
LH: loop header
LB: loop body
LE: loop exit
PB: predicated region body
PF: predicated region fallthrough
CT: control target
= control target key end

     0   :  { %s907_s15 = smov 0   ;;  %s1118_s0 = inlined_call_operand.vmem [shape: bf16[2,256,72], index: 0, kind: input, shape index: {}]   ;;  %s1119_s1 = inlined_call_operand.vmem [shape: bf16[72,4], index: 1, kind: input, shape index: {}]   ;;  %s1120_s2 = inlined_call_operand.vmem [shape: f32[1,1,4], index: 2, kind: input, shape index: {}]   ;;  %s1121_s3 = inlined_call_operand.vmem [shape: f32[2,1,4], index: 3, kind: input, shape index: {}]   ;;  %s1122_s4 = inlined_call_operand.vmem [shape: f32[2,256,4], index: 4, kind: output, shape index: {}]  }
   0x1 LB: > { %s718_s16 = sadd.s32 4294967295, %s880_s15   ;;  %p722_p0 = scmp.ge.s32.totalorder %s880_s15, 1  ;;  %s880_s15 = sphi %s907_s15, %s14_s15  }
   0x2   : > { %p170_p1 = scmp.lt.s32.totalorder %s880_s15, 3 }
   0x4   : > { %p171_p2 = pnand %p722_p0, %p170_p1 }
   0x5   : > { %v853_v0 = vld [vmem:[%s1119_s1] sm:$0xff] (!%p171_p2)   ;;  %v854_v1 = vld [vmem:[%s1119_s1 + $0x8] sm:$0xff] (!%p171_p2)   ;;  %p199_p3 = scmp.lt.s32.totalorder (!%p171_p2), %s718_s16, 1  ;;  %v855_v2 = vld [vmem:[%s1119_s1 + $0x10] sm:$0xff] (!%p171_p2)   ;;  %vm368_vm0 = vcmask (!%p171_p2), 588800   ;;  %vm417_vm1 = vcmask (!%p171_p2), 1043456  }
   0x6   : > { %174 = sbr.rel (%p171_p2) target bundleno = 270 (0x10e), region = 36  ;;  %791 = vmatprep.subr.bf16.mxu0 (!%p171_p2), %v853_v0  ;;  %833 = vmatprep.subr.bf16.mxu1 (!%p171_p2), %v853_v0  ;;  %v856_v3 = vld [vmem:[%s1119_s1 + $0x18] sm:$0xff] (!%p171_p2)   ;;  %v857_v6 = vld [vmem:[%s1119_s1 + $0x20] ss:$0 sps:$4 sm:$0xff] (!%p171_p2)   ;;  %vm621_vm2 = vcmask (!%p171_p2), 31744  }
   0x7   : > { %792 = vmatpush3.bf16.msra.mxu0 (!%p171_p2), %v853_v0  ;;  %838 = vmatpush3.bf16.msra.mxu1 (!%p171_p2), %v853_v0  ;;  %v419_v7 = vsel (!%p171_p2), %vm417_vm1, %v857_v6, 0  ;;  %v977_v22 = vld [vmem:[%s1120_s2] ss:$0 sm:$0xff] (!%p171_p2) }
   0x8   : > { %793 = vmatprep.subr.bf16.mxu0 (!%p171_p2), %v854_v1  ;;  %834 = vmatprep.subr.bf16.mxu1 (!%p171_p2), %v854_v1 }
   0xb   : > { %794 = vmatpush3.bf16.msra.mxu0 (!%p171_p2), %v854_v1  ;;  %839 = vmatpush3.bf16.msra.mxu1 (!%p171_p2), %v854_v1 }
   0xc   : > { %795 = vmatprep.subr.bf16.mxu0 (!%p171_p2), %v855_v2  ;;  %835 = vmatprep.subr.bf16.mxu1 (!%p171_p2), %v855_v2 }
   0xd   : > { %s1124_s16 = smov (!%p199_p3, %s718_s16), 1 }
   0xe   : > { %s768_s23 = sshll.u32 %s1124_s16, 7  ;;  %s206_s7 = scalar_lea.vmem %s1121_s3, %s1124_s16 }
   0xf   : > { %s933_s28 = scalar_lea.vmem %s1118_s0, %s768_s23  ;;  %796 = vmatpush3.bf16.msra.mxu0 %v855_v2  ;;  %840 = vmatpush3.bf16.msra.mxu1 %v855_v2  ;;  %s769_s10 = sshll.u32 %s1124_s16, 8  ;;  %v980_v24 = vld [vmem:[%s206_s7] ss:$0 sm:$0xff] }
  0x10   : > { %v858_v4 = vld [vmem:[%s933_s28] sm:$0xff]   ;;  %797 = vmatprep.subr.bf16.mxu0 %v856_v3  ;;  %836 = vmatprep.subr.bf16.mxu1 %v856_v3  ;;  %v860_v8 = vld [vmem:[%s933_s28 + $0x8] sm:$0xff]   ;;  %v862_v10 = vld [vmem:[%s933_s28 + $0x10] sm:$0xff]   ;;  %s987_s13 = scalar_lea.vmem %s1122_s4, %s769_s10 }
  0x11   : > { %v859_v5 = vld [vmem:[%s933_s28 + $0x40] sm:$0xff]   ;;  %801 = vmatprep.mubr.msk.bf16.mxu0 %vm368_vm0, %v858_v4  ;;  %v861_v9 = vld [vmem:[%s933_s28 + $0x48] sm:$0xff]   ;;  %v863_v11 = vld [vmem:[%s933_s28 + $0x50] sm:$0xff]  }
  0x12   : > { %817 = vmatprep.mubr.msk.bf16.mxu1 %vm368_vm0, %v859_v5  ;;  %v864_v12 = vld [vmem:[%s933_s28 + $0x18] sm:$0xff]   ;;  %v866_v14 = vld [vmem:[%s933_s28 + $0x20] sm:$0xff]   ;;  %v868_v16 = vld [vmem:[%s933_s28 + $0x28] sm:$0xff]  }
  0x13   : > { %798 = vmatpush3.bf16.msra.mxu0 %v856_v3  ;;  %841 = vmatpush3.bf16.msra.mxu1 %v856_v3  ;;  %v865_v13 = vld [vmem:[%s933_s28 + $0x58] sm:$0xff]   ;;  %v867_v15 = vld [vmem:[%s933_s28 + $0x60] sm:$0xff]   ;;  %v869_v17 = vld [vmem:[%s933_s28 + $0x68] sm:$0xff]  }
  0x14   : > { %843 = vmatprep.subr.msk.bf16.mxu0 %vm417_vm1, %v857_v6  ;;  %844 = vmatprep.subr.msk.bf16.mxu1 %vm417_vm1, %v857_v6  ;;  %v870_v18 = vld [vmem:[%s933_s28 + $0x30] sm:$0xff]   ;;  %v872_v20 = vld [vmem:[%s933_s28 + $0x38] sm:$0xff]  }
  0x15   : > { %v871_v19 = vld [vmem:[%s933_s28 + $0x70] sm:$0xff]   ;;  %v873_v21 = vld [vmem:[%s933_s28 + $0x78] sm:$0xff]  }
  0x17   : > { %800 = vmatpush3.bf16.msra.mxu0 %v419_v7  ;;  %842 = vmatpush3.bf16.msra.mxu1 %v419_v7 }
  0x1a   : > { %802 = vmatmul.mubr.msk.bf16.vlgmr.msra.gmra.mrb[0].mxu0 %vm368_vm0, %v860_v8  ;;  %818 = vmatmul.mubr.msk.bf16.vlgmr.msra.gmra.mrb[0].mxu1 %vm368_vm0, %v861_v9 }
  0x1b   : > { %805 = vmatprep.mubr.msk.bf16.mxu0 %vm368_vm0, %v862_v10  ;;  %821 = vmatprep.mubr.msk.bf16.mxu1 %vm368_vm0, %v863_v11 }
  0x22   : > { %806 = vmatmul.mubr.msk.bf16.gmra.mrb[4].mxu0 %vm368_vm0, %v864_v12  ;;  %822 = vmatmul.mubr.msk.bf16.gmra.mrb[4].mxu1 %vm368_vm0, %v865_v13 }
  0x23   : > { %809 = vmatprep.mubr.msk.bf16.mxu0 %vm368_vm0, %v866_v14  ;;  %825 = vmatprep.mubr.msk.bf16.mxu1 %vm368_vm0, %v867_v15 }
  0x2a   : > { %810 = vmatmul.mubr.msk.bf16.gmra.mrb[8].mxu0 %vm368_vm0, %v868_v16  ;;  %826 = vmatmul.mubr.msk.bf16.gmra.mrb[8].mxu1 %vm368_vm0, %v869_v17 }
  0x2b   : > { %813 = vmatprep.mubr.msk.bf16.mxu0 %vm368_vm0, %v870_v18  ;;  %829 = vmatprep.mubr.msk.bf16.mxu1 %vm368_vm0, %v871_v19 }
  0x32   : > { %814 = vmatmul.mubr.msk.bf16.gmra.mrb[12].mxu0 %vm368_vm0, %v872_v20  ;;  %830 = vmatmul.mubr.msk.bf16.gmra.mrb[12].mxu1 %vm368_vm0, %v873_v21 }
  0xed   : > { %v803_v23 = vpop.f32.mrb[0].mxu0  ;;  %v819_v25 = vpop.f32.mrb[0].mxu1 }
  0xee   : > { %v464_v26 = vadd.f32 %v803_v23, %v977_v22  ;;  %v528_v27 = vadd.f32 %v819_v25, %v977_v22  ;;  %v455_v28 = vpop.f32.mrb[1].mxu0  ;;  %v519_v29 = vpop.f32.mrb[1].mxu1 }
  0xef   : > { %v456_v30 = vadd.f32 %v977_v22, %v455_v28  ;;  %v520_v31 = vadd.f32 %v977_v22, %v519_v29  ;;  %v804_v32 = vpop.f32.mrb[2].mxu0  ;;  %v820_v33 = vpop.f32.mrb[2].mxu1 }
  0xf0   : > { %v591_v34 = vadd.f32 %v980_v24, %v464_v26  ;;  %v607_v35 = vadd.f32 %v980_v24, %v528_v27  ;;  %v467_v36 = vadd.f32 %v804_v32, %v977_v22  ;;  %v531_v37 = vadd.f32 %v820_v33, %v977_v22  ;;  %v458_v38 = vpop.f32.mrb[3].mxu0  ;;  %v522_v39 = vpop.f32.mrb[3].mxu1 }
  0xf1   : > { %v589_v40 = vadd.f32 %v980_v24, %v456_v30  ;;  %v605_v41 = vadd.f32 %v980_v24, %v520_v31  ;;  %v459_v42 = vadd.f32 %v977_v22, %v458_v38  ;;  %v523_v43 = vadd.f32 %v977_v22, %v522_v39 }
  0xf2   : > { %624 = vst.msk [vmem:[%s987_s13 + $0x10] sm:$0xff] %vm621_vm2, %v591_v34  ;;  %640 = vst.msk [vmem:[%s987_s13 + $0x90] sm:$0xff] %vm621_vm2, %v607_v35  ;;  %v592_v44 = vadd.f32 %v980_v24, %v467_v36  ;;  %v608_v45 = vadd.f32 %v980_v24, %v531_v37 }
  0xf3   : > { %622 = vst.msk [vmem:[%s987_s13] sm:$0xff] %vm621_vm2, %v589_v40  ;;  %638 = vst.msk [vmem:[%s987_s13 + $0x80] sm:$0xff] %vm621_vm2, %v605_v41  ;;  %v590_v46 = vadd.f32 %v980_v24, %v459_v42  ;;  %v606_v47 = vadd.f32 %v980_v24, %v523_v43 }
  0xf4   : > { %625 = vst.msk [vmem:[%s987_s13 + $0x18] sm:$0xff] %vm621_vm2, %v592_v44  ;;  %641 = vst.msk [vmem:[%s987_s13 + $0x98] sm:$0xff] %vm621_vm2, %v608_v45 }
  0xf5   : > { %623 = vst.msk [vmem:[%s987_s13 + $0x8] sm:$0xff] %vm621_vm2, %v590_v46  ;;  %639 = vst.msk [vmem:[%s987_s13 + $0x88] sm:$0xff] %vm621_vm2, %v606_v47  ;;  %v807_v48 = vpop.f32.mrb[4].mxu0  ;;  %v823_v49 = vpop.f32.mrb[4].mxu1 }
  0xf6   : > { %v480_v50 = vadd.f32 %v807_v48, %v977_v22  ;;  %v544_v51 = vadd.f32 %v823_v49, %v977_v22  ;;  %v471_v52 = vpop.f32.mrb[5].mxu0  ;;  %v535_v53 = vpop.f32.mrb[5].mxu1 }
  0xf7   : > { %v472_v54 = vadd.f32 %v977_v22, %v471_v52  ;;  %v536_v55 = vadd.f32 %v977_v22, %v535_v53  ;;  %v808_v56 = vpop.f32.mrb[6].mxu0  ;;  %v824_v57 = vpop.f32.mrb[6].mxu1 }
  0xf8   : > { %v595_v58 = vadd.f32 %v980_v24, %v480_v50  ;;  %v611_v59 = vadd.f32 %v980_v24, %v544_v51  ;;  %v483_v60 = vadd.f32 %v808_v56, %v977_v22  ;;  %v547_v61 = vadd.f32 %v824_v57, %v977_v22  ;;  %v474_v62 = vpop.f32.mrb[7].mxu0  ;;  %v538_v63 = vpop.f32.mrb[7].mxu1 }
  0xf9   : > { %v593_v0 = vadd.f32 %v980_v24, %v472_v54  ;;  %v609_v1 = vadd.f32 %v980_v24, %v536_v55  ;;  %v475_v2 = vadd.f32 %v977_v22, %v474_v62  ;;  %v539_v3 = vadd.f32 %v977_v22, %v538_v63 }
  0xfa   : > { %628 = vst.msk [vmem:[%s987_s13 + $0x30] sm:$0xff] %vm621_vm2, %v595_v58  ;;  %644 = vst.msk [vmem:[%s987_s13 + $0xb0] sm:$0xff] %vm621_vm2, %v611_v59  ;;  %v596_v4 = vadd.f32 %v980_v24, %v483_v60  ;;  %v612_v5 = vadd.f32 %v980_v24, %v547_v61 }
  0xfb   : > { %626 = vst.msk [vmem:[%s987_s13 + $0x20] sm:$0xff] %vm621_vm2, %v593_v0  ;;  %642 = vst.msk [vmem:[%s987_s13 + $0xa0] sm:$0xff] %vm621_vm2, %v609_v1  ;;  %v594_v6 = vadd.f32 %v980_v24, %v475_v2  ;;  %v610_v7 = vadd.f32 %v980_v24, %v539_v3 }
  0xfc   : > { %629 = vst.msk [vmem:[%s987_s13 + $0x38] sm:$0xff] %vm621_vm2, %v596_v4  ;;  %645 = vst.msk [vmem:[%s987_s13 + $0xb8] sm:$0xff] %vm621_vm2, %v612_v5 }
  0xfd   : > { %627 = vst.msk [vmem:[%s987_s13 + $0x28] sm:$0xff] %vm621_vm2, %v594_v6  ;;  %643 = vst.msk [vmem:[%s987_s13 + $0xa8] sm:$0xff] %vm621_vm2, %v610_v7  ;;  %v811_v8 = vpop.f32.mrb[8].mxu0  ;;  %v827_v9 = vpop.f32.mrb[8].mxu1 }
  0xfe   : > { %v496_v10 = vadd.f32 %v811_v8, %v977_v22  ;;  %v560_v11 = vadd.f32 %v827_v9, %v977_v22  ;;  %v487_v12 = vpop.f32.mrb[9].mxu0  ;;  %v551_v13 = vpop.f32.mrb[9].mxu1 }
  0xff   : > { %v488_v14 = vadd.f32 %v977_v22, %v487_v12  ;;  %v552_v15 = vadd.f32 %v977_v22, %v551_v13  ;;  %v812_v16 = vpop.f32.mrb[10].mxu0  ;;  %v828_v17 = vpop.f32.mrb[10].mxu1 }
 0x100   : > { %v599_v18 = vadd.f32 %v980_v24, %v496_v10  ;;  %v615_v19 = vadd.f32 %v980_v24, %v560_v11  ;;  %v499_v20 = vadd.f32 %v812_v16, %v977_v22  ;;  %v563_v21 = vadd.f32 %v828_v17, %v977_v22  ;;  %v490_v23 = vpop.f32.mrb[11].mxu0  ;;  %v554_v25 = vpop.f32.mrb[11].mxu1 }
 0x101   : > { %v597_v26 = vadd.f32 %v980_v24, %v488_v14  ;;  %v613_v27 = vadd.f32 %v980_v24, %v552_v15  ;;  %v491_v28 = vadd.f32 %v977_v22, %v490_v23  ;;  %v555_v29 = vadd.f32 %v977_v22, %v554_v25 }
 0x102   : > { %632 = vst.msk [vmem:[%s987_s13 + $0x50] sm:$0xff] %vm621_vm2, %v599_v18  ;;  %648 = vst.msk [vmem:[%s987_s13 + $0xd0] sm:$0xff] %vm621_vm2, %v615_v19  ;;  %v600_v30 = vadd.f32 %v980_v24, %v499_v20  ;;  %v616_v31 = vadd.f32 %v980_v24, %v563_v21 }
 0x103   : > { %630 = vst.msk [vmem:[%s987_s13 + $0x40] sm:$0xff] %vm621_vm2, %v597_v26  ;;  %646 = vst.msk [vmem:[%s987_s13 + $0xc0] sm:$0xff] %vm621_vm2, %v613_v27  ;;  %v598_v32 = vadd.f32 %v980_v24, %v491_v28  ;;  %v614_v33 = vadd.f32 %v980_v24, %v555_v29 }
 0x104   : > { %633 = vst.msk [vmem:[%s987_s13 + $0x58] sm:$0xff] %vm621_vm2, %v600_v30  ;;  %649 = vst.msk [vmem:[%s987_s13 + $0xd8] sm:$0xff] %vm621_vm2, %v616_v31 }
 0x105   : > { %631 = vst.msk [vmem:[%s987_s13 + $0x48] sm:$0xff] %vm621_vm2, %v598_v32  ;;  %647 = vst.msk [vmem:[%s987_s13 + $0xc8] sm:$0xff] %vm621_vm2, %v614_v33  ;;  %v815_v34 = vpop.f32.mrb[12].mxu0  ;;  %v831_v35 = vpop.f32.mrb[12].mxu1 }
 0x106   : > { %v512_v36 = vadd.f32 %v815_v34, %v977_v22  ;;  %v576_v37 = vadd.f32 %v831_v35, %v977_v22  ;;  %v503_v38 = vpop.f32.mrb[13].mxu0  ;;  %v567_v39 = vpop.f32.mrb[13].mxu1 }
 0x107   : > { %v504_v40 = vadd.f32 %v977_v22, %v503_v38  ;;  %v568_v41 = vadd.f32 %v977_v22, %v567_v39  ;;  %v816_v42 = vpop.f32.mrb[14].mxu0  ;;  %v832_v43 = vpop.f32.mrb[14].mxu1 }
 0x108   : > { %v603_v44 = vadd.f32 %v980_v24, %v512_v36  ;;  %v619_v45 = vadd.f32 %v980_v24, %v576_v37  ;;  %v515_v46 = vadd.f32 %v816_v42, %v977_v22  ;;  %v579_v47 = vadd.f32 %v832_v43, %v977_v22  ;;  %v506_v48 = vpop.f32.mrb[15].mxu0  ;;  %v570_v49 = vpop.f32.mrb[15].mxu1 }
 0x109   : > { %v601_v50 = vadd.f32 %v980_v24, %v504_v40  ;;  %v617_v51 = vadd.f32 %v980_v24, %v568_v41  ;;  %v507_v52 = vadd.f32 %v977_v22, %v506_v48  ;;  %v571_v53 = vadd.f32 %v977_v22, %v570_v49 }
 0x10a   : > { %636 = vst.msk [vmem:[%s987_s13 + $0x70] sm:$0xff] %vm621_vm2, %v603_v44  ;;  %652 = vst.msk [vmem:[%s987_s13 + $0xf0] sm:$0xff] %vm621_vm2, %v619_v45  ;;  %v604_v54 = vadd.f32 %v980_v24, %v515_v46  ;;  %v620_v55 = vadd.f32 %v980_v24, %v579_v47 }
 0x10b   : > { %634 = vst.msk [vmem:[%s987_s13 + $0x60] sm:$0xff] %vm621_vm2, %v601_v50  ;;  %650 = vst.msk [vmem:[%s987_s13 + $0xe0] sm:$0xff] %vm621_vm2, %v617_v51  ;;  %v602_v56 = vadd.f32 %v980_v24, %v507_v52  ;;  %v618_v57 = vadd.f32 %v980_v24, %v571_v53 }
 0x10c   : > { %637 = vst.msk [vmem:[%s987_s13 + $0x78] sm:$0xff] %vm621_vm2, %v604_v54  ;;  %653 = vst.msk [vmem:[%s987_s13 + $0xf8] sm:$0xff] %vm621_vm2, %v620_v55 }
 0x10d   : > { %635 = vst.msk [vmem:[%s987_s13 + $0x68] sm:$0xff] %vm621_vm2, %v602_v56  ;;  %651 = vst.msk [vmem:[%s987_s13 + $0xe8] sm:$0xff] %vm621_vm2, %v618_v57 }
 0x10e PF: > { %s14_s15 = sadd.s32 1, %s880_s15  }
 0x10f   : > { %p11_p4 = scmp.ge.s32.totalorder %s14_s15, 4  }
 0x111   :  { %13 = sbr.rel (!%p11_p4) target bundleno = 1 (0x1), region = 69 }

// kernel: _fwd.35
= control target key start
LH: loop header
LB: loop body
LE: loop exit
PB: predicated region body
PF: predicated region fallthrough
CT: control target
= control target key end

     0   :  { %s189_s0 = inlined_call_operand.vmem [shape: f32[168,128], index: 0, kind: input, shape index: {}]   ;;  %s190_s1 = inlined_call_operand.hbm [shape: f32[1,1], index: 1, kind: output, shape index: {}]  }
   0x1   :  { %v9_v0 = vld [vmem:[%s189_s0] sm:$0xff]  ;;  %v10_v1 = vld [vmem:[%s189_s0 + $0x8] sm:$0xff]  ;;  %v11_v2 = vld [vmem:[%s189_s0 + $0x10] sm:$0xff] }
   0x2   :  { %v30_v3 = vadd.f32 %v10_v1, %v9_v0  ;;  %v12_v4 = vld [vmem:[%s189_s0 + $0x18] sm:$0xff]  ;;  %v13_v6 = vld [vmem:[%s189_s0 + $0x20] sm:$0xff]  ;;  %v14_v8 = vld [vmem:[%s189_s0 + $0x28] sm:$0xff] }
   0x4   :  { %v31_v5 = vadd.f32 %v30_v3, %v11_v2 }
   0x6   :  { %v32_v7 = vadd.f32 %v31_v5, %v12_v4 }
   0x8   :  { %v33_v9 = vadd.f32 %v32_v7, %v13_v6 }
   0x9   :  { %6 = vsyncpa [#allocation3], 0  ;;  %v15_v10 = vld [vmem:[%s189_s0 + $0x30] sm:$0xff]  ;;  %v16_v12 = vld [vmem:[%s189_s0 + $0x38] sm:$0xff]  ;;  %s103_s19 = smov [#allocation2]   ;;  %vm60_vm0 = vcmask 0  }
   0xa   :  { %v34_v11 = vadd.f32 %v33_v9, %v14_v8  ;;  %v17_v14 = vld [vmem:[%s189_s0 + $0x40] sm:$0xff]  ;;  %v18_v16 = vld [vmem:[%s189_s0 + $0x48] sm:$0xff]  ;;  %v19_v18 = vld [vmem:[%s189_s0 + $0x50] sm:$0xff]  ;;  %s68_s20 = sshll.u32 %s103_s19, 4  ;;  %s69_s20 = int_to_ptr.vmem [resolvable:$true] %s68_s20 }
   0xb   :  { %v20_v20 = vld [vmem:[%s189_s0 + $0x58] sm:$0xff]  ;;  %v21_v22 = vld [vmem:[%s189_s0 + $0x60] sm:$0xff]  ;;  %v22_v24 = vld [vmem:[%s189_s0 + $0x68] sm:$0xff]  ;;  %s79_s22 = scalar_lea.vmem %s69_s20, 16  ;;  %p84_p1 = scmp.lt.s32.totalorder %s69_s20, %s69_s20 }
   0xc   :  { %v35_v13 = vadd.f32 %v34_v11, %v15_v10  ;;  %v23_v26 = vld [vmem:[%s189_s0 + $0x70] sm:$0xff]  ;;  %v24_v28 = vld [vmem:[%s189_s0 + $0x78] sm:$0xff]  ;;  %v25_v30 = vld [vmem:[%s189_s0 + $0x80] sm:$0xff]  ;;  %p80_p0 = scmp.ne.s32.totalorder %s69_s20, %s79_s22 }
   0xd   :  { %v26_v32 = vld [vmem:[%s189_s0 + $0x88] sm:$0xff]  ;;  %v27_v34 = vld [vmem:[%s189_s0 + $0x90] sm:$0xff]  ;;  %v28_v36 = vld [vmem:[%s189_s0 + $0x98] sm:$0xff] }
   0xe   :  { %v36_v15 = vadd.f32 %v35_v13, %v16_v12  ;;  %v29_v38 = vld [vmem:[%s189_s0 + $0xa0] sm:$0xff]  ;;  %s83_s0 = scalar_lea.vmem %s69_s20, 32 }
   0xf   :  { %p85_p2 = scmp.lt.s32.totalorder %s83_s0, %s79_s22 }
  0x10   :  { %v37_v17 = vadd.f32 %v36_v15, %v17_v14 }
  0x11   :  { %p86_p3 = por %p85_p2, %p84_p1 }
  0x12   :  { %v38_v19 = vadd.f32 %v37_v17, %v18_v16 }
  0x13   :  { %p87_p4 = pnand %p86_p3, %p80_p0 }
  0x14   :  { %v39_v21 = vadd.f32 %v38_v19, %v19_v18 }
  0x16   :  { %v40_v23 = vadd.f32 %v39_v21, %v20_v20 }
  0x18   :  { %v41_v25 = vadd.f32 %v40_v23, %v21_v22 }
  0x1a   :  { %v42_v27 = vadd.f32 %v41_v25, %v22_v24 }
  0x1c   :  { %v43_v29 = vadd.f32 %v42_v27, %v23_v26 }
  0x1e   :  { %v44_v31 = vadd.f32 %v43_v29, %v24_v28 }
  0x20   :  { %v45_v33 = vadd.f32 %v44_v31, %v25_v30 }
  0x22   :  { %v46_v35 = vadd.f32 %v45_v33, %v26_v32 }
  0x24   :  { %v47_v37 = vadd.f32 %v46_v35, %v27_v34 }
  0x26   :  { %v48_v39 = vadd.f32 %v47_v37, %v28_v36 }
  0x28   :  { %v49_v40 = vadd.f32 %v48_v39, %v29_v38 }
  0x2a   :  { %50 = vadd.xlane.f32.xlu0 %v49_v40 }
  0xb7   :  { %v51_v41 = vpop.xlane.xlu0 %50 }
  0xb8   :  { %v52_v42 = vrot.slane %v51_v41, 4 }
  0xba   :  { %v53_v43 = vadd.f32 %v52_v42, %v51_v41 }
  0xbc   :  { %v54_v44 = vrot.slane %v53_v43, 2 }
  0xbe   :  { %v55_v45 = vadd.f32 %v54_v44, %v53_v43 }
  0xc0   :  { %v56_v46 = vrot.slane %v55_v45, 1 }
  0xc2   :  { %v57_v47 = vadd.f32 %v56_v46, %v55_v45 }
  0xc4   :  { %76 = vpush %v57_v47 }
  0xf5   :  { %s77_s21 = spop %76 }
  0xf6   :  { %v59_v48 = vstv %s77_s21 }
  0xf7   :  { %61 = vst.msk [vmem:[#allocation2] sm:$0x1] %vm60_vm0, %v59_v48 }
  0xf8   :  { %90 = shalt.err (!%p87_p4)
}
  0xf9   :  { %s91_s25 = scalar_lea.hbm %s190_s1, 16 }
  0xfa   :  { %p92_p5 = scmp.ne.s32.totalorder %s190_s1, %s91_s25  ;;  %p95_p6 = scmp.lt.u32.totalorder %s91_s25, %s190_s1 }
  0xfc   :  { %p97_p7 = pnand %p95_p6, %p92_p5 }
  0xfe   :  { %100 = shalt.err (!%p97_p7)
}
  0xff   :  { %71 = dma.vmem_to_hbm [thread:$0]  %s69_s20, 16, %s190_s1, [#allocation3]  }
 0x100   :  { %101 = dma.done.wait [#allocation3], 16  }
 0x101   :  { %102 = vsyncadd [#allocation3], 4294967280 }
 0x102   :  { %75 = vsyncpa [#allocation3], 1 }

</bundles_post_ra>
